<compile_context>
chip_gen: v7x
topology: tpu7x:2x2x1
jax: 0.10.0
libtpu: 0.0.40
codegen_flags: <defaults>
</compile_context>

<pallas_src>
import math

import jax
import jax.numpy as jnp
from jax import lax
from jax.experimental import pallas as pl
from jax.experimental.pallas import tpu as pltpu

LANE = 128


def _vmem_spec():
    # whole array resident in VMEM (no grid -> single kernel invocation)
    return pl.BlockSpec(memory_space=pltpu.MemorySpace.VMEM)


def _pad_lane(c):
    return ((c + LANE - 1) // LANE) * LANE


def _pad2d(v, rows, cols):
    out = jnp.zeros((rows, cols), jnp.float32)
    return out.at[: v.shape[0], : v.shape[1]].set(v)


# ---------------------------------------------------------------------------
# Fused kernel: all RegularBlocks + out_mlp in one pallas_call
# ---------------------------------------------------------------------------
def make_fused_ppgn_kernel(num_blocks, depth, n, hid, hid_pad):
    nbp = 4 * depth                      # per-block params: fused L0 (w,b) + 2*(depth-1)*(w,b) + skip (w,b)
    n_in = 1 + num_blocks * nbp + 4
    nn = n * n

    def kernel(*refs):
        x_ref = refs[0]
        out_ref = refs[n_in]

        h = x_ref[...]                   # (n*n, C_pad) activation, stays on-chip
        idx = 1
        for _ in range(num_blocks):
            p = refs[idx:idx + nbp]
            idx += nbp

            # --- mlp1/mlp2, first layer fused over the shared input h --------
            w12 = p[0][...]              # (C_in_pad, 2*hid_pad)
            b12 = p[1][...]              # (1, 2*hid_pad)
            f = jnp.maximum(
                jnp.dot(h, w12, preferred_element_type=jnp.float32) + b12, 0.0)
            m1 = f[:, :hid_pad]          # lane-tile-aligned static split
            m2 = f[:, hid_pad:]
            for l in range(depth - 1):
                w1l = p[2 + 2 * l][...]
                b1l = p[3 + 2 * l][...]
                w2l = p[2 + 2 * (depth - 1) + 2 * l][...]
                b2l = p[3 + 2 * (depth - 1) + 2 * l][...]
                m1 = jnp.maximum(
                    jnp.dot(m1, w1l, preferred_element_type=jnp.float32) + b1l, 0.0)
                m2 = jnp.maximum(
                    jnp.dot(m2, w2l, preferred_element_type=jnp.float32) + b2l, 0.0)

            # --- per-channel matmul: mult[i,j,c] = sum_k m1[i,k,c]*m2[k,j,c] --
            # static unroll over k (n=16): static value slices, no scratch refs,
            # no dynamic sublane addressing.  Padded channels stay exactly 0.
            m1r = m1.reshape(n, n, hid_pad)        # leading-dim split only (free relabel)
            m2r = m2.reshape(n, n, hid_pad)
            mult = jnp.zeros((n, n, hid_pad), jnp.float32)
            for k in range(n):
                a = lax.slice_in_dim(m1r, k, k + 1, axis=1)   # (n, 1, C)
                b = lax.slice_in_dim(m2r, k, k + 1, axis=0)   # (1, n, C)
                mult = mult + a * b
            # divide by the *logical* out_features (hid), NOT hid_pad
            mult_flat = mult.reshape(nn, hid_pad) * (1.0 / hid)

            # --- SkipConnection: conv(concat([h, mult])) as ONE matmul --------
            # (replaces two dots + add; both concat halves are 128-lane tiles)
            w_s = p[nbp - 2][...]        # (C_in_pad + hid_pad, hid_pad)
            b_s = p[nbp - 1][...]        # (1, hid_pad)
            hm = jnp.concatenate([h, mult_flat], axis=-1)
            h = jnp.dot(hm, w_s, preferred_element_type=jnp.float32) + b_s

        # --- out_mlp: lin -> SimpleNormLayer(hid) -> relu -> lin (no final act)
        w1 = refs[idx][...]              # (hid_pad, hid_pad)
        b1 = refs[idx + 1][...]          # (1, hid_pad)
        w2t = refs[idx + 2][...]         # (1, hid_pad)   final weight, row-major transposed
        b2 = refs[idx + 3][...]          # (1, 1)
        g = jnp.dot(h, w1, preferred_element_type=jnp.float32) + b1
        # TODO(synk): SimpleNormLayer assumed x / num_features (logical hid).
        g = jnp.maximum(g * (1.0 / hid), 0.0)
        # transposed final layer via NT dot_general: lane-dense (1, n*n) output,
        # no materialized g.T
        o = lax.dot_general(w2t, g,
                            dimension_numbers=(((1,), (1,)), ((), ())),
                            preferred_element_type=jnp.float32) + b2
        out_ref[...] = o                 # (1, n*n)

    return kernel


# ---------------------------------------------------------------------------
# Host-side wrappers (glue)
# ---------------------------------------------------------------------------
def build_input(feat, edge_index, edge_attr, node_dim, edge_dim):
    """Dense (n, n, C0) channel-last tensor (PyTorch builds (1, C0, n, n))."""
    n = feat.shape[0]
    fdim = edge_dim + 2 * node_dim
    vals = jnp.concatenate(
        [edge_attr, feat[edge_index[0]], feat[edge_index[1]]], axis=-1)
    # NOTE: with duplicate edges, .at[].set resolution order is unspecified in
    # JAX (torch advanced indexing is last-write-wins); the test uses unique edges.
    fmtr = jnp.zeros((n, n, fdim), jnp.float32).at[edge_index[0], edge_index[1]].set(vals)
    nmtr = jnp.zeros((n, n, node_dim), jnp.float32).at[
        jnp.arange(n), jnp.arange(n)].set(feat)
    return jnp.concatenate([fmtr, nmtr], axis=-1)  # (n, n, C0)


def ppgn_forward(feat, edge_index, edge_attr, params, node_dim, edge_dim, hid):
    n = feat.shape[0]
    x = build_input(feat, edge_index, edge_attr, node_dim, edge_dim)
    c0 = x.shape[-1]
    c0_pad = _pad_lane(c0)
    hid_pad = _pad_lane(hid)

    # lane-dense padded input activation (zero pad columns stay exactly zero)
    xf = jnp.zeros((n * n, c0_pad), jnp.float32).at[:, :c0].set(x.reshape(n * n, c0))

    num_blocks = len(params['blocks'])
    depth = len(params['blocks'][0]['mlp1'])

    flat = [xf]
    c_in, c_in_pad = c0, c0_pad
    for blk in params['blocks']:
        w1_0, b1_0 = blk['mlp1'][0]
        w2_0, b2_0 = blk['mlp2'][0]
        # fused first-layer weight/bias for mlp1+mlp2 (split point = hid_pad)
        w12 = (jnp.zeros((c_in_pad, 2 * hid_pad), jnp.float32)
               .at[:c_in, :hid].set(w1_0)
               .at[:c_in, hid_pad:hid_pad + hid].set(w2_0))
        b12 = (jnp.zeros((1, 2 * hid_pad), jnp.float32)
               .at[:, :hid].set(b1_0)
               .at[:, hid_pad:hid_pad + hid].set(b2_0))
        flat += [w12, b12]
        for (w, b) in blk['mlp1'][1:]:
            flat += [_pad2d(w, hid_pad, hid_pad), _pad2d(b, 1, hid_pad)]
        for (w, b) in blk['mlp2'][1:]:
            flat += [_pad2d(w, hid_pad, hid_pad), _pad2d(b, 1, hid_pad)]
        # skip weight stacked for the lane-concat [h (c_in_pad cols), mult (hid_pad cols)]
        w_s = (jnp.zeros((c_in_pad + hid_pad, hid_pad), jnp.float32)
               .at[:c_in, :hid].set(blk['w_sx'])
               .at[c_in_pad:c_in_pad + hid, :hid].set(blk['w_sm']))
        b_s = _pad2d(blk['b_s'], 1, hid_pad)
        flat += [w_s, b_s]
        c_in, c_in_pad = hid, hid_pad

    out_p = params['out']
    flat += [_pad2d(out_p['w1'], hid_pad, hid_pad),
             _pad2d(out_p['b1'], 1, hid_pad),
             _pad2d(out_p['w2t'], 1, hid_pad),
             out_p['b2']]

    kernel = make_fused_ppgn_kernel(num_blocks, depth, n, hid, hid_pad)
    y = pl.pallas_call(
        kernel,
        out_shape=jax.ShapeDtypeStruct((1, n * n), jnp.float32),
        in_specs=[_vmem_spec()] * len(flat),
        out_specs=_vmem_spec(),
        compiler_params=pltpu.CompilerParams(
            vmem_limit_bytes=32 * 1024 * 1024),
    )(*flat)
    return y.reshape(n, n)


# ---------------------------------------------------------------------------
# Deterministic parameter init (xavier_uniform weights, zero biases)
# ---------------------------------------------------------------------------
def _xavier(key, fan_in, fan_out, shape):
    bound = math.sqrt(6.0 / (fan_in + fan_out))
    return jax.random.uniform(key, shape, jnp.float32, -bound, bound)


def init_params(key, node_dim, edge_dim, hid, num_blocks, mlp_layers):
    c0 = edge_dim + 2 * node_dim + node_dim
    depth = mlp_layers + 1            # RegularBlock uses depth_of_mlp + 1 convs
    blocks = []
    c_in = c0
    for _ in range(num_blocks):
        blk = {}
        for name in ('mlp1', 'mlp2'):
            layers = []
            c_prev = c_in
            for _ in range(depth):
                key, kw = jax.random.split(key)
                # stored transposed vs torch conv weight: (c_prev, hid)
                layers.append((_xavier(kw, c_prev, hid, (c_prev, hid)),
                               jnp.zeros((1, hid), jnp.float32)))
                c_prev = hid
            blk[name] = layers
        key, kw = jax.random.split(key)
        skip_w = _xavier(kw, c_in + hid, hid, (c_in + hid, hid))
        blk['w_sx'] = skip_w[:c_in]       # acts on the block input
        blk['w_sm'] = skip_w[c_in:]       # acts on mult
        blk['b_s'] = jnp.zeros((1, hid), jnp.float32)
        blocks.append(blk)
        c_in = hid
    key, k1, k2 = jax.random.split(key, 3)
    out_p = {'w1': _xavier(k1, hid, hid, (hid, hid)),
             'b1': jnp.zeros((1, hid), jnp.float32),
             'w2t': _xavier(k2, hid, 1, (1, hid)),     # stored row-major transposed
             'b2': jnp.zeros((1, 1), jnp.float32)}
    return {'blocks': blocks, 'out': out_p}


# ---------------------------------------------------------------------------
# Pure-JAX reference (correctness check, full-precision einsums)
# ---------------------------------------------------------------------------
def ref_forward(feat, edge_index, edge_attr, params, node_dim, edge_dim, hid):
    hi = lax.Precision.HIGHEST
    x = build_input(feat, edge_index, edge_attr, node_dim, edge_dim)
    for blk in params['blocks']:
        def run(layers, h):
            for w, b in layers:
                h = jax.nn.relu(jnp.einsum('ijc,co->ijo', h, w, precision=hi) + b)
            return h
        m1 = run(blk['mlp1'], x)
        m2 = run(blk['mlp2'], x)
        mult = jnp.einsum('ikc,kjc->ijc', m1, m2, precision=hi) / hid
        x = (jnp.einsum('ijc,co->ijo', x, blk['w_sx'], precision=hi)
             + jnp.einsum('ijc,co->ijo', mult, blk['w_sm'], precision=hi)
             + blk['b_s'])
    h = jnp.einsum('ijc,co->ijo', x, params['out']['w1'], precision=hi) + params['out']['b1']
    h = jax.nn.relu(h / hid)
    o = jnp.einsum('ijc,oc->ijo', h, params['out']['w2t'], precision=hi) + params['out']['b2']
    return o[..., 0]


# ---------------------------------------------------------------------------
if __name__ == "__main__":
    node_dim, edge_dim, hid, num_blocks, mlp_layers = 4, 4, 32, 2, 1
    n = 16

    key = jax.random.PRNGKey(0)
    k_feat, k_attr, k_par = jax.random.split(key, 3)

    feat = jax.random.normal(k_feat, (n, node_dim), jnp.float32)
    # directed ring in both directions -> 2n unique edges (no duplicate scatter)
    src = jnp.arange(n, dtype=jnp.int32)
    dst = (src + 1) % n
    edge_index = jnp.stack([jnp.concatenate([src, dst]),
                            jnp.concatenate([dst, src])])          # (2, 2n)
    edge_attr = jax.random.normal(k_attr, (2 * n, edge_dim), jnp.float32)

    params = init_params(k_par, node_dim, edge_dim, hid, num_blocks, mlp_layers)

    out = ppgn_forward(feat, edge_index, edge_attr, params,
                       node_dim, edge_dim, hid)
    out = jax.block_until_ready(out)
    assert out.shape == (n, n)

    ref = ref_forward(feat, edge_index, edge_attr, params,
                      node_dim, edge_dim, hid)
    max_err = float(jnp.max(jnp.abs(out - ref)))
    # tightened from 1e-2; not 1e-4 to stay robust to MXU vs. XLA f32
    # accumulation-order / multi-pass differences across TPU generations.
    assert jnp.allclose(out, ref, rtol=1e-3, atol=1e-3), f"max_err={max_err}"

    print("KERNEL_OK")
</pallas_src>

<mosaic_0001>
module attributes {stable_mosaic.version = 11 : i64} {
  func.func @kernel(%arg0: memref<256x128xf32, #tpu.memory_space<vmem>>, %arg1: memref<128x256xf32, #tpu.memory_space<vmem>>, %arg2: memref<1x256xf32, #tpu.memory_space<vmem>>, %arg3: memref<128x128xf32, #tpu.memory_space<vmem>>, %arg4: memref<1x128xf32, #tpu.memory_space<vmem>>, %arg5: memref<128x128xf32, #tpu.memory_space<vmem>>, %arg6: memref<1x128xf32, #tpu.memory_space<vmem>>, %arg7: memref<256x128xf32, #tpu.memory_space<vmem>>, %arg8: memref<1x128xf32, #tpu.memory_space<vmem>>, %arg9: memref<128x256xf32, #tpu.memory_space<vmem>>, %arg10: memref<1x256xf32, #tpu.memory_space<vmem>>, %arg11: memref<128x128xf32, #tpu.memory_space<vmem>>, %arg12: memref<1x128xf32, #tpu.memory_space<vmem>>, %arg13: memref<128x128xf32, #tpu.memory_space<vmem>>, %arg14: memref<1x128xf32, #tpu.memory_space<vmem>>, %arg15: memref<256x128xf32, #tpu.memory_space<vmem>>, %arg16: memref<1x128xf32, #tpu.memory_space<vmem>>, %arg17: memref<128x128xf32, #tpu.memory_space<vmem>>, %arg18: memref<1x128xf32, #tpu.memory_space<vmem>>, %arg19: memref<1x128xf32, #tpu.memory_space<vmem>>, %arg20: memref<1x1xf32, #tpu.memory_space<vmem>>, %arg21: memref<1x256xf32, #tpu.memory_space<vmem>>) attributes {dimension_semantics = [], scalar_prefetch = 0 : i64, scratch_operands = 0 : i64, tpu.core_type = #tpu.core_type<tc>} {
    %c0 = arith.constant 0 : index
    %c0_0 = arith.constant 0 : index
    %0 = vector.load %arg0[%c0, %c0_0] : memref<256x128xf32, #tpu.memory_space<vmem>>, vector<256x128xf32>
    %c0_1 = arith.constant 0 : index
    %c0_2 = arith.constant 0 : index
    %1 = vector.load %arg1[%c0_1, %c0_2] : memref<128x256xf32, #tpu.memory_space<vmem>>, vector<128x256xf32>
    %c0_3 = arith.constant 0 : index
    %c0_4 = arith.constant 0 : index
    %2 = vector.load %arg2[%c0_3, %c0_4] : memref<1x256xf32, #tpu.memory_space<vmem>>, vector<1x256xf32>
    %cst = arith.constant dense<0.000000e+00> : vector<256x256xf32>
    %3 = tpu.matmul %0, %1, %cst {dimension_numbers = #tpu.dot_dimension_numbers<[1], [0], [0], [1], [0, 0, 1, 1], [], []>} : vector<256x128xf32>, vector<128x256xf32>, vector<256x256xf32> -> vector<256x256xf32>
    %4 = vector.broadcast %2 : vector<1x256xf32> to vector<256x256xf32>
    %5 = arith.addf %3, %4 : vector<256x256xf32>
    %cst_5 = arith.constant 0.000000e+00 : f32
    %6 = vector.broadcast %cst_5 : f32 to vector<256x256xf32>
    %7 = arith.maximumf %5, %6 : vector<256x256xf32>
    %8 = vector.extract_strided_slice %7 {offsets = [0, 0], sizes = [256, 128], strides = [1, 1]} : vector<256x256xf32> to vector<256x128xf32>
    %9 = vector.extract_strided_slice %7 {offsets = [0, 128], sizes = [256, 128], strides = [1, 1]} : vector<256x256xf32> to vector<256x128xf32>
    %c0_6 = arith.constant 0 : index
    %c0_7 = arith.constant 0 : index
    %10 = vector.load %arg3[%c0_6, %c0_7] : memref<128x128xf32, #tpu.memory_space<vmem>>, vector<128x128xf32>
    %c0_8 = arith.constant 0 : index
    %c0_9 = arith.constant 0 : index
    %11 = vector.load %arg4[%c0_8, %c0_9] : memref<1x128xf32, #tpu.memory_space<vmem>>, vector<1x128xf32>
    %c0_10 = arith.constant 0 : index
    %c0_11 = arith.constant 0 : index
    %12 = vector.load %arg5[%c0_10, %c0_11] : memref<128x128xf32, #tpu.memory_space<vmem>>, vector<128x128xf32>
    %c0_12 = arith.constant 0 : index
    %c0_13 = arith.constant 0 : index
    %13 = vector.load %arg6[%c0_12, %c0_13] : memref<1x128xf32, #tpu.memory_space<vmem>>, vector<1x128xf32>
    %cst_14 = arith.constant dense<0.000000e+00> : vector<256x128xf32>
    %14 = tpu.matmul %8, %10, %cst_14 {dimension_numbers = #tpu.dot_dimension_numbers<[1], [0], [0], [1], [0, 0, 1, 1], [], []>} : vector<256x128xf32>, vector<128x128xf32>, vector<256x128xf32> -> vector<256x128xf32>
    %15 = vector.broadcast %11 : vector<1x128xf32> to vector<256x128xf32>
    %16 = arith.addf %14, %15 : vector<256x128xf32>
    %cst_15 = arith.constant 0.000000e+00 : f32
    %17 = vector.broadcast %cst_15 : f32 to vector<256x128xf32>
    %18 = arith.maximumf %16, %17 : vector<256x128xf32>
    %cst_16 = arith.constant dense<0.000000e+00> : vector<256x128xf32>
    %19 = tpu.matmul %9, %12, %cst_16 {dimension_numbers = #tpu.dot_dimension_numbers<[1], [0], [0], [1], [0, 0, 1, 1], [], []>} : vector<256x128xf32>, vector<128x128xf32>, vector<256x128xf32> -> vector<256x128xf32>
    %20 = vector.broadcast %13 : vector<1x128xf32> to vector<256x128xf32>
    %21 = arith.addf %19, %20 : vector<256x128xf32>
    %cst_17 = arith.constant 0.000000e+00 : f32
    %22 = vector.broadcast %cst_17 : f32 to vector<256x128xf32>
    %23 = arith.maximumf %21, %22 : vector<256x128xf32>
    %24 = vector.shape_cast %18 : vector<256x128xf32> to vector<16x16x128xf32>
    %25 = vector.shape_cast %23 : vector<256x128xf32> to vector<16x16x128xf32>
    %cst_18 = arith.constant 0.000000e+00 : f32
    %26 = vector.broadcast %cst_18 : f32 to vector<16x16x128xf32>
    %27 = vector.extract_strided_slice %24 {offsets = [0, 0, 0], sizes = [16, 1, 128], strides = [1, 1, 1]} : vector<16x16x128xf32> to vector<16x1x128xf32>
    %28 = vector.extract_strided_slice %25 {offsets = [0, 0, 0], sizes = [1, 16, 128], strides = [1, 1, 1]} : vector<16x16x128xf32> to vector<1x16x128xf32>
    %29 = vector.broadcast %27 : vector<16x1x128xf32> to vector<16x16x128xf32>
    %30 = vector.broadcast %28 : vector<1x16x128xf32> to vector<16x16x128xf32>
    %31 = arith.mulf %29, %30 : vector<16x16x128xf32>
    %32 = arith.addf %26, %31 : vector<16x16x128xf32>
    %33 = vector.extract_strided_slice %24 {offsets = [0, 1, 0], sizes = [16, 1, 128], strides = [1, 1, 1]} : vector<16x16x128xf32> to vector<16x1x128xf32>
    %34 = vector.extract_strided_slice %25 {offsets = [1, 0, 0], sizes = [1, 16, 128], strides = [1, 1, 1]} : vector<16x16x128xf32> to vector<1x16x128xf32>
    %35 = vector.broadcast %33 : vector<16x1x128xf32> to vector<16x16x128xf32>
    %36 = vector.broadcast %34 : vector<1x16x128xf32> to vector<16x16x128xf32>
    %37 = arith.mulf %35, %36 : vector<16x16x128xf32>
    %38 = arith.addf %32, %37 : vector<16x16x128xf32>
    %39 = vector.extract_strided_slice %24 {offsets = [0, 2, 0], sizes = [16, 1, 128], strides = [1, 1, 1]} : vector<16x16x128xf32> to vector<16x1x128xf32>
    %40 = vector.extract_strided_slice %25 {offsets = [2, 0, 0], sizes = [1, 16, 128], strides = [1, 1, 1]} : vector<16x16x128xf32> to vector<1x16x128xf32>
    %41 = vector.broadcast %39 : vector<16x1x128xf32> to vector<16x16x128xf32>
    %42 = vector.broadcast %40 : vector<1x16x128xf32> to vector<16x16x128xf32>
    %43 = arith.mulf %41, %42 : vector<16x16x128xf32>
    %44 = arith.addf %38, %43 : vector<16x16x128xf32>
    %45 = vector.extract_strided_slice %24 {offsets = [0, 3, 0], sizes = [16, 1, 128], strides = [1, 1, 1]} : vector<16x16x128xf32> to vector<16x1x128xf32>
    %46 = vector.extract_strided_slice %25 {offsets = [3, 0, 0], sizes = [1, 16, 128], strides = [1, 1, 1]} : vector<16x16x128xf32> to vector<1x16x128xf32>
    %47 = vector.broadcast %45 : vector<16x1x128xf32> to vector<16x16x128xf32>
    %48 = vector.broadcast %46 : vector<1x16x128xf32> to vector<16x16x128xf32>
    %49 = arith.mulf %47, %48 : vector<16x16x128xf32>
    %50 = arith.addf %44, %49 : vector<16x16x128xf32>
    %51 = vector.extract_strided_slice %24 {offsets = [0, 4, 0], sizes = [16, 1, 128], strides = [1, 1, 1]} : vector<16x16x128xf32> to vector<16x1x128xf32>
    %52 = vector.extract_strided_slice %25 {offsets = [4, 0, 0], sizes = [1, 16, 128], strides = [1, 1, 1]} : vector<16x16x128xf32> to vector<1x16x128xf32>
    %53 = vector.broadcast %51 : vector<16x1x128xf32> to vector<16x16x128xf32>
    %54 = vector.broadcast %52 : vector<1x16x128xf32> to vector<16x16x128xf32>
    %55 = arith.mulf %53, %54 : vector<16x16x128xf32>
    %56 = arith.addf %50, %55 : vector<16x16x128xf32>
    %57 = vector.extract_strided_slice %24 {offsets = [0, 5, 0], sizes = [16, 1, 128], strides = [1, 1, 1]} : vector<16x16x128xf32> to vector<16x1x128xf32>
    %58 = vector.extract_strided_slice %25 {offsets = [5, 0, 0], sizes = [1, 16, 128], strides = [1, 1, 1]} : vector<16x16x128xf32> to vector<1x16x128xf32>
    %59 = vector.broadcast %57 : vector<16x1x128xf32> to vector<16x16x128xf32>
    %60 = vector.broadcast %58 : vector<1x16x128xf32> to vector<16x16x128xf32>
    %61 = arith.mulf %59, %60 : vector<16x16x128xf32>
    %62 = arith.addf %56, %61 : vector<16x16x128xf32>
    %63 = vector.extract_strided_slice %24 {offsets = [0, 6, 0], sizes = [16, 1, 128], strides = [1, 1, 1]} : vector<16x16x128xf32> to vector<16x1x128xf32>
    %64 = vector.extract_strided_slice %25 {offsets = [6, 0, 0], sizes = [1, 16, 128], strides = [1, 1, 1]} : vector<16x16x128xf32> to vector<1x16x128xf32>
    %65 = vector.broadcast %63 : vector<16x1x128xf32> to vector<16x16x128xf32>
    %66 = vector.broadcast %64 : vector<1x16x128xf32> to vector<16x16x128xf32>
    %67 = arith.mulf %65, %66 : vector<16x16x128xf32>
    %68 = arith.addf %62, %67 : vector<16x16x128xf32>
    %69 = vector.extract_strided_slice %24 {offsets = [0, 7, 0], sizes = [16, 1, 128], strides = [1, 1, 1]} : vector<16x16x128xf32> to vector<16x1x128xf32>
    %70 = vector.extract_strided_slice %25 {offsets = [7, 0, 0], sizes = [1, 16, 128], strides = [1, 1, 1]} : vector<16x16x128xf32> to vector<1x16x128xf32>
    %71 = vector.broadcast %69 : vector<16x1x128xf32> to vector<16x16x128xf32>
    %72 = vector.broadcast %70 : vector<1x16x128xf32> to vector<16x16x128xf32>
    %73 = arith.mulf %71, %72 : vector<16x16x128xf32>
    %74 = arith.addf %68, %73 : vector<16x16x128xf32>
    %75 = vector.extract_strided_slice %24 {offsets = [0, 8, 0], sizes = [16, 1, 128], strides = [1, 1, 1]} : vector<16x16x128xf32> to vector<16x1x128xf32>
    %76 = vector.extract_strided_slice %25 {offsets = [8, 0, 0], sizes = [1, 16, 128], strides = [1, 1, 1]} : vector<16x16x128xf32> to vector<1x16x128xf32>
    %77 = vector.broadcast %75 : vector<16x1x128xf32> to vector<16x16x128xf32>
    %78 = vector.broadcast %76 : vector<1x16x128xf32> to vector<16x16x128xf32>
    %79 = arith.mulf %77, %78 : vector<16x16x128xf32>
    %80 = arith.addf %74, %79 : vector<16x16x128xf32>
    %81 = vector.extract_strided_slice %24 {offsets = [0, 9, 0], sizes = [16, 1, 128], strides = [1, 1, 1]} : vector<16x16x128xf32> to vector<16x1x128xf32>
    %82 = vector.extract_strided_slice %25 {offsets = [9, 0, 0], sizes = [1, 16, 128], strides = [1, 1, 1]} : vector<16x16x128xf32> to vector<1x16x128xf32>
    %83 = vector.broadcast %81 : vector<16x1x128xf32> to vector<16x16x128xf32>
    %84 = vector.broadcast %82 : vector<1x16x128xf32> to vector<16x16x128xf32>
    %85 = arith.mulf %83, %84 : vector<16x16x128xf32>
    %86 = arith.addf %80, %85 : vector<16x16x128xf32>
    %87 = vector.extract_strided_slice %24 {offsets = [0, 10, 0], sizes = [16, 1, 128], strides = [1, 1, 1]} : vector<16x16x128xf32> to vector<16x1x128xf32>
    %88 = vector.extract_strided_slice %25 {offsets = [10, 0, 0], sizes = [1, 16, 128], strides = [1, 1, 1]} : vector<16x16x128xf32> to vector<1x16x128xf32>
    %89 = vector.broadcast %87 : vector<16x1x128xf32> to vector<16x16x128xf32>
    %90 = vector.broadcast %88 : vector<1x16x128xf32> to vector<16x16x128xf32>
    %91 = arith.mulf %89, %90 : vector<16x16x128xf32>
    %92 = arith.addf %86, %91 : vector<16x16x128xf32>
    %93 = vector.extract_strided_slice %24 {offsets = [0, 11, 0], sizes = [16, 1, 128], strides = [1, 1, 1]} : vector<16x16x128xf32> to vector<16x1x128xf32>
    %94 = vector.extract_strided_slice %25 {offsets = [11, 0, 0], sizes = [1, 16, 128], strides = [1, 1, 1]} : vector<16x16x128xf32> to vector<1x16x128xf32>
    %95 = vector.broadcast %93 : vector<16x1x128xf32> to vector<16x16x128xf32>
    %96 = vector.broadcast %94 : vector<1x16x128xf32> to vector<16x16x128xf32>
    %97 = arith.mulf %95, %96 : vector<16x16x128xf32>
    %98 = arith.addf %92, %97 : vector<16x16x128xf32>
    %99 = vector.extract_strided_slice %24 {offsets = [0, 12, 0], sizes = [16, 1, 128], strides = [1, 1, 1]} : vector<16x16x128xf32> to vector<16x1x128xf32>
    %100 = vector.extract_strided_slice %25 {offsets = [12, 0, 0], sizes = [1, 16, 128], strides = [1, 1, 1]} : vector<16x16x128xf32> to vector<1x16x128xf32>
    %101 = vector.broadcast %99 : vector<16x1x128xf32> to vector<16x16x128xf32>
    %102 = vector.broadcast %100 : vector<1x16x128xf32> to vector<16x16x128xf32>
    %103 = arith.mulf %101, %102 : vector<16x16x128xf32>
    %104 = arith.addf %98, %103 : vector<16x16x128xf32>
    %105 = vector.extract_strided_slice %24 {offsets = [0, 13, 0], sizes = [16, 1, 128], strides = [1, 1, 1]} : vector<16x16x128xf32> to vector<16x1x128xf32>
    %106 = vector.extract_strided_slice %25 {offsets = [13, 0, 0], sizes = [1, 16, 128], strides = [1, 1, 1]} : vector<16x16x128xf32> to vector<1x16x128xf32>
    %107 = vector.broadcast %105 : vector<16x1x128xf32> to vector<16x16x128xf32>
    %108 = vector.broadcast %106 : vector<1x16x128xf32> to vector<16x16x128xf32>
    %109 = arith.mulf %107, %108 : vector<16x16x128xf32>
    %110 = arith.addf %104, %109 : vector<16x16x128xf32>
    %111 = vector.extract_strided_slice %24 {offsets = [0, 14, 0], sizes = [16, 1, 128], strides = [1, 1, 1]} : vector<16x16x128xf32> to vector<16x1x128xf32>
    %112 = vector.extract_strided_slice %25 {offsets = [14, 0, 0], sizes = [1, 16, 128], strides = [1, 1, 1]} : vector<16x16x128xf32> to vector<1x16x128xf32>
    %113 = vector.broadcast %111 : vector<16x1x128xf32> to vector<16x16x128xf32>
    %114 = vector.broadcast %112 : vector<1x16x128xf32> to vector<16x16x128xf32>
    %115 = arith.mulf %113, %114 : vector<16x16x128xf32>
    %116 = arith.addf %110, %115 : vector<16x16x128xf32>
    %117 = vector.extract_strided_slice %24 {offsets = [0, 15, 0], sizes = [16, 1, 128], strides = [1, 1, 1]} : vector<16x16x128xf32> to vector<16x1x128xf32>
    %118 = vector.extract_strided_slice %25 {offsets = [15, 0, 0], sizes = [1, 16, 128], strides = [1, 1, 1]} : vector<16x16x128xf32> to vector<1x16x128xf32>
    %119 = vector.broadcast %117 : vector<16x1x128xf32> to vector<16x16x128xf32>
    %120 = vector.broadcast %118 : vector<1x16x128xf32> to vector<16x16x128xf32>
    %121 = arith.mulf %119, %120 : vector<16x16x128xf32>
    %122 = arith.addf %116, %121 : vector<16x16x128xf32>
    %123 = vector.shape_cast %122 : vector<16x16x128xf32> to vector<256x128xf32>
    %cst_19 = arith.constant 3.125000e-02 : f32
    %124 = vector.broadcast %cst_19 : f32 to vector<256x128xf32>
    %125 = arith.mulf %123, %124 : vector<256x128xf32>
    %c0_20 = arith.constant 0 : index
    %c0_21 = arith.constant 0 : index
    %126 = vector.load %arg7[%c0_20, %c0_21] : memref<256x128xf32, #tpu.memory_space<vmem>>, vector<256x128xf32>
    %c0_22 = arith.constant 0 : index
    %c0_23 = arith.constant 0 : index
    %127 = vector.load %arg8[%c0_22, %c0_23] : memref<1x128xf32, #tpu.memory_space<vmem>>, vector<1x128xf32>
    %128 = tpu.concatenate %0, %125 in 1 : vector<256x128xf32>, vector<256x128xf32> -> vector<256x256xf32>
    %cst_24 = arith.constant dense<0.000000e+00> : vector<256x128xf32>
    %129 = tpu.matmul %128, %126, %cst_24 {dimension_numbers = #tpu.dot_dimension_numbers<[1], [0], [0], [1], [0, 0, 1, 1], [], []>} : vector<256x256xf32>, vector<256x128xf32>, vector<256x128xf32> -> vector<256x128xf32>
    %130 = vector.broadcast %127 : vector<1x128xf32> to vector<256x128xf32>
    %131 = arith.addf %129, %130 : vector<256x128xf32>
    %c0_25 = arith.constant 0 : index
    %c0_26 = arith.constant 0 : index
    %132 = vector.load %arg9[%c0_25, %c0_26] : memref<128x256xf32, #tpu.memory_space<vmem>>, vector<128x256xf32>
    %c0_27 = arith.constant 0 : index
    %c0_28 = arith.constant 0 : index
    %133 = vector.load %arg10[%c0_27, %c0_28] : memref<1x256xf32, #tpu.memory_space<vmem>>, vector<1x256xf32>
    %cst_29 = arith.constant dense<0.000000e+00> : vector<256x256xf32>
    %134 = tpu.matmul %131, %132, %cst_29 {dimension_numbers = #tpu.dot_dimension_numbers<[1], [0], [0], [1], [0, 0, 1, 1], [], []>} : vector<256x128xf32>, vector<128x256xf32>, vector<256x256xf32> -> vector<256x256xf32>
    %135 = vector.broadcast %133 : vector<1x256xf32> to vector<256x256xf32>
    %136 = arith.addf %134, %135 : vector<256x256xf32>
    %cst_30 = arith.constant 0.000000e+00 : f32
    %137 = vector.broadcast %cst_30 : f32 to vector<256x256xf32>
    %138 = arith.maximumf %136, %137 : vector<256x256xf32>
    %139 = vector.extract_strided_slice %138 {offsets = [0, 0], sizes = [256, 128], strides = [1, 1]} : vector<256x256xf32> to vector<256x128xf32>
    %140 = vector.extract_strided_slice %138 {offsets = [0, 128], sizes = [256, 128], strides = [1, 1]} : vector<256x256xf32> to vector<256x128xf32>
    %c0_31 = arith.constant 0 : index
    %c0_32 = arith.constant 0 : index
    %141 = vector.load %arg11[%c0_31, %c0_32] : memref<128x128xf32, #tpu.memory_space<vmem>>, vector<128x128xf32>
    %c0_33 = arith.constant 0 : index
    %c0_34 = arith.constant 0 : index
    %142 = vector.load %arg12[%c0_33, %c0_34] : memref<1x128xf32, #tpu.memory_space<vmem>>, vector<1x128xf32>
    %c0_35 = arith.constant 0 : index
    %c0_36 = arith.constant 0 : index
    %143 = vector.load %arg13[%c0_35, %c0_36] : memref<128x128xf32, #tpu.memory_space<vmem>>, vector<128x128xf32>
    %c0_37 = arith.constant 0 : index
    %c0_38 = arith.constant 0 : index
    %144 = vector.load %arg14[%c0_37, %c0_38] : memref<1x128xf32, #tpu.memory_space<vmem>>, vector<1x128xf32>
    %cst_39 = arith.constant dense<0.000000e+00> : vector<256x128xf32>
    %145 = tpu.matmul %139, %141, %cst_39 {dimension_numbers = #tpu.dot_dimension_numbers<[1], [0], [0], [1], [0, 0, 1, 1], [], []>} : vector<256x128xf32>, vector<128x128xf32>, vector<256x128xf32> -> vector<256x128xf32>
    %146 = vector.broadcast %142 : vector<1x128xf32> to vector<256x128xf32>
    %147 = arith.addf %145, %146 : vector<256x128xf32>
    %cst_40 = arith.constant 0.000000e+00 : f32
    %148 = vector.broadcast %cst_40 : f32 to vector<256x128xf32>
    %149 = arith.maximumf %147, %148 : vector<256x128xf32>
    %cst_41 = arith.constant dense<0.000000e+00> : vector<256x128xf32>
    %150 = tpu.matmul %140, %143, %cst_41 {dimension_numbers = #tpu.dot_dimension_numbers<[1], [0], [0], [1], [0, 0, 1, 1], [], []>} : vector<256x128xf32>, vector<128x128xf32>, vector<256x128xf32> -> vector<256x128xf32>
    %151 = vector.broadcast %144 : vector<1x128xf32> to vector<256x128xf32>
    %152 = arith.addf %150, %151 : vector<256x128xf32>
    %cst_42 = arith.constant 0.000000e+00 : f32
    %153 = vector.broadcast %cst_42 : f32 to vector<256x128xf32>
    %154 = arith.maximumf %152, %153 : vector<256x128xf32>
    %155 = vector.shape_cast %149 : vector<256x128xf32> to vector<16x16x128xf32>
    %156 = vector.shape_cast %154 : vector<256x128xf32> to vector<16x16x128xf32>
    %cst_43 = arith.constant 0.000000e+00 : f32
    %157 = vector.broadcast %cst_43 : f32 to vector<16x16x128xf32>
    %158 = vector.extract_strided_slice %155 {offsets = [0, 0, 0], sizes = [16, 1, 128], strides = [1, 1, 1]} : vector<16x16x128xf32> to vector<16x1x128xf32>
    %159 = vector.extract_strided_slice %156 {offsets = [0, 0, 0], sizes = [1, 16, 128], strides = [1, 1, 1]} : vector<16x16x128xf32> to vector<1x16x128xf32>
    %160 = vector.broadcast %158 : vector<16x1x128xf32> to vector<16x16x128xf32>
    %161 = vector.broadcast %159 : vector<1x16x128xf32> to vector<16x16x128xf32>
    %162 = arith.mulf %160, %161 : vector<16x16x128xf32>
    %163 = arith.addf %157, %162 : vector<16x16x128xf32>
    %164 = vector.extract_strided_slice %155 {offsets = [0, 1, 0], sizes = [16, 1, 128], strides = [1, 1, 1]} : vector<16x16x128xf32> to vector<16x1x128xf32>
    %165 = vector.extract_strided_slice %156 {offsets = [1, 0, 0], sizes = [1, 16, 128], strides = [1, 1, 1]} : vector<16x16x128xf32> to vector<1x16x128xf32>
    %166 = vector.broadcast %164 : vector<16x1x128xf32> to vector<16x16x128xf32>
    %167 = vector.broadcast %165 : vector<1x16x128xf32> to vector<16x16x128xf32>
    %168 = arith.mulf %166, %167 : vector<16x16x128xf32>
    %169 = arith.addf %163, %168 : vector<16x16x128xf32>
    %170 = vector.extract_strided_slice %155 {offsets = [0, 2, 0], sizes = [16, 1, 128], strides = [1, 1, 1]} : vector<16x16x128xf32> to vector<16x1x128xf32>
    %171 = vector.extract_strided_slice %156 {offsets = [2, 0, 0], sizes = [1, 16, 128], strides = [1, 1, 1]} : vector<16x16x128xf32> to vector<1x16x128xf32>
    %172 = vector.broadcast %170 : vector<16x1x128xf32> to vector<16x16x128xf32>
    %173 = vector.broadcast %171 : vector<1x16x128xf32> to vector<16x16x128xf32>
    %174 = arith.mulf %172, %173 : vector<16x16x128xf32>
    %175 = arith.addf %169, %174 : vector<16x16x128xf32>
    %176 = vector.extract_strided_slice %155 {offsets = [0, 3, 0], sizes = [16, 1, 128], strides = [1, 1, 1]} : vector<16x16x128xf32> to vector<16x1x128xf32>
    %177 = vector.extract_strided_slice %156 {offsets = [3, 0, 0], sizes = [1, 16, 128], strides = [1, 1, 1]} : vector<16x16x128xf32> to vector<1x16x128xf32>
    %178 = vector.broadcast %176 : vector<16x1x128xf32> to vector<16x16x128xf32>
    %179 = vector.broadcast %177 : vector<1x16x128xf32> to vector<16x16x128xf32>
    %180 = arith.mulf %178, %179 : vector<16x16x128xf32>
    %181 = arith.addf %175, %180 : vector<16x16x128xf32>
    %182 = vector.extract_strided_slice %155 {offsets = [0, 4, 0], sizes = [16, 1, 128], strides = [1, 1, 1]} : vector<16x16x128xf32> to vector<16x1x128xf32>
    %183 = vector.extract_strided_slice %156 {offsets = [4, 0, 0], sizes = [1, 16, 128], strides = [1, 1, 1]} : vector<16x16x128xf32> to vector<1x16x128xf32>
    %184 = vector.broadcast %182 : vector<16x1x128xf32> to vector<16x16x128xf32>
    %185 = vector.broadcast %183 : vector<1x16x128xf32> to vector<16x16x128xf32>
    %186 = arith.mulf %184, %185 : vector<16x16x128xf32>
    %187 = arith.addf %181, %186 : vector<16x16x128xf32>
    %188 = vector.extract_strided_slice %155 {offsets = [0, 5, 0], sizes = [16, 1, 128], strides = [1, 1, 1]} : vector<16x16x128xf32> to vector<16x1x128xf32>
    %189 = vector.extract_strided_slice %156 {offsets = [5, 0, 0], sizes = [1, 16, 128], strides = [1, 1, 1]} : vector<16x16x128xf32> to vector<1x16x128xf32>
    %190 = vector.broadcast %188 : vector<16x1x128xf32> to vector<16x16x128xf32>
    %191 = vector.broadcast %189 : vector<1x16x128xf32> to vector<16x16x128xf32>
    %192 = arith.mulf %190, %191 : vector<16x16x128xf32>
    %193 = arith.addf %187, %192 : vector<16x16x128xf32>
    %194 = vector.extract_strided_slice %155 {offsets = [0, 6, 0], sizes = [16, 1, 128], strides = [1, 1, 1]} : vector<16x16x128xf32> to vector<16x1x128xf32>
    %195 = vector.extract_strided_slice %156 {offsets = [6, 0, 0], sizes = [1, 16, 128], strides = [1, 1, 1]} : vector<16x16x128xf32> to vector<1x16x128xf32>
    %196 = vector.broadcast %194 : vector<16x1x128xf32> to vector<16x16x128xf32>
    %197 = vector.broadcast %195 : vector<1x16x128xf32> to vector<16x16x128xf32>
    %198 = arith.mulf %196, %197 : vector<16x16x128xf32>
    %199 = arith.addf %193, %198 : vector<16x16x128xf32>
    %200 = vector.extract_strided_slice %155 {offsets = [0, 7, 0], sizes = [16, 1, 128], strides = [1, 1, 1]} : vector<16x16x128xf32> to vector<16x1x128xf32>
    %201 = vector.extract_strided_slice %156 {offsets = [7, 0, 0], sizes = [1, 16, 128], strides = [1, 1, 1]} : vector<16x16x128xf32> to vector<1x16x128xf32>
    %202 = vector.broadcast %200 : vector<16x1x128xf32> to vector<16x16x128xf32>
    %203 = vector.broadcast %201 : vector<1x16x128xf32> to vector<16x16x128xf32>
    %204 = arith.mulf %202, %203 : vector<16x16x128xf32>
    %205 = arith.addf %199, %204 : vector<16x16x128xf32>
    %206 = vector.extract_strided_slice %155 {offsets = [0, 8, 0], sizes = [16, 1, 128], strides = [1, 1, 1]} : vector<16x16x128xf32> to vector<16x1x128xf32>
    %207 = vector.extract_strided_slice %156 {offsets = [8, 0, 0], sizes = [1, 16, 128], strides = [1, 1, 1]} : vector<16x16x128xf32> to vector<1x16x128xf32>
    %208 = vector.broadcast %206 : vector<16x1x128xf32> to vector<16x16x128xf32>
    %209 = vector.broadcast %207 : vector<1x16x128xf32> to vector<16x16x128xf32>
    %210 = arith.mulf %208, %209 : vector<16x16x128xf32>
    %211 = arith.addf %205, %210 : vector<16x16x128xf32>
    %212 = vector.extract_strided_slice %155 {offsets = [0, 9, 0], sizes = [16, 1, 128], strides = [1, 1, 1]} : vector<16x16x128xf32> to vector<16x1x128xf32>
    %213 = vector.extract_strided_slice %156 {offsets = [9, 0, 0], sizes = [1, 16, 128], strides = [1, 1, 1]} : vector<16x16x128xf32> to vector<1x16x128xf32>
    %214 = vector.broadcast %212 : vector<16x1x128xf32> to vector<16x16x128xf32>
    %215 = vector.broadcast %213 : vector<1x16x128xf32> to vector<16x16x128xf32>
    %216 = arith.mulf %214, %215 : vector<16x16x128xf32>
    %217 = arith.addf %211, %216 : vector<16x16x128xf32>
    %218 = vector.extract_strided_slice %155 {offsets = [0, 10, 0], sizes = [16, 1, 128], strides = [1, 1, 1]} : vector<16x16x128xf32> to vector<16x1x128xf32>
    %219 = vector.extract_strided_slice %156 {offsets = [10, 0, 0], sizes = [1, 16, 128], strides = [1, 1, 1]} : vector<16x16x128xf32> to vector<1x16x128xf32>
    %220 = vector.broadcast %218 : vector<16x1x128xf32> to vector<16x16x128xf32>
    %221 = vector.broadcast %219 : vector<1x16x128xf32> to vector<16x16x128xf32>
    %222 = arith.mulf %220, %221 : vector<16x16x128xf32>
    %223 = arith.addf %217, %222 : vector<16x16x128xf32>
    %224 = vector.extract_strided_slice %155 {offsets = [0, 11, 0], sizes = [16, 1, 128], strides = [1, 1, 1]} : vector<16x16x128xf32> to vector<16x1x128xf32>
    %225 = vector.extract_strided_slice %156 {offsets = [11, 0, 0], sizes = [1, 16, 128], strides = [1, 1, 1]} : vector<16x16x128xf32> to vector<1x16x128xf32>
    %226 = vector.broadcast %224 : vector<16x1x128xf32> to vector<16x16x128xf32>
    %227 = vector.broadcast %225 : vector<1x16x128xf32> to vector<16x16x128xf32>
    %228 = arith.mulf %226, %227 : vector<16x16x128xf32>
    %229 = arith.addf %223, %228 : vector<16x16x128xf32>
    %230 = vector.extract_strided_slice %155 {offsets = [0, 12, 0], sizes = [16, 1, 128], strides = [1, 1, 1]} : vector<16x16x128xf32> to vector<16x1x128xf32>
    %231 = vector.extract_strided_slice %156 {offsets = [12, 0, 0], sizes = [1, 16, 128], strides = [1, 1, 1]} : vector<16x16x128xf32> to vector<1x16x128xf32>
    %232 = vector.broadcast %230 : vector<16x1x128xf32> to vector<16x16x128xf32>
    %233 = vector.broadcast %231 : vector<1x16x128xf32> to vector<16x16x128xf32>
    %234 = arith.mulf %232, %233 : vector<16x16x128xf32>
    %235 = arith.addf %229, %234 : vector<16x16x128xf32>
    %236 = vector.extract_strided_slice %155 {offsets = [0, 13, 0], sizes = [16, 1, 128], strides = [1, 1, 1]} : vector<16x16x128xf32> to vector<16x1x128xf32>
    %237 = vector.extract_strided_slice %156 {offsets = [13, 0, 0], sizes = [1, 16, 128], strides = [1, 1, 1]} : vector<16x16x128xf32> to vector<1x16x128xf32>
    %238 = vector.broadcast %236 : vector<16x1x128xf32> to vector<16x16x128xf32>
    %239 = vector.broadcast %237 : vector<1x16x128xf32> to vector<16x16x128xf32>
    %240 = arith.mulf %238, %239 : vector<16x16x128xf32>
    %241 = arith.addf %235, %240 : vector<16x16x128xf32>
    %242 = vector.extract_strided_slice %155 {offsets = [0, 14, 0], sizes = [16, 1, 128], strides = [1, 1, 1]} : vector<16x16x128xf32> to vector<16x1x128xf32>
    %243 = vector.extract_strided_slice %156 {offsets = [14, 0, 0], sizes = [1, 16, 128], strides = [1, 1, 1]} : vector<16x16x128xf32> to vector<1x16x128xf32>
    %244 = vector.broadcast %242 : vector<16x1x128xf32> to vector<16x16x128xf32>
    %245 = vector.broadcast %243 : vector<1x16x128xf32> to vector<16x16x128xf32>
    %246 = arith.mulf %244, %245 : vector<16x16x128xf32>
    %247 = arith.addf %241, %246 : vector<16x16x128xf32>
    %248 = vector.extract_strided_slice %155 {offsets = [0, 15, 0], sizes = [16, 1, 128], strides = [1, 1, 1]} : vector<16x16x128xf32> to vector<16x1x128xf32>
    %249 = vector.extract_strided_slice %156 {offsets = [15, 0, 0], sizes = [1, 16, 128], strides = [1, 1, 1]} : vector<16x16x128xf32> to vector<1x16x128xf32>
    %250 = vector.broadcast %248 : vector<16x1x128xf32> to vector<16x16x128xf32>
    %251 = vector.broadcast %249 : vector<1x16x128xf32> to vector<16x16x128xf32>
    %252 = arith.mulf %250, %251 : vector<16x16x128xf32>
    %253 = arith.addf %247, %252 : vector<16x16x128xf32>
    %254 = vector.shape_cast %253 : vector<16x16x128xf32> to vector<256x128xf32>
    %cst_44 = arith.constant 3.125000e-02 : f32
    %255 = vector.broadcast %cst_44 : f32 to vector<256x128xf32>
    %256 = arith.mulf %254, %255 : vector<256x128xf32>
    %c0_45 = arith.constant 0 : index
    %c0_46 = arith.constant 0 : index
    %257 = vector.load %arg15[%c0_45, %c0_46] : memref<256x128xf32, #tpu.memory_space<vmem>>, vector<256x128xf32>
    %c0_47 = arith.constant 0 : index
    %c0_48 = arith.constant 0 : index
    %258 = vector.load %arg16[%c0_47, %c0_48] : memref<1x128xf32, #tpu.memory_space<vmem>>, vector<1x128xf32>
    %259 = tpu.concatenate %131, %256 in 1 : vector<256x128xf32>, vector<256x128xf32> -> vector<256x256xf32>
    %cst_49 = arith.constant dense<0.000000e+00> : vector<256x128xf32>
    %260 = tpu.matmul %259, %257, %cst_49 {dimension_numbers = #tpu.dot_dimension_numbers<[1], [0], [0], [1], [0, 0, 1, 1], [], []>} : vector<256x256xf32>, vector<256x128xf32>, vector<256x128xf32> -> vector<256x128xf32>
    %261 = vector.broadcast %258 : vector<1x128xf32> to vector<256x128xf32>
    %262 = arith.addf %260, %261 : vector<256x128xf32>
    %c0_50 = arith.constant 0 : index
    %c0_51 = arith.constant 0 : index
    %263 = vector.load %arg17[%c0_50, %c0_51] : memref<128x128xf32, #tpu.memory_space<vmem>>, vector<128x128xf32>
    %c0_52 = arith.constant 0 : index
    %c0_53 = arith.constant 0 : index
    %264 = vector.load %arg18[%c0_52, %c0_53] : memref<1x128xf32, #tpu.memory_space<vmem>>, vector<1x128xf32>
    %c0_54 = arith.constant 0 : index
    %c0_55 = arith.constant 0 : index
    %265 = vector.load %arg19[%c0_54, %c0_55] : memref<1x128xf32, #tpu.memory_space<vmem>>, vector<1x128xf32>
    %c0_56 = arith.constant 0 : index
    %c0_57 = arith.constant 0 : index
    %266 = vector.load %arg20[%c0_56, %c0_57] : memref<1x1xf32, #tpu.memory_space<vmem>>, vector<1x1xf32>
    %cst_58 = arith.constant dense<0.000000e+00> : vector<256x128xf32>
    %267 = tpu.matmul %262, %263, %cst_58 {dimension_numbers = #tpu.dot_dimension_numbers<[1], [0], [0], [1], [0, 0, 1, 1], [], []>} : vector<256x128xf32>, vector<128x128xf32>, vector<256x128xf32> -> vector<256x128xf32>
    %268 = vector.broadcast %264 : vector<1x128xf32> to vector<256x128xf32>
    %269 = arith.addf %267, %268 : vector<256x128xf32>
    %cst_59 = arith.constant 3.125000e-02 : f32
    %270 = vector.broadcast %cst_59 : f32 to vector<256x128xf32>
    %271 = arith.mulf %269, %270 : vector<256x128xf32>
    %cst_60 = arith.constant 0.000000e+00 : f32
    %272 = vector.broadcast %cst_60 : f32 to vector<256x128xf32>
    %273 = arith.maximumf %271, %272 : vector<256x128xf32>
    %cst_61 = arith.constant dense<0.000000e+00> : vector<1x256xf32>
    %274 = tpu.matmul %265, %273, %cst_61 {dimension_numbers = #tpu.dot_dimension_numbers<[1], [1], [0], [0], [0, 0, 1, 0], [], []>} : vector<1x128xf32>, vector<256x128xf32>, vector<1x256xf32> -> vector<1x256xf32>
    %275 = vector.broadcast %266 : vector<1x1xf32> to vector<1x256xf32>
    %276 = arith.addf %274, %275 : vector<1x256xf32>
    %c0_62 = arith.constant 0 : index
    %c0_63 = arith.constant 0 : index
    %277 = vector.load %arg21[%c0_62, %c0_63] : memref<1x256xf32, #tpu.memory_space<vmem>>, vector<1x256xf32>
    tpu.vector_store %arg21[%c0_62, %c0_63], %276 {strides = array<i32>} : memref<1x256xf32, #tpu.memory_space<vmem>>, vector<1x256xf32>,
    return
  }
}

</mosaic_0001>

<bundles_post_ra>
// kernel: tpu_custom_call.1
= control target key start
LH: loop header
LB: loop body
LE: loop exit
PB: predicated region body
PF: predicated region fallthrough
CT: control target
= control target key end

     0   :  { %s13733_s0 = inlined_call_operand.hbm [shape: f32[256,128], index: 0, kind: input, shape index: {}]   ;;  %s13734_s1 = inlined_call_operand.hbm [shape: f32[128,256], index: 1, kind: input, shape index: {}]   ;;  %s13735_s2 = inlined_call_operand.vmem [shape: f32[1,256], index: 2, kind: input, shape index: {}]   ;;  %s13736_s3 = inlined_call_operand.hbm [shape: f32[128,128], index: 3, kind: input, shape index: {}]   ;;  %s13737_s4 = inlined_call_operand.vmem [shape: f32[1,128], index: 4, kind: input, shape index: {}]   ;;  %s13738_s5 = inlined_call_operand.hbm [shape: f32[128,128], index: 5, kind: input, shape index: {}]   ;;  %s13739_s6 = inlined_call_operand.vmem [shape: f32[1,128], index: 6, kind: input, shape index: {}]   ;;  %s13740_s7 = inlined_call_operand.hbm [shape: f32[256,128], index: 7, kind: input, shape index: {}]   ;;  %s13741_s8 = inlined_call_operand.vmem [shape: f32[1,128], index: 8, kind: input, shape index: {}]   ;;  %s13742_s9 = inlined_call_operand.hbm [shape: f32[128,256], index: 9, kind: input, shape index: {}]   ;;  %s13743_s10 = inlined_call_operand.vmem [shape: f32[1,256], index: 10, kind: input, shape index: {}]   ;;  %s13744_s11 = inlined_call_operand.hbm [shape: f32[128,128], index: 11, kind: input, shape index: {}]   ;;  %s13745_s12 = inlined_call_operand.vmem [shape: f32[1,128], index: 12, kind: input, shape index: {}]   ;;  %s13746_s13 = inlined_call_operand.hbm [shape: f32[128,128], index: 13, kind: input, shape index: {}]   ;;  %s13747_s14 = inlined_call_operand.vmem [shape: f32[1,128], index: 14, kind: input, shape index: {}]   ;;  %s13748_s15 = inlined_call_operand.hbm [shape: f32[256,128], index: 15, kind: input, shape index: {}]   ;;  %s13749_s16 = inlined_call_operand.vmem [shape: f32[1,128], index: 16, kind: input, shape index: {}]   ;;  %s13750_s17 = inlined_call_operand.hbm [shape: f32[128,128], index: 17, kind: input, shape index: {}]   ;;  %s13751_s18 = inlined_call_operand.vmem [shape: f32[1,128], index: 18, kind: input, shape index: {}]   ;;  %s13752_s19 = inlined_call_operand.vmem [shape: f32[1,128], index: 19, kind: input, shape index: {}]   ;;  %s13753_s20 = inlined_call_operand.<no memory space> [shape: f32[1,1], index: 20, kind: input, shape index: {}]   ;;  %s13754_s21 = inlined_call_operand.hbm [shape: f32[1,256], index: 21, kind: output, shape index: {}]  }
   0x1   :  { %14289 = sst [smem:[#allocation217_spill]] %s13733_s0  ;;  %v26_v0 = vstv %s13753_s20 }
   0x2   :  { %14290 = sst [smem:[#allocation218_spill]] %s13734_s1  ;;  %27 = vst [vmem:[#allocation2] sm:$0x1] %v26_v0 }
   0x3   :  { %14291 = sst [smem:[#allocation219_spill]] %s13735_s2 }
   0x4   :  { %14292 = sst [smem:[#allocation220_spill]] %s13736_s3 }
   0x5   :  { %14293 = sst [smem:[#allocation221_spill]] %s13737_s4 }
   0x6   :  { %14294 = sst [smem:[#allocation222_spill]] %s13738_s5 }
   0x7   :  { %14295 = sst [smem:[#allocation223_spill]] %s13752_s19 }
   0x8   :  { %14296 = sst [smem:[#allocation224_spill]] %s13754_s21 }
   0x9   :  { %28 = vsyncpa [#allocation4], 0 }
   0xa   :  { %29 = vsyncpa [#allocation7], 0 }
   0xb   :  { %30 = vsyncpa [#allocation10], 0 }
   0xc   :  { %31 = vsyncpa [#allocation13], 0 }
   0xd   :  { %32 = vsyncpa [#allocation16], 0 }
   0xe   :  { %33 = vsyncpa [#allocation19], 0 }
   0xf   :  { %34 = vsyncpa [#allocation5], 0  ;;  %s8557_s26 = smov [#allocation6]   ;;  %s14297_s29 = sld [smem:[#allocation218_spill]] }
  0x10   :  { %s52_s27 = sshll.u32 %s8557_s26, 4  ;;  %s53_s27 = int_to_ptr.vmem [resolvable:$true] %s52_s27 }
  0x15   :  { %s8301_s0 = scalar_lea.hbm %s14297_s29, 4096 }
  0x16   :  { %p8302_p0 = scmp.ne.s32.totalorder %s14297_s29, %s8301_s0  ;;  %p8305_p1 = scmp.lt.u32.totalorder %s8301_s0, %s14297_s29 }
  0x18   :  { %p8307_p2 = pnand %p8305_p1, %p8302_p0 }
  0x1a   :  { %8310 = shalt.err (!%p8307_p2)
}
  0x1b   :  { %s8311_s22 = scalar_lea.vmem %s53_s27, 4096  ;;  %p8316_p4 = scmp.lt.s32.totalorder %s53_s27, %s53_s27 }
  0x1c   :  { %p8312_p3 = scmp.ne.s32.totalorder %s53_s27, %s8311_s22  ;;  %p8317_p5 = scmp.lt.s32.totalorder %s8311_s22, %s8311_s22 }
  0x1e   :  { %p8318_p6 = por %p8317_p5, %p8316_p4 }
  0x20   :  { %p8319_p7 = pnand %p8318_p6, %p8312_p3 }
  0x22   :  { %8322 = shalt.err (!%p8319_p7)
}
  0x23   :  { %s8558_s23 = smov 256   ;;  %s8559_s1 = smov 16  }
  0x24   :  { %58 = dma.hbm_to_vmem [thread:$0]  %s14297_s29, 4096, %s53_s27, [#allocation7], %s8558_s23, %s8558_s23, %s8559_s1  }
  0x25   :  { %s8560_s25 = smov [#allocation9]   ;;  %s8561_s3 = smov [#allocation12]  }
  0x26   :  { %s80_s26 = sshll.u32 %s8560_s25, 4  ;;  %s108_s28 = sshll.u32 %s8561_s3, 4  ;;  %s81_s26 = int_to_ptr.vmem [resolvable:$true] %s80_s26  ;;  %s109_s28 = int_to_ptr.vmem [resolvable:$true] %s108_s28 }
  0x27   :  { %s14298_s30 = sld [smem:[#allocation222_spill]] }
  0x2d   :  { %s8323_s20 = scalar_lea.hbm %s14298_s30, 2048 }
  0x2e   :  { %p8324_p8 = scmp.ne.s32.totalorder %s14298_s30, %s8323_s20  ;;  %p8327_p9 = scmp.lt.u32.totalorder %s8323_s20, %s14298_s30 }
  0x30   :  { %p8329_p10 = pnand %p8327_p9, %p8324_p8 }
  0x32   :  { %8332 = shalt.err (!%p8329_p10)
}
  0x33   :  { %s8333_s27 = scalar_lea.vmem %s81_s26, 2048  ;;  %p8338_p12 = scmp.lt.s32.totalorder %s81_s26, %s81_s26 }
  0x34   :  { %p8334_p11 = scmp.ne.s32.totalorder %s81_s26, %s8333_s27  ;;  %p8339_p13 = scmp.lt.s32.totalorder %s8333_s27, %s8333_s27 }
  0x36   :  { %p8340_p0 = por %p8339_p13, %p8338_p12 }
  0x38   :  { %p8341_p1 = pnand %p8340_p0, %p8334_p11 }
  0x3a   :  { %8344 = shalt.err (!%p8341_p1)
}
  0x3b   :  { %s8562_s29 = smov 128   ;;  %s8563_s24 = smov 8  }
  0x3c   :  { %86 = dma.hbm_to_vmem [thread:$0]  %s14298_s30, 2048, %s81_s26, [#allocation10], %s8562_s29, %s8562_s29, %s8563_s24  }
  0x3d   :  { %s8345_s3 = scalar_lea.hbm %s13742_s9, 4096 }
  0x3e   :  { %p8346_p2 = scmp.ne.s32.totalorder %s13742_s9, %s8345_s3  ;;  %p8349_p3 = scmp.lt.u32.totalorder %s8345_s3, %s13742_s9 }
  0x40   :  { %p8351_p4 = pnand %p8349_p3, %p8346_p2 }
  0x42   :  { %8354 = shalt.err (!%p8351_p4)
}
  0x43   :  { %s8355_s22 = scalar_lea.vmem %s109_s28, 4096  ;;  %p8360_p6 = scmp.lt.s32.totalorder %s109_s28, %s109_s28 }
  0x44   :  { %p8356_p5 = scmp.ne.s32.totalorder %s109_s28, %s8355_s22  ;;  %p8361_p7 = scmp.lt.s32.totalorder %s8355_s22, %s8355_s22 }
  0x46   :  { %p8362_p8 = por %p8361_p7, %p8360_p6 }
  0x48   :  { %p8363_p9 = pnand %p8362_p8, %p8356_p5 }
  0x4a   :  { %8366 = shalt.err (!%p8363_p9)
}
  0x4b   :  { %114 = dma.hbm_to_vmem [thread:$0]  %s13742_s9, 4096, %s109_s28, [#allocation13], %s8558_s23, %s8558_s23, %s8559_s1  }
  0x4c   :  { %s8564_s27 = smov [#allocation15]   ;;  %s8565_s25 = smov [#allocation3]  }
  0x4d   :  { %s136_s2 = sshll.u32 %s8564_s27, 4  ;;  %s40_s19 = sshll.u32 %s8565_s25, 4  ;;  %s137_s2 = int_to_ptr.vmem [resolvable:$true] %s136_s2  ;;  %s41_s19 = int_to_ptr.vmem [resolvable:$true] %s40_s19 }
  0x4e   :  { %s8367_s0 = scalar_lea.hbm %s13746_s13, 2048 }
  0x4f   :  { %p8368_p10 = scmp.ne.s32.totalorder %s13746_s13, %s8367_s0  ;;  %p8371_p11 = scmp.lt.u32.totalorder %s8367_s0, %s13746_s13 }
  0x51   :  { %p8373_p12 = pnand %p8371_p11, %p8368_p10 }
  0x53   :  { %8376 = shalt.err (!%p8373_p12)
}
  0x54   :  { %s8377_s9 = scalar_lea.vmem %s137_s2, 2048  ;;  %p8382_p0 = scmp.lt.s32.totalorder %s137_s2, %s137_s2 }
  0x55   :  { %p8378_p13 = scmp.ne.s32.totalorder %s137_s2, %s8377_s9  ;;  %p8383_p1 = scmp.lt.s32.totalorder %s8377_s9, %s8377_s9 }
  0x57   :  { %p8384_p2 = por %p8383_p1, %p8382_p0 }
  0x59   :  { %p8385_p3 = pnand %p8384_p2, %p8378_p13 }
  0x5b   :  { %8388 = shalt.err (!%p8385_p3)
}
  0x5c   :  { %142 = dma.hbm_to_vmem [thread:$0]  %s13746_s13, 2048, %s137_s2, [#allocation16], %s8562_s29, %s8562_s29, %s8563_s24  }
  0x5d   :  { %s14299_s30 = sld [smem:[#allocation217_spill]] }
  0x63   :  { %s8389_s27 = scalar_lea.hbm %s14299_s30, 4096 }
  0x64   :  { %p8390_p4 = scmp.ne.s32.totalorder %s14299_s30, %s8389_s27  ;;  %p8393_p5 = scmp.lt.u32.totalorder %s8389_s27, %s14299_s30 }
  0x66   :  { %p8395_p6 = pnand %p8393_p5, %p8390_p4 }
  0x68   :  { %8398 = shalt.err (!%p8395_p6)
}
  0x69   :  { %s8399_s4 = scalar_lea.vmem %s41_s19, 4096  ;;  %p8404_p8 = scmp.lt.s32.totalorder %s41_s19, %s41_s19 }
  0x6a   :  { %p8400_p7 = scmp.ne.s32.totalorder %s41_s19, %s8399_s4  ;;  %p8405_p9 = scmp.lt.s32.totalorder %s8399_s4, %s8399_s4 }
  0x6c   :  { %p8406_p10 = por %p8405_p9, %p8404_p8 }
  0x6e   :  { %p8407_p11 = pnand %p8406_p10, %p8400_p7 }
  0x70   :  { %8410 = shalt.err (!%p8407_p11)
}
  0x71   :  { %46 = dma.hbm_to_vmem [thread:$0]  %s14299_s30, 4096, %s41_s19, [#allocation4], %s8562_s29, %s8562_s29, %s8563_s24  }
  0x72   :  { %s8566_s20 = smov [#allocation8]   ;;  %s8567_s22 = smov [#allocation11]  }
  0x73   :  { %s66_s5 = sshll.u32 %s8566_s20, 4  ;;  %s94_s9 = sshll.u32 %s8567_s22, 4  ;;  %s67_s5 = int_to_ptr.vmem [resolvable:$true] %s66_s5  ;;  %s95_s9 = int_to_ptr.vmem [resolvable:$true] %s94_s9 }
  0x74   :  { %s14300_s28 = sld [smem:[#allocation220_spill]] }
  0x7a   :  { %s8411_s26 = scalar_lea.hbm %s14300_s28, 2048 }
  0x7b   :  { %p8412_p12 = scmp.ne.s32.totalorder %s14300_s28, %s8411_s26  ;;  %p8415_p13 = scmp.lt.u32.totalorder %s8411_s26, %s14300_s28 }
  0x7d   :  { %p8417_p0 = pnand %p8415_p13, %p8412_p12 }
  0x7f   :  { %8420 = shalt.err (!%p8417_p0)
}
  0x80   :  { %s8421_s19 = scalar_lea.vmem %s67_s5, 2048  ;;  %p8426_p2 = scmp.lt.s32.totalorder %s67_s5, %s67_s5 }
  0x81   :  { %p8422_p1 = scmp.ne.s32.totalorder %s67_s5, %s8421_s19  ;;  %p8427_p3 = scmp.lt.s32.totalorder %s8421_s19, %s8421_s19 }
  0x83   :  { %p8428_p4 = por %p8427_p3, %p8426_p2 }
  0x85   :  { %p8429_p5 = pnand %p8428_p4, %p8422_p1 }
  0x87   :  { %8432 = shalt.err (!%p8429_p5)
}
  0x88   :  { %72 = dma.hbm_to_vmem [thread:$0]  %s14300_s28, 2048, %s67_s5, [#allocation7], %s8562_s29, %s8562_s29, %s8563_s24  }
  0x89   :  { %s8433_s2 = scalar_lea.hbm %s13740_s7, 4096 }
  0x8a   :  { %p8434_p6 = scmp.ne.s32.totalorder %s13740_s7, %s8433_s2  ;;  %p8437_p7 = scmp.lt.u32.totalorder %s8433_s2, %s13740_s7 }
  0x8c   :  { %p8439_p8 = pnand %p8437_p7, %p8434_p6 }
  0x8e   :  { %8442 = shalt.err (!%p8439_p8)
}
  0x8f   :  { %s8443_s26 = scalar_lea.vmem %s95_s9, 4096  ;;  %p8448_p10 = scmp.lt.s32.totalorder %s95_s9, %s95_s9 }
  0x90   :  { %p8444_p9 = scmp.ne.s32.totalorder %s95_s9, %s8443_s26  ;;  %p8449_p11 = scmp.lt.s32.totalorder %s8443_s26, %s8443_s26 }
  0x92   :  { %p8450_p12 = por %p8449_p11, %p8448_p10 }
  0x94   :  { %p8451_p13 = pnand %p8450_p12, %p8444_p9 }
  0x96   :  { %8454 = shalt.err (!%p8451_p13)
}
  0x97   :  { %100 = dma.hbm_to_vmem [thread:$0]  %s13740_s7, 4096, %s95_s9, [#allocation10], %s8562_s29, %s8562_s29, %s8563_s24  }
  0x98   :  { %s8568_s27 = smov [#allocation14]   ;;  %s8569_s21 = smov [#allocation17]  }
  0x99   :  { %s122_s25 = sshll.u32 %s8568_s27, 4  ;;  %s150_s3 = sshll.u32 %s8569_s21, 4  ;;  %s123_s25 = int_to_ptr.vmem [resolvable:$true] %s122_s25  ;;  %s151_s3 = int_to_ptr.vmem [resolvable:$true] %s150_s3 }
  0x9a   :  { %s8455_s0 = scalar_lea.hbm %s13744_s11, 2048 }
  0x9b   :  { %p8456_p0 = scmp.ne.s32.totalorder %s13744_s11, %s8455_s0  ;;  %p8459_p1 = scmp.lt.u32.totalorder %s8455_s0, %s13744_s11 }
  0x9d   :  { %p8461_p2 = pnand %p8459_p1, %p8456_p0 }
  0x9f   :  { %8464 = shalt.err (!%p8461_p2)
}
  0xa0   :  { %s8465_s7 = scalar_lea.vmem %s123_s25, 2048  ;;  %p8470_p4 = scmp.lt.s32.totalorder %s123_s25, %s123_s25 }
  0xa1   :  { %p8466_p3 = scmp.ne.s32.totalorder %s123_s25, %s8465_s7  ;;  %p8471_p5 = scmp.lt.s32.totalorder %s8465_s7, %s8465_s7 }
  0xa3   :  { %p8472_p6 = por %p8471_p5, %p8470_p4 }
  0xa5   :  { %p8473_p7 = pnand %p8472_p6, %p8466_p3 }
  0xa7   :  { %8476 = shalt.err (!%p8473_p7)
}
  0xa8   :  { %128 = dma.hbm_to_vmem [thread:$0]  %s13744_s11, 2048, %s123_s25, [#allocation13], %s8562_s29, %s8562_s29, %s8563_s24  }
  0xa9   :  { %s8477_s26 = scalar_lea.hbm %s13748_s15, 4096 }
  0xaa   :  { %p8478_p8 = scmp.ne.s32.totalorder %s13748_s15, %s8477_s26  ;;  %p8481_p9 = scmp.lt.u32.totalorder %s8477_s26, %s13748_s15 }
  0xac   :  { %p8483_p10 = pnand %p8481_p9, %p8478_p8 }
  0xae   :  { %8486 = shalt.err (!%p8483_p10)
}
  0xaf   :  { %s8487_s19 = scalar_lea.vmem %s151_s3, 4096  ;;  %p8492_p12 = scmp.lt.s32.totalorder %s151_s3, %s151_s3 }
  0xb0   :  { %p8488_p11 = scmp.ne.s32.totalorder %s151_s3, %s8487_s19  ;;  %p8493_p13 = scmp.lt.s32.totalorder %s8487_s19, %s8487_s19 }
  0xb2   :  { %p8494_p0 = por %p8493_p13, %p8492_p12 }
  0xb4   :  { %p8495_p1 = pnand %p8494_p0, %p8488_p11 }
  0xb6   :  { %8498 = shalt.err (!%p8495_p1)
}
  0xb7   :  { %156 = dma.hbm_to_vmem [thread:$0]  %s13748_s15, 4096, %s151_s3, [#allocation16], %s8562_s29, %s8562_s29, %s8563_s24  }
  0xb8   :  { %s8570_s30 = smov [#allocation18]   ;;  %s8499_s2 = scalar_lea.hbm %s13750_s17, 2048 }
  0xb9   :  { %s164_s0 = sshll.u32 %s8570_s30, 4  ;;  %p8500_p2 = scmp.ne.s32.totalorder %s13750_s17, %s8499_s2  ;;  %s165_s0 = int_to_ptr.vmem [resolvable:$true] %s164_s0 }
  0xba   :  { %p8503_p3 = scmp.lt.u32.totalorder %s8499_s2, %s13750_s17 }
  0xbc   :  { %p8505_p4 = pnand %p8503_p3, %p8500_p2 }
  0xbe   :  { %8508 = shalt.err (!%p8505_p4)
}
  0xbf   :  { %s8509_s23 = scalar_lea.vmem %s165_s0, 2048  ;;  %p8514_p6 = scmp.lt.s32.totalorder %s165_s0, %s165_s0 }
  0xc0   :  { %p8510_p5 = scmp.ne.s32.totalorder %s165_s0, %s8509_s23  ;;  %p8515_p7 = scmp.lt.s32.totalorder %s8509_s23, %s8509_s23 }
  0xc2   :  { %p8516_p8 = por %p8515_p7, %p8514_p6 }
  0xc4   :  { %p8517_p9 = pnand %p8516_p8, %p8510_p5 }
  0xc6   :  { %8520 = shalt.err (!%p8517_p9)
}
  0xc7   :  { %170 = dma.hbm_to_vmem [thread:$0]  %s13750_s17, 2048, %s165_s0, [#allocation19], %s8562_s29, %s8562_s29, %s8563_s24  }
  0xc8   :  { %8543 = dma.done.wait [#allocation4], 4096  }
  0xc9   :  { %8544 = vsyncadd [#allocation4], 4294963200 }
  0xca   :  { %8545 = dma.done.wait [#allocation7], 6144  }
  0xcb   :  { %8546 = vsyncadd [#allocation7], 4294961152 }
  0xcc   :  { %8547 = dma.done.wait [#allocation10], 6144  }
  0xcd   :  { %8548 = vsyncadd [#allocation10], 4294961152 }
  0xce   :  { %8549 = dma.done.wait [#allocation13], 6144  }
  0xcf   :  { %8550 = vsyncadd [#allocation13], 4294961152 }
  0xd0   :  { %8551 = dma.done.wait [#allocation16], 6144  }
  0xd1   :  { %8552 = vsyncadd [#allocation16], 4294961152 }
  0xd2   :  { %8553 = dma.done.wait [#allocation19], 2048  }
  0xd3   :  { %8554 = vsyncadd [#allocation19], 4294965248  ;;  %v13763_v1 = vmov 0.0   ;;  %v240_v2 = vld [vmem:[#allocation6 + $0x8] sm:$0xff]  ;;  %v242_v3 = vld [vmem:[#allocation6 + $0x18] sm:$0xff]  ;;  %s14303_s24 = sld [smem:[#allocation219_spill]] }
  0xd4   :  { %347 = vmatprep.mubr.f32.mxu0 %v13763_v1  ;;  %v239_v4 = vld [vmem:[#allocation6] sm:$0xff]  ;;  %v7895_v5 = vpack.c.bf16 %v242_v3, %v240_v2  ;;  %v241_v6 = vld [vmem:[#allocation6 + $0x10] sm:$0xff]  ;;  %v244_v7 = vld [vmem:[#allocation6 + $0x28] sm:$0xff]  ;;  %s14305_s5 = sld [smem:[#allocation221_spill]]  ;;  %s15285_s9 = sld [smem:[#allocation223_spill]] }
  0xd5   :  { %v246_v8 = vld [vmem:[#allocation6 + $0x38] sm:$0xff]  ;;  %v7897_v9 = vpack.c.bf16 %v241_v6, %v239_v4  ;;  %v243_v11 = vld [vmem:[#allocation6 + $0x20] sm:$0xff]  ;;  %v245_v12 = vld [vmem:[#allocation6 + $0x30] sm:$0xff]  ;;  %s8575_s22 = smov [#allocation20]  }
  0xd6   :  { %v7899_v10 = vpack.c.bf16 %v246_v8, %v244_v7  ;;  %v248_v13 = vld [vmem:[#allocation6 + $0x48] sm:$0xff]  ;;  %7896 = vmatprep.subr.bf16.mxu0 %v7895_v5  ;;  %v250_v14 = vld [vmem:[#allocation6 + $0x58] sm:$0xff]  ;;  %v7901_v15 = vpack.c.bf16 %v245_v12, %v243_v11  ;;  %v247_v17 = vld [vmem:[#allocation6 + $0x40] sm:$0xff]  ;;  %s7200_s23 = sshll.u32 %s8575_s22, 4  ;;  %s7201_s23 = int_to_ptr.vmem [resolvable:$true] %s7200_s23 }
  0xd7   :  { %7898 = vmatpush1.bf16.msra.mxu0 %v7897_v9  ;;  %v7903_v16 = vpack.c.bf16 %v250_v14, %v248_v13  ;;  %v249_v18 = vld [vmem:[#allocation6 + $0x50] sm:$0xff]  ;;  %v252_v19 = vld [vmem:[#allocation6 + $0x68] sm:$0xff]  ;;  %v254_v20 = vld [vmem:[#allocation6 + $0x78] sm:$0xff]  ;;  %s8521_s15 = scalar_lea.vmem %s7201_s23, 32  ;;  %p8526_p11 = scmp.lt.s32.totalorder %s7201_s23, %s7201_s23 }
  0xd8   :  { %7900 = vmatprep.subr.bf16.mxu0 %v7899_v10  ;;  %v7905_v21 = vpack.c.bf16 %v249_v18, %v247_v17  ;;  %v7907_v22 = vpack.c.bf16 %v254_v20, %v252_v19  ;;  %v251_v23 = vld [vmem:[#allocation6 + $0x60] sm:$0xff]  ;;  %v253_v24 = vld [vmem:[#allocation6 + $0x70] sm:$0xff]  ;;  %v256_v25 = vld [vmem:[#allocation6 + $0x88] sm:$0xff]  ;;  %p8522_p10 = scmp.ne.s32.totalorder %s7201_s23, %s8521_s15  ;;  %p8527_p12 = scmp.lt.s32.totalorder %s8521_s15, %s8521_s15 }
  0xd9   :  { %v258_v26 = vld [vmem:[#allocation6 + $0x98] sm:$0xff]  ;;  %v7909_v27 = vpack.c.bf16 %v253_v24, %v251_v23  ;;  %v255_v29 = vld [vmem:[#allocation6 + $0x80] sm:$0xff]  ;;  %v257_v30 = vld [vmem:[#allocation6 + $0x90] sm:$0xff] }
  0xda   :  { %v7911_v28 = vpack.c.bf16 %v258_v26, %v256_v25  ;;  %v260_v31 = vld [vmem:[#allocation6 + $0xa8] sm:$0xff]  ;;  %v262_v32 = vld [vmem:[#allocation6 + $0xb8] sm:$0xff]  ;;  %v7913_v33 = vpack.c.bf16 %v257_v30, %v255_v29  ;;  %v259_v35 = vld [vmem:[#allocation6 + $0xa0] sm:$0xff]  ;;  %p8528_p13 = por %p8527_p12, %p8526_p11 }
  0xdb   :  { %7902 = vmatpush1.bf16.msra.mxu0 %v7901_v15  ;;  %v7915_v34 = vpack.c.bf16 %v262_v32, %v260_v31  ;;  %v261_v36 = vld [vmem:[#allocation6 + $0xb0] sm:$0xff]  ;;  %v264_v37 = vld [vmem:[#allocation6 + $0xc8] sm:$0xff]  ;;  %v266_v38 = vld [vmem:[#allocation6 + $0xd8] sm:$0xff] }
  0xdc   :  { %7904 = vmatprep.subr.bf16.mxu0 %v7903_v16  ;;  %v7917_v39 = vpack.c.bf16 %v261_v36, %v259_v35  ;;  %v7919_v40 = vpack.c.bf16 %v266_v38, %v264_v37  ;;  %v263_v41 = vld [vmem:[#allocation6 + $0xc0] sm:$0xff]  ;;  %v265_v42 = vld [vmem:[#allocation6 + $0xd0] sm:$0xff]  ;;  %v268_v43 = vld [vmem:[#allocation6 + $0xe8] sm:$0xff]  ;;  %p8529_p0 = pnand %p8528_p13, %p8522_p10 }
  0xdd   :  { %v270_v44 = vld [vmem:[#allocation6 + $0xf8] sm:$0xff]  ;;  %v7921_v45 = vpack.c.bf16 %v265_v42, %v263_v41  ;;  %v267_v47 = vld [vmem:[#allocation6 + $0xe0] sm:$0xff]  ;;  %v269_v48 = vld [vmem:[#allocation6 + $0xf0] sm:$0xff] }
  0xde   :  { %v7923_v46 = vpack.c.bf16 %v270_v44, %v268_v43  ;;  %v7925_v49 = vpack.c.bf16 %v269_v48, %v267_v47  ;;  %v604_v50 = vld [vmem:[#allocation8] sm:$0xff]  ;;  %v605_v51 = vld [vmem:[#allocation8 + $0x8] sm:$0xff]  ;;  %v606_v52 = vld [vmem:[#allocation8 + $0x10] sm:$0xff] }
  0xdf   :  { %7906 = vmatpush1.bf16.msra.mxu0 %v7905_v21  ;;  %v207_v53 = vld [vmem:[#allocation3] sm:$0xff]  ;;  %v7927_v54 = vpack.c.bf16 %v605_v51, %v604_v50  ;;  %v607_v55 = vld [vmem:[#allocation8 + $0x18] sm:$0xff]  ;;  %v609_v58 = vld [vmem:[#allocation8 + $0x28] sm:$0xff] }
  0xe0   :  { %7908 = vmatprep.subr.bf16.mxu0 %v7907_v22  ;;  %v7931_v56 = vpack.c.bf16 %v607_v55, %v606_v52  ;;  %v608_v57 = vld [vmem:[#allocation8 + $0x20] sm:$0xff]  ;;  %v208_v59 = vld [vmem:[#allocation3 + $0x8] sm:$0xff]  ;;  %v610_v61 = vld [vmem:[#allocation8 + $0x30] sm:$0xff] }
  0xe1   :  { %7928 = vmatprep.subr.bf16.mxu1 %v7927_v54  ;;  %v7935_v60 = vpack.c.bf16 %v609_v58, %v608_v57  ;;  %v611_v62 = vld [vmem:[#allocation8 + $0x38] sm:$0xff]  ;;  %v209_v63 = vld [vmem:[#allocation3 + $0x10] sm:$0xff]  ;;  %v612_v2 = vld [vmem:[#allocation8 + $0x40] sm:$0xff] }
  0xe2   :  { %7930 = vmatpush3.bf16.msra.mxu1 %v7927_v54  ;;  %v7939_v0 = vpack.c.bf16 %v611_v62, %v610_v61  ;;  %v613_v3 = vld [vmem:[#allocation8 + $0x48] sm:$0xff]  ;;  %v210_v4 = vld [vmem:[#allocation3 + $0x18] sm:$0xff]  ;;  %v614_v6 = vld [vmem:[#allocation8 + $0x50] sm:$0xff] }
  0xe3   :  { %7910 = vmatpush1.bf16.msra.mxu0 %v7909_v27  ;;  %7932 = vmatprep.subr.bf16.mxu1 %v7931_v56  ;;  %v7943_v5 = vpack.c.bf16 %v613_v3, %v612_v2  ;;  %v615_v7 = vld [vmem:[#allocation8 + $0x58] sm:$0xff]  ;;  %v211_v8 = vld [vmem:[#allocation3 + $0x20] sm:$0xff]  ;;  %v212_v10 = vld [vmem:[#allocation3 + $0x28] sm:$0xff] }
  0xe4   :  { %7912 = vmatprep.subr.bf16.mxu0 %v7911_v28  ;;  %v7947_v9 = vpack.c.bf16 %v615_v7, %v614_v6  ;;  %v213_v11 = vld [vmem:[#allocation3 + $0x30] sm:$0xff]  ;;  %v214_v12 = vld [vmem:[#allocation3 + $0x38] sm:$0xff]  ;;  %v215_v13 = vld [vmem:[#allocation3 + $0x40] sm:$0xff] }
  0xe5   :  { %v216_v14 = vld [vmem:[#allocation3 + $0x48] sm:$0xff]  ;;  %v217_v15 = vld [vmem:[#allocation3 + $0x50] sm:$0xff]  ;;  %v218_v16 = vld [vmem:[#allocation3 + $0x58] sm:$0xff] }
  0xe6   :  { %7934 = vmatpush3.bf16.msra.mxu1 %v7931_v56  ;;  %v219_v17 = vld [vmem:[#allocation3 + $0x60] sm:$0xff]  ;;  %v220_v18 = vld [vmem:[#allocation3 + $0x68] sm:$0xff]  ;;  %v221_v19 = vld [vmem:[#allocation3 + $0x70] sm:$0xff] }
  0xe7   :  { %7914 = vmatpush1.bf16.msra.mxu0 %v7913_v33  ;;  %7936 = vmatprep.subr.bf16.mxu1 %v7935_v60  ;;  %v222_v20 = vld [vmem:[#allocation3 + $0x78] sm:$0xff]  ;;  %v223_v21 = vld [vmem:[#allocation3 + $0x80] sm:$0xff]  ;;  %v224_v22 = vld [vmem:[#allocation3 + $0x88] sm:$0xff] }
  0xe8   :  { %7916 = vmatprep.subr.bf16.mxu0 %v7915_v34  ;;  %v225_v23 = vld [vmem:[#allocation3 + $0x90] sm:$0xff]  ;;  %v226_v24 = vld [vmem:[#allocation3 + $0x98] sm:$0xff]  ;;  %v227_v25 = vld [vmem:[#allocation3 + $0xa0] sm:$0xff] }
  0xe9   :  { %v228_v26 = vld [vmem:[#allocation3 + $0xa8] sm:$0xff]  ;;  %v616_v27 = vld [vmem:[#allocation8 + $0x60] sm:$0xff]  ;;  %v229_v30 = vld [vmem:[#allocation3 + $0xb0] sm:$0xff] }
  0xea   :  { %7938 = vmatpush3.bf16.msra.mxu1 %v7935_v60  ;;  %v617_v28 = vld [vmem:[#allocation8 + $0x68] sm:$0xff]  ;;  %v618_v31 = vld [vmem:[#allocation8 + $0x70] sm:$0xff]  ;;  %v619_v32 = vld [vmem:[#allocation8 + $0x78] sm:$0xff] }
  0xeb   :  { %7918 = vmatpush1.bf16.msra.mxu0 %v7917_v39  ;;  %7940 = vmatprep.subr.bf16.mxu1 %v7939_v0  ;;  %v7951_v29 = vpack.c.bf16 %v617_v28, %v616_v27  ;;  %v7955_v33 = vpack.c.bf16 %v619_v32, %v618_v31  ;;  %v230_v34 = vld [vmem:[#allocation3 + $0xb8] sm:$0xff]  ;;  %v231_v35 = vld [vmem:[#allocation3 + $0xc0] sm:$0xff]  ;;  %v232_v36 = vld [vmem:[#allocation3 + $0xc8] sm:$0xff] }
  0xec   :  { %7920 = vmatprep.subr.bf16.mxu0 %v7919_v40  ;;  %v233_v37 = vld [vmem:[#allocation3 + $0xd0] sm:$0xff]  ;;  %v234_v38 = vld [vmem:[#allocation3 + $0xd8] sm:$0xff]  ;;  %v235_v39 = vld [vmem:[#allocation3 + $0xe0] sm:$0xff] }
  0xed   :  { %v236_v40 = vld [vmem:[#allocation3 + $0xe8] sm:$0xff]  ;;  %v237_v41 = vld [vmem:[#allocation3 + $0xf0] sm:$0xff]  ;;  %v238_v42 = vld [vmem:[#allocation3 + $0xf8] sm:$0xff] }
  0xee   :  { %7942 = vmatpush3.bf16.msra.mxu1 %v7939_v0  ;;  %v621_v43 = vld [vmem:[#allocation9] sm:$0xff]  ;;  %v622_v44 = vld [vmem:[#allocation9 + $0x8] sm:$0xff]  ;;  %v624_v60 = vld [vmem:[#allocation9 + $0x18] sm:$0xff] }
  0xef   :  { %7922 = vmatpush1.bf16.msra.mxu0 %v7921_v45  ;;  %7944 = vmatprep.subr.bf16.mxu1 %v7943_v5  ;;  %v7959_v45 = vpack.c.bf16 %v622_v44, %v621_v43  ;;  %v631_v28 = vld [vmem:[#allocation9 + $0x50] sm:$0xff] }
  0xf0   :  { %7924 = vmatprep.subr.bf16.mxu0 %v7923_v46  ;;  %v13760_v46 = vlaneseq  ;;  %v635_v44 = vld [vmem:[#allocation9 + $0x70] sm:$0xff] }
  0xf2   :  { %7946 = vmatpush3.bf16.msra.mxu1 %v7943_v5  ;;  %v8872_v47 = vshrl.u32 %v13760_v46, 7  ;;  %v626_v5 = vld [vmem:[#allocation9 + $0x28] sm:$0xff] }
  0xf3   :  { %7926 = vmatpush1.bf16.msra.mxu0 %v7925_v49  ;;  %7948 = vmatprep.subr.bf16.mxu1 %v7947_v9  ;;  %v271_v49 = vld [vmem:[%s14303_s24] sm:$0x3] }
  0xf4   :  { %14301 = vst [vmem:[#allocation28_spill] sm:$0xff] %v8872_v47  ;;  %v8875_v48 = vsub.s32 0, %v8872_v47  ;;  %v8881_v50 = vsub.s32 1, %v8872_v47 }
  0xf6   :  { %348 = vmatmul.mubr.f32.vlgmr.msra.gmra.mrb[0].mxu0 %v207_v53  ;;  %7950 = vmatpush3.bf16.msra.mxu1 %v7947_v9  ;;  %14302 = vst [vmem:[#allocation29_spill] sm:$0xff] %v8875_v48  ;;  %14304 = vst [vmem:[#allocation30_spill] sm:$0xff] %v8881_v50  ;;  %v8884_v51 = vrot.slane %v271_v49, %v8875_v48  ;;  %v8887_v52 = vrot.slane %v271_v49, %v8881_v50 }
  0xf7   :  { %353 = vmatprep.mubr.f32.mxu0 %v13763_v1  ;;  %7952 = vmatprep.subr.bf16.mxu1 %v7951_v29 }
  0xfa   :  { %354 = vmatmul.mubr.f32.gmra.mrb[2].mxu0 %v208_v59  ;;  %7954 = vmatpush3.bf16.msra.mxu1 %v7951_v29  ;;  %v623_v59 = vld [vmem:[#allocation9 + $0x10] sm:$0xff]  ;;  %v632_v29 = vld [vmem:[#allocation9 + $0x58] sm:$0xff] }
  0xfb   :  { %359 = vmatprep.mubr.f32.mxu0 %v13763_v1  ;;  %7956 = vmatprep.subr.bf16.mxu1 %v7955_v33  ;;  %v7963_v2 = vpack.c.bf16 %v624_v60, %v623_v59 }
  0xfe   :  { %360 = vmatmul.mubr.f32.gmra.mrb[4].mxu0 %v209_v63  ;;  %7958 = vmatpush3.bf16.msra.mxu1 %v7955_v33 }
  0xff   :  { %365 = vmatprep.mubr.f32.mxu0 %v13763_v1  ;;  %7960 = vmatprep.subr.bf16.mxu1 %v7959_v45 }
 0x102   :  { %366 = vmatmul.mubr.f32.gmra.mrb[6].mxu0 %v210_v4  ;;  %v625_v4 = vld [vmem:[#allocation9 + $0x20] sm:$0xff] }
 0x103   :  { %371 = vmatprep.mubr.f32.mxu0 %v13763_v1 }
 0x106   :  { %372 = vmatmul.mubr.f32.gmra.mrb[8].mxu0 %v211_v8 }
 0x107   :  { %377 = vmatprep.mubr.f32.mxu0 %v13763_v1 }
 0x10a   :  { %378 = vmatmul.mubr.f32.gmra.mrb[10].mxu0 %v212_v10  ;;  %v7967_v10 = vpack.c.bf16 %v626_v5, %v625_v4 }
 0x10b   :  { %383 = vmatprep.mubr.f32.mxu0 %v13763_v1 }
 0x10e   :  { %384 = vmatmul.mubr.f32.gmra.mrb[12].mxu0 %v213_v11 }
 0x10f   :  { %389 = vmatprep.mubr.f32.mxu0 %v13763_v1 }
 0x112   :  { %390 = vmatmul.mubr.f32.gmra.mrb[14].mxu0 %v214_v12  ;;  %v627_v12 = vld [vmem:[#allocation9 + $0x30] sm:$0xff] }
 0x113   :  { %395 = vmatprep.mubr.f32.mxu0 %v13763_v1 }
 0x116   :  { %396 = vmatmul.mubr.f32.gmra.mrb[16].mxu0 %v215_v13  ;;  %v628_v13 = vld [vmem:[#allocation9 + $0x38] sm:$0xff] }
 0x117   :  { %401 = vmatprep.mubr.f32.mxu0 %v13763_v1 }
 0x11a   :  { %402 = vmatmul.mubr.f32.gmra.mrb[18].mxu0 %v216_v14 }
 0x11b   :  { %407 = vmatprep.mubr.f32.mxu0 %v13763_v1 }
 0x11e   :  { %408 = vmatmul.mubr.f32.gmra.mrb[20].mxu0 %v217_v15 }
 0x11f   :  { %413 = vmatprep.mubr.f32.mxu0 %v13763_v1 }
 0x122   :  { %414 = vmatmul.mubr.f32.gmra.mrb[22].mxu0 %v218_v16 }
 0x123   :  { %419 = vmatprep.mubr.f32.mxu0 %v13763_v1 }
 0x126   :  { %420 = vmatmul.mubr.f32.gmra.mrb[24].mxu0 %v219_v17 }
 0x127   :  { %425 = vmatprep.mubr.f32.mxu0 %v13763_v1 }
 0x12a   :  { %426 = vmatmul.mubr.f32.gmra.mrb[26].mxu0 %v220_v18  ;;  %v7971_v18 = vpack.c.bf16 %v628_v13, %v627_v12 }
 0x12b   :  { %431 = vmatprep.mubr.f32.mxu0 %v13763_v1 }
 0x12e   :  { %432 = vmatmul.mubr.f32.gmra.mrb[28].mxu0 %v221_v19 }
 0x12f   :  { %437 = vmatprep.mubr.f32.mxu0 %v13763_v1 }
 0x132   :  { %438 = vmatmul.mubr.f32.gmra.mrb[30].mxu0 %v222_v20  ;;  %v629_v20 = vld [vmem:[#allocation9 + $0x40] sm:$0xff] }
 0x133   :  { %443 = vmatprep.mubr.f32.mxu0 %v13763_v1 }
 0x136   :  { %444 = vmatmul.mubr.f32.gmra.mrb[32].mxu0 %v223_v21  ;;  %v630_v21 = vld [vmem:[#allocation9 + $0x48] sm:$0xff] }
 0x137   :  { %449 = vmatprep.mubr.f32.mxu0 %v13763_v1 }
 0x13a   :  { %450 = vmatmul.mubr.f32.gmra.mrb[34].mxu0 %v224_v22 }
 0x13b   :  { %455 = vmatprep.mubr.f32.mxu0 %v13763_v1 }
 0x13e   :  { %456 = vmatmul.mubr.f32.gmra.mrb[36].mxu0 %v225_v23 }
 0x13f   :  { %461 = vmatprep.mubr.f32.mxu0 %v13763_v1 }
 0x142   :  { %462 = vmatmul.mubr.f32.gmra.mrb[38].mxu0 %v226_v24 }
 0x143   :  { %467 = vmatprep.mubr.f32.mxu0 %v13763_v1 }
 0x146   :  { %468 = vmatmul.mubr.f32.gmra.mrb[40].mxu0 %v227_v25 }
 0x147   :  { %473 = vmatprep.mubr.f32.mxu0 %v13763_v1 }
 0x14a   :  { %474 = vmatmul.mubr.f32.gmra.mrb[42].mxu0 %v228_v26  ;;  %v7975_v26 = vpack.c.bf16 %v630_v21, %v629_v20 }
 0x14b   :  { %479 = vmatprep.mubr.f32.mxu0 %v13763_v1 }
 0x14e   :  { %480 = vmatmul.mubr.f32.gmra.mrb[44].mxu0 %v229_v30 }
 0x14f   :  { %485 = vmatprep.mubr.f32.mxu0 %v13763_v1 }
 0x152   :  { %486 = vmatmul.mubr.f32.gmra.mrb[46].mxu0 %v230_v34  ;;  %v7979_v34 = vpack.c.bf16 %v632_v29, %v631_v28 }
 0x153   :  { %491 = vmatprep.mubr.f32.mxu0 %v13763_v1 }
 0x156   :  { %492 = vmatmul.mubr.f32.gmra.mrb[48].mxu0 %v231_v35 }
 0x157   :  { %497 = vmatprep.mubr.f32.mxu0 %v13763_v1 }
 0x15a   :  { %498 = vmatmul.mubr.f32.gmra.mrb[50].mxu0 %v232_v36  ;;  %v633_v36 = vld [vmem:[#allocation9 + $0x60] sm:$0xff] }
 0x15b   :  { %503 = vmatprep.mubr.f32.mxu0 %v13763_v1 }
 0x15e   :  { %504 = vmatmul.mubr.f32.gmra.mrb[52].mxu0 %v233_v37  ;;  %v634_v37 = vld [vmem:[#allocation9 + $0x68] sm:$0xff] }
 0x15f   :  { %509 = vmatprep.mubr.f32.mxu0 %v13763_v1 }
 0x162   :  { %510 = vmatmul.mubr.f32.gmra.mrb[54].mxu0 %v234_v38 }
 0x163   :  { %515 = vmatprep.mubr.f32.mxu0 %v13763_v1 }
 0x166   :  { %516 = vmatmul.mubr.f32.gmra.mrb[56].mxu0 %v235_v39 }
 0x167   :  { %521 = vmatprep.mubr.f32.mxu0 %v13763_v1 }
 0x16a   :  { %522 = vmatmul.mubr.f32.gmra.mrb[58].mxu0 %v236_v40 }
 0x16b   :  { %527 = vmatprep.mubr.f32.mxu0 %v13763_v1 }
 0x16e   :  { %528 = vmatmul.mubr.f32.gmra.mrb[60].mxu0 %v237_v41 }
 0x16f   :  { %533 = vmatprep.mubr.f32.mxu0 %v13763_v1 }
 0x172   :  { %534 = vmatmul.mubr.f32.gmra.mrb[62].mxu0 %v238_v42  ;;  %v7983_v42 = vpack.c.bf16 %v634_v37, %v633_v36 }
 0x1c9   :  { %v349_v53 = vpop.f32.mrb[0].mxu0 }
 0x1ca   :  { %v351_v54 = vpop.f32.mrb[1].mxu0  ;;  %v350_v55 = vadd.f32 %v349_v53, %v8884_v51 }
 0x1cb   :  { %v8891_v56 = vadd.f32 %v351_v54, %v8887_v52 }
 0x1cc   :  { %v540_v57 = vmax.f32 %v350_v55, 0.0 }
 0x1cd   :  { %v355_v58 = vpop.f32.mrb[2].mxu0 }
 0x1ce   :  { %v356_v61 = vadd.f32 %v355_v58, %v8884_v51  ;;  %v357_v62 = vpop.f32.mrb[3].mxu0  ;;  %7527 = vmatprep.mubr.f32.mxu1 %v540_v57 }
 0x1cf   :  { %v8895_v63 = vadd.f32 %v357_v62, %v8887_v52 }
 0x1d0   :  { %v542_v0 = vmax.f32 %v356_v61, 0.0 }
 0x1d1   :  { %v361_v3 = vpop.f32.mrb[4].mxu0 }
 0x1d2   :  { %v362_v6 = vadd.f32 %v361_v3, %v8884_v51  ;;  %v363_v7 = vpop.f32.mrb[5].mxu0  ;;  %7528 = vmatmul.mubr.f32.vlgmr.msra.gmra.mrb[0].mxu1 %v542_v0 }
 0x1d3   :  { %v8899_v8 = vadd.f32 %v363_v7, %v8887_v52  ;;  %7962 = vmatpush3.bf16.msra.mxu1 %v7959_v45  ;;  %v636_v45 = vld [vmem:[#allocation9 + $0x78] sm:$0xff] }
 0x1d4   :  { %v544_v9 = vmax.f32 %v362_v6, 0.0  ;;  %7964 = vmatprep.subr.bf16.mxu1 %v7963_v2  ;;  %v7987_v57 = vpack.c.bf16 %v636_v45, %v635_v44 }
 0x1d5   :  { %v367_v11 = vpop.f32.mrb[6].mxu0 }
 0x1d6   :  { %v368_v14 = vadd.f32 %v367_v11, %v8884_v51  ;;  %v369_v15 = vpop.f32.mrb[7].mxu0  ;;  %7530 = vmatprep.mubr.f32.mxu1 %v544_v9 }
 0x1d7   :  { %v8903_v16 = vadd.f32 %v369_v15, %v8887_v52  ;;  %7966 = vmatpush3.bf16.msra.mxu1 %v7963_v2 }
 0x1d8   :  { %v546_v17 = vmax.f32 %v368_v14, 0.0  ;;  %7968 = vmatprep.subr.bf16.mxu1 %v7967_v10 }
 0x1d9   :  { %v373_v19 = vpop.f32.mrb[8].mxu0 }
 0x1da   :  { %v374_v22 = vadd.f32 %v373_v19, %v8884_v51  ;;  %v375_v23 = vpop.f32.mrb[9].mxu0  ;;  %7531 = vmatmul.mubr.f32.gmra.mrb[2].mxu1 %v546_v17 }
 0x1db   :  { %v8907_v24 = vadd.f32 %v375_v23, %v8887_v52  ;;  %7970 = vmatpush3.bf16.msra.mxu1 %v7967_v10 }
 0x1dc   :  { %v548_v25 = vmax.f32 %v374_v22, 0.0  ;;  %7972 = vmatprep.subr.bf16.mxu1 %v7971_v18 }
 0x1dd   :  { %v379_v27 = vpop.f32.mrb[10].mxu0 }
 0x1de   :  { %v380_v30 = vadd.f32 %v379_v27, %v8884_v51  ;;  %v381_v31 = vpop.f32.mrb[11].mxu0  ;;  %7533 = vmatprep.mubr.f32.mxu1 %v548_v25 }
 0x1df   :  { %v8911_v32 = vadd.f32 %v381_v31, %v8887_v52  ;;  %7974 = vmatpush3.bf16.msra.mxu1 %v7971_v18 }
 0x1e0   :  { %v550_v33 = vmax.f32 %v380_v30, 0.0  ;;  %7976 = vmatprep.subr.bf16.mxu1 %v7975_v26 }
 0x1e1   :  { %v385_v35 = vpop.f32.mrb[12].mxu0 }
 0x1e2   :  { %v386_v38 = vadd.f32 %v385_v35, %v8884_v51  ;;  %v387_v39 = vpop.f32.mrb[13].mxu0  ;;  %7534 = vmatmul.mubr.f32.gmra.mrb[4].mxu1 %v550_v33 }
 0x1e3   :  { %v8915_v40 = vadd.f32 %v387_v39, %v8887_v52  ;;  %7978 = vmatpush3.bf16.msra.mxu1 %v7975_v26 }
 0x1e4   :  { %v552_v41 = vmax.f32 %v386_v38, 0.0  ;;  %7980 = vmatprep.subr.bf16.mxu1 %v7979_v34 }
 0x1e5   :  { %v391_v43 = vpop.f32.mrb[14].mxu0 }
 0x1e6   :  { %v392_v49 = vadd.f32 %v391_v43, %v8884_v51  ;;  %v393_v53 = vpop.f32.mrb[15].mxu0  ;;  %7536 = vmatprep.mubr.f32.mxu1 %v552_v41 }
 0x1e7   :  { %v8919_v54 = vadd.f32 %v393_v53, %v8887_v52  ;;  %7982 = vmatpush3.bf16.msra.mxu1 %v7979_v34 }
 0x1e8   :  { %v554_v55 = vmax.f32 %v392_v49, 0.0  ;;  %7984 = vmatprep.subr.bf16.mxu1 %v7983_v42 }
 0x1e9   :  { %v397_v58 = vpop.f32.mrb[16].mxu0 }
 0x1ea   :  { %v398_v59 = vadd.f32 %v397_v58, %v8884_v51  ;;  %v399_v60 = vpop.f32.mrb[17].mxu0  ;;  %7537 = vmatmul.mubr.f32.gmra.mrb[6].mxu1 %v554_v55 }
 0x1eb   :  { %v8923_v61 = vadd.f32 %v399_v60, %v8887_v52  ;;  %7986 = vmatpush3.bf16.msra.mxu1 %v7983_v42 }
 0x1ec   :  { %v556_v62 = vmax.f32 %v398_v59, 0.0  ;;  %7988 = vmatprep.subr.bf16.mxu1 %v7987_v57 }
 0x1ed   :  { %v403_v0 = vpop.f32.mrb[18].mxu0 }
 0x1ee   :  { %v404_v2 = vadd.f32 %v403_v0, %v8884_v51  ;;  %v405_v3 = vpop.f32.mrb[19].mxu0  ;;  %7539 = vmatprep.mubr.f32.mxu1 %v556_v62 }
 0x1ef   :  { %v8927_v4 = vadd.f32 %v405_v3, %v8887_v52  ;;  %7990 = vmatpush3.bf16.msra.mxu1 %v7987_v57 }
 0x1f0   :  { %v558_v5 = vmax.f32 %v404_v2, 0.0 }
 0x1f1   :  { %v409_v6 = vpop.f32.mrb[20].mxu0 }
 0x1f2   :  { %v410_v7 = vadd.f32 %v409_v6, %v8884_v51  ;;  %v411_v9 = vpop.f32.mrb[21].mxu0  ;;  %7540 = vmatmul.mubr.f32.gmra.mrb[8].mxu1 %v558_v5 }
 0x1f3   :  { %v8931_v10 = vadd.f32 %v411_v9, %v8887_v52 }
 0x1f4   :  { %v560_v11 = vmax.f32 %v410_v7, 0.0 }
 0x1f5   :  { %v415_v12 = vpop.f32.mrb[22].mxu0 }
 0x1f6   :  { %v416_v13 = vadd.f32 %v415_v12, %v8884_v51  ;;  %v417_v14 = vpop.f32.mrb[23].mxu0  ;;  %7542 = vmatprep.mubr.f32.mxu1 %v560_v11 }
 0x1f7   :  { %v8935_v15 = vadd.f32 %v417_v14, %v8887_v52 }
 0x1f8   :  { %v562_v17 = vmax.f32 %v416_v13, 0.0 }
 0x1f9   :  { %v421_v18 = vpop.f32.mrb[24].mxu0 }
 0x1fa   :  { %v422_v19 = vadd.f32 %v421_v18, %v8884_v51  ;;  %v423_v20 = vpop.f32.mrb[25].mxu0  ;;  %7543 = vmatmul.mubr.f32.gmra.mrb[10].mxu1 %v562_v17 }
 0x1fb   :  { %v8939_v21 = vadd.f32 %v423_v20, %v8887_v52 }
 0x1fc   :  { %v564_v22 = vmax.f32 %v422_v19, 0.0 }
 0x1fd   :  { %v427_v23 = vpop.f32.mrb[26].mxu0 }
 0x1fe   :  { %v428_v25 = vadd.f32 %v427_v23, %v8884_v51  ;;  %v429_v26 = vpop.f32.mrb[27].mxu0  ;;  %7545 = vmatprep.mubr.f32.mxu1 %v564_v22 }
 0x1ff   :  { %v8943_v27 = vadd.f32 %v429_v26, %v8887_v52 }
 0x200   :  { %v566_v28 = vmax.f32 %v428_v25, 0.0 }
 0x201   :  { %v433_v29 = vpop.f32.mrb[28].mxu0 }
 0x202   :  { %v434_v30 = vadd.f32 %v433_v29, %v8884_v51  ;;  %v435_v31 = vpop.f32.mrb[29].mxu0  ;;  %7546 = vmatmul.mubr.f32.gmra.mrb[12].mxu1 %v566_v28 }
 0x203   :  { %v8947_v33 = vadd.f32 %v435_v31, %v8887_v52 }
 0x204   :  { %v568_v34 = vmax.f32 %v434_v30, 0.0 }
 0x205   :  { %v439_v35 = vpop.f32.mrb[30].mxu0 }
 0x206   :  { %v440_v36 = vadd.f32 %v439_v35, %v8884_v51  ;;  %v441_v37 = vpop.f32.mrb[31].mxu0  ;;  %7548 = vmatprep.mubr.f32.mxu1 %v568_v34 }
 0x207   :  { %v8951_v38 = vadd.f32 %v441_v37, %v8887_v52 }
 0x208   :  { %v570_v39 = vmax.f32 %v440_v36, 0.0 }
 0x209   :  { %v445_v41 = vpop.f32.mrb[32].mxu0 }
 0x20a   :  { %v446_v42 = vadd.f32 %v445_v41, %v8884_v51  ;;  %v447_v43 = vpop.f32.mrb[33].mxu0  ;;  %7549 = vmatmul.mubr.f32.gmra.mrb[14].mxu1 %v570_v39 }
 0x20b   :  { %v8955_v44 = vadd.f32 %v447_v43, %v8887_v52 }
 0x20c   :  { %v572_v45 = vmax.f32 %v446_v42, 0.0 }
 0x20d   :  { %v451_v49 = vpop.f32.mrb[34].mxu0 }
 0x20e   :  { %v452_v53 = vadd.f32 %v451_v49, %v8884_v51  ;;  %v453_v55 = vpop.f32.mrb[35].mxu0  ;;  %7551 = vmatprep.mubr.f32.mxu1 %v572_v45 }
 0x20f   :  { %v8959_v57 = vadd.f32 %v453_v55, %v8887_v52 }
 0x210   :  { %v574_v58 = vmax.f32 %v452_v53, 0.0 }
 0x211   :  { %v457_v59 = vpop.f32.mrb[36].mxu0 }
 0x212   :  { %v458_v60 = vadd.f32 %v457_v59, %v8884_v51  ;;  %v459_v62 = vpop.f32.mrb[37].mxu0  ;;  %7552 = vmatmul.mubr.f32.gmra.mrb[16].mxu1 %v574_v58 }
 0x213   :  { %v8963_v0 = vadd.f32 %v459_v62, %v8887_v52 }
 0x214   :  { %v576_v2 = vmax.f32 %v458_v60, 0.0 }
 0x215   :  { %v463_v3 = vpop.f32.mrb[38].mxu0 }
 0x216   :  { %v464_v5 = vadd.f32 %v463_v3, %v8884_v51  ;;  %v465_v6 = vpop.f32.mrb[39].mxu0  ;;  %7554 = vmatprep.mubr.f32.mxu1 %v576_v2 }
 0x217   :  { %v8967_v7 = vadd.f32 %v465_v6, %v8887_v52 }
 0x218   :  { %v578_v9 = vmax.f32 %v464_v5, 0.0 }
 0x219   :  { %v469_v11 = vpop.f32.mrb[40].mxu0 }
 0x21a   :  { %v470_v12 = vadd.f32 %v469_v11, %v8884_v51  ;;  %v471_v13 = vpop.f32.mrb[41].mxu0  ;;  %7555 = vmatmul.mubr.f32.gmra.mrb[18].mxu1 %v578_v9 }
 0x21b   :  { %v8971_v14 = vadd.f32 %v471_v13, %v8887_v52 }
 0x21c   :  { %v580_v17 = vmax.f32 %v470_v12, 0.0 }
 0x21d   :  { %v475_v18 = vpop.f32.mrb[42].mxu0 }
 0x21e   :  { %v476_v19 = vadd.f32 %v475_v18, %v8884_v51  ;;  %v477_v20 = vpop.f32.mrb[43].mxu0  ;;  %7557 = vmatprep.mubr.f32.mxu1 %v580_v17 }
 0x21f   :  { %v8975_v22 = vadd.f32 %v477_v20, %v8887_v52 }
 0x220   :  { %v582_v23 = vmax.f32 %v476_v19, 0.0 }
 0x221   :  { %v481_v25 = vpop.f32.mrb[44].mxu0 }
 0x222   :  { %v482_v26 = vadd.f32 %v481_v25, %v8884_v51  ;;  %v483_v28 = vpop.f32.mrb[45].mxu0  ;;  %7558 = vmatmul.mubr.f32.gmra.mrb[20].mxu1 %v582_v23 }
 0x223   :  { %v8979_v29 = vadd.f32 %v483_v28, %v8887_v52 }
 0x224   :  { %v584_v30 = vmax.f32 %v482_v26, 0.0 }
 0x225   :  { %v487_v31 = vpop.f32.mrb[46].mxu0 }
 0x226   :  { %v488_v34 = vadd.f32 %v487_v31, %v8884_v51  ;;  %v489_v35 = vpop.f32.mrb[47].mxu0  ;;  %7560 = vmatprep.mubr.f32.mxu1 %v584_v30 }
 0x227   :  { %v8983_v36 = vadd.f32 %v489_v35, %v8887_v52 }
 0x228   :  { %v586_v37 = vmax.f32 %v488_v34, 0.0 }
 0x229   :  { %v493_v39 = vpop.f32.mrb[48].mxu0 }
 0x22a   :  { %v494_v41 = vadd.f32 %v493_v39, %v8884_v51  ;;  %v495_v42 = vpop.f32.mrb[49].mxu0  ;;  %7561 = vmatmul.mubr.f32.gmra.mrb[22].mxu1 %v586_v37 }
 0x22b   :  { %v8987_v43 = vadd.f32 %v495_v42, %v8887_v52 }
 0x22c   :  { %v588_v45 = vmax.f32 %v494_v41, 0.0 }
 0x22d   :  { %v499_v49 = vpop.f32.mrb[50].mxu0 }
 0x22e   :  { %v500_v53 = vadd.f32 %v499_v49, %v8884_v51  ;;  %v501_v55 = vpop.f32.mrb[51].mxu0  ;;  %7563 = vmatprep.mubr.f32.mxu1 %v588_v45 }
 0x22f   :  { %v8991_v58 = vadd.f32 %v501_v55, %v8887_v52 }
 0x230   :  { %v590_v59 = vmax.f32 %v500_v53, 0.0 }
 0x231   :  { %v505_v60 = vpop.f32.mrb[52].mxu0 }
 0x232   :  { %v506_v62 = vadd.f32 %v505_v60, %v8884_v51  ;;  %v507_v2 = vpop.f32.mrb[53].mxu0  ;;  %7564 = vmatmul.mubr.f32.gmra.mrb[24].mxu1 %v590_v59  ;;  %v541_v59 = vmax.f32 %v8891_v56, 0.0  ;;  %v543_v60 = vmax.f32 %v8895_v63, 0.0  ;;  %v555_v56 = vmax.f32 %v8919_v54, 0.0 }
 0x233   :  { %v8995_v3 = vadd.f32 %v507_v2, %v8887_v52  ;;  %v547_v2 = vmax.f32 %v8903_v16, 0.0  ;;  %v557_v63 = vmax.f32 %v8923_v61, 0.0  ;;  %v561_v16 = vmax.f32 %v8931_v10, 0.0  ;;  %v3244_v10 = vld [vmem:[#allocation11] sm:$0xff] }
 0x234   :  { %v592_v5 = vmax.f32 %v506_v62, 0.0  ;;  %v545_v62 = vmax.f32 %v8899_v8, 0.0  ;;  %v559_v8 = vmax.f32 %v8927_v4, 0.0  ;;  %v569_v54 = vmax.f32 %v8947_v33, 0.0 }
 0x235   :  { %v511_v6 = vpop.f32.mrb[54].mxu0  ;;  %v571_v61 = vmax.f32 %v8951_v38, 0.0  ;;  %v573_v4 = vmax.f32 %v8955_v44, 0.0  ;;  %v579_v33 = vmax.f32 %v8967_v7, 0.0  ;;  %v581_v38 = vmax.f32 %v8971_v14, 0.0  ;;  %v3246_v44 = vld [vmem:[#allocation11 + $0x10] sm:$0xff] }
 0x236   :  { %v512_v9 = vadd.f32 %v511_v6, %v8884_v51  ;;  %v513_v11 = vpop.f32.mrb[55].mxu0  ;;  %7566 = vmatprep.mubr.f32.mxu1 %v592_v5  ;;  %v553_v5 = vmax.f32 %v8915_v40, 0.0  ;;  %v567_v40 = vmax.f32 %v8943_v27, 0.0  ;;  %v3245_v6 = vld [vmem:[#allocation11 + $0x8] sm:$0xff]  ;;  %v577_v27 = vmax.f32 %v8963_v0, 0.0  ;;  %v3248_v14 = vld [vmem:[#allocation11 + $0x20] sm:$0xff] }
 0x237   :  { %v8999_v12 = vadd.f32 %v513_v11, %v8887_v52  ;;  %v3247_v11 = vld [vmem:[#allocation11 + $0x18] sm:$0xff]  ;;  %v587_v0 = vmax.f32 %v8983_v36, 0.0  ;;  %v589_v7 = vmax.f32 %v8987_v43, 0.0  ;;  %v3250_v43 = vld [vmem:[#allocation11 + $0x30] sm:$0xff] }
 0x238   :  { %v594_v13 = vmax.f32 %v512_v9, 0.0  ;;  %v13761_v9 = vmov 0.0|0.0  }
 0x239   :  { %v517_v17 = vpop.f32.mrb[56].mxu0  ;;  %7991 = vmatprep.subr.bf16.mxu0 %v13761_v9 }
 0x23a   :  { %v518_v18 = vadd.f32 %v517_v17, %v8884_v51  ;;  %v519_v19 = vpop.f32.mrb[57].mxu0  ;;  %7567 = vmatmul.mubr.f32.gmra.mrb[26].mxu1 %v594_v13  ;;  %v7995_v13 = vpack.c.bf16 %v3247_v11, %v3246_v44  ;;  %v585_v17 = vmax.f32 %v8979_v29, 0.0  ;;  %v595_v29 = vmax.f32 %v8999_v12, 0.0  ;;  %v3252_v12 = vld [vmem:[#allocation11 + $0x40] sm:$0xff] }
 0x23b   :  { %v9003_v20 = vadd.f32 %v519_v19, %v8887_v52  ;;  %v591_v19 = vmax.f32 %v8991_v58, 0.0 }
 0x23c   :  { %v596_v23 = vmax.f32 %v518_v18, 0.0  ;;  %v3249_v18 = vld [vmem:[#allocation11 + $0x28] sm:$0xff] }
 0x23d   :  { %v523_v25 = vpop.f32.mrb[58].mxu0  ;;  %v597_v36 = vmax.f32 %v9003_v20, 0.0 }
 0x23e   :  { %v524_v26 = vadd.f32 %v523_v25, %v8884_v51  ;;  %v525_v28 = vpop.f32.mrb[59].mxu0  ;;  %7569 = vmatprep.mubr.f32.mxu1 %v596_v23  ;;  %v7998_v23 = vpack.c.bf16 %v3249_v18, %v3248_v14  ;;  %v3251_v25 = vld [vmem:[#allocation11 + $0x38] sm:$0xff]  ;;  %v3272_v14 = vld [vmem:[#allocation11 + $0xe0] sm:$0xff]  ;;  %v3273_v18 = vld [vmem:[#allocation11 + $0xe8] sm:$0xff] }
 0x23f   :  { %v9007_v30 = vadd.f32 %v525_v28, %v8887_v52  ;;  %v8001_v28 = vpack.c.bf16 %v3251_v25, %v3250_v43 }
 0x240   :  { %v598_v31 = vmax.f32 %v524_v26, 0.0 }
 0x241   :  { %v529_v34 = vpop.f32.mrb[60].mxu0  ;;  %v599_v26 = vmax.f32 %v9007_v30, 0.0  ;;  %v3254_v30 = vld [vmem:[#allocation11 + $0x50] sm:$0xff] }
 0x242   :  { %v530_v35 = vadd.f32 %v529_v34, %v8884_v51  ;;  %v531_v37 = vpop.f32.mrb[61].mxu0  ;;  %7570 = vmatmul.mubr.f32.gmra.mrb[28].mxu1 %v598_v31  ;;  %v3253_v31 = vld [vmem:[#allocation11 + $0x48] sm:$0xff]  ;;  %v3255_v34 = vld [vmem:[#allocation11 + $0x58] sm:$0xff] }
 0x243   :  { %v9011_v39 = vadd.f32 %v531_v37, %v8887_v52  ;;  %v8004_v20 = vpack.c.bf16 %v3253_v31, %v3252_v12  ;;  %v3256_v37 = vld [vmem:[#allocation11 + $0x60] sm:$0xff]  ;;  %v9105_v31 = vsub.s32 3, %v8872_v47 }
 0x244   :  { %v600_v41 = vmax.f32 %v530_v35, 0.0  ;;  %v8007_v35 = vpack.c.bf16 %v3255_v34, %v3254_v30 }
 0x245   :  { %v535_v42 = vpop.f32.mrb[62].mxu0  ;;  %v601_v58 = vmax.f32 %v9011_v39, 0.0  ;;  %v3257_v39 = vld [vmem:[#allocation11 + $0x68] sm:$0xff]  ;;  %14307 = vst [vmem:[#allocation32_spill] sm:$0xff] %v9105_v31 }
 0x246   :  { %v536_v45 = vadd.f32 %v535_v42, %v8884_v51  ;;  %v537_v49 = vpop.f32.mrb[63].mxu0  ;;  %7572 = vmatprep.mubr.f32.mxu1 %v600_v41  ;;  %v549_v51 = vmax.f32 %v8907_v24, 0.0  ;;  %v563_v24 = vmax.f32 %v8935_v15, 0.0  ;;  %v575_v15 = vmax.f32 %v8959_v57, 0.0 }
 0x247   :  { %v9015_v53 = vadd.f32 %v537_v49, %v8887_v52  ;;  %v551_v52 = vmax.f32 %v8911_v32, 0.0  ;;  %v565_v32 = vmax.f32 %v8939_v21, 0.0  ;;  %v7992_v21 = vpack.c.bf16 %v3245_v6, %v3244_v10  ;;  %v3259_v49 = vld [vmem:[#allocation11 + $0x78] sm:$0xff] }
 0x248   :  { %v602_v55 = vmax.f32 %v536_v45, 0.0  ;;  %v583_v57 = vmax.f32 %v8975_v22, 0.0  ;;  %v593_v22 = vmax.f32 %v8995_v3, 0.0  ;;  %v8010_v41 = vpack.c.bf16 %v3257_v39, %v3256_v37  ;;  %v3258_v45 = vld [vmem:[#allocation11 + $0x70] sm:$0xff]  ;;  %v3267_v10 = vld [vmem:[#allocation11 + $0xb8] sm:$0xff] }
 0x249   :  { %7993 = vmatpush1.bf16.msra.mxu0 %v7992_v21  ;;  %v603_v3 = vmax.f32 %v9015_v53, 0.0  ;;  %v9113_v37 = vsub.s32 5, %v8872_v47  ;;  %v9116_v39 = vsub.s32 6, %v8872_v47 }
 0x24a   :  { %7573 = vmatmul.mubr.f32.gmra.mrb[30].mxu1 %v602_v55  ;;  %7994 = vmatprep.subr.bf16.mxu0 %v13761_v9  ;;  %v8013_v55 = vpack.c.bf16 %v3259_v49, %v3258_v45 }
 0x24b   :  { %7607 = vmatprep.mubr.f32.mxu1 %v541_v59  ;;  %14309 = vst [vmem:[#allocation34_spill] sm:$0xff] %v9113_v37  ;;  %14310 = vst [vmem:[#allocation35_spill] sm:$0xff] %v9116_v39 }
 0x24d   :  { %7996 = vmatpush1.bf16.msra.mxu0 %v7995_v13  ;;  %v3271_v13 = vld [vmem:[#allocation11 + $0xd8] sm:$0xff] }
 0x24e   :  { %7608 = vmatmul.mubr.f32.vlgmr.msra.gmra.mrb[32].mxu1 %v543_v60  ;;  %7997 = vmatprep.subr.bf16.mxu0 %v13761_v9  ;;  %v3260_v60 = vld [vmem:[#allocation11 + $0x80] sm:$0xff] }
 0x24f   :  { %7610 = vmatprep.mubr.f32.mxu1 %v545_v62  ;;  %v3261_v62 = vld [vmem:[#allocation11 + $0x88] sm:$0xff] }
 0x251   :  { %7999 = vmatpush1.bf16.msra.mxu0 %v7998_v23  ;;  %v8034_v23 = vpack.c.bf16 %v3273_v18, %v3272_v14 }
 0x252   :  { %7611 = vmatmul.mubr.f32.gmra.mrb[34].mxu1 %v547_v2  ;;  %8000 = vmatprep.subr.bf16.mxu0 %v13761_v9 }
 0x253   :  { %7613 = vmatprep.mubr.f32.mxu1 %v549_v51  ;;  %v8016_v51 = vpack.c.bf16 %v3261_v62, %v3260_v60 }
 0x255   :  { %8002 = vmatpush1.bf16.msra.mxu0 %v8001_v28 }
 0x256   :  { %7614 = vmatmul.mubr.f32.gmra.mrb[36].mxu1 %v551_v52  ;;  %8003 = vmatprep.subr.bf16.mxu0 %v13761_v9 }
 0x257   :  { %7616 = vmatprep.mubr.f32.mxu1 %v553_v5  ;;  %v3262_v5 = vld [vmem:[#allocation11 + $0x90] sm:$0xff] }
 0x259   :  { %8005 = vmatpush1.bf16.msra.mxu0 %v8004_v20 }
 0x25a   :  { %7617 = vmatmul.mubr.f32.gmra.mrb[38].mxu1 %v555_v56  ;;  %8006 = vmatprep.subr.bf16.mxu0 %v13761_v9  ;;  %v3263_v56 = vld [vmem:[#allocation11 + $0x98] sm:$0xff] }
 0x25b   :  { %7619 = vmatprep.mubr.f32.mxu1 %v557_v63 }
 0x25d   :  { %8008 = vmatpush1.bf16.msra.mxu0 %v8007_v35  ;;  %v9110_v35 = vsub.s32 4, %v8872_v47 }
 0x25e   :  { %7620 = vmatmul.mubr.f32.gmra.mrb[40].mxu1 %v559_v8  ;;  %8009 = vmatprep.subr.bf16.mxu0 %v13761_v9  ;;  %v8019_v8 = vpack.c.bf16 %v3263_v56, %v3262_v5 }
 0x25f   :  { %7622 = vmatprep.mubr.f32.mxu1 %v561_v16  ;;  %14308 = vst [vmem:[#allocation33_spill] sm:$0xff] %v9110_v35 }
 0x261   :  { %8011 = vmatpush1.bf16.msra.mxu0 %v8010_v41  ;;  %v9119_v41 = vsub.s32 7, %v8872_v47 }
 0x262   :  { %7623 = vmatmul.mubr.f32.gmra.mrb[42].mxu1 %v563_v24  ;;  %8012 = vmatprep.subr.bf16.mxu0 %v13761_v9  ;;  %v3264_v24 = vld [vmem:[#allocation11 + $0xa0] sm:$0xff] }
 0x263   :  { %7625 = vmatprep.mubr.f32.mxu1 %v565_v32  ;;  %v3265_v32 = vld [vmem:[#allocation11 + $0xa8] sm:$0xff]  ;;  %14311 = vst [vmem:[#allocation36_spill] sm:$0xff] %v9119_v41 }
 0x265   :  { %8014 = vmatpush1.bf16.msra.mxu0 %v8013_v55 }
 0x266   :  { %7626 = vmatmul.mubr.f32.gmra.mrb[44].mxu1 %v567_v40  ;;  %8015 = vmatprep.subr.bf16.mxu0 %v13761_v9 }
 0x267   :  { %7628 = vmatprep.mubr.f32.mxu1 %v569_v54  ;;  %v8022_v54 = vpack.c.bf16 %v3265_v32, %v3264_v24 }
 0x269   :  { %8017 = vmatpush1.bf16.msra.mxu0 %v8016_v51 }
 0x26a   :  { %7629 = vmatmul.mubr.f32.gmra.mrb[46].mxu1 %v571_v61  ;;  %8018 = vmatprep.subr.bf16.mxu0 %v13761_v9 }
 0x26b   :  { %7631 = vmatprep.mubr.f32.mxu1 %v573_v4  ;;  %v3266_v4 = vld [vmem:[#allocation11 + $0xb0] sm:$0xff] }
 0x26d   :  { %8020 = vmatpush1.bf16.msra.mxu0 %v8019_v8 }
 0x26e   :  { %7632 = vmatmul.mubr.f32.gmra.mrb[48].mxu1 %v575_v15  ;;  %8021 = vmatprep.subr.bf16.mxu0 %v13761_v9  ;;  %v8025_v15 = vpack.c.bf16 %v3267_v10, %v3266_v4 }
 0x26f   :  { %7634 = vmatprep.mubr.f32.mxu1 %v577_v27  ;;  %v3268_v27 = vld [vmem:[#allocation11 + $0xc0] sm:$0xff] }
 0x271   :  { %8023 = vmatpush1.bf16.msra.mxu0 %v8022_v54 }
 0x272   :  { %7635 = vmatmul.mubr.f32.gmra.mrb[50].mxu1 %v579_v33  ;;  %8024 = vmatprep.subr.bf16.mxu0 %v13761_v9  ;;  %v3269_v33 = vld [vmem:[#allocation11 + $0xc8] sm:$0xff] }
 0x273   :  { %7637 = vmatprep.mubr.f32.mxu1 %v581_v38  ;;  %v8028_v44 = vpack.c.bf16 %v3269_v33, %v3268_v27 }
 0x275   :  { %8026 = vmatpush1.bf16.msra.mxu0 %v8025_v15 }
 0x276   :  { %7638 = vmatmul.mubr.f32.gmra.mrb[52].mxu1 %v583_v57  ;;  %8027 = vmatprep.subr.bf16.mxu0 %v13761_v9  ;;  %v3270_v57 = vld [vmem:[#allocation11 + $0xd0] sm:$0xff] }
 0x277   :  { %7640 = vmatprep.mubr.f32.mxu1 %v585_v17 }
 0x279   :  { %8029 = vmatpush1.bf16.msra.mxu0 %v8028_v44 }
 0x27a   :  { %7641 = vmatmul.mubr.f32.gmra.mrb[54].mxu1 %v587_v0  ;;  %8030 = vmatprep.subr.bf16.mxu0 %v13761_v9  ;;  %v8031_v0 = vpack.c.bf16 %v3271_v13, %v3270_v57 }
 0x27b   :  { %7643 = vmatprep.mubr.f32.mxu1 %v589_v7 }
 0x27d   :  { %8032 = vmatpush1.bf16.msra.mxu0 %v8031_v0 }
 0x27e   :  { %7644 = vmatmul.mubr.f32.gmra.mrb[56].mxu1 %v591_v19  ;;  %8033 = vmatprep.subr.bf16.mxu0 %v13761_v9 }
 0x27f   :  { %7646 = vmatprep.mubr.f32.mxu1 %v593_v22  ;;  %v9092_v22 = vld [vmem:[%s14305_s5] ss:$0 sm:$0xff] }
 0x281   :  { %8035 = vmatpush1.bf16.msra.mxu0 %v8034_v23 }
 0x282   :  { %7647 = vmatmul.mubr.f32.gmra.mrb[58].mxu1 %v595_v29  ;;  %8036 = vmatprep.subr.bf16.mxu0 %v13761_v9  ;;  %v3274_v29 = vld [vmem:[#allocation11 + $0xf0] sm:$0xff] }
 0x283   :  { %7649 = vmatprep.mubr.f32.mxu1 %v597_v36  ;;  %v3275_v36 = vld [vmem:[#allocation11 + $0xf8] sm:$0xff] }
 0x284   :  { %v8037_v25 = vpack.c.bf16 %v3275_v36, %v3274_v29 }
 0x286   :  { %7650 = vmatmul.mubr.f32.gmra.mrb[60].mxu1 %v599_v26  ;;  %8038 = vmatpush1.bf16.msra.mxu0 %v8037_v25 }
 0x287   :  { %7652 = vmatprep.mubr.f32.mxu1 %v601_v58 }
 0x28a   :  { %7653 = vmatmul.mubr.f32.gmra.mrb[62].mxu1 %v603_v3  ;;  %v9100_v3 = vsub.s32 2, %v8872_v47 }
 0x28b   :  { %3616 = vmatprep.mubr.f32.mxu1 %v13763_v1 }
 0x28c   :  { %14306 = vst [vmem:[#allocation31_spill] sm:$0xff] %v9100_v3 }
 0x2a5   :  { %v7529_v42 = vpop.f32.mrb[0].mxu1 }
 0x2a6   :  { %v710_v53 = vpop.f32.mrb[1].mxu1  ;;  %v716_v43 = vadd.f32 %v7529_v42, %v9092_v22 }
 0x2a7   :  { %v711_v26 = vadd.f32 %v9092_v22, %v710_v53 }
 0x2a8   :  { %v870_v58 = vmax.f32 %v716_v43, 0.0 }
 0x2a9   :  { %v869_v20 = vmax.f32 %v711_v26, 0.0 }
 0x2aa   :  { %v9122_v42 = vrot.slane %v870_v58, %v8875_v48  ;;  %v9125_v45 = vrot.slane %v870_v58, %v8881_v50  ;;  %v9128_v49 = vrot.slane %v870_v58, %v9100_v3  ;;  %v9131_v53 = vrot.slane %v870_v58, %v9105_v31 }
 0x2ab   :  { %v9134_v55 = vrot.slane %v869_v20, %v8875_v48  ;;  %v9140_v60 = vrot.slane %v869_v20, %v9100_v3  ;;  %v9145_v5 = vrot.slane %v869_v20, %v9105_v31  ;;  %v9148_v56 = vrot.slane %v869_v20, %v9110_v35 }
 0x2ac   :  { %14312 = vst [vmem:[#allocation37_spill] sm:$0xff] %v9128_v49  ;;  %14313 = vst [vmem:[#allocation38_spill] sm:$0xff] %v9131_v53  ;;  %v9155_v32 = vrot.slane %v869_v20, %v9113_v37  ;;  %v9158_v54 = vrot.slane %v869_v20, %v9116_v39  ;;  %v9161_v4 = vrot.slane %v869_v20, %v9119_v41 }
 0x2ad   :  { %v7532_v59 = vpop.f32.mrb[2].mxu1  ;;  %v9166_v10 = vrot.slane %v870_v58, %v9110_v35  ;;  %v9169_v15 = vrot.slane %v870_v58, %v9113_v37  ;;  %v9175_v27 = vrot.slane %v870_v58, %v9119_v41 }
 0x2ae   :  { %v720_v2 = vpop.f32.mrb[3].mxu1  ;;  %v726_v30 = vadd.f32 %v7532_v59, %v9092_v22  ;;  %v9137_v59 = vrot.slane %v869_v20, %v8881_v50 }
 0x2af   :  { %v721_v34 = vadd.f32 %v9092_v22, %v720_v2  ;;  %14314 = vst [vmem:[#allocation39_spill] sm:$0xff] %v9166_v10  ;;  %14315 = vst [vmem:[#allocation40_spill] sm:$0xff] %v9169_v15 }
 0x2b0   :  { %v872_v62 = vmax.f32 %v726_v30, 0.0  ;;  %14317 = vst [vmem:[#allocation42_spill] sm:$0xff] %v9175_v27 }
 0x2b1   :  { %v871_v2 = vmax.f32 %v721_v34, 0.0 }
 0x2b2   :  { %v9178_v33 = vrot.slane %v872_v62, %v8875_v48  ;;  %v9181_v44 = vrot.slane %v872_v62, %v8881_v50  ;;  %v9184_v57 = vrot.slane %v872_v62, %v9100_v3  ;;  %v9187_v13 = vrot.slane %v872_v62, %v9105_v31 }
 0x2b3   :  { %v9190_v0 = vrot.slane %v871_v2, %v8875_v48  ;;  %v9193_v14 = vrot.slane %v871_v2, %v8881_v50  ;;  %v9196_v18 = vrot.slane %v871_v2, %v9100_v3  ;;  %v9201_v43 = vrot.slane %v871_v2, %v9105_v31 }
 0x2b4   :  { %14318 = vst [vmem:[#allocation43_spill] sm:$0xff] %v9184_v57  ;;  %14319 = vst [vmem:[#allocation44_spill] sm:$0xff] %v9187_v13  ;;  %v9204_v25 = vrot.slane %v871_v2, %v9110_v35  ;;  %v9212_v20 = vrot.slane %v871_v2, %v9116_v39  ;;  %v9215_v30 = vrot.slane %v871_v2, %v9119_v41 }
 0x2b5   :  { %v9060_v52 = vpop.f32.mrb[4].mxu1  ;;  %v9221_v34 = vrot.slane %v872_v62, %v9113_v37 }
 0x2b6   :  { %v9062_v63 = vpop.f32.mrb[5].mxu1  ;;  %v736_v51 = vadd.f32 %v9060_v52, %v9092_v22 }
 0x2b7   :  { %v731_v8 = vadd.f32 %v9092_v22, %v9062_v63  ;;  %v9172_v63 = vrot.slane %v870_v58, %v9116_v39  ;;  %v9209_v58 = vrot.slane %v871_v2, %v9113_v37  ;;  %14321 = vst [vmem:[#allocation46_spill] sm:$0xff] %v9221_v34 }
 0x2b8   :  { %v874_v23 = vmax.f32 %v736_v51, 0.0  ;;  %v9224_v51 = vrot.slane %v872_v62, %v9116_v39 }
 0x2b9   :  { %14316 = vst [vmem:[#allocation41_spill] sm:$0xff] %v9172_v63  ;;  %v873_v29 = vmax.f32 %v731_v8, 0.0 }
 0x2ba   :  { %14322 = vst [vmem:[#allocation47_spill] sm:$0xff] %v9224_v51  ;;  %v9230_v8 = vrot.slane %v874_v23, %v8875_v48  ;;  %v9233_v46 = vrot.slane %v874_v23, %v8881_v50  ;;  %v9236_v2 = vrot.slane %v874_v23, %v9100_v3  ;;  %v9239_v9 = vrot.slane %v874_v23, %v9105_v31 }
 0x2bb   :  { %v9242_v1 = vrot.slane %v873_v29, %v8875_v48  ;;  %v9245_v47 = vrot.slane %v873_v29, %v8881_v50  ;;  %v9257_v15 = vrot.slane %v873_v29, %v9105_v31  ;;  %v9277_v13 = vrot.slane %v874_v23, %v9113_v37 }
 0x2bc   :  { %14324 = vst [vmem:[#allocation49_spill] sm:$0xff] %v9233_v46  ;;  %14325 = vst [vmem:[#allocation50_spill] sm:$0xff] %v9236_v2  ;;  %v9280_v53 = vrot.slane %v874_v23, %v9116_v39 }
 0x2bd   :  { %v9065_v16 = vpop.f32.mrb[6].mxu1  ;;  %14326 = vst [vmem:[#allocation51_spill] sm:$0xff] %v9239_v9  ;;  %v9265_v9 = vrot.slane %v873_v29, %v9113_v37  ;;  %14328 = vst [vmem:[#allocation53_spill] sm:$0xff] %v9277_v13 }
 0x2be   :  { %v9067_v40 = vpop.f32.mrb[7].mxu1  ;;  %v746_v36 = vadd.f32 %v9065_v16, %v9092_v22  ;;  %v9218_v16 = vrot.slane %v872_v62, %v9110_v35  ;;  %14329 = vst [vmem:[#allocation54_spill] sm:$0xff] %v9280_v53 }
 0x2bf   :  { %v741_v26 = vadd.f32 %v9092_v22, %v9067_v40  ;;  %v9227_v40 = vrot.slane %v872_v62, %v9119_v41  ;;  %v9248_v62 = vrot.slane %v873_v29, %v9100_v3 }
 0x2c0   :  { %14320 = vst [vmem:[#allocation45_spill] sm:$0xff] %v9218_v16  ;;  %v9260_v16 = vrot.slane %v873_v29, %v9110_v35 }
 0x2c1   :  { %14323 = vst [vmem:[#allocation48_spill] sm:$0xff] %v9227_v40  ;;  %v876_v40 = vmax.f32 %v746_v36, 0.0  ;;  %v875_v51 = vmax.f32 %v741_v26, 0.0  ;;  %v9268_v36 = vrot.slane %v873_v29, %v9116_v39  ;;  %v9271_v26 = vrot.slane %v873_v29, %v9119_v41 }
 0x2c3   :  { %v9286_v2 = vrot.slane %v876_v40, %v8875_v48  ;;  %v9289_v57 = vrot.slane %v876_v40, %v8881_v50  ;;  %v9292_v29 = vrot.slane %v876_v40, %v9100_v3  ;;  %v9298_v13 = vrot.slane %v875_v51, %v8875_v48 }
 0x2c4   :  { %v9301_v53 = vrot.slane %v875_v51, %v8881_v50  ;;  %v9309_v49 = vrot.slane %v875_v51, %v9105_v31  ;;  %v9317_v46 = vrot.slane %v875_v51, %v9113_v37 }
 0x2c5   :  { %v9070_v61 = vpop.f32.mrb[8].mxu1  ;;  %14331 = vst [vmem:[#allocation56_spill] sm:$0xff] %v9286_v2  ;;  %14332 = vst [vmem:[#allocation57_spill] sm:$0xff] %v9289_v57 }
 0x2c6   :  { %v9072_v6 = vpop.f32.mrb[9].mxu1  ;;  %v756_v63 = vadd.f32 %v9070_v61, %v9092_v22  ;;  %v9274_v61 = vrot.slane %v874_v23, %v9110_v35  ;;  %14333 = vst [vmem:[#allocation58_spill] sm:$0xff] %v9292_v29  ;;  %14335 = vst [vmem:[#allocation60_spill] sm:$0xff] %v9301_v53  ;;  %v9312_v29 = vrot.slane %v875_v51, %v9110_v35 }
 0x2c7   :  { %v751_v10 = vadd.f32 %v9092_v22, %v9072_v6  ;;  %v9283_v6 = vrot.slane %v874_v23, %v9119_v41  ;;  %v9304_v23 = vrot.slane %v875_v51, %v9100_v3  ;;  %14337 = vst [vmem:[#allocation62_spill] sm:$0xff] %v9309_v49  ;;  %14339 = vst [vmem:[#allocation64_spill] sm:$0xff] %v9317_v46 }
 0x2c8   :  { %14327 = vst [vmem:[#allocation52_spill] sm:$0xff] %v9274_v61  ;;  %v9295_v61 = vrot.slane %v876_v40, %v9105_v31  ;;  %14338 = vst [vmem:[#allocation63_spill] sm:$0xff] %v9312_v29  ;;  %v9320_v53 = vrot.slane %v875_v51, %v9116_v39  ;;  %v9331_v49 = vrot.slane %v876_v40, %v9113_v37 }
 0x2c9   :  { %14330 = vst [vmem:[#allocation55_spill] sm:$0xff] %v9283_v6  ;;  %14336 = vst [vmem:[#allocation61_spill] sm:$0xff] %v9304_v23  ;;  %v878_v6 = vmax.f32 %v756_v63, 0.0  ;;  %v877_v2 = vmax.f32 %v751_v10, 0.0  ;;  %v9323_v10 = vrot.slane %v875_v51, %v9119_v41  ;;  %v9334_v29 = vrot.slane %v876_v40, %v9116_v39 }
 0x2ca   :  { %14334 = vst [vmem:[#allocation59_spill] sm:$0xff] %v9295_v61  ;;  %14340 = vst [vmem:[#allocation65_spill] sm:$0xff] %v9320_v53 }
 0x2cb   :  { %14341 = vst [vmem:[#allocation66_spill] sm:$0xff] %v9323_v10  ;;  %14343 = vst [vmem:[#allocation68_spill] sm:$0xff] %v9331_v49  ;;  %v9342_v53 = vrot.slane %v878_v6, %v8875_v48  ;;  %v9345_v51 = vrot.slane %v878_v6, %v8881_v50  ;;  %v9348_v10 = vrot.slane %v878_v6, %v9100_v3 }
 0x2cc   :  { %14344 = vst [vmem:[#allocation69_spill] sm:$0xff] %v9334_v29  ;;  %v9354_v49 = vrot.slane %v877_v2, %v8875_v48  ;;  %v9365_v23 = vrot.slane %v877_v2, %v9105_v31 }
 0x2cd   :  { %v9075_v21 = vpop.f32.mrb[10].mxu1  ;;  %14346 = vst [vmem:[#allocation71_spill] sm:$0xff] %v9342_v53  ;;  %14347 = vst [vmem:[#allocation72_spill] sm:$0xff] %v9345_v51 }
 0x2ce   :  { %v9077_v38 = vpop.f32.mrb[11].mxu1  ;;  %v766_v57 = vadd.f32 %v9075_v21, %v9092_v22  ;;  %v9328_v21 = vrot.slane %v876_v40, %v9110_v35  ;;  %14348 = vst [vmem:[#allocation73_spill] sm:$0xff] %v9348_v10  ;;  %14350 = vst [vmem:[#allocation75_spill] sm:$0xff] %v9354_v49  ;;  %v9368_v10 = vrot.slane %v877_v2, %v9110_v35 }
 0x2cf   :  { %v761_v61 = vadd.f32 %v9092_v22, %v9077_v38  ;;  %v9337_v38 = vrot.slane %v876_v40, %v9119_v41  ;;  %v9357_v40 = vrot.slane %v877_v2, %v8881_v50  ;;  %14353 = vst [vmem:[#allocation78_spill] sm:$0xff] %v9365_v23  ;;  %v9373_v49 = vrot.slane %v877_v2, %v9113_v37 }
 0x2d0   :  { %14342 = vst [vmem:[#allocation67_spill] sm:$0xff] %v9328_v21  ;;  %v9351_v21 = vrot.slane %v878_v6, %v9105_v31  ;;  %v880_v29 = vmax.f32 %v766_v57, 0.0  ;;  %14354 = vst [vmem:[#allocation79_spill] sm:$0xff] %v9368_v10  ;;  %v9379_v57 = vrot.slane %v877_v2, %v9119_v41  ;;  %v9388_v10 = vrot.slane %v878_v6, %v9116_v39 }
 0x2d1   :  { %14345 = vst [vmem:[#allocation70_spill] sm:$0xff] %v9337_v38  ;;  %14351 = vst [vmem:[#allocation76_spill] sm:$0xff] %v9357_v40  ;;  %v9360_v38 = vrot.slane %v877_v2, %v9100_v3  ;;  %v879_v53 = vmax.f32 %v761_v61, 0.0  ;;  %v9376_v40 = vrot.slane %v877_v2, %v9116_v39  ;;  %v9385_v61 = vrot.slane %v878_v6, %v9113_v37 }
 0x2d2   :  { %14349 = vst [vmem:[#allocation74_spill] sm:$0xff] %v9351_v21  ;;  %14355 = vst [vmem:[#allocation80_spill] sm:$0xff] %v9373_v49  ;;  %v9394_v49 = vrot.slane %v880_v29, %v8875_v48  ;;  %v9400_v2 = vrot.slane %v880_v29, %v9100_v3 }
 0x2d3   :  { %14352 = vst [vmem:[#allocation77_spill] sm:$0xff] %v9360_v38  ;;  %14356 = vst [vmem:[#allocation81_spill] sm:$0xff] %v9376_v40  ;;  %v9397_v40 = vrot.slane %v880_v29, %v8881_v50 }
 0x2d4   :  { %14357 = vst [vmem:[#allocation82_spill] sm:$0xff] %v9379_v57  ;;  %14359 = vst [vmem:[#allocation84_spill] sm:$0xff] %v9385_v61  ;;  %v9406_v61 = vrot.slane %v879_v53, %v8875_v48 }
 0x2d5   :  { %v9080_v11 = vpop.f32.mrb[12].mxu1  ;;  %14360 = vst [vmem:[#allocation85_spill] sm:$0xff] %v9388_v10  ;;  %14362 = vst [vmem:[#allocation87_spill] sm:$0xff] %v9394_v49  ;;  %v9409_v10 = vrot.slane %v879_v53, %v8881_v50 }
 0x2d6   :  { %v9082_v17 = vpop.f32.mrb[13].mxu1  ;;  %v776_v51 = vadd.f32 %v9080_v11, %v9092_v22  ;;  %v9382_v11 = vrot.slane %v878_v6, %v9110_v35  ;;  %14363 = vst [vmem:[#allocation88_spill] sm:$0xff] %v9397_v40  ;;  %14364 = vst [vmem:[#allocation89_spill] sm:$0xff] %v9400_v2 }
 0x2d7   :  { %v771_v21 = vadd.f32 %v9092_v22, %v9082_v17  ;;  %v9391_v17 = vrot.slane %v878_v6, %v9119_v41  ;;  %14366 = vst [vmem:[#allocation91_spill] sm:$0xff] %v9406_v61  ;;  %14367 = vst [vmem:[#allocation92_spill] sm:$0xff] %v9409_v10  ;;  %v9412_v6 = vrot.slane %v879_v53, %v9100_v3 }
 0x2d8   :  { %14358 = vst [vmem:[#allocation83_spill] sm:$0xff] %v9382_v11  ;;  %v9403_v11 = vrot.slane %v880_v29, %v9105_v31  ;;  %v9426_v10 = vrot.slane %v879_v53, %v9110_v35 }
 0x2d9   :  { %14361 = vst [vmem:[#allocation86_spill] sm:$0xff] %v9391_v17  ;;  %14368 = vst [vmem:[#allocation93_spill] sm:$0xff] %v9412_v6  ;;  %v882_v17 = vmax.f32 %v776_v51, 0.0  ;;  %v881_v49 = vmax.f32 %v771_v21, 0.0  ;;  %v9429_v6 = vrot.slane %v879_v53, %v9113_v37  ;;  %v9432_v21 = vrot.slane %v879_v53, %v9116_v39 }
 0x2da   :  { %14365 = vst [vmem:[#allocation90_spill] sm:$0xff] %v9403_v11  ;;  %v9421_v11 = vrot.slane %v879_v53, %v9105_v31  ;;  %14370 = vst [vmem:[#allocation95_spill] sm:$0xff] %v9426_v10  ;;  %v9441_v51 = vrot.slane %v880_v29, %v9113_v37  ;;  %v9447_v10 = vrot.slane %v880_v29, %v9119_v41 }
 0x2db   :  { %14371 = vst [vmem:[#allocation96_spill] sm:$0xff] %v9429_v6  ;;  %14372 = vst [vmem:[#allocation97_spill] sm:$0xff] %v9432_v21  ;;  %v9450_v6 = vrot.slane %v882_v17, %v8875_v48  ;;  %v9453_v21 = vrot.slane %v882_v17, %v8881_v50 }
 0x2dc   :  { %14369 = vst [vmem:[#allocation94_spill] sm:$0xff] %v9421_v11  ;;  %14375 = vst [vmem:[#allocation100_spill] sm:$0xff] %v9441_v51  ;;  %v9444_v11 = vrot.slane %v880_v29, %v9116_v39  ;;  %v9462_v51 = vrot.slane %v881_v49, %v8875_v48 }
 0x2dd   :  { %v9085_v7 = vpop.f32.mrb[14].mxu1  ;;  %14377 = vst [vmem:[#allocation102_spill] sm:$0xff] %v9447_v10  ;;  %14378 = vst [vmem:[#allocation103_spill] sm:$0xff] %v9450_v6  ;;  %v9473_v6 = vrot.slane %v881_v49, %v9105_v31 }
 0x2de   :  { %v9087_v19 = vpop.f32.mrb[15].mxu1  ;;  %v786_v40 = vadd.f32 %v9085_v7, %v9092_v22  ;;  %v9435_v7 = vrot.slane %v879_v53, %v9119_v41  ;;  %14376 = vst [vmem:[#allocation101_spill] sm:$0xff] %v9444_v11  ;;  %14379 = vst [vmem:[#allocation104_spill] sm:$0xff] %v9453_v21  ;;  %v9456_v53 = vrot.slane %v882_v17, %v9100_v3 }
 0x2df   :  { %v781_v2 = vadd.f32 %v9092_v22, %v9087_v19  ;;  %v9438_v19 = vrot.slane %v880_v29, %v9110_v35  ;;  %14382 = vst [vmem:[#allocation107_spill] sm:$0xff] %v9462_v51  ;;  %v9465_v11 = vrot.slane %v881_v49, %v8881_v50  ;;  %14385 = vst [vmem:[#allocation110_spill] sm:$0xff] %v9473_v6 }
 0x2e0   :  { %14373 = vst [vmem:[#allocation98_spill] sm:$0xff] %v9435_v7  ;;  %14380 = vst [vmem:[#allocation105_spill] sm:$0xff] %v9456_v53  ;;  %v884_v29 = vmax.f32 %v786_v40, 0.0  ;;  %v9468_v7 = vrot.slane %v881_v49, %v9100_v3  ;;  %v9476_v53 = vrot.slane %v881_v49, %v9110_v35  ;;  %v9481_v51 = vrot.slane %v881_v49, %v9113_v37 }
 0x2e1   :  { %14374 = vst [vmem:[#allocation99_spill] sm:$0xff] %v9438_v19  ;;  %v9459_v19 = vrot.slane %v882_v17, %v9105_v31  ;;  %14383 = vst [vmem:[#allocation108_spill] sm:$0xff] %v9465_v11  ;;  %v883_v10 = vmax.f32 %v781_v2, 0.0  ;;  %v9484_v40 = vrot.slane %v881_v49, %v9116_v39  ;;  %v9487_v2 = vrot.slane %v881_v49, %v9119_v41 }
 0x2e2   :  { %14384 = vst [vmem:[#allocation109_spill] sm:$0xff] %v9468_v7  ;;  %14386 = vst [vmem:[#allocation111_spill] sm:$0xff] %v9476_v53  ;;  %v9493_v6 = vrot.slane %v882_v17, %v9113_v37  ;;  %v9496_v53 = vrot.slane %v882_v17, %v9116_v39  ;;  %v9507_v49 = vrot.slane %v884_v29, %v8875_v48 }
 0x2e3   :  { %14381 = vst [vmem:[#allocation106_spill] sm:$0xff] %v9459_v19  ;;  %14387 = vst [vmem:[#allocation112_spill] sm:$0xff] %v9481_v51  ;;  %v9502_v51 = vrot.slane %v883_v10, %v8875_v48 }
 0x2e4   :  { %14388 = vst [vmem:[#allocation113_spill] sm:$0xff] %v9484_v40  ;;  %14389 = vst [vmem:[#allocation114_spill] sm:$0xff] %v9487_v2  ;;  %v9510_v2 = vrot.slane %v884_v29, %v8881_v50 }
 0x2e5   :  { %v9097_v28 = vpop.f32.mrb[16].mxu1  ;;  %14391 = vst [vmem:[#allocation116_spill] sm:$0xff] %v9493_v6  ;;  %14392 = vst [vmem:[#allocation117_spill] sm:$0xff] %v9496_v53  ;;  %v9516_v6 = vrot.slane %v883_v10, %v8881_v50 }
 0x2e6   :  { %v9102_v12 = vpop.f32.mrb[17].mxu1  ;;  %v796_v19 = vadd.f32 %v9097_v28, %v9092_v22  ;;  %v9499_v28 = vrot.slane %v882_v17, %v9119_v41  ;;  %14394 = vst [vmem:[#allocation119_spill] sm:$0xff] %v9502_v51  ;;  %14395 = vst [vmem:[#allocation120_spill] sm:$0xff] %v9507_v49 }
 0x2e7   :  { %v791_v21 = vadd.f32 %v9092_v22, %v9102_v12  ;;  %v9490_v12 = vrot.slane %v882_v17, %v9110_v35  ;;  %14396 = vst [vmem:[#allocation121_spill] sm:$0xff] %v9510_v2  ;;  %14398 = vst [vmem:[#allocation123_spill] sm:$0xff] %v9516_v6  ;;  %v9519_v17 = vrot.slane %v883_v10, %v9100_v3 }
 0x2e8   :  { %14393 = vst [vmem:[#allocation118_spill] sm:$0xff] %v9499_v28  ;;  %v886_v40 = vmax.f32 %v796_v19, 0.0  ;;  %v9526_v2 = vrot.slane %v883_v10, %v9105_v31  ;;  %v9532_v6 = vrot.slane %v883_v10, %v9113_v37  ;;  %v9546_v19 = vrot.slane %v884_v29, %v9110_v35 }
 0x2e9   :  { %14390 = vst [vmem:[#allocation115_spill] sm:$0xff] %v9490_v12  ;;  %v9513_v12 = vrot.slane %v884_v29, %v9100_v3  ;;  %14399 = vst [vmem:[#allocation124_spill] sm:$0xff] %v9519_v17  ;;  %v885_v28 = vmax.f32 %v791_v21, 0.0  ;;  %v9535_v17 = vrot.slane %v883_v10, %v9116_v39  ;;  %v9538_v21 = vrot.slane %v883_v10, %v9119_v41 }
 0x2ea   :  { %14400 = vst [vmem:[#allocation125_spill] sm:$0xff] %v9526_v2  ;;  %14402 = vst [vmem:[#allocation127_spill] sm:$0xff] %v9532_v6  ;;  %v9552_v6 = vrot.slane %v884_v29, %v9116_v39  ;;  %v9625_v2 = vrot.slane %v886_v40, %v9116_v39 }
 0x2eb   :  { %14397 = vst [vmem:[#allocation122_spill] sm:$0xff] %v9513_v12  ;;  %v9529_v12 = vrot.slane %v883_v10, %v9110_v35  ;;  %14403 = vst [vmem:[#allocation128_spill] sm:$0xff] %v9535_v17  ;;  %v9555_v17 = vrot.slane %v885_v28, %v8875_v48  ;;  %v9558_v10 = vrot.slane %v885_v28, %v8881_v50 }
 0x2ec   :  { %14404 = vst [vmem:[#allocation129_spill] sm:$0xff] %v9538_v21  ;;  %14406 = vst [vmem:[#allocation131_spill] sm:$0xff] %v9546_v19 }
 0x2ed   :  { %v9152_v24 = vpop.f32.mrb[18].mxu1  ;;  %14401 = vst [vmem:[#allocation126_spill] sm:$0xff] %v9529_v12  ;;  %v9549_v12 = vrot.slane %v884_v29, %v9113_v37  ;;  %14408 = vst [vmem:[#allocation133_spill] sm:$0xff] %v9552_v6  ;;  %v9571_v6 = vrot.slane %v886_v40, %v8875_v48 }
 0x2ee   :  { %v9163_v52 = vpop.f32.mrb[19].mxu1  ;;  %v806_v49 = vadd.f32 %v9152_v24, %v9092_v22  ;;  %14409 = vst [vmem:[#allocation134_spill] sm:$0xff] %v9555_v17  ;;  %14410 = vst [vmem:[#allocation135_spill] sm:$0xff] %v9558_v10  ;;  %v9574_v17 = vrot.slane %v885_v28, %v9105_v31  ;;  %v9577_v10 = vrot.slane %v885_v28, %v9110_v35 }
 0x2ef   :  { %v801_v53 = vadd.f32 %v9092_v22, %v9163_v52  ;;  %v9541_v52 = vrot.slane %v884_v29, %v9105_v31  ;;  %14407 = vst [vmem:[#allocation132_spill] sm:$0xff] %v9549_v12  ;;  %14413 = vst [vmem:[#allocation138_spill] sm:$0xff] %v9571_v6  ;;  %v9590_v6 = vrot.slane %v885_v28, %v9113_v37 }
 0x2f0   :  { %v9566_v19 = vmax.f32 %v806_v49, 0.0  ;;  %14414 = vst [vmem:[#allocation139_spill] sm:$0xff] %v9574_v17  ;;  %14415 = vst [vmem:[#allocation140_spill] sm:$0xff] %v9577_v10  ;;  %v9593_v17 = vrot.slane %v885_v28, %v9116_v39 }
 0x2f1   :  { %14405 = vst [vmem:[#allocation130_spill] sm:$0xff] %v9541_v52  ;;  %v887_v21 = vmax.f32 %v801_v53, 0.0  ;;  %v9561_v52 = vrot.slane %v884_v29, %v9119_v41  ;;  %v9580_v53 = vrot.slane %v886_v40, %v8881_v50  ;;  %v9583_v29 = vrot.slane %v886_v40, %v9100_v3  ;;  %14418 = vst [vmem:[#allocation143_spill] sm:$0xff] %v9590_v6 }
 0x2f2   :  { %14419 = vst [vmem:[#allocation144_spill] sm:$0xff] %v9593_v17  ;;  %v9611_v17 = vrot.slane %v885_v28, %v9119_v41  ;;  %14428 = vst [vmem:[#allocation153_spill] sm:$0xff] %v9625_v2 }
 0x2f3   :  { %14411 = vst [vmem:[#allocation136_spill] sm:$0xff] %v9561_v52  ;;  %14416 = vst [vmem:[#allocation141_spill] sm:$0xff] %v9580_v53  ;;  %v9596_v10 = vrot.slane %v887_v21, %v8875_v48  ;;  %v9599_v53 = vrot.slane %v887_v21, %v8881_v50 }
 0x2f4   :  { %14417 = vst [vmem:[#allocation142_spill] sm:$0xff] %v9583_v29  ;;  %14424 = vst [vmem:[#allocation149_spill] sm:$0xff] %v9611_v17 }
 0x2f5   :  { %v9250_v27 = vpop.f32.mrb[20].mxu1  ;;  %14420 = vst [vmem:[#allocation145_spill] sm:$0xff] %v9596_v10  ;;  %14421 = vst [vmem:[#allocation146_spill] sm:$0xff] %v9599_v53  ;;  %v9614_v10 = vrot.slane %v886_v40, %v9105_v31 }
 0x2f6   :  { %v9254_v34 = vpop.f32.mrb[21].mxu1  ;;  %v816_v49 = vadd.f32 %v9250_v27, %v9092_v22 }
 0x2f7   :  { %v811_v24 = vadd.f32 %v9092_v22, %v9254_v34  ;;  %v9564_v34 = vrot.slane %v885_v28, %v9100_v3  ;;  %14425 = vst [vmem:[#allocation150_spill] sm:$0xff] %v9614_v10 }
 0x2f9   :  { %14412 = vst [vmem:[#allocation137_spill] sm:$0xff] %v9564_v34  ;;  %v9587_v52 = vmax.f32 %v811_v24, 0.0  ;;  %v9606_v34 = vrot.slane %v887_v21, %v9100_v3 }
 0x2fb   :  { %14422 = vst [vmem:[#allocation147_spill] sm:$0xff] %v9606_v34  ;;  %v9631_v28 = vrot.slane %v9587_v52, %v8875_v48  ;;  %v9635_v34 = vrot.slane %v9587_v52, %v8881_v50 }
 0x2fd   :  { %v9325_v63 = vpop.f32.mrb[22].mxu1  ;;  %14430 = vst [vmem:[#allocation155_spill] sm:$0xff] %v9631_v28  ;;  %14431 = vst [vmem:[#allocation156_spill] sm:$0xff] %v9635_v34 }
 0x2fe   :  { %v9339_v46 = vpop.f32.mrb[23].mxu1  ;;  %v826_v29 = vadd.f32 %v9325_v63, %v9092_v22  ;;  %v9619_v63 = vrot.slane %v886_v40, %v9110_v35 }
 0x2ff   :  { %v821_v12 = vadd.f32 %v9092_v22, %v9339_v46 }
 0x300   :  { %14426 = vst [vmem:[#allocation151_spill] sm:$0xff] %v9619_v63  ;;  %v9642_v63 = vrot.slane %v9587_v52, %v9100_v3 }
 0x301   :  { %v9608_v6 = vmax.f32 %v821_v12, 0.0  ;;  %v9627_v12 = vmax.f32 %v816_v49, 0.0 }
 0x302   :  { %14433 = vst [vmem:[#allocation158_spill] sm:$0xff] %v9642_v63 }
 0x303   :  { %14423 = vst [vmem:[#allocation148_spill] sm:$0xff] %v9608_v6  ;;  %14429 = vst [vmem:[#allocation154_spill] sm:$0xff] %v9627_v12  ;;  %v9651_v28 = vrot.slane %v9608_v6, %v8875_v48  ;;  %v9655_v34 = vrot.slane %v9608_v6, %v8881_v50 }
 0x305   :  { %v9418_v57 = vpop.f32.mrb[24].mxu1  ;;  %14436 = vst [vmem:[#allocation161_spill] sm:$0xff] %v9651_v28  ;;  %14437 = vst [vmem:[#allocation162_spill] sm:$0xff] %v9655_v34 }
 0x306   :  { %v9423_v23 = vpop.f32.mrb[25].mxu1  ;;  %v836_v53 = vadd.f32 %v9418_v57, %v9092_v22  ;;  %v9638_v57 = vrot.slane %v886_v40, %v9119_v41 }
 0x307   :  { %v831_v27 = vadd.f32 %v9092_v22, %v9423_v23  ;;  %v9622_v23 = vrot.slane %v886_v40, %v9113_v37  ;;  %v9659_v40 = vrot.slane %v9608_v6, %v9100_v3 }
 0x308   :  { %14432 = vst [vmem:[#allocation157_spill] sm:$0xff] %v9638_v57 }
 0x309   :  { %14427 = vst [vmem:[#allocation152_spill] sm:$0xff] %v9622_v23  ;;  %v9644_v23 = vmax.f32 %v826_v29, 0.0  ;;  %v9646_v2 = vmax.f32 %v831_v27, 0.0  ;;  %14438 = vst [vmem:[#allocation163_spill] sm:$0xff] %v9659_v40  ;;  %v9662_v29 = vmax.f32 %v836_v53, 0.0  ;;  %v9666_v27 = vrot.slane %v9566_v19, %v8875_v48 }
 0x30a   :  { %v9682_v53 = vrot.slane %v887_v21, %v9110_v35 }
 0x30b   :  { %14434 = vst [vmem:[#allocation159_spill] sm:$0xff] %v9644_v23  ;;  %14435 = vst [vmem:[#allocation160_spill] sm:$0xff] %v9646_v2  ;;  %v9674_v23 = vrot.slane %v9566_v19, %v9100_v3  ;;  %v9689_v34 = vrot.slane %v9646_v2, %v8875_v48  ;;  %v9693_v28 = vrot.slane %v9646_v2, %v8881_v50 }
 0x30c   :  { %14439 = vst [vmem:[#allocation164_spill] sm:$0xff] %v9662_v29  ;;  %14440 = vst [vmem:[#allocation165_spill] sm:$0xff] %v9666_v27  ;;  %v9685_v29 = vrot.slane %v887_v21, %v9113_v37  ;;  %v9702_v27 = vrot.slane %v9646_v2, %v9100_v3  ;;  %v9719_v2 = vrot.slane %v9566_v19, %v9105_v31 }
 0x30d   :  { %v9504_v7 = vpop.f32.mrb[26].mxu1  ;;  %14442 = vst [vmem:[#allocation167_spill] sm:$0xff] %v9674_v23  ;;  %14444 = vst [vmem:[#allocation169_spill] sm:$0xff] %v9682_v53 }
 0x30e   :  { %v840_v51 = vpop.f32.mrb[27].mxu1  ;;  %v846_v6 = vadd.f32 %v9504_v7, %v9092_v22  ;;  %14445 = vst [vmem:[#allocation170_spill] sm:$0xff] %v9685_v29  ;;  %14446 = vst [vmem:[#allocation171_spill] sm:$0xff] %v9689_v34 }
 0x30f   :  { %v841_v49 = vadd.f32 %v9092_v22, %v840_v51  ;;  %v9670_v51 = vrot.slane %v9566_v19, %v8881_v50  ;;  %14447 = vst [vmem:[#allocation172_spill] sm:$0xff] %v9693_v28  ;;  %14450 = vst [vmem:[#allocation175_spill] sm:$0xff] %v9702_v27  ;;  %v9711_v28 = vld [vmem:[%s13739_s6] ss:$0 sm:$0xff]  ;;  %v9729_v27 = vrot.slane %v9566_v19, %v9113_v37 }
 0x310   :  { %14453 = vst [vmem:[#allocation178_spill] sm:$0xff] %v9719_v2 }
 0x311   :  { %14441 = vst [vmem:[#allocation166_spill] sm:$0xff] %v9670_v51  ;;  %v9695_v23 = vmax.f32 %v841_v49, 0.0  ;;  %v9698_v51 = vrot.slane %v887_v21, %v9116_v39  ;;  %14456 = vst [vmem:[#allocation181_spill] sm:$0xff] %v9729_v27 }
 0x313   :  { %14448 = vst [vmem:[#allocation173_spill] sm:$0xff] %v9695_v23  ;;  %14449 = vst [vmem:[#allocation174_spill] sm:$0xff] %v9698_v51 }
 0x315   :  { %v7571_v46 = vpop.f32.mrb[28].mxu1 }
 0x316   :  { %v850_v24 = vpop.f32.mrb[29].mxu1  ;;  %v856_v29 = vadd.f32 %v7571_v46, %v9092_v22  ;;  %v9723_v46 = vrot.slane %v9566_v19, %v9110_v35 }
 0x317   :  { %v851_v63 = vadd.f32 %v9092_v22, %v850_v24  ;;  %v9679_v24 = vrot.slane %v887_v21, %v9105_v31 }
 0x318   :  { %14454 = vst [vmem:[#allocation179_spill] sm:$0xff] %v9723_v46 }
 0x319   :  { %14443 = vst [vmem:[#allocation168_spill] sm:$0xff] %v9679_v24  ;;  %v9705_v53 = vmax.f32 %v851_v63, 0.0  ;;  %v9715_v24 = vrot.slane %v887_v21, %v9119_v41  ;;  %v9725_v63 = vmax.f32 %v846_v6, 0.0  ;;  %v9737_v21 = vrot.slane %v9566_v19, %v9119_v41 }
 0x31a   :  { %v9745_v6 = vrot.slane %v9695_v23, %v8881_v50 }
 0x31b   :  { %14451 = vst [vmem:[#allocation176_spill] sm:$0xff] %v9705_v53  ;;  %14452 = vst [vmem:[#allocation177_spill] sm:$0xff] %v9715_v24 }
 0x31c   :  { %14455 = vst [vmem:[#allocation180_spill] sm:$0xff] %v9725_v63  ;;  %14458 = vst [vmem:[#allocation183_spill] sm:$0xff] %v9737_v21  ;;  %v9749_v63 = vrot.slane %v9695_v23, %v9100_v3 }
 0x31d   :  { %v7574_v40 = vpop.f32.mrb[30].mxu1  ;;  %14460 = vst [vmem:[#allocation185_spill] sm:$0xff] %v9745_v6  ;;  %v9763_v6 = vrot.slane %v9705_v53, %v8881_v50 }
 0x31e   :  { %v860_v7 = vpop.f32.mrb[31].mxu1  ;;  %v866_v49 = vadd.f32 %v7574_v40, %v9092_v22  ;;  %v9741_v40 = vrot.slane %v9695_v23, %v8875_v48  ;;  %14461 = vst [vmem:[#allocation186_spill] sm:$0xff] %v9749_v63  ;;  %v9767_v23 = vrot.slane %v9705_v53, %v9100_v3 }
 0x31f   :  { %v861_v34 = vadd.f32 %v9092_v22, %v860_v7  ;;  %v9733_v22 = vrot.slane %v9566_v19, %v9116_v39  ;;  %v9756_v19 = vrot.slane %v9705_v53, %v8875_v48  ;;  %14465 = vst [vmem:[#allocation190_spill] sm:$0xff] %v9763_v6  ;;  %v9785_v6 = vrot.slane %v9627_v12, %v9100_v3 }
 0x320   :  { %14459 = vst [vmem:[#allocation184_spill] sm:$0xff] %v9741_v40  ;;  %14466 = vst [vmem:[#allocation191_spill] sm:$0xff] %v9767_v23  ;;  %v9798_v53 = vrot.slane %v9587_v52, %v9113_v37 }
 0x321   :  { %v7609_v7 = vpop.f32.mrb[32].mxu1  ;;  %14457 = vst [vmem:[#allocation182_spill] sm:$0xff] %v9733_v22  ;;  %v9752_v22 = vmax.f32 %v856_v29, 0.0  ;;  %14463 = vst [vmem:[#allocation188_spill] sm:$0xff] %v9756_v19  ;;  %v9758_v21 = vmax.f32 %v861_v34, 0.0  ;;  %v9777_v34 = vrot.slane %v9627_v12, %v8875_v48 }
 0x322   :  { %v979_v27 = vadd.f32 %v7609_v7, %v9711_v28  ;;  %v973_v46 = vpop.f32.mrb[33].mxu1  ;;  %v9769_v7 = vmax.f32 %v866_v49, 0.0  ;;  %14472 = vst [vmem:[#allocation197_spill] sm:$0xff] %v9785_v6  ;;  %14475 = vst [vmem:[#allocation200_spill] sm:$0xff] %v9798_v53 }
 0x323   :  { %14462 = vst [vmem:[#allocation187_spill] sm:$0xff] %v9752_v22  ;;  %14464 = vst [vmem:[#allocation189_spill] sm:$0xff] %v9758_v21  ;;  %v974_v40 = vadd.f32 %v9711_v28, %v973_v46  ;;  %v9781_v46 = vrot.slane %v9627_v12, %v8881_v50  ;;  %v9802_v23 = vrot.slane %v9758_v21, %v8875_v48 }
 0x324   :  { %14467 = vst [vmem:[#allocation192_spill] sm:$0xff] %v9769_v7  ;;  %v9771_v29 = vmax.f32 %v979_v27, 0.0  ;;  %14470 = vst [vmem:[#allocation195_spill] sm:$0xff] %v9777_v34  ;;  %v9790_v27 = vrot.slane %v9587_v52, %v9105_v31 }
 0x325   :  { %v9773_v22 = vmax.f32 %v974_v40, 0.0  ;;  %v7612_v63 = vpop.f32.mrb[34].mxu1  ;;  %14471 = vst [vmem:[#allocation196_spill] sm:$0xff] %v9781_v46  ;;  %v9794_v40 = vrot.slane %v9587_v52, %v9110_v35  ;;  %14476 = vst [vmem:[#allocation201_spill] sm:$0xff] %v9802_v23 }
 0x326   :  { %14468 = vst [vmem:[#allocation193_spill] sm:$0xff] %v9771_v29  ;;  %v989_v49 = vadd.f32 %v7612_v63, %v9711_v28  ;;  %v983_v7 = vpop.f32.mrb[35].mxu1  ;;  %14473 = vst [vmem:[#allocation198_spill] sm:$0xff] %v9790_v27  ;;  %v9806_v63 = vrot.slane %v9758_v21, %v8881_v50  ;;  %v1229_v6 = vmul.f32 %v9134_v55, %v9771_v29 }
 0x327   :  { %14469 = vst [vmem:[#allocation194_spill] sm:$0xff] %v9773_v22  ;;  %14474 = vst [vmem:[#allocation199_spill] sm:$0xff] %v9794_v40  ;;  %v984_v19 = vadd.f32 %v9711_v28, %v983_v7  ;;  %v1228_v34 = vmul.f32 %v9134_v55, %v9773_v22  ;;  %v1231_v53 = vmul.f32 %v9190_v0, %v9771_v29 }
 0x328   :  { %14477 = vst [vmem:[#allocation202_spill] sm:$0xff] %v9806_v63  ;;  %v9811_v46 = vmax.f32 %v989_v49, 0.0  ;;  %v1233_v23 = vmul.f32 %v9242_v1, %v9771_v29  ;;  %v1230_v7 = vmul.f32 %v9190_v0, %v9773_v22  ;;  %v1232_v63 = vmul.f32 %v9242_v1, %v9773_v22 }
 0x329   :  { %v9819_v48 = vmax.f32 %v984_v19, 0.0  ;;  %v7615_v50 = vpop.f32.mrb[36].mxu1  ;;  %v9827_v49 = vmul.f32 %v9298_v13, %v9773_v22 }
 0x32a   :  { %14478 = vst [vmem:[#allocation203_spill] sm:$0xff] %v9811_v46  ;;  %v999_v55 = vadd.f32 %v7615_v50, %v9711_v28  ;;  %v993_v40 = vpop.f32.mrb[37].mxu1  ;;  %v1357_v27 = vmul.f32 %v9137_v59, %v9811_v46  ;;  %v1359_v19 = vmul.f32 %v9193_v14, %v9811_v46  ;;  %v1361_v2 = vmul.f32 %v9245_v47, %v9811_v46 }
 0x32b   :  { %14479 = vst [vmem:[#allocation204_spill] sm:$0xff] %v9819_v48  ;;  %v994_v0 = vadd.f32 %v9711_v28, %v993_v40  ;;  %v1356_v1 = vmul.f32 %v9137_v59, %v9819_v48  ;;  %v1358_v24 = vmul.f32 %v9193_v14, %v9819_v48  ;;  %v1360_v50 = vmul.f32 %v9245_v47, %v9819_v48 }
 0x32c   :  { %v9843_v51 = vmax.f32 %v999_v55, 0.0  ;;  %v1389_v57 = vadd.f32 %v1357_v27, %v1229_v6  ;;  %v1391_v10 = vadd.f32 %v1359_v19, %v1231_v53  ;;  %v1393_v17 = vadd.f32 %v1361_v2, %v1233_v23 }
 0x32d   :  { %v9845_v11 = vmax.f32 %v994_v0, 0.0  ;;  %v7618_v38 = vpop.f32.mrb[38].mxu1  ;;  %v1388_v46 = vadd.f32 %v1356_v1, %v1228_v34  ;;  %v1390_v61 = vadd.f32 %v1358_v24, %v1230_v7  ;;  %v1392_v40 = vadd.f32 %v1360_v50, %v1232_v63 }
 0x32e   :  { %14480 = vst [vmem:[#allocation205_spill] sm:$0xff] %v9843_v51  ;;  %v1009_v22 = vadd.f32 %v7618_v38, %v9711_v28  ;;  %v1003_v59 = vpop.f32.mrb[39].mxu1  ;;  %v1485_v14 = vmul.f32 %v9140_v60, %v9843_v51  ;;  %v1487_v47 = vmul.f32 %v9196_v18, %v9843_v51  ;;  %v1489_v6 = vmul.f32 %v9248_v62, %v9843_v51 }
 0x32f   :  { %14481 = vst [vmem:[#allocation206_spill] sm:$0xff] %v9845_v11  ;;  %v1004_v2 = vadd.f32 %v9711_v28, %v1003_v59  ;;  %v1484_v23 = vmul.f32 %v9140_v60, %v9845_v11  ;;  %v1486_v24 = vmul.f32 %v9196_v18, %v9845_v11  ;;  %v1488_v38 = vmul.f32 %v9248_v62, %v9845_v11 }
 0x330   :  { %v9861_v53 = vmax.f32 %v1009_v22, 0.0  ;;  %v1517_v34 = vadd.f32 %v1485_v14, %v1389_v57  ;;  %v1519_v27 = vadd.f32 %v1487_v47, %v1391_v10  ;;  %v1521_v63 = vadd.f32 %v1489_v6, %v1393_v17 }
 0x331   :  { %v9863_v7 = vmax.f32 %v1004_v2, 0.0  ;;  %v7621_v55 = vpop.f32.mrb[40].mxu1  ;;  %v1516_v19 = vadd.f32 %v1484_v23, %v1388_v46  ;;  %v1518_v0 = vadd.f32 %v1486_v24, %v1390_v61  ;;  %v1520_v1 = vadd.f32 %v1488_v38, %v1392_v40 }
 0x332   :  { %14482 = vst [vmem:[#allocation207_spill] sm:$0xff] %v9861_v53  ;;  %v1019_v50 = vadd.f32 %v7621_v55, %v9711_v28  ;;  %v1013_v60 = vpop.f32.mrb[41].mxu1  ;;  %v1613_v18 = vmul.f32 %v9145_v5, %v9861_v53  ;;  %v1615_v62 = vmul.f32 %v9201_v43, %v9861_v53  ;;  %v1617_v57 = vmul.f32 %v9257_v15, %v9861_v53 }
 0x333   :  { %14483 = vst [vmem:[#allocation208_spill] sm:$0xff] %v9863_v7  ;;  %v1014_v17 = vadd.f32 %v9711_v28, %v1013_v60  ;;  %v1612_v10 = vmul.f32 %v9145_v5, %v9863_v7  ;;  %v1614_v61 = vmul.f32 %v9201_v43, %v9863_v7  ;;  %v1616_v22 = vmul.f32 %v9257_v15, %v9863_v7 }
 0x334   :  { %v9879_v46 = vmax.f32 %v1019_v50, 0.0  ;;  %v1645_v40 = vadd.f32 %v1613_v18, %v1517_v34  ;;  %v1647_v59 = vadd.f32 %v1615_v62, %v1519_v27  ;;  %v1649_v14 = vadd.f32 %v1617_v57, %v1521_v63 }
 0x335   :  { %v9881_v47 = vmax.f32 %v1014_v17, 0.0  ;;  %v7624_v6 = vpop.f32.mrb[42].mxu1  ;;  %v1644_v2 = vadd.f32 %v1612_v10, %v1516_v19  ;;  %v1646_v23 = vadd.f32 %v1614_v61, %v1518_v0  ;;  %v1648_v24 = vadd.f32 %v1616_v22, %v1520_v1 }
 0x336   :  { %14484 = vst [vmem:[#allocation209_spill] sm:$0xff] %v9879_v46  ;;  %v1029_v38 = vadd.f32 %v7624_v6, %v9711_v28  ;;  %v1023_v5 = vpop.f32.mrb[43].mxu1  ;;  %v1741_v43 = vmul.f32 %v9148_v56, %v9879_v46  ;;  %v1743_v15 = vmul.f32 %v9204_v25, %v9879_v46  ;;  %v1745_v34 = vmul.f32 %v9260_v16, %v9879_v46 }
 0x337   :  { %14485 = vst [vmem:[#allocation210_spill] sm:$0xff] %v9881_v47  ;;  %v1024_v27 = vadd.f32 %v9711_v28, %v1023_v5  ;;  %v1740_v63 = vmul.f32 %v9148_v56, %v9881_v47  ;;  %v1742_v55 = vmul.f32 %v9204_v25, %v9881_v47  ;;  %v1744_v19 = vmul.f32 %v9260_v16, %v9881_v47 }
 0x338   :  { %v9897_v0 = vmax.f32 %v1029_v38, 0.0  ;;  %v1773_v1 = vadd.f32 %v1741_v43, %v1645_v40  ;;  %v1775_v50 = vadd.f32 %v1743_v15, %v1647_v59  ;;  %v1777_v60 = vadd.f32 %v1745_v34, %v1649_v14 }
 0x339   :  { %v9899_v18 = vmax.f32 %v1024_v27, 0.0  ;;  %v7627_v62 = vpop.f32.mrb[44].mxu1  ;;  %v1772_v57 = vadd.f32 %v1740_v63, %v1644_v2  ;;  %v1774_v17 = vadd.f32 %v1742_v55, %v1646_v23  ;;  %v1776_v10 = vadd.f32 %v1744_v19, %v1648_v24 }
 0x33a   :  { %14486 = vst [vmem:[#allocation211_spill] sm:$0xff] %v9897_v0  ;;  %v1039_v61 = vadd.f32 %v7627_v62, %v9711_v28  ;;  %v1033_v56 = vpop.f32.mrb[45].mxu1  ;;  %v1869_v25 = vmul.f32 %v9155_v32, %v9897_v0  ;;  %v1871_v16 = vmul.f32 %v9209_v58, %v9897_v0  ;;  %v1873_v22 = vmul.f32 %v9265_v9, %v9897_v0 }
 0x33b   :  { %v1034_v40 = vadd.f32 %v9711_v28, %v1033_v56  ;;  %v1868_v59 = vmul.f32 %v9155_v32, %v9899_v18  ;;  %v1870_v14 = vmul.f32 %v9209_v58, %v9899_v18  ;;  %v1872_v6 = vmul.f32 %v9265_v9, %v9899_v18 }
 0x33c   :  { %v9915_v2 = vmax.f32 %v1039_v61, 0.0  ;;  %v1901_v23 = vadd.f32 %v1869_v25, %v1773_v1  ;;  %v1903_v24 = vadd.f32 %v1871_v16, %v1775_v50  ;;  %v1905_v38 = vadd.f32 %v1873_v22, %v1777_v60 }
 0x33d   :  { %v9917_v5 = vmax.f32 %v1034_v40, 0.0  ;;  %v7630_v43 = vpop.f32.mrb[46].mxu1  ;;  %v1900_v15 = vadd.f32 %v1868_v59, %v1772_v57  ;;  %v1902_v34 = vadd.f32 %v1870_v14, %v1774_v17  ;;  %v1904_v27 = vadd.f32 %v1872_v6, %v1776_v10 }
 0x33e   :  { %14487 = vst [vmem:[#allocation212_spill] sm:$0xff] %v9915_v2  ;;  %v1049_v63 = vadd.f32 %v7630_v43, %v9711_v28  ;;  %v1043_v32 = vpop.f32.mrb[47].mxu1  ;;  %v1997_v58 = vmul.f32 %v9158_v54, %v9915_v2  ;;  %v1999_v9 = vmul.f32 %v9212_v20, %v9915_v2  ;;  %v2001_v55 = vmul.f32 %v9268_v36, %v9915_v2 }
 0x33f   :  { %v1044_v19 = vadd.f32 %v9711_v28, %v1043_v32  ;;  %v1996_v1 = vmul.f32 %v9158_v54, %v9917_v5  ;;  %v1998_v50 = vmul.f32 %v9212_v20, %v9917_v5  ;;  %v2000_v60 = vmul.f32 %v9268_v36, %v9917_v5 }
 0x340   :  { %v9933_v62 = vmax.f32 %v1049_v63, 0.0  ;;  %v2029_v57 = vadd.f32 %v1997_v58, %v1901_v23  ;;  %v2031_v17 = vadd.f32 %v1999_v9, %v1903_v24  ;;  %v2033_v10 = vadd.f32 %v2001_v55, %v1905_v38 }
 0x341   :  { %v9935_v61 = vmax.f32 %v1044_v19, 0.0  ;;  %v7633_v56 = vpop.f32.mrb[48].mxu1  ;;  %v2028_v25 = vadd.f32 %v1996_v1, %v1900_v15  ;;  %v2030_v16 = vadd.f32 %v1998_v50, %v1902_v34  ;;  %v2032_v22 = vadd.f32 %v2000_v60, %v1904_v27 }
 0x342   :  { %14488 = vst [vmem:[#allocation213_spill] sm:$0xff] %v9933_v62  ;;  %v1059_v40 = vadd.f32 %v7633_v56, %v9711_v28  ;;  %v1053_v54 = vpop.f32.mrb[49].mxu1  ;;  %v2125_v20 = vmul.f32 %v9161_v4, %v9933_v62  ;;  %v2127_v36 = vmul.f32 %v9215_v30, %v9933_v62  ;;  %v2129_v59 = vmul.f32 %v9271_v26, %v9933_v62 }
 0x343   :  { %v1054_v14 = vadd.f32 %v9711_v28, %v1053_v54  ;;  %v2124_v6 = vmul.f32 %v9161_v4, %v9935_v61  ;;  %v2126_v23 = vmul.f32 %v9215_v30, %v9935_v61  ;;  %v2128_v24 = vmul.f32 %v9271_v26, %v9935_v61 }
 0x344   :  { %v9951_v38 = vmax.f32 %v1059_v40, 0.0  ;;  %v2157_v43 = vadd.f32 %v2125_v20, %v2029_v57  ;;  %v2159_v15 = vadd.f32 %v2127_v36, %v2031_v17  ;;  %v2161_v34 = vadd.f32 %v2129_v59, %v2033_v10  ;;  %v14492_v59 = vld [vmem:[#allocation49_spill] sm:$0xff] }
 0x345   :  { %v9953_v27 = vmax.f32 %v1054_v14, 0.0  ;;  %v7636_v63 = vpop.f32.mrb[50].mxu1  ;;  %v2156_v32 = vadd.f32 %v2124_v6, %v2028_v25  ;;  %v2158_v58 = vadd.f32 %v2126_v23, %v2030_v16  ;;  %v2160_v9 = vadd.f32 %v2128_v24, %v2032_v22 }
 0x346   :  { %14489 = vst [vmem:[#allocation214_spill] sm:$0xff] %v9951_v38  ;;  %v1069_v55 = vadd.f32 %v7636_v63, %v9711_v28  ;;  %v1063_v4 = vpop.f32.mrb[51].mxu1  ;;  %v2253_v30 = vmul.f32 %v9122_v42, %v9951_v38  ;;  %v2255_v26 = vmul.f32 %v9178_v33, %v9951_v38  ;;  %v2257_v19 = vmul.f32 %v9230_v8, %v9951_v38 }
 0x347   :  { %14490 = vst [vmem:[#allocation215_spill] sm:$0xff] %v9953_v27  ;;  %v1064_v1 = vadd.f32 %v9711_v28, %v1063_v4  ;;  %v2252_v50 = vmul.f32 %v9122_v42, %v9953_v27  ;;  %v2254_v60 = vmul.f32 %v9178_v33, %v9953_v27  ;;  %v2256_v57 = vmul.f32 %v9230_v8, %v9953_v27 }
 0x348   :  { %v9969_v17 = vmax.f32 %v1069_v55, 0.0  ;;  %v2285_v10 = vadd.f32 %v2253_v30, %v2157_v43  ;;  %v2287_v56 = vadd.f32 %v2255_v26, %v2159_v15  ;;  %v2289_v25 = vadd.f32 %v2257_v19, %v2161_v34  ;;  %v14494_v19 = vld [vmem:[#allocation37_spill] sm:$0xff] }
 0x349   :  { %v9971_v16 = vmax.f32 %v1064_v1, 0.0  ;;  %v7639_v22 = vpop.f32.mrb[52].mxu1  ;;  %v2284_v40 = vadd.f32 %v2252_v50, %v2156_v32  ;;  %v2286_v54 = vadd.f32 %v2254_v60, %v2158_v58  ;;  %v2288_v20 = vadd.f32 %v2256_v57, %v2160_v9  ;;  %v14495_v1 = vld [vmem:[#allocation43_spill] sm:$0xff]  ;;  %v14496_v60 = vld [vmem:[#allocation50_spill] sm:$0xff] }
 0x34a   :  { %v1079_v36 = vadd.f32 %v7639_v22, %v9711_v28  ;;  %v1073_v42 = vpop.f32.mrb[53].mxu1  ;;  %v2381_v33 = vmul.f32 %v9125_v45, %v9969_v17  ;;  %v2383_v8 = vmul.f32 %v9181_v44, %v9969_v17  ;;  %v2385_v14 = vmul.f32 %v14492_v59, %v9969_v17 }
 0x34b   :  { %14491 = vst [vmem:[#allocation216_spill] sm:$0xff] %v9971_v16  ;;  %v1074_v6 = vadd.f32 %v9711_v28, %v1073_v42  ;;  %v2380_v23 = vmul.f32 %v9125_v45, %v9971_v16  ;;  %v2382_v24 = vmul.f32 %v9181_v44, %v9971_v16  ;;  %v2384_v43 = vmul.f32 %v14492_v59, %v9971_v16 }
 0x34c   :  { %v9987_v15 = vmax.f32 %v1079_v36, 0.0  ;;  %v2413_v34 = vadd.f32 %v2381_v33, %v2285_v10  ;;  %v2415_v63 = vadd.f32 %v2383_v8, %v2287_v56  ;;  %v2417_v32 = vadd.f32 %v2385_v14, %v2289_v25 }
 0x34d   :  { %v9989_v58 = vmax.f32 %v1074_v6, 0.0  ;;  %v7642_v9 = vpop.f32.mrb[54].mxu1  ;;  %v2412_v55 = vadd.f32 %v2380_v23, %v2284_v40  ;;  %v2414_v4 = vadd.f32 %v2382_v24, %v2286_v54  ;;  %v2416_v30 = vadd.f32 %v2384_v43, %v2288_v20  ;;  %v14499_v24 = vld [vmem:[#allocation38_spill] sm:$0xff] }
 0x34e   :  { %v1089_v26 = vadd.f32 %v7642_v9, %v9711_v28  ;;  %v1083_v45 = vpop.f32.mrb[55].mxu1  ;;  %v2509_v44 = vmul.f32 %v14494_v19, %v9987_v15  ;;  %v2511_v50 = vmul.f32 %v14495_v1, %v9987_v15  ;;  %v2513_v57 = vmul.f32 %v14496_v60, %v9987_v15  ;;  %v14500_v9 = vld [vmem:[#allocation44_spill] sm:$0xff] }
 0x34f   :  { %14493 = vst [vmem:[#allocation49_spill] sm:$0xff] %v9989_v58  ;;  %v1084_v10 = vadd.f32 %v9711_v28, %v1083_v45  ;;  %v2508_v56 = vmul.f32 %v14494_v19, %v9989_v58  ;;  %v2510_v25 = vmul.f32 %v14495_v1, %v9989_v58  ;;  %v2512_v22 = vmul.f32 %v14496_v60, %v9989_v58 }
 0x350   :  { %v10005_v40 = vmax.f32 %v1089_v26, 0.0  ;;  %v2541_v54 = vadd.f32 %v2509_v44, %v2413_v34  ;;  %v2543_v20 = vadd.f32 %v2511_v50, %v2415_v63  ;;  %v2545_v36 = vadd.f32 %v2513_v57, %v2417_v32  ;;  %v14501_v26 = vld [vmem:[#allocation51_spill] sm:$0xff] }
 0x351   :  { %v10007_v42 = vmax.f32 %v1084_v10, 0.0  ;;  %v7645_v33 = vpop.f32.mrb[56].mxu1  ;;  %v2540_v8 = vadd.f32 %v2508_v56, %v2412_v55  ;;  %v2542_v59 = vadd.f32 %v2510_v25, %v2414_v4  ;;  %v2544_v14 = vadd.f32 %v2512_v22, %v2416_v30 }
 0x352   :  { %14497 = vst [vmem:[#allocation37_spill] sm:$0xff] %v10005_v40  ;;  %v1099_v6 = vadd.f32 %v7645_v33, %v9711_v28  ;;  %v1093_v23 = vpop.f32.mrb[57].mxu1  ;;  %v2637_v43 = vmul.f32 %v14499_v24, %v10005_v40  ;;  %v2639_v45 = vmul.f32 %v14500_v9, %v10005_v40  ;;  %v2641_v34 = vmul.f32 %v14501_v26, %v10005_v40  ;;  %v14504_v33 = vld [vmem:[#allocation39_spill] sm:$0xff] }
 0x353   :  { %14498 = vst [vmem:[#allocation43_spill] sm:$0xff] %v10007_v42  ;;  %v1094_v63 = vadd.f32 %v9711_v28, %v1093_v23  ;;  %v2636_v32 = vmul.f32 %v14499_v24, %v10007_v42  ;;  %v2638_v55 = vmul.f32 %v14500_v9, %v10007_v42  ;;  %v2640_v4 = vmul.f32 %v14501_v26, %v10007_v42  ;;  %v14505_v24 = vld [vmem:[#allocation45_spill] sm:$0xff]  ;;  %v14515_v40 = vld [vmem:[#allocation47_spill] sm:$0xff] }
 0x354   :  { %v10023_v30 = vmax.f32 %v1099_v6, 0.0  ;;  %v2669_v19 = vadd.f32 %v2637_v43, %v2541_v54  ;;  %v2671_v44 = vadd.f32 %v2639_v45, %v2543_v20  ;;  %v2673_v1 = vadd.f32 %v2641_v34, %v2545_v36  ;;  %v14506_v6 = vld [vmem:[#allocation52_spill] sm:$0xff] }
 0x355   :  { %v10025_v50 = vmax.f32 %v1094_v63, 0.0  ;;  %v7648_v60 = vpop.f32.mrb[58].mxu1  ;;  %v2668_v57 = vadd.f32 %v2636_v32, %v2540_v8  ;;  %v2670_v10 = vadd.f32 %v2638_v55, %v2542_v59  ;;  %v2672_v56 = vadd.f32 %v2640_v4, %v2544_v14 }
 0x356   :  { %14502 = vst [vmem:[#allocation50_spill] sm:$0xff] %v10023_v30  ;;  %v1109_v25 = vadd.f32 %v7648_v60, %v9711_v28  ;;  %v1103_v22 = vpop.f32.mrb[59].mxu1  ;;  %v2765_v23 = vmul.f32 %v14504_v33, %v10023_v30  ;;  %v2767_v9 = vmul.f32 %v14505_v24, %v10023_v30  ;;  %v2769_v54 = vmul.f32 %v14506_v6, %v10023_v30  ;;  %v14510_v30 = vld [vmem:[#allocation46_spill] sm:$0xff] }
 0x357   :  { %14503 = vst [vmem:[#allocation38_spill] sm:$0xff] %v10025_v50  ;;  %v1104_v20 = vadd.f32 %v9711_v28, %v1103_v22  ;;  %v2764_v36 = vmul.f32 %v14504_v33, %v10025_v50  ;;  %v2766_v8 = vmul.f32 %v14505_v24, %v10025_v50  ;;  %v2768_v59 = vmul.f32 %v14506_v6, %v10025_v50  ;;  %v14509_v33 = vld [vmem:[#allocation40_spill] sm:$0xff] }
 0x358   :  { %v10041_v14 = vmax.f32 %v1109_v25, 0.0  ;;  %v2797_v43 = vadd.f32 %v2765_v23, %v2669_v19  ;;  %v2799_v45 = vadd.f32 %v2767_v9, %v2671_v44  ;;  %v2801_v26 = vadd.f32 %v2769_v54, %v2673_v1  ;;  %v14511_v25 = vld [vmem:[#allocation53_spill] sm:$0xff] }
 0x359   :  { %v10043_v34 = vmax.f32 %v1104_v20, 0.0  ;;  %v7651_v63 = vpop.f32.mrb[60].mxu1  ;;  %v2796_v32 = vadd.f32 %v2764_v36, %v2668_v57  ;;  %v2798_v55 = vadd.f32 %v2766_v8, %v2670_v10  ;;  %v2800_v4 = vadd.f32 %v2768_v59, %v2672_v56 }
 0x35a   :  { %14507 = vst [vmem:[#allocation44_spill] sm:$0xff] %v10041_v14  ;;  %v1119_v60 = vadd.f32 %v7651_v63, %v9711_v28  ;;  %v1113_v22 = vpop.f32.mrb[61].mxu1  ;;  %v2893_v24 = vmul.f32 %v14509_v33, %v10041_v14  ;;  %v2895_v6 = vmul.f32 %v14510_v30, %v10041_v14  ;;  %v2897_v19 = vmul.f32 %v14511_v25, %v10041_v14  ;;  %v14514_v14 = vld [vmem:[#allocation41_spill] sm:$0xff] }
 0x35b   :  { %14508 = vst [vmem:[#allocation51_spill] sm:$0xff] %v10043_v34  ;;  %v1114_v44 = vadd.f32 %v9711_v28, %v1113_v22  ;;  %v2892_v1 = vmul.f32 %v14509_v33, %v10043_v34  ;;  %v2894_v57 = vmul.f32 %v14510_v30, %v10043_v34  ;;  %v2896_v10 = vmul.f32 %v14511_v25, %v10043_v34 }
 0x35c   :  { %v10059_v56 = vmax.f32 %v1119_v60, 0.0  ;;  %v2925_v23 = vadd.f32 %v2893_v24, %v2797_v43  ;;  %v2927_v9 = vadd.f32 %v2895_v6, %v2799_v45  ;;  %v2929_v54 = vadd.f32 %v2897_v19, %v2801_v26  ;;  %v14516_v60 = vld [vmem:[#allocation54_spill] sm:$0xff] }
 0x35d   :  { %v10061_v20 = vmax.f32 %v1114_v44, 0.0  ;;  %v7654_v36 = vpop.f32.mrb[62].mxu1  ;;  %v2924_v8 = vadd.f32 %v2892_v1, %v2796_v32  ;;  %v2926_v59 = vadd.f32 %v2894_v57, %v2798_v55  ;;  %v2928_v63 = vadd.f32 %v2896_v10, %v2800_v4 }
 0x35e   :  { %14512 = vst [vmem:[#allocation39_spill] sm:$0xff] %v10059_v56  ;;  %v1129_v22 = vadd.f32 %v7654_v36, %v9711_v28  ;;  %v1123_v33 = vpop.f32.mrb[63].mxu1  ;;  %v3021_v30 = vmul.f32 %v14514_v14, %v10059_v56  ;;  %v3023_v25 = vmul.f32 %v14515_v40, %v10059_v56  ;;  %v3025_v43 = vmul.f32 %v14516_v60, %v10059_v56 }
 0x35f   :  { %14513 = vst [vmem:[#allocation45_spill] sm:$0xff] %v10061_v20  ;;  %v1124_v45 = vadd.f32 %v9711_v28, %v1123_v33  ;;  %v3020_v26 = vmul.f32 %v14514_v14, %v10061_v20  ;;  %v3022_v32 = vmul.f32 %v14515_v40, %v10061_v20  ;;  %v3024_v55 = vmul.f32 %v14516_v60, %v10061_v20  ;;  %v14519_v28 = vld [vmem:[#allocation42_spill] sm:$0xff]  ;;  %v14520_v14 = vld [vmem:[#allocation48_spill] sm:$0xff]  ;;  %v14521_v40 = vld [vmem:[#allocation55_spill] sm:$0xff] }
 0x360   :  { %v10077_v4 = vmax.f32 %v1129_v22, 0.0  ;;  %v3053_v24 = vadd.f32 %v3021_v30, %v2925_v23  ;;  %v3055_v6 = vadd.f32 %v3023_v25, %v2927_v9  ;;  %v3057_v19 = vadd.f32 %v3025_v43, %v2929_v54  ;;  %v14522_v22 = vld [vmem:[#allocation60_spill] sm:$0xff] }
 0x361   :  { %v10079_v44 = vmax.f32 %v1124_v45, 0.0  ;;  %v3052_v1 = vadd.f32 %v3020_v26, %v2924_v8  ;;  %v3054_v57 = vadd.f32 %v3022_v32, %v2926_v59  ;;  %v3056_v10 = vadd.f32 %v3024_v55, %v2928_v63  ;;  %v14523_v8 = vld [vmem:[#allocation61_spill] sm:$0xff]  ;;  %v14524_v55 = vld [vmem:[#allocation62_spill] sm:$0xff] }
 0x362   :  { %14517 = vst [vmem:[#allocation52_spill] sm:$0xff] %v10077_v4  ;;  %v3149_v36 = vmul.f32 %v14519_v28, %v10077_v4  ;;  %v3151_v33 = vmul.f32 %v14520_v14, %v10077_v4  ;;  %v3153_v56 = vmul.f32 %v14521_v40, %v10077_v4  ;;  %v1362_v60 = vmul.f32 %v14522_v22, %v9819_v48 }
 0x363   :  { %14518 = vst [vmem:[#allocation40_spill] sm:$0xff] %v10079_v44  ;;  %v3148_v23 = vmul.f32 %v14519_v28, %v10079_v44  ;;  %v3150_v9 = vmul.f32 %v14520_v14, %v10079_v44  ;;  %v3152_v54 = vmul.f32 %v14521_v40, %v10079_v44  ;;  %v1490_v59 = vmul.f32 %v14523_v8, %v9845_v11 }
 0x364   :  { %v3181_v63 = vadd.f32 %v3149_v36, %v3053_v24  ;;  %v3183_v30 = vadd.f32 %v3151_v33, %v3055_v6  ;;  %v3185_v25 = vadd.f32 %v3153_v56, %v3057_v19  ;;  %v1394_v43 = vadd.f32 %v1362_v60, %v9827_v49  ;;  %v14528_v24 = vld [vmem:[#allocation63_spill] sm:$0xff] }
 0x365   :  { %v3180_v45 = vadd.f32 %v3148_v23, %v3052_v1  ;;  %v3182_v26 = vadd.f32 %v3150_v9, %v3054_v57  ;;  %v3184_v32 = vadd.f32 %v3152_v54, %v3056_v10  ;;  %v1618_v28 = vmul.f32 %v14524_v55, %v9863_v7  ;;  %v14531_v10 = vld [vmem:[#allocation64_spill] sm:$0xff]  ;;  %v14534_v9 = vld [vmem:[#allocation194_spill] sm:$0xff]  ;;  %v14535_v54 = vld [vmem:[#allocation75_spill] sm:$0xff] }
 0x366   :  { %v10102_v14 = vrot.slane %v9758_v21, %v9100_v3  ;;  %v1522_v4 = vadd.f32 %v1490_v59, %v1394_v43  ;;  %v10106_v40 = vrot.slane %v9587_v52, %v9116_v39  ;;  %v10110_v56 = vrot.slane %v9587_v52, %v9119_v41  ;;  %v8267_v43 = vld [vmem:[#allocation3] sm:$0xff]  ;;  %v14541_v41 = vld [vmem:[#allocation66_spill] sm:$0xff] }
 0x367   :  { %v3212_v49 = vmul.f32 0.03125, %v3180_v45  ;;  %v1746_v6 = vmul.f32 %v14528_v24, %v9881_v47  ;;  %v10116_v19 = vrot.slane %v9627_v12, %v9105_v31  ;;  %v10120_v1 = vrot.slane %v9627_v12, %v9110_v35 }
 0x368   :  { %14525 = vst [vmem:[#allocation46_spill] sm:$0xff] %v10102_v14  ;;  %14526 = vst [vmem:[#allocation53_spill] sm:$0xff] %v10106_v40  ;;  %v1650_v57 = vadd.f32 %v1618_v28, %v1522_v4  ;;  %v1874_v36 = vmul.f32 %v14531_v10, %v9899_v18  ;;  %v10126_v52 = vrot.slane %v9627_v12, %v9113_v37  ;;  %v3213_v60 = vmul.f32 0.03125, %v3181_v63  ;;  %v14536_v28 = vld [vmem:[#allocation65_spill] sm:$0xff]  ;;  %v14537_v14 = vld [vmem:[#allocation91_spill] sm:$0xff] }
 0x369   :  { %14527 = vst [vmem:[#allocation41_spill] sm:$0xff] %v10110_v56  ;;  %14529 = vst [vmem:[#allocation47_spill] sm:$0xff] %v10116_v19  ;;  %v10130_v33 = vrot.slane %v9627_v12, %v9116_v39  ;;  %3347 = vmatprep.mubr.f32.mxu0 %v3212_v49  ;;  %v1235_v23 = vmul.f32 %v9298_v13, %v9771_v29  ;;  %v1236_v59 = vmul.f32 %v14535_v54, %v14534_v9  ;;  %v14551_v40 = vld [vmem:[#allocation76_spill] sm:$0xff] }
 0x36a   :  { %14530 = vst [vmem:[#allocation54_spill] sm:$0xff] %v10120_v1  ;;  %14532 = vst [vmem:[#allocation42_spill] sm:$0xff] %v10126_v52  ;;  %v10138_v4 = vmul.f32 %v14535_v54, %v9771_v29  ;;  %3348 = vmatmul.mubr.f32.vlgmr.msra.gmra.mrb[64].mxu0 %v8267_v43  ;;  %v1778_v45 = vadd.f32 %v1746_v6, %v1650_v57  ;;  %v2002_v21 = vmul.f32 %v14536_v28, %v9917_v5  ;;  %v14540_v54 = vld [vmem:[#allocation203_spill] sm:$0xff]  ;;  %v14547_v1 = vld [vmem:[#allocation68_spill] sm:$0xff] }
 0x36b   :  { %14533 = vst [vmem:[#allocation48_spill] sm:$0xff] %v10130_v33  ;;  %v10144_v49 = vmul.f32 %v14537_v14, %v14534_v9  ;;  %v10148_v13 = vmul.f32 %v14537_v14, %v9771_v29  ;;  %3352 = vmatprep.mubr.f32.mxu0 %v3213_v60  ;;  %v3215_v63 = vmul.f32 0.03125, %v3183_v30  ;;  %v10150_v3 = vmul.f32 0.03125, %v3185_v25  ;;  %v14542_v33 = vld [vmem:[#allocation56_spill] sm:$0xff]  ;;  %v14543_v60 = vld [vmem:[#allocation57_spill] sm:$0xff] }
 0x36c   :  { %v1363_v39 = vmul.f32 %v14522_v22, %v14540_v54  ;;  %v1491_v6 = vmul.f32 %v14523_v8, %v9843_v51  ;;  %v3214_v57 = vmul.f32 0.03125, %v3182_v26  ;;  %v3216_v43 = vmul.f32 0.03125, %v3184_v32  ;;  %v8268_v22 = vld [vmem:[#allocation3 + $0x8] sm:$0xff]  ;;  %v14544_v8 = vld [vmem:[#allocation58_spill] sm:$0xff]  ;;  %v14545_v32 = vld [vmem:[#allocation59_spill] sm:$0xff] }
 0x36d   :  { %14538 = vst [vmem:[#allocation55_spill] sm:$0xff] %v10144_v49  ;;  %14539 = vst [vmem:[#allocation60_spill] sm:$0xff] %v10148_v13  ;;  %v1906_v12 = vadd.f32 %v1874_v36, %v1778_v45  ;;  %v2130_v37 = vmul.f32 %v14541_v41, %v9935_v61  ;;  %v2258_v14 = vmul.f32 %v14542_v33, %v9953_v27  ;;  %v14546_v45 = vld [vmem:[#allocation67_spill] sm:$0xff] }
 0x36e   :  { %v2386_v30 = vmul.f32 %v14543_v60, %v9971_v16  ;;  %v1395_v25 = vadd.f32 %v1363_v39, %v1235_v23  ;;  %v1619_v35 = vmul.f32 %v14524_v55, %v9861_v53  ;;  %3353 = vmatmul.mubr.f32.gmra.mrb[66].mxu0 %v8268_v22  ;;  %v2514_v26 = vmul.f32 %v14544_v8, %v9989_v58  ;;  %v14548_v39 = vld [vmem:[#allocation69_spill] sm:$0xff]  ;;  %v14549_v22 = vld [vmem:[#allocation70_spill] sm:$0xff] }
 0x36f   :  { %v2034_v52 = vadd.f32 %v2002_v21, %v1906_v12  ;;  %v2642_v36 = vmul.f32 %v14545_v32, %v10007_v42  ;;  %v2770_v31 = vmul.f32 %v14546_v45, %v10025_v50  ;;  %3357 = vmatprep.mubr.f32.mxu0 %v3214_v57  ;;  %v2898_v19 = vmul.f32 %v14547_v1, %v10043_v34  ;;  %v14552_v57 = vld [vmem:[#allocation77_spill] sm:$0xff] }
 0x370   :  { %v10174_v23 = vmul.f32 %v14548_v39, %v10061_v20  ;;  %v1523_v55 = vadd.f32 %v1491_v6, %v1395_v25  ;;  %v1747_v12 = vmul.f32 %v14528_v24, %v9879_v46  ;;  %v10180_v56 = vmul.f32 %v14549_v22, %v10079_v44  ;;  %v8269_v24 = vld [vmem:[#allocation3 + $0x10] sm:$0xff] }
 0x371   :  { %v2162_v21 = vadd.f32 %v2130_v37, %v2034_v52  ;;  %v1364_v29 = vmul.f32 %v14551_v40, %v9819_v48  ;;  %v1492_v9 = vmul.f32 %v14552_v57, %v9845_v11  ;;  %v1875_v20 = vmul.f32 %v14531_v10, %v9897_v0 }
 0x372   :  { %14550 = vst [vmem:[#allocation61_spill] sm:$0xff] %v10180_v56  ;;  %v1651_v13 = vadd.f32 %v1619_v35, %v1523_v55  ;;  %v2003_v6 = vmul.f32 %v14536_v28, %v9915_v2  ;;  %v2131_v37 = vmul.f32 %v14541_v41, %v9933_v62  ;;  %3358 = vmatmul.mubr.f32.gmra.mrb[68].mxu0 %v8269_v24  ;;  %v14553_v56 = vld [vmem:[#allocation78_spill] sm:$0xff]  ;;  %v14554_v55 = vld [vmem:[#allocation37_spill] sm:$0xff] }
 0x373   :  { %v2290_v52 = vadd.f32 %v2258_v14, %v2162_v21  ;;  %v2259_v25 = vmul.f32 %v14542_v33, %v9951_v38  ;;  %v1396_v44 = vadd.f32 %v1364_v29, %v1236_v59  ;;  %v1620_v49 = vmul.f32 %v14553_v56, %v9863_v7  ;;  %3362 = vmatprep.mubr.f32.mxu0 %v3215_v63  ;;  %v14555_v14 = vld [vmem:[#allocation50_spill] sm:$0xff]  ;;  %v14556_v33 = vld [vmem:[#allocation79_spill] sm:$0xff] }
 0x374   :  { %v1779_v35 = vadd.f32 %v1747_v12, %v1651_v13  ;;  %v2387_v10 = vmul.f32 %v14543_v60, %v9969_v17  ;;  %v2515_v28 = vmul.f32 %v14544_v8, %v9987_v15  ;;  %v2643_v41 = vmul.f32 %v14545_v32, %v14554_v55  ;;  %v14557_v13 = vld [vmem:[#allocation44_spill] sm:$0xff]  ;;  %v14558_v60 = vld [vmem:[#allocation39_spill] sm:$0xff] }
 0x375   :  { %v2418_v24 = vadd.f32 %v2386_v30, %v2290_v52  ;;  %v10204_v21 = vmul.f32 %v14546_v45, %v14555_v14  ;;  %v1524_v29 = vadd.f32 %v1492_v9, %v1396_v44  ;;  %v1748_v59 = vmul.f32 %v14556_v33, %v9881_v47  ;;  %v8270_v32 = vld [vmem:[#allocation3 + $0x18] sm:$0xff]  ;;  %v14559_v44 = vld [vmem:[#allocation80_spill] sm:$0xff] }
 0x376   :  { %v1907_v63 = vadd.f32 %v1875_v20, %v1779_v35  ;;  %v10210_v12 = vmul.f32 %v14547_v1, %v14557_v13  ;;  %v10214_v8 = vmul.f32 %v14548_v39, %v14558_v60  ;;  %v1365_v30 = vmul.f32 %v14551_v40, %v14540_v54  ;;  %3363 = vmatmul.mubr.f32.gmra.mrb[70].mxu0 %v8270_v32  ;;  %v14560_v35 = vld [vmem:[#allocation52_spill] sm:$0xff] }
 0x377   :  { %v2546_v45 = vadd.f32 %v2514_v26, %v2418_v24  ;;  %v1652_v52 = vadd.f32 %v1620_v49, %v1524_v29  ;;  %v1876_v9 = vmul.f32 %v14559_v44, %v9899_v18  ;;  %v1493_v20 = vmul.f32 %v14552_v57, %v9843_v51  ;;  %3367 = vmatprep.mubr.f32.mxu0 %v3216_v43  ;;  %v14561_v49 = vld [vmem:[#allocation81_spill] sm:$0xff]  ;;  %v14562_v29 = vld [vmem:[#allocation82_spill] sm:$0xff]  ;;  %v14563_v43 = vld [vmem:[#allocation71_spill] sm:$0xff] }
 0x378   :  { %v2035_v1 = vadd.f32 %v2003_v6, %v1907_v63  ;;  %v10224_v13 = vmul.f32 %v14549_v22, %v14560_v35  ;;  %v1397_v39 = vadd.f32 %v1365_v30, %v10138_v4  ;;  %v1621_v40 = vmul.f32 %v14553_v56, %v9861_v53  ;;  %v8271_v4 = vld [vmem:[#allocation3 + $0x20] sm:$0xff] }
 0x379   :  { %v2674_v32 = vadd.f32 %v2642_v36, %v2546_v45  ;;  %v1780_v26 = vadd.f32 %v1748_v59, %v1652_v52  ;;  %v2004_v24 = vmul.f32 %v14561_v49, %v9917_v5  ;;  %v2132_v60 = vmul.f32 %v14562_v29, %v9935_v61  ;;  %v14564_v36 = vld [vmem:[#allocation72_spill] sm:$0xff]  ;;  %v14565_v45 = vld [vmem:[#allocation73_spill] sm:$0xff] }
 0x37a   :  { %v2163_v57 = vadd.f32 %v2131_v37, %v2035_v1  ;;  %v2260_v6 = vmul.f32 %v14563_v43, %v9953_v27  ;;  %v1525_v63 = vadd.f32 %v1493_v20, %v1397_v39  ;;  %v1749_v22 = vmul.f32 %v14556_v33, %v9879_v46  ;;  %3368 = vmatmul.mubr.f32.gmra.mrb[72].mxu0 %v8271_v4  ;;  %v14566_v1 = vld [vmem:[#allocation74_spill] sm:$0xff] }
 0x37b   :  { %v2802_v30 = vadd.f32 %v2770_v31, %v2674_v32  ;;  %v1908_v56 = vadd.f32 %v1876_v9, %v1780_v26  ;;  %v2388_v59 = vmul.f32 %v14564_v36, %v9971_v16  ;;  %v2516_v52 = vmul.f32 %v14565_v45, %v9989_v58  ;;  %3372 = vmatprep.mubr.f32.mxu0 %v10150_v3  ;;  %v14567_v31 = vld [vmem:[#allocation83_spill] sm:$0xff]  ;;  %v14568_v3 = vld [vmem:[#allocation92_spill] sm:$0xff] }
 0x37c   :  { %v2291_v37 = vadd.f32 %v2259_v25, %v2163_v57  ;;  %v2644_v35 = vmul.f32 %v14566_v1, %v10007_v42  ;;  %v1653_v20 = vadd.f32 %v1621_v40, %v1525_v63  ;;  %v1877_v33 = vmul.f32 %v14559_v44, %v9897_v0  ;;  %v14569_v57 = vld [vmem:[#allocation93_spill] sm:$0xff] }
 0x37d   :  { %v2930_v39 = vadd.f32 %v2898_v19, %v2802_v30  ;;  %v2036_v4 = vadd.f32 %v2004_v24, %v1908_v56  ;;  %v2772_v9 = vmul.f32 %v14567_v31, %v10025_v50  ;;  %v2005_v32 = vmul.f32 %v14561_v49, %v9915_v2  ;;  %v8272_v40 = vld [vmem:[#allocation3 + $0x28] sm:$0xff] }
 0x37e   :  { %v2419_v26 = vadd.f32 %v2387_v10, %v2291_v37  ;;  %v1781_v58 = vadd.f32 %v1749_v22, %v1653_v20  ;;  %v1366_v25 = vmul.f32 %v14568_v3, %v9819_v48  ;;  %v1494_v42 = vmul.f32 %v14569_v57, %v9845_v11  ;;  %3373 = vmatmul.mubr.f32.gmra.mrb[74].mxu0 %v8272_v40  ;;  %v14570_v24 = vld [vmem:[#allocation84_spill] sm:$0xff]  ;;  %v14571_v22 = vld [vmem:[#allocation55_spill] sm:$0xff]  ;;  %v14572_v37 = vld [vmem:[#allocation94_spill] sm:$0xff] }
 0x37f   :  { %v3058_v44 = vadd.f32 %v10174_v23, %v2930_v39  ;;  %v2164_v19 = vadd.f32 %v2132_v60, %v2036_v4  ;;  %v2900_v63 = vmul.f32 %v14570_v24, %v10043_v34  ;;  %v2133_v30 = vmul.f32 %v14562_v29, %v9933_v62  ;;  %v14573_v48 = vld [vmem:[#allocation61_spill] sm:$0xff] }
 0x380   :  { %v2547_v49 = vadd.f32 %v2515_v28, %v2419_v26  ;;  %v1909_v10 = vadd.f32 %v1877_v33, %v1781_v58  ;;  %v1398_v56 = vadd.f32 %v1366_v25, %v14571_v22  ;;  %v1622_v20 = vmul.f32 %v14572_v37, %v9863_v7  ;;  %v14574_v40 = vld [vmem:[#allocation45_spill] sm:$0xff]  ;;  %v14576_v28 = vld [vmem:[#allocation95_spill] sm:$0xff]  ;;  %v14577_v26 = vld [vmem:[#allocation40_spill] sm:$0xff] }
 0x381   :  { %v3186_v11 = vadd.f32 %v14573_v48, %v3058_v44  ;;  %v2292_v2 = vadd.f32 %v2260_v6, %v2164_v19  ;;  %v14575_v50 = vld [vmem:[#allocation85_spill] sm:$0xff]  ;;  %v2261_v60 = vmul.f32 %v14563_v43, %v9951_v38  ;;  %v1750_v58 = vmul.f32 %v14576_v28, %v9881_v47  ;;  %v14578_v25 = vld [vmem:[#allocation86_spill] sm:$0xff]  ;;  %v14579_v43 = vld [vmem:[#allocation96_spill] sm:$0xff] }
 0x382   :  { %v3028_v23 = vmul.f32 %v14575_v50, %v14574_v40  ;;  %v2675_v39 = vadd.f32 %v2643_v41, %v2547_v49  ;;  %v2037_v4 = vadd.f32 %v2005_v32, %v1909_v10  ;;  %v1526_v34 = vadd.f32 %v1494_v42, %v1398_v56 }
 0x383   :  { %v3218_v29 = vmul.f32 0.03125, %v3186_v11  ;;  %v2420_v33 = vadd.f32 %v2388_v59, %v2292_v2  ;;  %v3156_v22 = vmul.f32 %v14578_v25, %v14577_v26  ;;  %v2389_v48 = vmul.f32 %v14564_v36, %v9969_v17  ;;  %v8273_v59 = vld [vmem:[#allocation3 + $0x30] sm:$0xff] }
 0x384   :  { %v2803_v6 = vadd.f32 %v10204_v21, %v2675_v39  ;;  %v2165_v44 = vadd.f32 %v2133_v30, %v2037_v4  ;;  %v1654_v19 = vadd.f32 %v1622_v20, %v1526_v34  ;;  %v1878_v41 = vmul.f32 %v14579_v43, %v9899_v18  ;;  %v14580_v30 = vld [vmem:[#allocation97_spill] sm:$0xff] }
 0x385   :  { %3377 = vmatprep.mubr.f32.mxu0 %v3218_v29  ;;  %v2548_v42 = vadd.f32 %v2516_v52, %v2420_v33  ;;  %v2517_v32 = vmul.f32 %v14565_v45, %v9987_v15  ;;  %v2645_v11 = vmul.f32 %v14566_v1, %v14554_v55  ;;  %v2773_v2 = vmul.f32 %v14567_v31, %v14555_v14  ;;  %v14581_v52 = vld [vmem:[#allocation44_spill] sm:$0xff] }
 0x386   :  { %3378 = vmatmul.mubr.f32.gmra.mrb[76].mxu0 %v8273_v59  ;;  %v2931_v21 = vadd.f32 %v10210_v12, %v2803_v6  ;;  %v2293_v36 = vadd.f32 %v2261_v60, %v2165_v44  ;;  %v1782_v34 = vadd.f32 %v1750_v58, %v1654_v19  ;;  %v2006_v49 = vmul.f32 %v14580_v30, %v9917_v5  ;;  %v14582_v12 = vld [vmem:[#allocation98_spill] sm:$0xff]  ;;  %v14583_v58 = vld [vmem:[#allocation39_spill] sm:$0xff]  ;;  %v14584_v29 = vld [vmem:[#allocation60_spill] sm:$0xff] }
 0x387   :  { %v2676_v10 = vadd.f32 %v2644_v35, %v2548_v42  ;;  %v2901_v56 = vmul.f32 %v14570_v24, %v14581_v52  ;;  %v1367_v45 = vmul.f32 %v14568_v3, %v14540_v54  ;;  %v1495_v1 = vmul.f32 %v14569_v57, %v9843_v51  ;;  %v14586_v19 = vld [vmem:[#allocation52_spill] sm:$0xff] }
 0x388   :  { %v3059_v31 = vadd.f32 %v10214_v8, %v2931_v21  ;;  %v2421_v20 = vadd.f32 %v2389_v48, %v2293_v36  ;;  %v1910_v39 = vadd.f32 %v1878_v41, %v1782_v34  ;;  %v2134_v60 = vmul.f32 %v14582_v12, %v9935_v61  ;;  %v14585_v8 = vld [vmem:[#allocation87_spill] sm:$0xff]  ;;  %v14589_v34 = vld [vmem:[#allocation89_spill] sm:$0xff] }
 0x389   :  { %v2804_v4 = vadd.f32 %v2772_v9, %v2676_v10  ;;  %v3029_v35 = vmul.f32 %v14575_v50, %v14583_v58  ;;  %v1399_v33 = vadd.f32 %v1367_v45, %v14584_v29  ;;  %v1623_v24 = vmul.f32 %v14572_v37, %v9861_v53  ;;  %v14587_v37 = vld [vmem:[#allocation88_spill] sm:$0xff] }
 0x38a   :  { %v3187_v3 = vadd.f32 %v10224_v13, %v3059_v31  ;;  %v2549_v6 = vadd.f32 %v2517_v32, %v2421_v20  ;;  %v2038_v57 = vadd.f32 %v2006_v49, %v1910_v39  ;;  %v2262_v48 = vmul.f32 %v14585_v8, %v9953_v27  ;;  %v14588_v32 = vld [vmem:[#allocation49_spill] sm:$0xff]  ;;  %v14591_v31 = vld [vmem:[#allocation90_spill] sm:$0xff]  ;;  %v14594_v29 = vld [vmem:[#allocation212_spill] sm:$0xff] }
 0x38b   :  { %v2932_v44 = vadd.f32 %v2900_v63, %v2804_v4  ;;  %v3157_v41 = vmul.f32 %v14578_v25, %v14586_v19  ;;  %v1527_v9 = vadd.f32 %v1495_v1, %v1399_v33  ;;  %v1751_v50 = vmul.f32 %v14576_v28, %v9879_v46  ;;  %v14590_v1 = vld [vmem:[#allocation43_spill] sm:$0xff]  ;;  %v14592_v20 = vld [vmem:[#allocation38_spill] sm:$0xff] }
 0x38c   :  { %v3219_v42 = vmul.f32 0.03125, %v3187_v3  ;;  %v2677_v59 = vadd.f32 %v2645_v11, %v2549_v6  ;;  %v2166_v21 = vadd.f32 %v2134_v60, %v2038_v57  ;;  %v2390_v36 = vmul.f32 %v14587_v37, %v9971_v16  ;;  %v14593_v11 = vld [vmem:[#allocation99_spill] sm:$0xff] }
 0x38d   :  { %v3060_v13 = vadd.f32 %v3028_v23, %v2932_v44  ;;  %v2518_v49 = vmul.f32 %v14589_v34, %v14588_v32  ;;  %v1655_v10 = vadd.f32 %v1623_v24, %v1527_v9  ;;  %v1879_v63 = vmul.f32 %v14579_v43, %v9897_v0  ;;  %v8274_v60 = vld [vmem:[#allocation3 + $0x38] sm:$0xff] }
 0x38e   :  { %3382 = vmatprep.mubr.f32.mxu0 %v3219_v42  ;;  %v2805_v25 = vadd.f32 %v2773_v2, %v2677_v59  ;;  %v2294_v45 = vadd.f32 %v2262_v48, %v2166_v21  ;;  %v2646_v28 = vmul.f32 %v14591_v31, %v14590_v1  ;;  %v2774_v39 = vmul.f32 %v14593_v11, %v14592_v20  ;;  %v14595_v24 = vld [vmem:[#allocation194_spill] sm:$0xff]  ;;  %v14596_v3 = vld [vmem:[#allocation107_spill] sm:$0xff]  ;;  %v14597_v2 = vld [vmem:[#allocation204_spill] sm:$0xff] }
 0x38f   :  { %3383 = vmatmul.mubr.f32.gmra.mrb[78].mxu0 %v8274_v60  ;;  %v3188_v4 = vadd.f32 %v3156_v22, %v3060_v13  ;;  %v1783_v23 = vadd.f32 %v1751_v50, %v1655_v10  ;;  %v2007_v33 = vmul.f32 %v14580_v30, %v14594_v29  ;;  %v1240_v6 = vmul.f32 %v14596_v3, %v14595_v24  ;;  %v14598_v48 = vld [vmem:[#allocation108_spill] sm:$0xff]  ;;  %v14599_v9 = vld [vmem:[#allocation206_spill] sm:$0xff]  ;;  %v14600_v42 = vld [vmem:[#allocation109_spill] sm:$0xff] }
 0x390   :  { %v2933_v43 = vadd.f32 %v2901_v56, %v2805_v25  ;;  %v2422_v57 = vadd.f32 %v2390_v36, %v2294_v45  ;;  %v1368_v44 = vmul.f32 %v14598_v48, %v14597_v2  ;;  %v1496_v59 = vmul.f32 %v14600_v42, %v14599_v9  ;;  %v14601_v0 = vld [vmem:[#allocation51_spill] sm:$0xff]  ;;  %v14602_v20 = vld [vmem:[#allocation100_spill] sm:$0xff]  ;;  %v14603_v56 = vld [vmem:[#allocation110_spill] sm:$0xff] }
 0x391   :  { %v3220_v21 = vmul.f32 0.03125, %v3188_v4  ;;  %v2902_v60 = vmul.f32 %v14602_v20, %v14601_v0  ;;  %v1911_v22 = vadd.f32 %v1879_v63, %v1783_v23  ;;  %v2135_v50 = vmul.f32 %v14582_v12, %v9933_v62  ;;  %v14604_v25 = vld [vmem:[#allocation101_spill] sm:$0xff]  ;;  %v14605_v9 = vld [vmem:[#allocation102_spill] sm:$0xff]  ;;  %v8275_v23 = vld [vmem:[#allocation3 + $0x40] sm:$0xff] }
 0x392   :  { %v3061_v30 = vadd.f32 %v3029_v35, %v2933_v43  ;;  %v2550_v13 = vadd.f32 %v2518_v49, %v2422_v57  ;;  %v1400_v10 = vadd.f32 %v1368_v44, %v1240_v6  ;;  %v1624_v36 = vmul.f32 %v14603_v56, %v9863_v7  ;;  %v14606_v6 = vld [vmem:[#allocation111_spill] sm:$0xff] }
 0x393   :  { %3387 = vmatprep.mubr.f32.mxu0 %v3220_v21  ;;  %v3030_v45 = vmul.f32 %v14604_v25, %v14574_v40  ;;  %v3158_v4 = vmul.f32 %v14605_v9, %v14577_v26  ;;  %v2039_v29 = vadd.f32 %v2007_v33, %v1911_v22  ;;  %v2263_v63 = vmul.f32 %v14585_v8, %v9951_v38 }
 0x394   :  { %3388 = vmatmul.mubr.f32.gmra.mrb[80].mxu0 %v8275_v23  ;;  %v3189_v12 = vadd.f32 %v3157_v41, %v3061_v30  ;;  %v2678_v35 = vadd.f32 %v2646_v28, %v2550_v13  ;;  %v1528_v49 = vadd.f32 %v1496_v59, %v1400_v10  ;;  %v1752_v43 = vmul.f32 %v14606_v6, %v9881_v47  ;;  %v14607_v41 = vld [vmem:[#allocation112_spill] sm:$0xff] }
 0x395   :  { %v2167_v57 = vadd.f32 %v2135_v50, %v2039_v29  ;;  %v2391_v44 = vmul.f32 %v14587_v37, %v9969_v17  ;;  %v2519_v21 = vmul.f32 %v14589_v34, %v9987_v15  ;;  %v2647_v33 = vmul.f32 %v14591_v31, %v14554_v55  ;;  %v14608_v29 = vld [vmem:[#allocation113_spill] sm:$0xff] }
 0x396   :  { %v3221_v22 = vmul.f32 0.03125, %v3189_v12  ;;  %v2806_v8 = vadd.f32 %v2774_v39, %v2678_v35  ;;  %v1656_v38 = vadd.f32 %v1624_v36, %v1528_v49  ;;  %v1880_v28 = vmul.f32 %v14607_v41, %v9899_v18  ;;  %v14609_v37 = vld [vmem:[#allocation193_spill] sm:$0xff] }
 0x397   :  { %v2295_v59 = vadd.f32 %v2263_v63, %v2167_v57  ;;  %v2775_v30 = vmul.f32 %v14593_v11, %v14555_v14  ;;  %v2008_v50 = vmul.f32 %v14608_v29, %v9917_v5  ;;  %v1241_v13 = vmul.f32 %v14596_v3, %v14609_v37  ;;  %v8276_v36 = vld [vmem:[#allocation3 + $0x48] sm:$0xff]  ;;  %v14610_v3 = vld [vmem:[#allocation114_spill] sm:$0xff] }
 0x398   :  { %3392 = vmatprep.mubr.f32.mxu0 %v3221_v22  ;;  %v2934_v34 = vadd.f32 %v2902_v60, %v2806_v8  ;;  %v1784_v10 = vadd.f32 %v1752_v43, %v1656_v38  ;;  %v1369_v31 = vmul.f32 %v14598_v48, %v14540_v54  ;;  %v1497_v39 = vmul.f32 %v14600_v42, %v9843_v51  ;;  %v14611_v43 = vld [vmem:[#allocation103_spill] sm:$0xff] }
 0x399   :  { %3393 = vmatmul.mubr.f32.gmra.mrb[82].mxu0 %v8276_v36  ;;  %v2423_v63 = vadd.f32 %v2391_v44, %v2295_v59  ;;  %v2903_v11 = vmul.f32 %v14602_v20, %v14581_v52  ;;  %v3031_v23 = vmul.f32 %v14604_v25, %v14583_v58  ;;  %v2136_v12 = vmul.f32 %v14610_v3, %v9935_v61  ;;  %v14612_v20 = vld [vmem:[#allocation104_spill] sm:$0xff]  ;;  %v14613_v59 = vld [vmem:[#allocation105_spill] sm:$0xff] }
 0x39a   :  { %v3062_v60 = vadd.f32 %v3030_v45, %v2934_v34  ;;  %v1912_v38 = vadd.f32 %v1880_v28, %v1784_v10  ;;  %v1401_v35 = vadd.f32 %v1369_v31, %v1241_v13  ;;  %v1625_v48 = vmul.f32 %v14603_v56, %v9861_v53  ;;  %v14616_v34 = vld [vmem:[#allocation115_spill] sm:$0xff] }
 0x39b   :  { %v2551_v49 = vadd.f32 %v2519_v21, %v2423_v63  ;;  %v3159_v42 = vmul.f32 %v14605_v9, %v14586_v19  ;;  %v2264_v57 = vmul.f32 %v14611_v43, %v9953_v27  ;;  %v2392_v44 = vmul.f32 %v14612_v20, %v9971_v16  ;;  %v14614_v21 = vld [vmem:[#allocation106_spill] sm:$0xff]  ;;  %v14617_v16 = vld [vmem:[#allocation211_spill] sm:$0xff] }
 0x39c   :  { %v3190_v25 = vadd.f32 %v3158_v4, %v3062_v60  ;;  %v2040_v22 = vadd.f32 %v2008_v50, %v1912_v38  ;;  %v1529_v8 = vadd.f32 %v1497_v39, %v1401_v35  ;;  %v1753_v45 = vmul.f32 %v14606_v6, %v9879_v46  ;;  %v14615_v9 = vld [vmem:[#allocation38_spill] sm:$0xff]  ;;  %v14618_v39 = vld [vmem:[#allocation116_spill] sm:$0xff]  ;;  %v14620_v38 = vld [vmem:[#allocation123_spill] sm:$0xff] }
 0x39d   :  { %v2679_v28 = vadd.f32 %v2647_v33, %v2551_v49  ;;  %v2520_v56 = vmul.f32 %v14613_v59, %v14588_v32  ;;  %v2648_v13 = vmul.f32 %v14614_v21, %v14590_v1  ;;  %v2776_v10 = vmul.f32 %v14616_v34, %v14615_v9  ;;  %v14619_v33 = vld [vmem:[#allocation119_spill] sm:$0xff]  ;;  %v14621_v9 = vld [vmem:[#allocation212_spill] sm:$0xff] }
 0x39e   :  { %v3222_v31 = vmul.f32 0.03125, %v3190_v25  ;;  %v2168_v36 = vadd.f32 %v2136_v12, %v2040_v22  ;;  %v1657_v63 = vadd.f32 %v1625_v48, %v1529_v8  ;;  %v1881_v4 = vmul.f32 %v14607_v41, %v14617_v16  ;;  %v14622_v48 = vld [vmem:[#allocation206_spill] sm:$0xff]  ;;  %v14623_v25 = vld [vmem:[#allocation124_spill] sm:$0xff]  ;;  %v14624_v8 = vld [vmem:[#allocation117_spill] sm:$0xff] }
 0x39f   :  { %v2807_v50 = vadd.f32 %v2775_v30, %v2679_v28  ;;  %v2904_v6 = vmul.f32 %v14618_v39, %v14601_v0  ;;  %v1242_v60 = vmul.f32 %v14619_v33, %v14595_v24  ;;  %v1370_v35 = vmul.f32 %v14620_v38, %v14597_v2  ;;  %v8277_v41 = vld [vmem:[#allocation3 + $0x50] sm:$0xff] }
 0x3a0   :  { %3397 = vmatprep.mubr.f32.mxu0 %v3222_v31  ;;  %v2296_v49 = vadd.f32 %v2264_v57, %v2168_v36  ;;  %v1785_v1 = vadd.f32 %v1753_v45, %v1657_v63  ;;  %v2009_v12 = vmul.f32 %v14608_v29, %v14621_v9  ;;  %v1498_v22 = vmul.f32 %v14623_v25, %v14622_v48  ;;  %v14625_v24 = vld [vmem:[#allocation125_spill] sm:$0xff]  ;;  %v14626_v57 = vld [vmem:[#allocation118_spill] sm:$0xff] }
 0x3a1   :  { %3398 = vmatmul.mubr.f32.gmra.mrb[84].mxu0 %v8277_v41  ;;  %v2935_v30 = vadd.f32 %v2903_v11, %v2807_v50  ;;  %v3032_v28 = vmul.f32 %v14624_v8, %v14574_v40  ;;  %v1402_v0 = vadd.f32 %v1370_v35, %v1242_v60  ;;  %v1626_v16 = vmul.f32 %v14625_v24, %v9863_v7  ;;  %v14627_v63 = vld [vmem:[#allocation214_spill] sm:$0xff] }
 0x3a2   :  { %v2424_v2 = vadd.f32 %v2392_v44, %v2296_v49  ;;  %v3160_v45 = vmul.f32 %v14626_v57, %v14577_v26  ;;  %v1913_v31 = vadd.f32 %v1881_v4, %v1785_v1  ;;  %v2137_v29 = vmul.f32 %v14610_v3, %v9933_v62  ;;  %v14628_v50 = vld [vmem:[#allocation126_spill] sm:$0xff]  ;;  %v14629_v4 = vld [vmem:[#allocation127_spill] sm:$0xff] }
 0x3a3   :  { %v3063_v36 = vadd.f32 %v3031_v23, %v2935_v30  ;;  %v2265_v41 = vmul.f32 %v14611_v43, %v14627_v63  ;;  %v1530_v11 = vadd.f32 %v1498_v22, %v1402_v0  ;;  %v1754_v40 = vmul.f32 %v14628_v50, %v9881_v47 }
 0x3a4   :  { %v2552_v60 = vadd.f32 %v2520_v56, %v2424_v2  ;;  %v2041_v35 = vadd.f32 %v2009_v12, %v1913_v31  ;;  %v2393_v44 = vmul.f32 %v14612_v20, %v9969_v17  ;;  %v2521_v49 = vmul.f32 %v14613_v59, %v9987_v15  ;;  %v14630_v56 = vld [vmem:[#allocation128_spill] sm:$0xff] }
 0x3a5   :  { %v3191_v1 = vadd.f32 %v3159_v42, %v3063_v36  ;;  %v2649_v3 = vmul.f32 %v14614_v21, %v14554_v55  ;;  %v1658_v23 = vadd.f32 %v1626_v16, %v1530_v11  ;;  %v1882_v43 = vmul.f32 %v14629_v4, %v9899_v18  ;;  %v8278_v11 = vld [vmem:[#allocation3 + $0x58] sm:$0xff] }
 0x3a6   :  { %v2680_v0 = vadd.f32 %v2648_v13, %v2552_v60  ;;  %v2169_v22 = vadd.f32 %v2137_v29, %v2041_v35  ;;  %v2777_v2 = vmul.f32 %v14616_v34, %v14555_v14  ;;  %v2010_v12 = vmul.f32 %v14630_v56, %v9917_v5  ;;  %v14631_v29 = vld [vmem:[#allocation129_spill] sm:$0xff]  ;;  %v14632_v60 = vld [vmem:[#allocation120_spill] sm:$0xff] }
 0x3a7   :  { %v3223_v20 = vmul.f32 0.03125, %v3191_v1  ;;  %v1786_v30 = vadd.f32 %v1754_v40, %v1658_v23  ;;  %v1243_v42 = vmul.f32 %v14619_v33, %v14609_v37  ;;  %v1371_v59 = vmul.f32 %v14620_v38, %v14540_v54 }
 0x3a8   :  { %v2808_v16 = vadd.f32 %v2776_v10, %v2680_v0  ;;  %v2297_v21 = vadd.f32 %v2265_v41, %v2169_v22  ;;  %v2905_v13 = vmul.f32 %v14618_v39, %v14581_v52  ;;  %v1499_v31 = vmul.f32 %v14623_v25, %v9843_v51  ;;  %v14633_v0 = vld [vmem:[#allocation216_spill] sm:$0xff]  ;;  %v14634_v22 = vld [vmem:[#allocation121_spill] sm:$0xff] }
 0x3a9   :  { %3402 = vmatprep.mubr.f32.mxu0 %v3223_v20  ;;  %v1914_v34 = vadd.f32 %v1882_v43, %v1786_v30  ;;  %v2138_v36 = vmul.f32 %v14631_v29, %v9935_v61  ;;  %v1403_v40 = vadd.f32 %v1371_v59, %v1243_v42  ;;  %v1627_v33 = vmul.f32 %v14625_v24, %v9861_v53  ;;  %v14636_v30 = vld [vmem:[#allocation43_spill] sm:$0xff]  ;;  %v14637_v42 = vld [vmem:[#allocation130_spill] sm:$0xff] }
 0x3aa   :  { %3403 = vmatmul.mubr.f32.gmra.mrb[86].mxu0 %v8278_v11  ;;  %v2936_v38 = vadd.f32 %v2904_v6, %v2808_v16  ;;  %v2425_v10 = vadd.f32 %v2393_v44, %v2297_v21  ;;  %v3033_v41 = vmul.f32 %v14624_v8, %v14583_v58  ;;  %v3161_v39 = vmul.f32 %v14626_v57, %v14586_v19  ;;  %v14635_v44 = vld [vmem:[#allocation122_spill] sm:$0xff]  ;;  %v14638_v59 = vld [vmem:[#allocation211_spill] sm:$0xff] }
 0x3ab   :  { %v2042_v25 = vadd.f32 %v2010_v12, %v1914_v34  ;;  %v2266_v35 = vmul.f32 %v14632_v60, %v9953_v27  ;;  %v1531_v1 = vadd.f32 %v1499_v31, %v1403_v40  ;;  %v1755_v23 = vmul.f32 %v14628_v50, %v9879_v46  ;;  %v14639_v34 = vld [vmem:[#allocation38_spill] sm:$0xff]  ;;  %v14640_v50 = vld [vmem:[#allocation131_spill] sm:$0xff] }
 0x3ac   :  { %v3064_v43 = vadd.f32 %v3032_v28, %v2936_v38  ;;  %v2553_v24 = vadd.f32 %v2521_v49, %v2425_v10  ;;  %v2394_v6 = vmul.f32 %v14634_v22, %v14633_v0  ;;  %v2522_v20 = vmul.f32 %v14635_v44, %v14588_v32  ;;  %v14641_v38 = vld [vmem:[#allocation194_spill] sm:$0xff]  ;;  %v14644_v46 = vld [vmem:[#allocation135_spill] sm:$0xff] }
 0x3ad   :  { %v2170_v8 = vadd.f32 %v2138_v36, %v2042_v25  ;;  %v2650_v57 = vmul.f32 %v14637_v42, %v14636_v30  ;;  %v1659_v12 = vadd.f32 %v1627_v33, %v1531_v1  ;;  %v1883_v16 = vmul.f32 %v14629_v4, %v14638_v59  ;;  %v14642_v10 = vld [vmem:[#allocation134_spill] sm:$0xff]  ;;  %v14643_v25 = vld [vmem:[#allocation204_spill] sm:$0xff] }
 0x3ae   :  { %v3192_v21 = vadd.f32 %v3160_v45, %v3064_v43  ;;  %v2681_v31 = vadd.f32 %v2649_v3, %v2553_v24  ;;  %v2778_v28 = vmul.f32 %v14640_v50, %v14639_v34  ;;  %v2011_v49 = vmul.f32 %v14630_v56, %v14621_v9  ;;  %v14645_v3 = vld [vmem:[#allocation137_spill] sm:$0xff]  ;;  %v14646_v56 = vld [vmem:[#allocation139_spill] sm:$0xff] }
 0x3af   :  { %v2298_v40 = vadd.f32 %v2266_v35, %v2170_v8  ;;  %v1787_v11 = vadd.f32 %v1755_v23, %v1659_v12  ;;  %v1244_v36 = vmul.f32 %v14642_v10, %v14641_v38  ;;  %v1372_v30 = vmul.f32 %v14644_v46, %v14643_v25  ;;  %v14647_v8 = vld [vmem:[#allocation51_spill] sm:$0xff]  ;;  %v14648_v12 = vld [vmem:[#allocation132_spill] sm:$0xff]  ;;  %v14649_v25 = vld [vmem:[#allocation45_spill] sm:$0xff] }
 0x3b0   :  { %v3224_v33 = vmul.f32 0.03125, %v3192_v21  ;;  %v2809_v1 = vadd.f32 %v2777_v2, %v2681_v31  ;;  %v2139_v45 = vmul.f32 %v14631_v29, %v9933_v62  ;;  %v1500_v4 = vmul.f32 %v14645_v3, %v14622_v48  ;;  %v14650_v21 = vld [vmem:[#allocation133_spill] sm:$0xff]  ;;  %v8279_v31 = vld [vmem:[#allocation3 + $0x60] sm:$0xff] }
 0x3b1   :  { %v2426_v43 = vadd.f32 %v2394_v6, %v2298_v40  ;;  %v1915_v24 = vadd.f32 %v1883_v16, %v1787_v11  ;;  %v1404_v59 = vadd.f32 %v1372_v30, %v1244_v36  ;;  %v1628_v35 = vmul.f32 %v14646_v56, %v9863_v7  ;;  %v14651_v30 = vld [vmem:[#allocation140_spill] sm:$0xff] }
 0x3b2   :  { %3407 = vmatprep.mubr.f32.mxu0 %v3224_v33  ;;  %v2937_v23 = vadd.f32 %v2905_v13, %v2809_v1  ;;  %v2906_v38 = vmul.f32 %v14648_v12, %v14647_v8  ;;  %v3034_v2 = vmul.f32 %v14650_v21, %v14649_v25  ;;  %v2267_v29 = vmul.f32 %v14632_v60, %v14627_v63  ;;  %v14652_v13 = vld [vmem:[#allocation136_spill] sm:$0xff] }
 0x3b3   :  { %3408 = vmatmul.mubr.f32.gmra.mrb[88].mxu0 %v8279_v31  ;;  %v2554_v62 = vadd.f32 %v2522_v20, %v2426_v43  ;;  %v2043_v6 = vadd.f32 %v2011_v49, %v1915_v24  ;;  %v1532_v16 = vadd.f32 %v1500_v4, %v1404_v59  ;;  %v1756_v40 = vmul.f32 %v14651_v30, %v9881_v47  ;;  %v14653_v20 = vld [vmem:[#allocation143_spill] sm:$0xff] }
 0x3b4   :  { %v3065_v11 = vadd.f32 %v3033_v41, %v2937_v23  ;;  %v3162_v36 = vmul.f32 %v14652_v13, %v14577_v26  ;;  %v2395_v33 = vmul.f32 %v14634_v22, %v9969_v17  ;;  %v2523_v1 = vmul.f32 %v14635_v44, %v9987_v15 }
 0x3b5   :  { %v2682_v7 = vadd.f32 %v2650_v57, %v2554_v62  ;;  %v2171_v60 = vadd.f32 %v2139_v45, %v2043_v6  ;;  %v1660_v63 = vadd.f32 %v1628_v35, %v1532_v16  ;;  %v1884_v49 = vmul.f32 %v14653_v20, %v9899_v18  ;;  %v14654_v62 = vld [vmem:[#allocation144_spill] sm:$0xff]  ;;  %v14656_v16 = vld [vmem:[#allocation138_spill] sm:$0xff] }
 0x3b6   :  { %v3193_v59 = vadd.f32 %v3161_v39, %v3065_v11  ;;  %v2651_v4 = vmul.f32 %v14637_v42, %v14554_v55  ;;  %v2779_v41 = vmul.f32 %v14640_v50, %v14555_v14  ;;  %v2907_v43 = vmul.f32 %v14648_v12, %v14581_v52  ;;  %v14657_v11 = vld [vmem:[#allocation141_spill] sm:$0xff] }
 0x3b7   :  { %v2810_v22 = vadd.f32 %v2778_v28, %v2682_v7  ;;  %v2299_v24 = vadd.f32 %v2267_v29, %v2171_v60  ;;  %v1788_v23 = vadd.f32 %v1756_v40, %v1660_v63  ;;  %v2012_v44 = vmul.f32 %v14654_v62, %v9917_v5  ;;  %v14655_v7 = vld [vmem:[#allocation149_spill] sm:$0xff] }
 0x3b8   :  { %v3225_v57 = vmul.f32 0.03125, %v3193_v59  ;;  %v1245_v45 = vmul.f32 %v14642_v10, %v14609_v37  ;;  %v1373_v39 = vmul.f32 %v14644_v46, %v14540_v54  ;;  %v1501_v42 = vmul.f32 %v14645_v3, %v9843_v51  ;;  %v8280_v29 = vld [vmem:[#allocation3 + $0x68] sm:$0xff] }
 0x3b9   :  { %v2938_v50 = vadd.f32 %v2906_v38, %v2810_v22  ;;  %v2427_v35 = vadd.f32 %v2395_v33, %v2299_v24  ;;  %v1916_v31 = vadd.f32 %v1884_v49, %v1788_v23  ;;  %v2140_v28 = vmul.f32 %v14655_v7, %v9935_v61  ;;  %v14660_v23 = vld [vmem:[#allocation43_spill] sm:$0xff] }
 0x3ba   :  { %3412 = vmatprep.mubr.f32.mxu0 %v3225_v57  ;;  %v3035_v63 = vmul.f32 %v14650_v21, %v14583_v58  ;;  %v3163_v12 = vmul.f32 %v14652_v13, %v14586_v19  ;;  %v1405_v10 = vadd.f32 %v1373_v39, %v1245_v45  ;;  %v1629_v46 = vmul.f32 %v14646_v56, %v9861_v53  ;;  %v14658_v21 = vld [vmem:[#allocation142_spill] sm:$0xff]  ;;  %v14659_v13 = vld [vmem:[#allocation209_spill] sm:$0xff]  ;;  %v14663_v45 = vld [vmem:[#allocation152_spill] sm:$0xff] }
 0x3bb   :  { %3413 = vmatmul.mubr.f32.gmra.mrb[90].mxu0 %v8280_v29  ;;  %v3066_v3 = vadd.f32 %v3034_v2, %v2938_v50  ;;  %v2555_v38 = vadd.f32 %v2523_v1, %v2427_v35  ;;  %v2044_v6 = vadd.f32 %v2012_v44, %v1916_v31  ;;  %v2268_v40 = vmul.f32 %v14656_v16, %v9953_v27  ;;  %v14661_v2 = vld [vmem:[#allocation150_spill] sm:$0xff]  ;;  %v14662_v44 = vld [vmem:[#allocation151_spill] sm:$0xff] }
 0x3bc   :  { %v2396_v33 = vmul.f32 %v14657_v11, %v14633_v0  ;;  %v2524_v60 = vmul.f32 %v14658_v21, %v14588_v32  ;;  %v1533_v49 = vadd.f32 %v1501_v42, %v1405_v10  ;;  %v1757_v59 = vmul.f32 %v14651_v30, %v14659_v13  ;;  %v14664_v35 = vld [vmem:[#allocation211_spill] sm:$0xff] }
 0x3bd   :  { %v3194_v22 = vadd.f32 %v3162_v36, %v3066_v3  ;;  %v2683_v56 = vadd.f32 %v2651_v4, %v2555_v38  ;;  %v2172_v24 = vadd.f32 %v2140_v28, %v2044_v6  ;;  %v2652_v1 = vmul.f32 %v14661_v2, %v14660_v23  ;;  %v14665_v4 = vld [vmem:[#allocation194_spill] sm:$0xff]  ;;  %v14666_v28 = vld [vmem:[#allocation145_spill] sm:$0xff]  ;;  %v14667_v38 = vld [vmem:[#allocation204_spill] sm:$0xff] }
 0x3be   :  { %v2780_v57 = vmul.f32 %v14662_v44, %v14639_v34  ;;  %v2908_v39 = vmul.f32 %v14663_v45, %v14647_v8  ;;  %v1661_v50 = vadd.f32 %v1629_v46, %v1533_v49  ;;  %v1885_v31 = vmul.f32 %v14653_v20, %v14664_v35  ;;  %v14668_v6 = vld [vmem:[#allocation146_spill] sm:$0xff]  ;;  %v14669_v23 = vld [vmem:[#allocation147_spill] sm:$0xff]  ;;  %v14670_v20 = vld [vmem:[#allocation153_spill] sm:$0xff] }
 0x3bf   :  { %v3226_v42 = vmul.f32 0.03125, %v3194_v22  ;;  %v2811_v10 = vadd.f32 %v2779_v41, %v2683_v56  ;;  %v2300_v29 = vadd.f32 %v2268_v40, %v2172_v24  ;;  %v2013_v30 = vmul.f32 %v14654_v62, %v14621_v9  ;;  %v14671_v40 = vld [vmem:[#allocation157_spill] sm:$0xff] }
 0x3c0   :  { %v1789_v36 = vadd.f32 %v1757_v59, %v1661_v50  ;;  %v1246_v3 = vmul.f32 %v14666_v28, %v14665_v4  ;;  %v1374_v34 = vmul.f32 %v14668_v6, %v14667_v38  ;;  %v1502_v8 = vmul.f32 %v14669_v23, %v14622_v48  ;;  %v8281_v62 = vld [vmem:[#allocation3 + $0x70] sm:$0xff]  ;;  %v14673_v38 = vld [vmem:[#allocation208_spill] sm:$0xff] }
 0x3c1   :  { %3417 = vmatprep.mubr.f32.mxu0 %v3226_v42  ;;  %v2939_v46 = vadd.f32 %v2907_v43, %v2811_v10  ;;  %v2428_v49 = vadd.f32 %v2396_v33, %v2300_v29  ;;  %v3036_v41 = vmul.f32 %v14670_v20, %v14649_v25  ;;  %v3164_v22 = vmul.f32 %v14671_v40, %v14577_v26  ;;  %v14672_v56 = vld [vmem:[#allocation213_spill] sm:$0xff]  ;;  %v14674_v4 = vld [vmem:[#allocation168_spill] sm:$0xff]  ;;  %v14675_v43 = vld [vmem:[#allocation214_spill] sm:$0xff] }
 0x3c2   :  { %3418 = vmatmul.mubr.f32.gmra.mrb[92].mxu0 %v8281_v62  ;;  %v1917_v59 = vadd.f32 %v1885_v31, %v1789_v36  ;;  %v2141_v24 = vmul.f32 %v14655_v7, %v14672_v56  ;;  %v1406_v50 = vadd.f32 %v1374_v34, %v1246_v3  ;;  %v1630_v9 = vmul.f32 %v14674_v4, %v14673_v38  ;;  %v14676_v36 = vld [vmem:[#allocation169_spill] sm:$0xff] }
 0x3c3   :  { %v3067_v48 = vadd.f32 %v3035_v63, %v2939_v46  ;;  %v2556_v42 = vadd.f32 %v2524_v60, %v2428_v49  ;;  %v2269_v33 = vmul.f32 %v14656_v16, %v14675_v43  ;;  %v2397_v10 = vmul.f32 %v14657_v11, %v9969_v17  ;;  %v14677_v46 = vld [vmem:[#allocation170_spill] sm:$0xff] }
 0x3c4   :  { %v2045_v29 = vadd.f32 %v2013_v30, %v1917_v59  ;;  %v2525_v62 = vmul.f32 %v14658_v21, %v9987_v15  ;;  %v1534_v31 = vadd.f32 %v1502_v8, %v1406_v50  ;;  %v1758_v7 = vmul.f32 %v14676_v36, %v9881_v47  ;;  %v8282_v50 = vld [vmem:[#allocation3 + $0x78] sm:$0xff] }
 0x3c5   :  { %v3195_v34 = vadd.f32 %v3163_v12, %v3067_v48  ;;  %v2684_v3 = vadd.f32 %v2652_v1, %v2556_v42  ;;  %v2653_v63 = vmul.f32 %v14661_v2, %v14554_v55  ;;  %v2781_v60 = vmul.f32 %v14662_v44, %v14555_v14  ;;  %v14678_v44 = vld [vmem:[#allocation174_spill] sm:$0xff] }
 0x3c6   :  { %v2173_v16 = vadd.f32 %v2141_v24, %v2045_v29  ;;  %v2909_v11 = vmul.f32 %v14663_v45, %v14581_v52  ;;  %v1662_v30 = vadd.f32 %v1630_v9, %v1534_v31  ;;  %v1886_v21 = vmul.f32 %v14677_v46, %v9899_v18  ;;  %v14679_v29 = vld [vmem:[#allocation177_spill] sm:$0xff] }
 0x3c7   :  { %v3227_v8 = vmul.f32 0.03125, %v3195_v34  ;;  %v2812_v49 = vadd.f32 %v2780_v57, %v2684_v3  ;;  %v1247_v48 = vmul.f32 %v14666_v28, %v14609_v37  ;;  %v1375_v12 = vmul.f32 %v14668_v6, %v14540_v54 }
 0x3c8   :  { %v2301_v2 = vadd.f32 %v2269_v33, %v2173_v16  ;;  %v1790_v1 = vadd.f32 %v1758_v7, %v1662_v30  ;;  %v2014_v59 = vmul.f32 %v14678_v44, %v9917_v5  ;;  %v1503_v45 = vmul.f32 %v14669_v23, %v9843_v51  ;;  %v14681_v16 = vld [vmem:[#allocation166_spill] sm:$0xff]  ;;  %v14682_v30 = vld [vmem:[#allocation167_spill] sm:$0xff] }
 0x3c9   :  { %3422 = vmatprep.mubr.f32.mxu0 %v3227_v8  ;;  %v2940_v9 = vadd.f32 %v2908_v39, %v2812_v49  ;;  %v3037_v24 = vmul.f32 %v14670_v20, %v14583_v58  ;;  %v1407_v57 = vadd.f32 %v1375_v12, %v1247_v48  ;;  %v1631_v28 = vmul.f32 %v14674_v4, %v9861_v53  ;;  %v14680_v39 = vld [vmem:[#allocation165_spill] sm:$0xff]  ;;  %v14683_v8 = vld [vmem:[#allocation43_spill] sm:$0xff]  ;;  %v14684_v49 = vld [vmem:[#allocation178_spill] sm:$0xff] }
 0x3ca   :  { %3423 = vmatmul.mubr.f32.gmra.mrb[94].mxu0 %v8282_v50  ;;  %v2429_v6 = vadd.f32 %v2397_v10, %v2301_v2  ;;  %v3165_v42 = vmul.f32 %v14671_v40, %v14586_v19  ;;  %v1918_v33 = vadd.f32 %v1886_v21, %v1790_v1  ;;  %v2142_v31 = vmul.f32 %v14679_v29, %v9935_v61 }
 0x3cb   :  { %v3068_v23 = vadd.f32 %v3036_v41, %v2940_v9  ;;  %v2270_v7 = vmul.f32 %v14680_v39, %v9953_v27  ;;  %v1535_v34 = vadd.f32 %v1503_v45, %v1407_v57  ;;  %v1759_v20 = vmul.f32 %v14676_v36, %v14659_v13  ;;  %v14685_v45 = vld [vmem:[#allocation38_spill] sm:$0xff]  ;;  %v14686_v36 = vld [vmem:[#allocation179_spill] sm:$0xff] }
 0x3cc   :  { %v2557_v3 = vadd.f32 %v2525_v62, %v2429_v6  ;;  %v2046_v4 = vadd.f32 %v2014_v59, %v1918_v33  ;;  %v2398_v10 = vmul.f32 %v14681_v16, %v14633_v0  ;;  %v2526_v40 = vmul.f32 %v14682_v30, %v14588_v32  ;;  %v14687_v59 = vld [vmem:[#allocation212_spill] sm:$0xff]  ;;  %v14688_v6 = vld [vmem:[#allocation194_spill] sm:$0xff]  ;;  %v14689_v33 = vld [vmem:[#allocation155_spill] sm:$0xff] }
 0x3cd   :  { %v3196_v21 = vadd.f32 %v3164_v22, %v3068_v23  ;;  %v2654_v48 = vmul.f32 %v14684_v49, %v14683_v8  ;;  %v1663_v41 = vadd.f32 %v1631_v28, %v1535_v34  ;;  %v1887_v12 = vmul.f32 %v14677_v46, %v14664_v35  ;;  %v14690_v23 = vld [vmem:[#allocation204_spill] sm:$0xff]  ;;  %v14692_v0 = vld [vmem:[#allocation51_spill] sm:$0xff]  ;;  %v14693_v46 = vld [vmem:[#allocation181_spill] sm:$0xff] }
 0x3ce   :  { %v2685_v2 = vadd.f32 %v2653_v63, %v2557_v3  ;;  %v2174_v1 = vadd.f32 %v2142_v31, %v2046_v4  ;;  %v2782_v62 = vmul.f32 %v14686_v36, %v14685_v45  ;;  %v2015_v9 = vmul.f32 %v14678_v44, %v14687_v59  ;;  %v14691_v32 = vld [vmem:[#allocation156_spill] sm:$0xff]  ;;  %v14694_v31 = vld [vmem:[#allocation206_spill] sm:$0xff] }
 0x3cf   :  { %v3228_v57 = vmul.f32 0.03125, %v3196_v21  ;;  %v1791_v50 = vadd.f32 %v1759_v20, %v1663_v41  ;;  %v1248_v22 = vmul.f32 %v14689_v33, %v14688_v6  ;;  %v1376_v8 = vmul.f32 %v14691_v32, %v14690_v23  ;;  %v14695_v3 = vld [vmem:[#allocation158_spill] sm:$0xff]  ;;  %v8283_v6 = vld [vmem:[#allocation3 + $0x80] sm:$0xff] }
 0x3d0   :  { %v2813_v28 = vadd.f32 %v2781_v60, %v2685_v2  ;;  %v2302_v34 = vadd.f32 %v2270_v7, %v2174_v1  ;;  %v2910_v63 = vmul.f32 %v14693_v46, %v14692_v0  ;;  %v1504_v4 = vmul.f32 %v14695_v3, %v14694_v31  ;;  %v14696_v21 = vld [vmem:[#allocation198_spill] sm:$0xff]  ;;  %v14698_v1 = vld [vmem:[#allocation183_spill] sm:$0xff] }
 0x3d1   :  { %3427 = vmatprep.mubr.f32.mxu0 %v3228_v57  ;;  %v1919_v45 = vadd.f32 %v1887_v12, %v1791_v50  ;;  %v2143_v44 = vmul.f32 %v14679_v29, %v14672_v56  ;;  %v1408_v20 = vadd.f32 %v1376_v8, %v1248_v22  ;;  %v1632_v41 = vmul.f32 %v14696_v21, %v14673_v38  ;;  %v14697_v7 = vld [vmem:[#allocation182_spill] sm:$0xff]  ;;  %v14699_v29 = vld [vmem:[#allocation199_spill] sm:$0xff] }
 0x3d2   :  { %3428 = vmatmul.mubr.f32.gmra.mrb[96].mxu0 %v8283_v6  ;;  %v2941_v23 = vadd.f32 %v2909_v11, %v2813_v28  ;;  %v2430_v60 = vadd.f32 %v2398_v10, %v2302_v34  ;;  %v3038_v2 = vmul.f32 %v14697_v7, %v14649_v25  ;;  %v3166_v0 = vmul.f32 %v14698_v1, %v14577_v26 }
 0x3d3   :  { %v2047_v31 = vadd.f32 %v2015_v9, %v1919_v45  ;;  %v2271_v12 = vmul.f32 %v14680_v39, %v14675_v43  ;;  %v1536_v57 = vadd.f32 %v1504_v4, %v1408_v20  ;;  %v1760_v8 = vmul.f32 %v14699_v29, %v9881_v47  ;;  %v14700_v9 = vld [vmem:[#allocation200_spill] sm:$0xff] }
 0x3d4   :  { %v3069_v50 = vadd.f32 %v3037_v24, %v2941_v23  ;;  %v2558_v22 = vadd.f32 %v2526_v40, %v2430_v60  ;;  %v2399_v11 = vmul.f32 %v14681_v16, %v9969_v17  ;;  %v2527_v10 = vmul.f32 %v14682_v30, %v9987_v15  ;;  %v14701_v40 = vld [vmem:[#allocation53_spill] sm:$0xff] }
 0x3d5   :  { %v2175_v6 = vadd.f32 %v2143_v44, %v2047_v31  ;;  %v2655_v28 = vmul.f32 %v14684_v49, %v14554_v55  ;;  %v1664_v45 = vadd.f32 %v1632_v41, %v1536_v57  ;;  %v1888_v39 = vmul.f32 %v14700_v9, %v9899_v18  ;;  %v14702_v41 = vld [vmem:[#allocation41_spill] sm:$0xff] }
 0x3d6   :  { %v3197_v34 = vadd.f32 %v3165_v42, %v3069_v50  ;;  %v2686_v4 = vadd.f32 %v2654_v48, %v2558_v22  ;;  %v2783_v24 = vmul.f32 %v14686_v36, %v14555_v14  ;;  %v2016_v23 = vmul.f32 %v14701_v40, %v9917_v5  ;;  %v8284_v22 = vld [vmem:[#allocation3 + $0x88] sm:$0xff] }
 0x3d7   :  { %v2303_v16 = vadd.f32 %v2271_v12, %v2175_v6  ;;  %v1792_v20 = vadd.f32 %v1760_v8, %v1664_v45  ;;  %v1249_v30 = vmul.f32 %v14689_v33, %v14609_v37  ;;  %v1377_v49 = vmul.f32 %v14691_v32, %v14540_v54 }
 0x3d8   :  { %v3229_v31 = vmul.f32 0.03125, %v3197_v34  ;;  %v2814_v44 = vadd.f32 %v2782_v62, %v2686_v4  ;;  %v2144_v42 = vmul.f32 %v14702_v41, %v9935_v61  ;;  %v1505_v48 = vmul.f32 %v14695_v3, %v9843_v51  ;;  %v14703_v62 = vld [vmem:[#allocation195_spill] sm:$0xff]  ;;  %v14706_v4 = vld [vmem:[#allocation49_spill] sm:$0xff] }
 0x3d9   :  { %v2431_v36 = vadd.f32 %v2399_v11, %v2303_v16  ;;  %v1920_v60 = vadd.f32 %v1888_v39, %v1792_v20  ;;  %v1409_v57 = vadd.f32 %v1377_v49, %v1249_v30  ;;  %v1633_v12 = vmul.f32 %v14696_v21, %v9861_v53  ;;  %v14704_v39 = vld [vmem:[#allocation216_spill] sm:$0xff] }
 0x3da   :  { %3432 = vmatprep.mubr.f32.mxu0 %v3229_v31  ;;  %v2942_v8 = vadd.f32 %v2910_v63, %v2814_v44  ;;  %v2911_v33 = vmul.f32 %v14693_v46, %v14581_v52  ;;  %v3039_v32 = vmul.f32 %v14697_v7, %v14583_v58  ;;  %v2272_v50 = vmul.f32 %v14703_v62, %v9953_v27  ;;  %v14705_v46 = vld [vmem:[#allocation196_spill] sm:$0xff]  ;;  %v14707_v7 = vld [vmem:[#allocation197_spill] sm:$0xff]  ;;  %v14708_v31 = vld [vmem:[#allocation43_spill] sm:$0xff] }
 0x3db   :  { %3433 = vmatmul.mubr.f32.gmra.mrb[98].mxu0 %v8284_v22  ;;  %v2559_v3 = vadd.f32 %v2527_v10, %v2431_v36  ;;  %v2048_v11 = vadd.f32 %v2016_v23, %v1920_v60  ;;  %v1537_v6 = vadd.f32 %v1505_v48, %v1409_v57  ;;  %v1761_v45 = vmul.f32 %v14699_v29, %v14659_v13  ;;  %v14709_v44 = vld [vmem:[#allocation47_spill] sm:$0xff]  ;;  %v14711_v48 = vld [vmem:[#allocation54_spill] sm:$0xff]  ;;  %v14713_v22 = vld [vmem:[#allocation161_spill] sm:$0xff] }
 0x3dc   :  { %v3070_v21 = vadd.f32 %v3038_v2, %v2942_v8  ;;  %v3167_v63 = vmul.f32 %v14698_v1, %v14586_v19  ;;  %v2400_v34 = vmul.f32 %v14705_v46, %v14704_v39  ;;  %v2528_v16 = vmul.f32 %v14707_v7, %v14706_v4  ;;  %v14710_v2 = vld [vmem:[#allocation38_spill] sm:$0xff] }
 0x3dd   :  { %v2687_v20 = vadd.f32 %v2655_v28, %v2559_v3  ;;  %v2176_v30 = vadd.f32 %v2144_v42, %v2048_v11  ;;  %v1665_v49 = vadd.f32 %v1633_v12, %v1537_v6  ;;  %v1889_v10 = vmul.f32 %v14700_v9, %v14664_v35  ;;  %v14712_v12 = vld [vmem:[#allocation194_spill] sm:$0xff] }
 0x3de   :  { %v3198_v23 = vadd.f32 %v3166_v0, %v3070_v21  ;;  %v2656_v29 = vmul.f32 %v14709_v44, %v14708_v31  ;;  %v2784_v36 = vmul.f32 %v14711_v48, %v14710_v2  ;;  %v2017_v1 = vmul.f32 %v14701_v40, %v14687_v59  ;;  %v14714_v0 = vld [vmem:[#allocation204_spill] sm:$0xff]  ;;  %v14715_v3 = vld [vmem:[#allocation162_spill] sm:$0xff]  ;;  %v14717_v21 = vld [vmem:[#allocation163_spill] sm:$0xff] }
 0x3df   :  { %v2815_v60 = vadd.f32 %v2783_v24, %v2687_v20  ;;  %v2304_v57 = vadd.f32 %v2272_v50, %v2176_v30  ;;  %v1793_v8 = vadd.f32 %v1761_v45, %v1665_v49  ;;  %v2145_v28 = vmul.f32 %v14702_v41, %v14672_v56  ;;  %v14716_v6 = vld [vmem:[#allocation206_spill] sm:$0xff]  ;;  %v14718_v40 = vld [vmem:[#allocation32_spill] sm:$0xff]  ;;  %v14720_v45 = vld [vmem:[#allocation51_spill] sm:$0xff] }
 0x3e0   :  { %v3230_v42 = vmul.f32 0.03125, %v3198_v23  ;;  %v1250_v9 = vmul.f32 %v14713_v22, %v14712_v12  ;;  %v1378_v11 = vmul.f32 %v14715_v3, %v14714_v0  ;;  %v1506_v35 = vmul.f32 %v14717_v21, %v14716_v6  ;;  %v14719_v24 = vld [vmem:[#allocation148_spill] sm:$0xff]  ;;  %v14721_v20 = vld [vmem:[#allocation42_spill] sm:$0xff]  ;;  %v14722_v23 = vld [vmem:[#allocation33_spill] sm:$0xff] }
 0x3e1   :  { %v2943_v2 = vadd.f32 %v2911_v33, %v2815_v60  ;;  %v2432_v31 = vadd.f32 %v2400_v34, %v2304_v57  ;;  %v1921_v13 = vadd.f32 %v1889_v10, %v1793_v8  ;;  %v1595_v50 = vrot.slane %v14719_v24, %v14718_v40  ;;  %v8285_v59 = vld [vmem:[#allocation3 + $0x90] sm:$0xff]  ;;  %v14723_v57 = vld [vmem:[#allocation48_spill] sm:$0xff] }
 0x3e2   :  { %3437 = vmatprep.mubr.f32.mxu0 %v3230_v42  ;;  %v2912_v41 = vmul.f32 %v14721_v20, %v14720_v45  ;;  %v2273_v30 = vmul.f32 %v14703_v62, %v14675_v43  ;;  %v1410_v49 = vadd.f32 %v1378_v11, %v1250_v9  ;;  %v10654_v56 = vrot.slane %v14719_v24, %v14722_v23  ;;  %v14724_v62 = vld [vmem:[#allocation34_spill] sm:$0xff] }
 0x3e3   :  { %3438 = vmatmul.mubr.f32.gmra.mrb[100].mxu0 %v8285_v59  ;;  %v3071_v33 = vadd.f32 %v3039_v32, %v2943_v2  ;;  %v2560_v34 = vadd.f32 %v2528_v16, %v2432_v31  ;;  %v2049_v10 = vadd.f32 %v2017_v1, %v1921_v13  ;;  %v1634_v60 = vmul.f32 %v1595_v50, %v14673_v38  ;;  %v14725_v13 = vld [vmem:[#allocation36_spill] sm:$0xff]  ;;  %v14726_v32 = vld [vmem:[#allocation154_spill] sm:$0xff]  ;;  %v14727_v2 = vld [vmem:[#allocation35_spill] sm:$0xff] }
 0x3e4   :  { %v3040_v8 = vmul.f32 %v14723_v57, %v14649_v25  ;;  %v1538_v42 = vadd.f32 %v1506_v35, %v1410_v49  ;;  %v1762_v6 = vmul.f32 %v10654_v56, %v9881_v47  ;;  %v10663_v9 = vrot.slane %v14719_v24, %v14724_v62 }
 0x3e5   :  { %v3199_v11 = vadd.f32 %v3167_v63, %v3071_v33  ;;  %v2688_v43 = vadd.f32 %v2656_v29, %v2560_v34  ;;  %v2177_v0 = vadd.f32 %v2145_v28, %v2049_v10  ;;  %v2401_v59 = vmul.f32 %v14705_v46, %v9969_v17 }
 0x3e6   :  { %v3127_v16 = vrot.slane %v14726_v32, %v14725_v13  ;;  %v1666_v31 = vadd.f32 %v1634_v60, %v1538_v42  ;;  %v1890_v35 = vmul.f32 %v10663_v9, %v9899_v18  ;;  %v10673_v1 = vrot.slane %v14719_v24, %v14727_v2  ;;  %v14729_v60 = vld [vmem:[#allocation159_spill] sm:$0xff] }
 0x3e7   :  { %v3231_v49 = vmul.f32 0.03125, %v3199_v11  ;;  %v2816_v47 = vadd.f32 %v2784_v36, %v2688_v43  ;;  %v2305_v38 = vadd.f32 %v2273_v30, %v2177_v0  ;;  %v2529_v63 = vmul.f32 %v14707_v7, %v9987_v15  ;;  %v8286_v7 = vld [vmem:[#allocation3 + $0x98] sm:$0xff] }
 0x3e8   :  { %v3168_v29 = vmul.f32 %v3127_v16, %v14577_v26  ;;  %v1794_v46 = vadd.f32 %v1762_v6, %v1666_v31  ;;  %v2018_v28 = vmul.f32 %v10673_v1, %v9917_v5  ;;  %v10682_v33 = vrot.slane %v14719_v24, %v14725_v13  ;;  %v14728_v24 = vld [vmem:[#allocation29_spill] sm:$0xff]  ;;  %v14731_v32 = vld [vmem:[#allocation31_spill] sm:$0xff] }
 0x3e9   :  { %3442 = vmatprep.mubr.f32.mxu0 %v3231_v49  ;;  %v2944_v34 = vadd.f32 %v2912_v41, %v2816_v47  ;;  %v2433_v10 = vadd.f32 %v2401_v59, %v2305_v38  ;;  %v2657_v43 = vmul.f32 %v14709_v44, %v14554_v55  ;;  %v2785_v36 = vmul.f32 %v14711_v48, %v14555_v14 }
 0x3ea   :  { %3443 = vmatmul.mubr.f32.gmra.mrb[102].mxu0 %v8286_v7  ;;  %v2913_v0 = vmul.f32 %v14721_v20, %v14581_v52  ;;  %v1922_v6 = vadd.f32 %v1890_v35, %v1794_v46  ;;  %v2146_v30 = vmul.f32 %v10682_v33, %v9935_v61  ;;  %v10694_v42 = vrot.slane %v14729_v60, %v14728_v24  ;;  %v14730_v20 = vld [vmem:[#allocation30_spill] sm:$0xff] }
 0x3eb   :  { %v3072_v47 = vadd.f32 %v3040_v8, %v2944_v34  ;;  %v2561_v38 = vadd.f32 %v2529_v63, %v2433_v10  ;;  %v3041_v44 = vmul.f32 %v14723_v57, %v14583_v58  ;;  %v3169_v48 = vmul.f32 %v3127_v16, %v14586_v19 }
 0x3ec   :  { %v2050_v41 = vadd.f32 %v2018_v28, %v1922_v6  ;;  %v2274_v11 = vmul.f32 %v10694_v42, %v9953_v27  ;;  %v2363_v59 = vrot.slane %v14729_v60, %v14730_v20  ;;  %v10705_v31 = vrot.slane %v14729_v60, %v14731_v32 }
 0x3ed   :  { %v3200_v35 = vadd.f32 %v3168_v29, %v3072_v47  ;;  %v2689_v49 = vadd.f32 %v2657_v43, %v2561_v38  ;;  %v1251_v8 = vmul.f32 %v14713_v22, %v14609_v37  ;;  %v1379_v57 = vmul.f32 %v14715_v3, %v14540_v54 }
 0x3ee   :  { %v2178_v16 = vadd.f32 %v2146_v30, %v2050_v41  ;;  %v2402_v63 = vmul.f32 %v2363_v59, %v14704_v39  ;;  %v2530_v46 = vmul.f32 %v10705_v31, %v14706_v4  ;;  %v1507_v28 = vmul.f32 %v14717_v21, %v9843_v51 }
 0x3ef   :  { %v3232_v34 = vmul.f32 0.03125, %v3200_v35  ;;  %v2817_v10 = vadd.f32 %v2785_v36, %v2689_v49  ;;  %v1411_v7 = vadd.f32 %v1379_v57, %v1251_v8  ;;  %v1635_v29 = vmul.f32 %v1595_v50, %v9861_v53  ;;  %v14732_v36 = vld [vmem:[#allocation209_spill] sm:$0xff]  ;;  %v8287_v50 = vld [vmem:[#allocation3 + $0xa0] sm:$0xff]  ;;  %v14734_v49 = vld [vmem:[#allocation38_spill] sm:$0xff] }
 0x3f0   :  { %v2306_v43 = vadd.f32 %v2274_v11, %v2178_v16  ;;  %v2619_v22 = vrot.slane %v14729_v60, %v14718_v40  ;;  %v2747_v3 = vrot.slane %v14729_v60, %v14722_v23  ;;  %v2875_v6 = vrot.slane %v14729_v60, %v14724_v62  ;;  %v14733_v11 = vld [vmem:[#allocation43_spill] sm:$0xff] }
 0x3f1   :  { %3447 = vmatprep.mubr.f32.mxu0 %v3232_v34  ;;  %v2945_v30 = vadd.f32 %v2913_v0, %v2817_v10  ;;  %v3003_v21 = vrot.slane %v14729_v60, %v14727_v2  ;;  %v1539_v47 = vadd.f32 %v1507_v28, %v1411_v7  ;;  %v1763_v38 = vmul.f32 %v10654_v56, %v14732_v36  ;;  %v14735_v10 = vld [vmem:[#allocation211_spill] sm:$0xff] }
 0x3f2   :  { %3448 = vmatmul.mubr.f32.gmra.mrb[104].mxu0 %v8287_v50  ;;  %v2434_v41 = vadd.f32 %v2402_v63, %v2306_v43  ;;  %v2658_v35 = vmul.f32 %v2619_v22, %v14733_v11  ;;  %v2786_v8 = vmul.f32 %v2747_v3, %v14734_v49  ;;  %v3131_v57 = vrot.slane %v14729_v60, %v14725_v13  ;;  %v14736_v56 = vld [vmem:[#allocation171_spill] sm:$0xff]  ;;  %v14737_v50 = vld [vmem:[#allocation204_spill] sm:$0xff]  ;;  %v14739_v11 = vld [vmem:[#allocation206_spill] sm:$0xff] }
 0x3f3   :  { %v3073_v16 = vadd.f32 %v3041_v44, %v2945_v30  ;;  %v2914_v0 = vmul.f32 %v2875_v6, %v14720_v45  ;;  %v1667_v34 = vadd.f32 %v1635_v29, %v1539_v47  ;;  %v1891_v28 = vmul.f32 %v10663_v9, %v14735_v10  ;;  %v14738_v63 = vld [vmem:[#allocation172_spill] sm:$0xff]  ;;  %v14740_v53 = vld [vmem:[#allocation175_spill] sm:$0xff]  ;;  %v14743_v10 = vld [vmem:[#allocation213_spill] sm:$0xff] }
 0x3f4   :  { %v2562_v7 = vadd.f32 %v2530_v46, %v2434_v41  ;;  %v1252_v36 = vmul.f32 %v14736_v56, %v14712_v12  ;;  %v1380_v43 = vmul.f32 %v14738_v63, %v14737_v50  ;;  %v1508_v49 = vmul.f32 %v14740_v53, %v14739_v11  ;;  %v14741_v60 = vld [vmem:[#allocation212_spill] sm:$0xff] }
 0x3f5   :  { %v3201_v4 = vadd.f32 %v3169_v48, %v3073_v16  ;;  %v1795_v51 = vadd.f32 %v1763_v38, %v1667_v34  ;;  %v2019_v44 = vmul.f32 %v10673_v1, %v14741_v60  ;;  %v14742_v29 = vld [vmem:[#allocation160_spill] sm:$0xff]  ;;  %v3042_v9 = vmul.f32 %v3003_v21, %v14649_v25  ;;  %v14745_v1 = vld [vmem:[#allocation210_spill] sm:$0xff] }
 0x3f6   :  { %v1599_v30 = vrot.slane %v14742_v29, %v14718_v40  ;;  %v2690_v47 = vadd.f32 %v2658_v35, %v2562_v7  ;;  %v1412_v46 = vadd.f32 %v1380_v43, %v1252_v36  ;;  %v1727_v41 = vrot.slane %v14742_v29, %v14722_v23  ;;  %v14744_v48 = vld [vmem:[#allocation208_spill] sm:$0xff]  ;;  %v14746_v43 = vld [vmem:[#allocation214_spill] sm:$0xff] }
 0x3f7   :  { %v3233_v12 = vmul.f32 0.03125, %v3201_v4  ;;  %v1923_v50 = vadd.f32 %v1891_v28, %v1795_v51  ;;  %v2147_v11 = vmul.f32 %v10682_v33, %v14743_v10  ;;  %v1855_v35 = vrot.slane %v14742_v29, %v14724_v62  ;;  %v8288_v28 = vld [vmem:[#allocation3 + $0xa8] sm:$0xff] }
 0x3f8   :  { %v1636_v38 = vmul.f32 %v1599_v30, %v14744_v48  ;;  %v2818_v16 = vadd.f32 %v2786_v8, %v2690_v47  ;;  %v1540_v34 = vadd.f32 %v1508_v49, %v1412_v46  ;;  %v1764_v60 = vmul.f32 %v1727_v41, %v14745_v1 }
 0x3f9   :  { %3452 = vmatprep.mubr.f32.mxu0 %v3233_v12  ;;  %v3170_v36 = vmul.f32 %v3131_v57, %v14577_v26  ;;  %v2051_v7 = vadd.f32 %v2019_v44, %v1923_v50  ;;  %v2275_v4 = vmul.f32 %v10694_v42, %v14746_v43  ;;  %v2403_v51 = vmul.f32 %v2363_v59, %v9969_v17 }
 0x3fa   :  { %3453 = vmatmul.mubr.f32.gmra.mrb[106].mxu0 %v8288_v28  ;;  %v2946_v33 = vadd.f32 %v2914_v0, %v2818_v16  ;;  %v1668_v10 = vadd.f32 %v1636_v38, %v1540_v34  ;;  %v1892_v49 = vmul.f32 %v1855_v35, %v9899_v18  ;;  %v1983_v8 = vrot.slane %v14742_v29, %v14727_v2 }
 0x3fb   :  { %v2179_v47 = vadd.f32 %v2147_v11, %v2051_v7  ;;  %v2531_v12 = vmul.f32 %v10705_v31, %v9987_v15  ;;  %v2659_v50 = vmul.f32 %v2619_v22, %v14554_v55  ;;  %v2787_v44 = vmul.f32 %v2747_v3, %v14555_v14  ;;  %v14747_v11 = vld [vmem:[#allocation164_spill] sm:$0xff] }
 0x3fc   :  { %v3074_v42 = vadd.f32 %v3042_v9, %v2946_v33  ;;  %v1796_v46 = vadd.f32 %v1764_v60, %v1668_v10  ;;  %v2020_v59 = vmul.f32 %v1983_v8, %v9917_v5  ;;  %v2111_v0 = vrot.slane %v14742_v29, %v14725_v13 }
 0x3fd   :  { %v2307_v38 = vadd.f32 %v2275_v4, %v2179_v47  ;;  %v2915_v16 = vmul.f32 %v2875_v6, %v14581_v52  ;;  %v3043_v34 = vmul.f32 %v3003_v21, %v14583_v58  ;;  %v2239_v7 = vrot.slane %v14747_v11, %v14728_v24 }
 0x3fe   :  { %v3202_v31 = vadd.f32 %v3170_v36, %v3074_v42  ;;  %v3171_v22 = vmul.f32 %v3131_v57, %v14586_v19  ;;  %v1924_v28 = vadd.f32 %v1892_v49, %v1796_v46  ;;  %v2148_v3 = vmul.f32 %v2111_v0, %v9935_v61  ;;  %v14748_v49 = vld [vmem:[#allocation205_spill] sm:$0xff] }
 0x3ff   :  { %v2435_v10 = vadd.f32 %v2403_v51, %v2307_v38  ;;  %v2276_v60 = vmul.f32 %v2239_v7, %v9953_v27  ;;  %v2367_v29 = vrot.slane %v14747_v11, %v14730_v20  ;;  %v2495_v6 = vrot.slane %v14747_v11, %v14731_v32  ;;  %v14749_v46 = vld [vmem:[#allocation49_spill] sm:$0xff]  ;;  %v14757_v32 = vld [vmem:[#allocation204_spill] sm:$0xff] }
 0x400   :  { %v3234_v9 = vmul.f32 0.03125, %v3202_v31  ;;  %v2052_v21 = vadd.f32 %v2020_v59, %v1924_v28  ;;  %v1253_v4 = vmul.f32 %v14736_v56, %v14609_v37  ;;  %v1381_v57 = vmul.f32 %v14738_v63, %v14540_v54  ;;  %v14750_v31 = vld [vmem:[#allocation207_spill] sm:$0xff]  ;;  %v8289_v56 = vld [vmem:[#allocation3 + $0xb0] sm:$0xff] }
 0x401   :  { %v2563_v36 = vadd.f32 %v2531_v12, %v2435_v10  ;;  %v2404_v33 = vmul.f32 %v2367_v29, %v14704_v39  ;;  %v2623_v51 = vrot.slane %v14747_v11, %v14718_v40  ;;  %v1509_v47 = vmul.f32 %v14740_v53, %v14748_v49  ;;  %v14751_v63 = vld [vmem:[#allocation43_spill] sm:$0xff]  ;;  %v14755_v49 = vld [vmem:[#allocation194_spill] sm:$0xff] }
 0x402   :  { %3457 = vmatprep.mubr.f32.mxu0 %v3234_v9  ;;  %v2180_v42 = vadd.f32 %v2148_v3, %v2052_v21  ;;  %v2532_v38 = vmul.f32 %v2495_v6, %v14749_v46  ;;  %v1413_v59 = vadd.f32 %v1381_v57, %v1253_v4  ;;  %v1637_v28 = vmul.f32 %v1599_v30, %v14750_v31  ;;  %v14752_v9 = vld [vmem:[#allocation209_spill] sm:$0xff]  ;;  %v14753_v30 = vld [vmem:[#allocation38_spill] sm:$0xff]  ;;  %v14754_v31 = vld [vmem:[#allocation211_spill] sm:$0xff] }
 0x403   :  { %3458 = vmatmul.mubr.f32.gmra.mrb[108].mxu0 %v8289_v56  ;;  %v2691_v37 = vadd.f32 %v2659_v50, %v2563_v36  ;;  %v2660_v12 = vmul.f32 %v2623_v51, %v14751_v63  ;;  %v2751_v10 = vrot.slane %v14747_v11, %v14722_v23  ;;  %v2879_v39 = vrot.slane %v14747_v11, %v14724_v62 }
 0x404   :  { %v2308_v54 = vadd.f32 %v2276_v60, %v2180_v42  ;;  %v3007_v53 = vrot.slane %v14747_v11, %v14727_v2  ;;  %v1541_v3 = vadd.f32 %v1509_v47, %v1413_v59  ;;  %v1765_v21 = vmul.f32 %v1727_v41, %v14752_v9  ;;  %v14756_v60 = vld [vmem:[#allocation184_spill] sm:$0xff]  ;;  %v14758_v47 = vld [vmem:[#allocation185_spill] sm:$0xff]  ;;  %v14759_v41 = vld [vmem:[#allocation206_spill] sm:$0xff] }
 0x405   :  { %v2819_v4 = vadd.f32 %v2787_v44, %v2691_v37  ;;  %v2788_v57 = vmul.f32 %v2751_v10, %v14753_v30  ;;  %v2916_v50 = vmul.f32 %v2879_v39, %v14720_v45  ;;  %v3135_v36 = vrot.slane %v14747_v11, %v14725_v13  ;;  %v14760_v37 = vld [vmem:[#allocation186_spill] sm:$0xff]  ;;  %v14761_v30 = vld [vmem:[#allocation173_spill] sm:$0xff] }
 0x406   :  { %v2436_v56 = vadd.f32 %v2404_v33, %v2308_v54  ;;  %v1669_v63 = vadd.f32 %v1637_v28, %v1541_v3  ;;  %v1893_v46 = vmul.f32 %v1855_v35, %v14754_v31  ;;  %v1254_v42 = vmul.f32 %v14756_v60, %v14755_v49  ;;  %v14762_v33 = vld [vmem:[#allocation212_spill] sm:$0xff]  ;;  %v14763_v31 = vld [vmem:[#allocation213_spill] sm:$0xff] }
 0x407   :  { %v2947_v27 = vadd.f32 %v2915_v16, %v2819_v4  ;;  %v1382_v59 = vmul.f32 %v14758_v47, %v14757_v32  ;;  %v1510_v44 = vmul.f32 %v14760_v37, %v14759_v41  ;;  %v1603_v45 = vrot.slane %v14761_v30, %v14718_v40 }
 0x408   :  { %v2564_v9 = vadd.f32 %v2532_v38, %v2436_v56  ;;  %v3044_v11 = vmul.f32 %v3007_v53, %v14649_v25  ;;  %v1797_v54 = vadd.f32 %v1765_v21, %v1669_v63  ;;  %v2021_v28 = vmul.f32 %v1983_v8, %v14762_v33 }
 0x409   :  { %v3075_v35 = vadd.f32 %v3043_v34, %v2947_v27  ;;  %v1414_v3 = vadd.f32 %v1382_v59, %v1254_v42  ;;  %v1638_v49 = vmul.f32 %v1603_v45, %v14744_v48  ;;  %v1731_v16 = vrot.slane %v14761_v30, %v14722_v23 }
 0x40a   :  { %v2692_v4 = vadd.f32 %v2660_v12, %v2564_v9  ;;  %v3172_v32 = vmul.f32 %v3135_v36, %v14577_v26  ;;  %v1925_v41 = vadd.f32 %v1893_v46, %v1797_v54  ;;  %v2149_v37 = vmul.f32 %v2111_v0, %v14763_v31 }
 0x40b   :  { %v3203_v40 = vadd.f32 %v3171_v22, %v3075_v35  ;;  %v1542_v38 = vadd.f32 %v1510_v44, %v1414_v3  ;;  %v1766_v56 = vmul.f32 %v1731_v16, %v14745_v1  ;;  %v1859_v8 = vrot.slane %v14761_v30, %v14724_v62 }
 0x40c   :  { %v2820_v27 = vadd.f32 %v2788_v57, %v2692_v4  ;;  %v2053_v34 = vadd.f32 %v2021_v28, %v1925_v41  ;;  %v2277_v63 = vmul.f32 %v2239_v7, %v14746_v43  ;;  %v2405_v21 = vmul.f32 %v2367_v29, %v9969_v17  ;;  %v8290_v29 = vld [vmem:[#allocation3 + $0xb8] sm:$0xff] }
 0x40d   :  { %v3235_v42 = vmul.f32 0.03125, %v3203_v40  ;;  %v1670_v12 = vadd.f32 %v1638_v49, %v1542_v38  ;;  %v1894_v9 = vmul.f32 %v1859_v8, %v9899_v18  ;;  %v1987_v0 = vrot.slane %v14761_v30, %v14727_v2 }
 0x40e   :  { %v2948_v22 = vadd.f32 %v2916_v50, %v2820_v27  ;;  %v2181_v46 = vadd.f32 %v2149_v37, %v2053_v34  ;;  %v2533_v59 = vmul.f32 %v2495_v6, %v9987_v15  ;;  %v2661_v44 = vmul.f32 %v2623_v51, %v14554_v55  ;;  %v14768_v34 = vld [vmem:[#allocation203_spill] sm:$0xff] }
 0x40f   :  { %3462 = vmatprep.mubr.f32.mxu0 %v3235_v42  ;;  %v2789_v57 = vmul.f32 %v2751_v10, %v14555_v14  ;;  %v1798_v41 = vadd.f32 %v1766_v56, %v1670_v12  ;;  %v2022_v7 = vmul.f32 %v1987_v0, %v9917_v5  ;;  %v2115_v40 = vrot.slane %v14761_v30, %v14725_v13  ;;  %v14764_v10 = vld [vmem:[#allocation180_spill] sm:$0xff] }
 0x410   :  { %3463 = vmatmul.mubr.f32.gmra.mrb[110].mxu0 %v8290_v29  ;;  %v3076_v49 = vadd.f32 %v3044_v11, %v2948_v22  ;;  %v2309_v54 = vadd.f32 %v2277_v63, %v2181_v46  ;;  %v2917_v50 = vmul.f32 %v2879_v39, %v14581_v52  ;;  %v3045_v37 = vmul.f32 %v3007_v53, %v14583_v58  ;;  %v14765_v11 = vld [vmem:[#allocation31_spill] sm:$0xff]  ;;  %v14771_v22 = vld [vmem:[#allocation186_spill] sm:$0xff]  ;;  %v14772_v29 = vld [vmem:[#allocation49_spill] sm:$0xff] }
 0x411   :  { %v3173_v6 = vmul.f32 %v3135_v36, %v14586_v19  ;;  %v1926_v51 = vadd.f32 %v1894_v9, %v1798_v41  ;;  %v2150_v28 = vmul.f32 %v2115_v40, %v9935_v61  ;;  %v2243_v35 = vrot.slane %v14764_v10, %v14728_v24  ;;  %v14766_v53 = vld [vmem:[#allocation215_spill] sm:$0xff]  ;;  %v14767_v36 = vld [vmem:[#allocation193_spill] sm:$0xff] }
 0x412   :  { %v3204_v3 = vadd.f32 %v3172_v32, %v3076_v49  ;;  %v2437_v4 = vadd.f32 %v2405_v21, %v2309_v54  ;;  %v10839_v30 = vrot.slane %v14764_v10, %v14730_v20  ;;  %v10843_v38 = vrot.slane %v14764_v10, %v14765_v11  ;;  %v14769_v21 = vld [vmem:[#allocation216_spill] sm:$0xff]  ;;  %v14770_v9 = vld [vmem:[#allocation205_spill] sm:$0xff]  ;;  %v14773_v54 = vld [vmem:[#allocation207_spill] sm:$0xff] }
 0x413   :  { %v2054_v39 = vadd.f32 %v2022_v7, %v1926_v51  ;;  %v2278_v56 = vmul.f32 %v2243_v35, %v14766_v53  ;;  %v1255_v27 = vmul.f32 %v14756_v60, %v14767_v36  ;;  %v1383_v63 = vmul.f32 %v14758_v47, %v14768_v34  ;;  %v14774_v36 = vld [vmem:[#allocation32_spill] sm:$0xff]  ;;  %v14780_v53 = vld [vmem:[#allocation194_spill] sm:$0xff] }
 0x414   :  { %v3236_v42 = vmul.f32 0.03125, %v3204_v3  ;;  %v2565_v32 = vadd.f32 %v2533_v59, %v2437_v4  ;;  %v2406_v12 = vmul.f32 %v10839_v30, %v14769_v21  ;;  %v1511_v46 = vmul.f32 %v14771_v22, %v14770_v9  ;;  %v8291_v4 = vld [vmem:[#allocation3 + $0xc0] sm:$0xff]  ;;  %v14777_v22 = vld [vmem:[#allocation38_spill] sm:$0xff] }
 0x415   :  { %v2182_v41 = vadd.f32 %v2150_v28, %v2054_v39  ;;  %v2534_v7 = vmul.f32 %v10843_v38, %v14772_v29  ;;  %v1415_v49 = vadd.f32 %v1383_v63, %v1255_v27  ;;  %v1639_v51 = vmul.f32 %v1603_v45, %v14773_v54  ;;  %v14775_v63 = vld [vmem:[#allocation209_spill] sm:$0xff]  ;;  %v14778_v9 = vld [vmem:[#allocation51_spill] sm:$0xff]  ;;  %v14781_v20 = vld [vmem:[#allocation188_spill] sm:$0xff] }
 0x416   :  { %3467 = vmatprep.mubr.f32.mxu0 %v3236_v42  ;;  %v2693_v60 = vadd.f32 %v2661_v44, %v2565_v32  ;;  %v2627_v47 = vrot.slane %v14764_v10, %v14774_v36  ;;  %v2755_v59 = vrot.slane %v14764_v10, %v14722_v23  ;;  %v2883_v3 = vrot.slane %v14764_v10, %v14724_v62  ;;  %v14776_v44 = vld [vmem:[#allocation43_spill] sm:$0xff] }
 0x417   :  { %3468 = vmatmul.mubr.f32.gmra.mrb[112].mxu0 %v8291_v4  ;;  %v2310_v28 = vadd.f32 %v2278_v56, %v2182_v41  ;;  %v3011_v39 = vrot.slane %v14764_v10, %v14727_v2  ;;  %v1543_v27 = vadd.f32 %v1511_v46, %v1415_v49  ;;  %v1767_v45 = vmul.f32 %v1731_v16, %v14775_v63  ;;  %v14779_v4 = vld [vmem:[#allocation211_spill] sm:$0xff]  ;;  %v14782_v49 = vld [vmem:[#allocation204_spill] sm:$0xff]  ;;  %v14783_v16 = vld [vmem:[#allocation190_spill] sm:$0xff] }
 0x418   :  { %v2821_v42 = vadd.f32 %v2789_v57, %v2693_v60  ;;  %v2662_v32 = vmul.f32 %v2627_v47, %v14776_v44  ;;  %v2790_v54 = vmul.f32 %v2755_v59, %v14777_v22  ;;  %v3139_v29 = vrot.slane %v14764_v10, %v14725_v13  ;;  %v14784_v60 = vld [vmem:[#allocation206_spill] sm:$0xff]  ;;  %v14785_v63 = vld [vmem:[#allocation191_spill] sm:$0xff] }
 0x419   :  { %v2438_v21 = vadd.f32 %v2406_v12, %v2310_v28  ;;  %v2918_v34 = vmul.f32 %v2883_v3, %v14778_v9  ;;  %v1671_v11 = vadd.f32 %v1639_v51, %v1543_v27  ;;  %v1895_v56 = vmul.f32 %v1859_v8, %v14779_v4  ;;  %v14786_v12 = vld [vmem:[#allocation176_spill] sm:$0xff] }
 0x41a   :  { %v2949_v41 = vadd.f32 %v2917_v50, %v2821_v42  ;;  %v1256_v46 = vmul.f32 %v14781_v20, %v14780_v53  ;;  %v1384_v57 = vmul.f32 %v14783_v16, %v14782_v49  ;;  %v1512_v44 = vmul.f32 %v14785_v63, %v14784_v60 }
 0x41b   :  { %v2566_v22 = vadd.f32 %v2534_v7, %v2438_v21  ;;  %v1799_v19 = vadd.f32 %v1767_v45, %v1671_v11  ;;  %v2023_v10 = vmul.f32 %v1987_v0, %v14762_v33  ;;  %v1607_v28 = vrot.slane %v14786_v12, %v14774_v36 }
 0x41c   :  { %v3077_v51 = vadd.f32 %v3045_v37, %v2949_v41  ;;  %v3046_v8 = vmul.f32 %v3011_v39, %v14649_v25  ;;  %v1416_v50 = vadd.f32 %v1384_v57, %v1256_v46  ;;  %v10884_v27 = vrot.slane %v14786_v12, %v14722_v23 }
 0x41d   :  { %v2694_v42 = vadd.f32 %v2662_v32, %v2566_v22  ;;  %v1927_v49 = vadd.f32 %v1895_v56, %v1799_v19  ;;  %v2151_v53 = vmul.f32 %v2115_v40, %v14763_v31  ;;  %v1640_v21 = vmul.f32 %v1607_v28, %v14744_v48 }
 0x41e   :  { %v3205_v11 = vadd.f32 %v3173_v6, %v3077_v51  ;;  %v1544_v7 = vadd.f32 %v1512_v44, %v1416_v50  ;;  %v1768_v0 = vmul.f32 %v10884_v27, %v14745_v1  ;;  %v1863_v37 = vrot.slane %v14786_v12, %v14724_v62  ;;  %v8292_v50 = vld [vmem:[#allocation3 + $0xc8] sm:$0xff] }
 0x41f   :  { %v2822_v45 = vadd.f32 %v2790_v54, %v2694_v42  ;;  %v3174_v41 = vmul.f32 %v3139_v29, %v14577_v26  ;;  %v2055_v46 = vadd.f32 %v2023_v10, %v1927_v49  ;;  %v2279_v57 = vmul.f32 %v2243_v35, %v14746_v43 }
 0x420   :  { %v3237_v32 = vmul.f32 0.03125, %v3205_v11  ;;  %v1672_v19 = vadd.f32 %v1640_v21, %v1544_v7  ;;  %v1896_v40 = vmul.f32 %v1863_v37, %v9899_v18  ;;  %v1991_v6 = vrot.slane %v14786_v12, %v14727_v2 }
 0x421   :  { %v2950_v44 = vadd.f32 %v2918_v34, %v2822_v45  ;;  %v2183_v22 = vadd.f32 %v2151_v53, %v2055_v46  ;;  %v2407_v56 = vmul.f32 %v10839_v30, %v9969_v17  ;;  %v2535_v54 = vmul.f32 %v10843_v38, %v9987_v15  ;;  %v14788_v46 = vld [vmem:[#allocation52_spill] sm:$0xff] }
 0x422   :  { %3472 = vmatprep.mubr.f32.mxu0 %v3237_v32  ;;  %v2663_v49 = vmul.f32 %v2627_v47, %v14554_v55  ;;  %v1800_v10 = vadd.f32 %v1768_v0, %v1672_v19  ;;  %v2024_v35 = vmul.f32 %v1991_v6, %v9917_v5  ;;  %v2119_v51 = vrot.slane %v14786_v12, %v14725_v13  ;;  %v14787_v47 = vld [vmem:[#allocation187_spill] sm:$0xff]  ;;  %v14789_v32 = vld [vmem:[#allocation30_spill] sm:$0xff] }
 0x423   :  { %3473 = vmatmul.mubr.f32.gmra.mrb[114].mxu0 %v8292_v50  ;;  %v3078_v42 = vadd.f32 %v3046_v8, %v2950_v44  ;;  %v2311_v34 = vadd.f32 %v2279_v57, %v2183_v22  ;;  %v2791_v53 = vmul.f32 %v2755_v59, %v14555_v14  ;;  %v2919_v30 = vmul.f32 %v2883_v3, %v14581_v52  ;;  %v14790_v19 = vld [vmem:[#allocation215_spill] sm:$0xff] }
 0x424   :  { %v3047_v21 = vmul.f32 %v3011_v39, %v14583_v58  ;;  %v1928_v38 = vadd.f32 %v1896_v40, %v1800_v10  ;;  %v2152_v11 = vmul.f32 %v2119_v51, %v9935_v61  ;;  %v2247_v7 = vrot.slane %v14787_v47, %v14728_v24  ;;  %v14791_v44 = vld [vmem:[#allocation31_spill] sm:$0xff]  ;;  %v14792_v39 = vld [vmem:[#allocation193_spill] sm:$0xff] }
 0x425   :  { %v3206_v0 = vadd.f32 %v3174_v41, %v3078_v42  ;;  %v2439_v45 = vadd.f32 %v2407_v56, %v2311_v34  ;;  %v3175_v12 = vmul.f32 %v3139_v29, %v14788_v46  ;;  %v2375_v8 = vrot.slane %v14787_v47, %v14789_v32  ;;  %v14793_v50 = vld [vmem:[#allocation203_spill] sm:$0xff]  ;;  %v14794_v56 = vld [vmem:[#allocation205_spill] sm:$0xff]  ;;  %v14795_v34 = vld [vmem:[#allocation216_spill] sm:$0xff] }
 0x426   :  { %v2056_v57 = vadd.f32 %v2024_v35, %v1928_v38  ;;  %v2280_v59 = vmul.f32 %v2247_v7, %v14790_v19  ;;  %v10917_v3 = vrot.slane %v14787_v47, %v14791_v44  ;;  %v1257_v40 = vmul.f32 %v14781_v20, %v14792_v39  ;;  %v14796_v38 = vld [vmem:[#allocation49_spill] sm:$0xff] }
 0x427   :  { %v3238_v22 = vmul.f32 0.03125, %v3206_v0  ;;  %v2567_v10 = vadd.f32 %v2535_v54, %v2439_v45  ;;  %v1385_v41 = vmul.f32 %v14783_v16, %v14793_v50  ;;  %v1513_v29 = vmul.f32 %v14785_v63, %v14794_v56  ;;  %v14797_v0 = vld [vmem:[#allocation207_spill] sm:$0xff]  ;;  %v8293_v63 = vld [vmem:[#allocation3 + $0xd0] sm:$0xff] }
 0x428   :  { %v2184_v42 = vadd.f32 %v2152_v11, %v2056_v57  ;;  %v2408_v35 = vmul.f32 %v2375_v8, %v14795_v34  ;;  %v2536_v46 = vmul.f32 %v10917_v3, %v14796_v38  ;;  %v10930_v58 = vrot.slane %v14787_v47, %v14774_v36  ;;  %v14798_v57 = vld [vmem:[#allocation43_spill] sm:$0xff]  ;;  %v14805_v50 = vld [vmem:[#allocation202_spill] sm:$0xff] }
 0x429   :  { %3477 = vmatprep.mubr.f32.mxu0 %v3238_v22  ;;  %v2695_v20 = vadd.f32 %v2663_v49, %v2567_v10  ;;  %v10934_v54 = vrot.slane %v14787_v47, %v14722_v23  ;;  %v1417_v16 = vadd.f32 %v1385_v41, %v1257_v40  ;;  %v1641_v45 = vmul.f32 %v1607_v28, %v14797_v0  ;;  %v14800_v10 = vld [vmem:[#allocation209_spill] sm:$0xff] }
 0x42a   :  { %3478 = vmatmul.mubr.f32.gmra.mrb[116].mxu0 %v8293_v63  ;;  %v2312_v11 = vadd.f32 %v2280_v59, %v2184_v42  ;;  %v2664_v52 = vmul.f32 %v10930_v58, %v14798_v57  ;;  %v10941_v38 = vrot.slane %v14787_v47, %v14724_v62  ;;  %v10945_v49 = vrot.slane %v14787_v47, %v14727_v2  ;;  %v14801_v42 = vld [vmem:[#allocation38_spill] sm:$0xff] }
 0x42b   :  { %v2823_v22 = vadd.f32 %v2791_v53, %v2695_v20  ;;  %v10949_v40 = vrot.slane %v14787_v47, %v14725_v13  ;;  %v1545_v28 = vadd.f32 %v1513_v29, %v1417_v16  ;;  %v1769_v59 = vmul.f32 %v10884_v27, %v14800_v10  ;;  %v14802_v53 = vld [vmem:[#allocation194_spill] sm:$0xff]  ;;  %v14803_v20 = vld [vmem:[#allocation201_spill] sm:$0xff]  ;;  %v14804_v47 = vld [vmem:[#allocation204_spill] sm:$0xff] }
 0x42c   :  { %14799 = vst [vmem:[#allocation62_spill] sm:$0xff] %v10941_v38  ;;  %v2440_v41 = vadd.f32 %v2408_v35, %v2312_v11  ;;  %v2792_v63 = vmul.f32 %v10934_v54, %v14801_v42  ;;  %v2920_v57 = vmul.f32 %v10941_v38, %v14778_v9  ;;  %v1897_v0 = vmul.f32 %v1863_v37, %v14779_v4  ;;  %v14806_v35 = vld [vmem:[#allocation46_spill] sm:$0xff]  ;;  %v14807_v42 = vld [vmem:[#allocation189_spill] sm:$0xff] }
 0x42d   :  { %v2951_v44 = vadd.f32 %v2919_v30, %v2823_v22  ;;  %v1673_v34 = vadd.f32 %v1641_v45, %v1545_v28  ;;  %v1258_v56 = vmul.f32 %v14803_v20, %v14802_v53  ;;  %v1386_v29 = vmul.f32 %v14805_v50, %v14804_v47  ;;  %v8294_v47 = vld [vmem:[#allocation3 + $0xd8] sm:$0xff] }
 0x42e   :  { %v2568_v16 = vadd.f32 %v2536_v46, %v2440_v41  ;;  %v2025_v27 = vmul.f32 %v1991_v6, %v14762_v33  ;;  %v1514_v11 = vmul.f32 %v14806_v35, %v14784_v60  ;;  %v1611_v10 = vrot.slane %v14807_v42, %v14774_v36 }
 0x42f   :  { %v3079_v9 = vadd.f32 %v3047_v21, %v2951_v44  ;;  %v1801_v38 = vadd.f32 %v1769_v59, %v1673_v34  ;;  %v1418_v37 = vadd.f32 %v1386_v29, %v1258_v56  ;;  %v10969_v30 = vrot.slane %v14807_v42, %v14722_v23 }
 0x430   :  { %v2696_v45 = vadd.f32 %v2664_v52, %v2568_v16  ;;  %v2153_v22 = vmul.f32 %v2119_v51, %v14763_v31  ;;  %v1642_v46 = vmul.f32 %v1611_v10, %v14744_v48  ;;  %v10975_v6 = vrot.slane %v14807_v42, %v14724_v62 }
 0x431   :  { %v3207_v60 = vadd.f32 %v3175_v12, %v3079_v9  ;;  %v1929_v28 = vadd.f32 %v1897_v0, %v1801_v38  ;;  %v1546_v41 = vadd.f32 %v1514_v11, %v1418_v37  ;;  %v1770_v21 = vmul.f32 %v10969_v30, %v14745_v1 }
 0x432   :  { %v2824_v44 = vadd.f32 %v2792_v63, %v2696_v45  ;;  %v3048_v56 = vmul.f32 %v10945_v49, %v14649_v25  ;;  %v2281_v52 = vmul.f32 %v2247_v7, %v14746_v43  ;;  %v10984_v51 = vrot.slane %v14807_v42, %v14727_v2 }
 0x433   :  { %v3239_v48 = vmul.f32 0.03125, %v3207_v60  ;;  %v2057_v34 = vadd.f32 %v2025_v27, %v1929_v28  ;;  %v1674_v59 = vadd.f32 %v1642_v46, %v1546_v41  ;;  %v1898_v9 = vmul.f32 %v10975_v6, %v9899_v18  ;;  %v14808_v27 = vld [vmem:[#allocation192_spill] sm:$0xff]  ;;  %v14809_v28 = vld [vmem:[#allocation203_spill] sm:$0xff] }
 0x434   :  { %v2952_v12 = vadd.f32 %v2920_v57, %v2824_v44  ;;  %v3176_v1 = vmul.f32 %v10949_v40, %v14577_v26  ;;  %v2409_v38 = vmul.f32 %v2375_v8, %v9969_v17  ;;  %v2026_v7 = vmul.f32 %v10984_v51, %v9917_v5 }
 0x435   :  { %3482 = vmatprep.mubr.f32.mxu0 %v3239_v48  ;;  %v2185_v0 = vadd.f32 %v2153_v22, %v2057_v34  ;;  %v1802_v63 = vadd.f32 %v1770_v21, %v1674_v59  ;;  %v10995_v53 = vrot.slane %v14807_v42, %v14725_v13  ;;  %v2537_v18 = vmul.f32 %v10917_v3, %v9987_v15  ;;  %v14813_v34 = vld [vmem:[#allocation44_spill] sm:$0xff]  ;;  %v14814_v59 = vld [vmem:[#allocation62_spill] sm:$0xff] }
 0x436   :  { %3483 = vmatmul.mubr.f32.gmra.mrb[118].mxu0 %v8294_v47  ;;  %v3080_v29 = vadd.f32 %v3048_v56, %v2952_v12  ;;  %v11003_v11 = vrot.slane %v14808_v27, %v14728_v24  ;;  %v2665_v42 = vmul.f32 %v10930_v58, %v14554_v55  ;;  %v2793_v37 = vmul.f32 %v10934_v54, %v14555_v14  ;;  %v14810_v58 = vld [vmem:[#allocation205_spill] sm:$0xff]  ;;  %v14811_v56 = vld [vmem:[#allocation216_spill] sm:$0xff]  ;;  %v14816_v12 = vld [vmem:[#allocation207_spill] sm:$0xff] }
 0x437   :  { %v2313_v57 = vadd.f32 %v2281_v52, %v2185_v0  ;;  %v1930_v16 = vadd.f32 %v1898_v9, %v1802_v63  ;;  %v2154_v8 = vmul.f32 %v10995_v53, %v9935_v61  ;;  %v11013_v46 = vrot.slane %v14808_v27, %v14789_v32 }
 0x438   :  { %v3208_v5 = vadd.f32 %v3176_v1, %v3080_v29  ;;  %v2282_v3 = vmul.f32 %v11003_v11, %v14790_v19  ;;  %v1259_v60 = vmul.f32 %v14803_v20, %v14792_v39  ;;  %v1387_v41 = vmul.f32 %v14805_v50, %v14809_v28  ;;  %v14812_v19 = vld [vmem:[#allocation31_spill] sm:$0xff] }
 0x439   :  { %v2441_v45 = vadd.f32 %v2409_v38, %v2313_v57  ;;  %v2058_v22 = vadd.f32 %v2026_v7, %v1930_v16  ;;  %v1515_v21 = vmul.f32 %v14806_v35, %v14810_v58  ;;  %v2410_v52 = vmul.f32 %v11013_v46, %v14811_v56  ;;  %v14815_v39 = vld [vmem:[#allocation39_spill] sm:$0xff]  ;;  %v3509_v35 = vld [vmem:[#allocation12 + $0x8] sm:$0xff]  ;;  %v3510_v16 = vld [vmem:[#allocation12 + $0x10] sm:$0xff] }
 0x43a   :  { %v3240_v61 = vmul.f32 0.03125, %v3208_v5  ;;  %v11025_v48 = vrot.slane %v14808_v27, %v14812_v19  ;;  %v2921_v9 = vmul.f32 %v14814_v59, %v14813_v34  ;;  %v3049_v20 = vmul.f32 %v10945_v49, %v14815_v39  ;;  %v8295_v38 = vld [vmem:[#allocation3 + $0xe0] sm:$0xff]  ;;  %v14817_v7 = vld [vmem:[#allocation49_spill] sm:$0xff] }
 0x43b   :  { %v2569_v54 = vadd.f32 %v2537_v18, %v2441_v45  ;;  %v2186_v44 = vadd.f32 %v2154_v8, %v2058_v22  ;;  %v1419_v50 = vadd.f32 %v1387_v41, %v1259_v60  ;;  %v1643_v1 = vmul.f32 %v1611_v10, %v14816_v12  ;;  %v3511_v18 = vld [vmem:[#allocation12 + $0x18] sm:$0xff]  ;;  %v3508_v57 = vld [vmem:[#allocation12] sm:$0xff]  ;;  %v3513_v22 = vld [vmem:[#allocation12 + $0x28] sm:$0xff] }
 0x43c   :  { %3487 = vmatprep.mubr.f32.mxu0 %v3240_v61  ;;  %v2538_v47 = vmul.f32 %v11025_v48, %v14817_v7  ;;  %v11036_v29 = vrot.slane %v14808_v27, %v14774_v36  ;;  %v14818_v8 = vld [vmem:[#allocation52_spill] sm:$0xff]  ;;  %v11042_v10 = vrot.slane %v14808_v27, %v14722_v23  ;;  %v14820_v41 = vld [vmem:[#allocation43_spill] sm:$0xff]  ;;  %v8039_v56 = vpack.c.bf16 %v3511_v18, %v3509_v35 }
 0x43d   :  { %3488 = vmatmul.mubr.f32.gmra.mrb[120].mxu0 %v8295_v38  ;;  %v2697_v0 = vadd.f32 %v2665_v42, %v2569_v54  ;;  %v2314_v63 = vadd.f32 %v2282_v3, %v2186_v44  ;;  %v3177_v49 = vmul.f32 %v10949_v40, %v14818_v8  ;;  %v1547_v5 = vadd.f32 %v1515_v21, %v1419_v50  ;;  %v14819_v42 = vld [vmem:[#allocation209_spill] sm:$0xff]  ;;  %v3515_v3 = vld [vmem:[#allocation12 + $0x38] sm:$0xff]  ;;  %v11046_v61 = vpop.f32.mrb[64].mxu0  ;;  %v3512_v59 = vld [vmem:[#allocation12 + $0x20] sm:$0xff] }
 0x43e   :  { %v1771_v45 = vmul.f32 %v10969_v30, %v14819_v42  ;;  %v2666_v58 = vmul.f32 %v11036_v29, %v14820_v41  ;;  %v11052_v40 = vrot.slane %v14808_v27, %v14724_v62  ;;  %v3351_v54 = vpop.f32.mrb[65].mxu0  ;;  %v1899_v21 = vmul.f32 %v10975_v6, %v14779_v4  ;;  %v3514_v50 = vld [vmem:[#allocation12 + $0x30] sm:$0xff]  ;;  %v3519_v7 = vld [vmem:[#allocation12 + $0x58] sm:$0xff]  ;;  %8040 = vmatprep.subr.bf16.mxu1 %v8039_v56  ;;  %v3521_v41 = vld [vmem:[#allocation12 + $0x68] sm:$0xff] }
 0x43f   :  { %v2825_v60 = vadd.f32 %v2793_v37, %v2697_v0  ;;  %v2442_v28 = vadd.f32 %v2410_v52, %v2314_v63  ;;  %v1675_v44 = vadd.f32 %v1643_v1, %v1547_v5  ;;  %v8041_v30 = vpack.c.bf16 %v3510_v16, %v3508_v57  ;;  %v14821_v37 = vld [vmem:[#allocation38_spill] sm:$0xff]  ;;  %v3517_v63 = vld [vmem:[#allocation12 + $0x48] sm:$0xff] }
 0x440   :  { %v2794_v52 = vmul.f32 %v11042_v10, %v14821_v37  ;;  %v8043_v0 = vpack.c.bf16 %v3515_v3, %v3513_v22  ;;  %v11060_v42 = vrot.slane %v14808_v27, %v14727_v2  ;;  %v2027_v4 = vmul.f32 %v10984_v51, %v14762_v33  ;;  %v3516_v3 = vld [vmem:[#allocation12 + $0x40] sm:$0xff]  ;;  %v8296_v37 = vld [vmem:[#allocation3 + $0xe8] sm:$0xff] }
 0x441   :  { %v2953_v12 = vadd.f32 %v2921_v9, %v2825_v60  ;;  %v2570_v38 = vadd.f32 %v2538_v47, %v2442_v28  ;;  %v1803_v1 = vadd.f32 %v1771_v45, %v1675_v44  ;;  %v11064_v6 = vpop.f32.mrb[66].mxu0  ;;  %v14822_v47 = vld [vmem:[#allocation51_spill] sm:$0xff]  ;;  %8042 = vmatpush1.bf16.msra.mxu1 %v8041_v30  ;;  %v8045_v57 = vpack.c.bf16 %v3514_v50, %v3512_v59  ;;  %v3518_v60 = vld [vmem:[#allocation12 + $0x50] sm:$0xff] }
 0x442   :  { %v2922_v18 = vmul.f32 %v11052_v40, %v14822_v47  ;;  %v3356_v16 = vpop.f32.mrb[67].mxu0  ;;  %v2155_v22 = vmul.f32 %v10995_v53, %v14763_v31  ;;  %8044 = vmatprep.subr.bf16.mxu1 %v8043_v0  ;;  %v8047_v45 = vpack.c.bf16 %v3519_v7, %v3517_v63  ;;  %v11074_v28 = vrot.slane %v14808_v27, %v14725_v13  ;;  %v3520_v50 = vld [vmem:[#allocation12 + $0x60] sm:$0xff] }
 0x443   :  { %v3081_v35 = vadd.f32 %v3049_v20, %v2953_v12  ;;  %v2698_v9 = vadd.f32 %v2666_v58, %v2570_v38  ;;  %v1931_v5 = vadd.f32 %v1899_v21, %v1803_v1  ;;  %v3050_v20 = vmul.f32 %v11060_v42, %v14649_v25  ;;  %v3523_v58 = vld [vmem:[#allocation12 + $0x78] sm:$0xff]  ;;  %v3522_v12 = vld [vmem:[#allocation12 + $0x70] sm:$0xff] }
 0x444   :  { %v2283_v44 = vmul.f32 %v11003_v11, %v14746_v43  ;;  %v8049_v56 = vpack.c.bf16 %v3518_v60, %v3516_v3  ;;  %v2411_v27 = vmul.f32 %v11013_v46, %v9969_v17  ;;  %v8051_v59 = vpack.c.bf16 %v3523_v58, %v3521_v41  ;;  %v3525_v11 = vld [vmem:[#allocation12 + $0x88] sm:$0xff]  ;;  %v3527_v38 = vld [vmem:[#allocation12 + $0x98] sm:$0xff]  ;;  %v3528_v60 = vld [vmem:[#allocation12 + $0xa0] sm:$0xff] }
 0x445   :  { %v3209_v33 = vadd.f32 %v3177_v49, %v3081_v35  ;;  %v2826_v51 = vadd.f32 %v2794_v52, %v2698_v9  ;;  %v2059_v54 = vadd.f32 %v2027_v4, %v1931_v5  ;;  %v11078_v31 = vpop.f32.mrb[68].mxu0  ;;  %v3178_v49 = vmul.f32 %v11074_v28, %v14577_v26  ;;  %8046 = vmatpush1.bf16.msra.mxu1 %v8045_v57  ;;  %v3524_v35 = vld [vmem:[#allocation12 + $0x80] sm:$0xff]  ;;  %v3526_v9 = vld [vmem:[#allocation12 + $0x90] sm:$0xff]  ;;  %v3531_v57 = vld [vmem:[#allocation12 + $0xb8] sm:$0xff] }
 0x446   :  { %v3361_v25 = vpop.f32.mrb[69].mxu0  ;;  %8048 = vmatprep.subr.bf16.mxu1 %v8047_v45  ;;  %v2539_v26 = vmul.f32 %v11025_v48, %v9987_v15  ;;  %v8053_v7 = vpack.c.bf16 %v3522_v12, %v3520_v50  ;;  %v2667_v1 = vmul.f32 %v11036_v29, %v14554_v55  ;;  %v8055_v4 = vpack.c.bf16 %v3527_v38, %v3525_v11  ;;  %v8297_v45 = vld [vmem:[#allocation3 + $0xf0] sm:$0xff] }
 0x447   :  { %v3241_v53 = vmul.f32 0.03125, %v3209_v33  ;;  %v2954_v21 = vadd.f32 %v2922_v18, %v2826_v51  ;;  %v2187_v30 = vadd.f32 %v2155_v22, %v2059_v54  ;;  %v3529_v18 = vld [vmem:[#allocation12 + $0xa8] sm:$0xff]  ;;  %v2795_v15 = vmul.f32 %v11042_v10, %v14555_v14  ;;  %v3530_v33 = vld [vmem:[#allocation12 + $0xb0] sm:$0xff] }
 0x448   :  { %v8057_v5 = vpack.c.bf16 %v3526_v9, %v3524_v35  ;;  %v2923_v29 = vmul.f32 %v11052_v40, %v14813_v34  ;;  %v8059_v3 = vpack.c.bf16 %v3531_v57, %v3529_v18  ;;  %v3533_v51 = vld [vmem:[#allocation12 + $0xc8] sm:$0xff]  ;;  %v3051_v14 = vmul.f32 %v11060_v42, %v14815_v39  ;;  %v3532_v40 = vld [vmem:[#allocation12 + $0xc0] sm:$0xff] }
 0x449   :  { %3492 = vmatprep.mubr.f32.mxu0 %v3241_v53  ;;  %v3082_v43 = vadd.f32 %v3050_v20, %v2954_v21  ;;  %v2315_v52 = vadd.f32 %v2283_v44, %v2187_v30  ;;  %v11086_v0 = vpop.f32.mrb[70].mxu0  ;;  %8050 = vmatpush1.bf16.msra.mxu1 %v8049_v56  ;;  %v3535_v20 = vld [vmem:[#allocation12 + $0xd8] sm:$0xff]  ;;  %v8061_v58 = vpack.c.bf16 %v3530_v33, %v3528_v60  ;;  %v3534_v21 = vld [vmem:[#allocation12 + $0xd0] sm:$0xff]  ;;  %v3536_v42 = vld [vmem:[#allocation12 + $0xe0] sm:$0xff] }
 0x44a   :  { %3493 = vmatmul.mubr.f32.gmra.mrb[122].mxu0 %v8296_v37  ;;  %v3366_v17 = vpop.f32.mrb[71].mxu0  ;;  %8052 = vmatprep.subr.bf16.mxu1 %v8051_v59  ;;  %v3179_v53 = vmul.f32 %v11074_v28, %v14818_v8  ;;  %v8063_v34 = vpack.c.bf16 %v3535_v20, %v3533_v51  ;;  %v3539_v56 = vld [vmem:[#allocation12 + $0xf8] sm:$0xff]  ;;  %v8065_v30 = vpack.c.bf16 %v3534_v21, %v3532_v40  ;;  %v3538_v59 = vld [vmem:[#allocation12 + $0xf0] sm:$0xff]  ;;  %v3890_v21 = vld [vmem:[#allocation15] sm:$0xff] }
 0x44b   :  { %v3210_v63 = vadd.f32 %v3178_v49, %v3082_v43  ;;  %v2443_v46 = vadd.f32 %v2411_v27, %v2315_v52  ;;  %v3537_v49 = vld [vmem:[#allocation12 + $0xe8] sm:$0xff]  ;;  %v8069_v11 = vpack.c.bf16 %v3538_v59, %v3536_v42  ;;  %v11103_v8 = vld [vmem:[%s13741_s8] ss:$0 sm:$0xff] }
 0x44c   :  { %v8067_v39 = vpack.c.bf16 %v3539_v56, %v3537_v49  ;;  %v8298_v28 = vld [vmem:[#allocation3 + $0xf8] sm:$0xff]  ;;  %v11107_v38 = vadd.f32 %v11103_v8, %v11046_v61  ;;  %v11112_v37 = vadd.f32 %v11103_v8, %v11064_v6  ;;  %v11124_v6 = vadd.f32 %v11103_v8, %v11086_v0  ;;  %v3891_v49 = vld [vmem:[#allocation15 + $0x8] sm:$0xff]  ;;  %v3892_v56 = vld [vmem:[#allocation15 + $0x10] sm:$0xff] }
 0x44d   :  { %v3242_v47 = vmul.f32 0.03125, %v3210_v63  ;;  %v2571_v16 = vadd.f32 %v2539_v26, %v2443_v46  ;;  %v11092_v48 = vpop.f32.mrb[72].mxu0  ;;  %8054 = vmatpush1.bf16.msra.mxu1 %v8053_v7  ;;  %v14825_v26 = vmov 0.0   ;;  %v11118_v7 = vadd.f32 %v11103_v8, %v11078_v31 }
 0x44e   :  { %v3371_v22 = vpop.f32.mrb[73].mxu0  ;;  %8056 = vmatprep.subr.bf16.mxu1 %v8055_v4  ;;  %14823 = vst [vmem:[#allocation63_spill] sm:$0xff] %v11107_v38  ;;  %14824 = vst [vmem:[#allocation64_spill] sm:$0xff] %v11112_v37  ;;  %v11130_v31 = vadd.f32 %v11103_v8, %v11092_v48 }
 0x44f   :  { %3497 = vmatprep.mubr.f32.mxu0 %v3242_v47  ;;  %v2699_v55 = vadd.f32 %v2667_v1, %v2571_v16  ;;  %14826 = vst [vmem:[#allocation75_spill] sm:$0xff] %v11118_v7  ;;  %14827 = vst [vmem:[#allocation65_spill] sm:$0xff] %v11124_v6 }
 0x450   :  { %3498 = vmatmul.mubr.f32.gmra.mrb[124].mxu0 %v8297_v45  ;;  %14828 = vst [vmem:[#allocation91_spill] sm:$0xff] %v11130_v31 }
 0x451   :  { %v2827_v41 = vadd.f32 %v2795_v15, %v2699_v55  ;;  %v3374_v10 = vpop.f32.mrb[74].mxu0  ;;  %8058 = vmatpush1.bf16.msra.mxu1 %v8057_v5 }
 0x452   :  { %v3376_v54 = vpop.f32.mrb[75].mxu0  ;;  %8060 = vmatprep.subr.bf16.mxu1 %v8059_v3  ;;  %v11135_v4 = vadd.f32 %v11103_v8, %v3374_v10 }
 0x453   :  { %v2955_v44 = vadd.f32 %v2923_v29, %v2827_v41 }
 0x454   :  { %14829 = vst [vmem:[#allocation66_spill] sm:$0xff] %v11135_v4 }
 0x455   :  { %v3083_v25 = vadd.f32 %v3051_v14, %v2955_v44  ;;  %8062 = vmatpush1.bf16.msra.mxu1 %v8061_v58 }
 0x456   :  { %8064 = vmatprep.subr.bf16.mxu1 %v8063_v34 }
 0x457   :  { %v3211_v27 = vadd.f32 %v3179_v53, %v3083_v25  ;;  %v8103_v25 = vpack.c.bf16 %v3891_v49, %v3890_v21  ;;  %v3883_v21 = vld [vmem:[#allocation14 + $0x50] sm:$0xff]  ;;  %v3884_v49 = vld [vmem:[#allocation14 + $0x58] sm:$0xff] }
 0x459   :  { %v3379_v50 = vpop.f32.mrb[76].mxu0  ;;  %v3243_v12 = vmul.f32 0.03125, %v3211_v27  ;;  %8066 = vmatpush1.bf16.msra.mxu1 %v8065_v30  ;;  %v3893_v30 = vld [vmem:[#allocation15 + $0x18] sm:$0xff]  ;;  %v3873_v27 = vld [vmem:[#allocation14] sm:$0xff] }
 0x45a   :  { %v3381_v43 = vpop.f32.mrb[77].mxu0  ;;  %8068 = vmatprep.subr.bf16.mxu1 %v8067_v39  ;;  %v11140_v9 = vadd.f32 %v11103_v8, %v3379_v50  ;;  %v3874_v39 = vld [vmem:[#allocation14 + $0x8] sm:$0xff]  ;;  %v8107_v42 = vpack.c.bf16 %v3893_v30, %v3892_v56  ;;  %v3894_v50 = vld [vmem:[#allocation15 + $0x20] sm:$0xff]  ;;  %v3900_v56 = vld [vmem:[#allocation15 + $0x50] sm:$0xff] }
 0x45b   :  { %3502 = vmatprep.mubr.f32.mxu0 %v3243_v12  ;;  %v8071_v59 = vpack.c.bf16 %v3874_v39, %v3873_v27  ;;  %v3895_v12 = vld [vmem:[#allocation15 + $0x28] sm:$0xff]  ;;  %v3875_v43 = vld [vmem:[#allocation14 + $0x10] sm:$0xff]  ;;  %v8091_v27 = vpack.c.bf16 %v3884_v49, %v3883_v21  ;;  %v3902_v39 = vld [vmem:[#allocation15 + $0x60] sm:$0xff] }
 0x45c   :  { %3503 = vmatmul.mubr.f32.gmra.mrb[126].mxu0 %v8298_v28  ;;  %14830 = vst [vmem:[#allocation56_spill] sm:$0xff] %v11140_v9  ;;  %v3876_v28 = vld [vmem:[#allocation14 + $0x18] sm:$0xff] }
 0x45d   :  { %8070 = vmatpush1.bf16.msra.mxu1 %v8069_v11  ;;  %8072 = vmatprep.subr.bf16.mxu0 %v8071_v59 }
 0x45e   :  { %8104 = vmatprep.subr.bf16.mxu1 %v8103_v25  ;;  %8074 = vmatpush3.bf16.msra.mxu0 %v8071_v59 }
 0x460   :  { %3617 = vmatmul.mubr.f32.vlgmr.msra.gmra.mrb[64].mxu1 %v11107_v38 }
 0x461   :  { %3622 = vmatprep.mubr.f32.mxu1 %v14825_v26  ;;  %8106 = vmatpush3.bf16.msra.mxu1 %v8103_v25  ;;  %v3901_v25 = vld [vmem:[#allocation15 + $0x58] sm:$0xff] }
 0x462   :  { %v3384_v52 = vpop.f32.mrb[78].mxu0  ;;  %8108 = vmatprep.subr.bf16.mxu1 %v8107_v42 }
 0x463   :  { %v3386_v63 = vpop.f32.mrb[79].mxu0  ;;  %v11145_v47 = vadd.f32 %v11103_v8, %v3384_v52  ;;  %v3877_v52 = vld [vmem:[#allocation14 + $0x20] sm:$0xff] }
 0x464   :  { %3623 = vmatmul.mubr.f32.gmra.mrb[66].mxu1 %v11112_v37  ;;  %v3878_v63 = vld [vmem:[#allocation14 + $0x28] sm:$0xff] }
 0x465   :  { %3628 = vmatprep.mubr.f32.mxu1 %v14825_v26  ;;  %14831 = vst [vmem:[#allocation57_spill] sm:$0xff] %v11145_v47  ;;  %8110 = vmatpush3.bf16.msra.mxu1 %v8107_v42  ;;  %v3903_v42 = vld [vmem:[#allocation15 + $0x68] sm:$0xff] }
 0x467   :  { %v3389_v61 = vpop.f32.mrb[80].mxu0 }
 0x468   :  { %v3391_v17 = vpop.f32.mrb[81].mxu0  ;;  %3629 = vmatmul.mubr.f32.gmra.mrb[68].mxu1 %v11118_v7  ;;  %v11150_v57 = vadd.f32 %v11103_v8, %v3389_v61 }
 0x469   :  { %3634 = vmatprep.mubr.f32.mxu1 %v14825_v26 }
 0x46a   :  { %14832 = vst [vmem:[#allocation58_spill] sm:$0xff] %v11150_v57 }
 0x46c   :  { %v3394_v46 = vpop.f32.mrb[82].mxu0  ;;  %3635 = vmatmul.mubr.f32.gmra.mrb[70].mxu1 %v11124_v6 }
 0x46d   :  { %v3396_v1 = vpop.f32.mrb[83].mxu0  ;;  %3640 = vmatprep.mubr.f32.mxu1 %v14825_v26  ;;  %v11155_v15 = vadd.f32 %v11103_v8, %v3394_v46  ;;  %v8075_v46 = vpack.c.bf16 %v3876_v28, %v3875_v43  ;;  %v3885_v43 = vld [vmem:[#allocation14 + $0x60] sm:$0xff]  ;;  %v8127_v28 = vpack.c.bf16 %v3903_v42, %v3902_v39 }
 0x46e   :  { %v8111_v1 = vpack.c.bf16 %v3895_v12, %v3894_v50  ;;  %v8123_v12 = vpack.c.bf16 %v3901_v25, %v3900_v56 }
 0x46f   :  { %14833 = vst [vmem:[#allocation59_spill] sm:$0xff] %v11155_v15  ;;  %8076 = vmatprep.subr.bf16.mxu0 %v8075_v46 }
 0x470   :  { %3641 = vmatmul.mubr.f32.gmra.mrb[72].mxu1 %v11130_v31  ;;  %8112 = vmatprep.subr.bf16.mxu1 %v8111_v1 }
 0x471   :  { %3646 = vmatprep.mubr.f32.mxu1 %v14825_v26  ;;  %8078 = vmatpush3.bf16.msra.mxu0 %v8075_v46  ;;  %v3904_v46 = vld [vmem:[#allocation15 + $0x70] sm:$0xff] }
 0x472   :  { %8114 = vmatpush3.bf16.msra.mxu1 %v8111_v1  ;;  %v3905_v1 = vld [vmem:[#allocation15 + $0x78] sm:$0xff] }
 0x474   :  { %v3399_v0 = vpop.f32.mrb[84].mxu0  ;;  %3647 = vmatmul.mubr.f32.gmra.mrb[74].mxu1 %v11135_v4 }
 0x475   :  { %v3401_v35 = vpop.f32.mrb[85].mxu0  ;;  %3652 = vmatprep.mubr.f32.mxu1 %v14825_v26  ;;  %v11160_v48 = vadd.f32 %v11103_v8, %v3399_v0  ;;  %v8079_v0 = vpack.c.bf16 %v3878_v63, %v3877_v52  ;;  %v3887_v63 = vld [vmem:[#allocation14 + $0x70] sm:$0xff] }
 0x476   :  { %v3879_v35 = vld [vmem:[#allocation14 + $0x30] sm:$0xff] }
 0x477   :  { %14834 = vst [vmem:[#allocation67_spill] sm:$0xff] %v11160_v48  ;;  %8080 = vmatprep.subr.bf16.mxu0 %v8079_v0 }
 0x478   :  { %3653 = vmatmul.mubr.f32.gmra.mrb[76].mxu1 %v11140_v9  ;;  %8082 = vmatpush3.bf16.msra.mxu0 %v8079_v0 }
 0x479   :  { %3658 = vmatprep.mubr.f32.mxu1 %v14825_v26 }
 0x47c   :  { %3659 = vmatmul.mubr.f32.gmra.mrb[78].mxu1 %v11145_v47 }
 0x47d   :  { %v3404_v18 = vpop.f32.mrb[86].mxu0  ;;  %3664 = vmatprep.mubr.f32.mxu1 %v14825_v26 }
 0x47e   :  { %v3406_v16 = vpop.f32.mrb[87].mxu0  ;;  %v11165_v45 = vadd.f32 %v11103_v8, %v3404_v18  ;;  %v3880_v18 = vld [vmem:[#allocation14 + $0x38] sm:$0xff] }
 0x47f   :  { %v3896_v16 = vld [vmem:[#allocation15 + $0x30] sm:$0xff] }
 0x480   :  { %3665 = vmatmul.mubr.f32.gmra.mrb[80].mxu1 %v11150_v57  ;;  %14835 = vst [vmem:[#allocation68_spill] sm:$0xff] %v11165_v45 }
 0x481   :  { %3670 = vmatprep.mubr.f32.mxu1 %v14825_v26 }
 0x484   :  { %3671 = vmatmul.mubr.f32.gmra.mrb[82].mxu1 %v11155_v15 }
 0x485   :  { %3676 = vmatprep.mubr.f32.mxu1 %v14825_v26 }
 0x486   :  { %v3409_v5 = vpop.f32.mrb[88].mxu0 }
 0x487   :  { %v3411_v22 = vpop.f32.mrb[89].mxu0  ;;  %v11170_v55 = vadd.f32 %v11103_v8, %v3409_v5  ;;  %v3897_v5 = vld [vmem:[#allocation15 + $0x38] sm:$0xff] }
 0x488   :  { %3677 = vmatmul.mubr.f32.gmra.mrb[84].mxu1 %v11160_v48  ;;  %v6537_v48 = vld [vmem:[#allocation17 + $0xc0] sm:$0xff] }
 0x489   :  { %3682 = vmatprep.mubr.f32.mxu1 %v14825_v26  ;;  %14836 = vst [vmem:[#allocation69_spill] sm:$0xff] %v11170_v55 }
 0x48c   :  { %3683 = vmatmul.mubr.f32.gmra.mrb[86].mxu1 %v11165_v45  ;;  %v6536_v45 = vld [vmem:[#allocation17 + $0xb8] sm:$0xff] }
 0x48d   :  { %3688 = vmatprep.mubr.f32.mxu1 %v14825_v26 }
 0x48e   :  { %v3414_v29 = vpop.f32.mrb[90].mxu0 }
 0x48f   :  { %v3416_v3 = vpop.f32.mrb[91].mxu0  ;;  %v11175_v60 = vadd.f32 %v11103_v8, %v3414_v29  ;;  %v8083_v29 = vpack.c.bf16 %v3880_v18, %v3879_v35 }
 0x490   :  { %3689 = vmatmul.mubr.f32.gmra.mrb[88].mxu1 %v11170_v55  ;;  %v3898_v3 = vld [vmem:[#allocation15 + $0x40] sm:$0xff]  ;;  %v6535_v55 = vld [vmem:[#allocation17 + $0xb0] sm:$0xff] }
 0x491   :  { %14837 = vst [vmem:[#allocation70_spill] sm:$0xff] %v11175_v60  ;;  %3694 = vmatprep.mubr.f32.mxu1 %v14825_v26  ;;  %8084 = vmatprep.subr.bf16.mxu0 %v8083_v29 }
 0x492   :  { %8086 = vmatpush3.bf16.msra.mxu0 %v8083_v29 }
 0x494   :  { %3695 = vmatmul.mubr.f32.gmra.mrb[90].mxu1 %v11175_v60 }
 0x495   :  { %v3419_v33 = vpop.f32.mrb[92].mxu0  ;;  %3700 = vmatprep.mubr.f32.mxu1 %v14825_v26 }
 0x496   :  { %v11180_v51 = vadd.f32 %v11103_v8, %v3419_v33  ;;  %v3421_v20 = vpop.f32.mrb[93].mxu0  ;;  %v3899_v33 = vld [vmem:[#allocation15 + $0x48] sm:$0xff] }
 0x498   :  { %14838 = vst [vmem:[#allocation76_spill] sm:$0xff] %v11180_v51  ;;  %3701 = vmatmul.mubr.f32.gmra.mrb[92].mxu1 %v11180_v51 }
 0x499   :  { %3706 = vmatprep.mubr.f32.mxu1 %v14825_v26 }
 0x49d   :  { %v3424_v41 = vpop.f32.mrb[94].mxu0 }
 0x49e   :  { %v11186_v14 = vadd.f32 %v11103_v8, %v3424_v41  ;;  %v3426_v10 = vpop.f32.mrb[95].mxu0 }
 0x49f   :  { %v8115_v10 = vpack.c.bf16 %v3897_v5, %v3896_v16  ;;  %v8131_v5 = vpack.c.bf16 %v3905_v1, %v3904_v46 }
 0x4a0   :  { %14839 = vst [vmem:[#allocation77_spill] sm:$0xff] %v11186_v14  ;;  %3707 = vmatmul.mubr.f32.gmra.mrb[94].mxu1 %v11186_v14 }
 0x4a1   :  { %3712 = vmatprep.mubr.f32.mxu1 %v14825_v26  ;;  %8116 = vmatprep.subr.bf16.mxu1 %v8115_v10 }
 0x4a2   :  { %8118 = vmatpush3.bf16.msra.mxu1 %v8115_v10 }
 0x4a5   :  { %v3429_v58 = vpop.f32.mrb[96].mxu0 }
 0x4a6   :  { %v11191_v54 = vadd.f32 %v11103_v8, %v3429_v58  ;;  %v3431_v44 = vpop.f32.mrb[97].mxu0  ;;  %v3881_v58 = vld [vmem:[#allocation14 + $0x40] sm:$0xff] }
 0x4a7   :  { %v3882_v44 = vld [vmem:[#allocation14 + $0x48] sm:$0xff] }
 0x4a8   :  { %14840 = vst [vmem:[#allocation78_spill] sm:$0xff] %v11191_v54  ;;  %3713 = vmatmul.mubr.f32.gmra.mrb[96].mxu1 %v11191_v54 }
 0x4a9   :  { %3718 = vmatprep.mubr.f32.mxu1 %v14825_v26 }
 0x4ae   :  { %v3434_v53 = vpop.f32.mrb[98].mxu0 }
 0x4af   :  { %v11196_v34 = vadd.f32 %v11103_v8, %v3434_v53  ;;  %v3436_v40 = vpop.f32.mrb[99].mxu0  ;;  %v8119_v53 = vpack.c.bf16 %v3899_v33, %v3898_v3 }
 0x4b0   :  { %v8087_v40 = vpack.c.bf16 %v3882_v44, %v3881_v58 }
 0x4b1   :  { %14841 = vst [vmem:[#allocation37_spill] sm:$0xff] %v11196_v34  ;;  %3719 = vmatmul.mubr.f32.gmra.mrb[98].mxu1 %v11196_v34  ;;  %8120 = vmatprep.subr.bf16.mxu1 %v8119_v53 }
 0x4b2   :  { %3724 = vmatprep.mubr.f32.mxu1 %v14825_v26  ;;  %8088 = vmatprep.subr.bf16.mxu0 %v8087_v40 }
 0x4b3   :  { %8122 = vmatpush3.bf16.msra.mxu1 %v8119_v53  ;;  %8090 = vmatpush3.bf16.msra.mxu0 %v8087_v40 }
 0x4b4   :  { %8092 = vmatprep.subr.bf16.mxu0 %v8091_v27  ;;  %8124 = vmatprep.subr.bf16.mxu1 %v8123_v12 }
 0x4b6   :  { %v3439_v11 = vpop.f32.mrb[100].mxu0 }
 0x4b7   :  { %v11201_v61 = vadd.f32 %v11103_v8, %v3439_v11  ;;  %v3441_v17 = vpop.f32.mrb[101].mxu0  ;;  %v3886_v11 = vld [vmem:[#allocation14 + $0x68] sm:$0xff]  ;;  %8126 = vmatpush3.bf16.msra.mxu1 %v8123_v12  ;;  %8094 = vmatpush3.bf16.msra.mxu0 %v8091_v27 }
 0x4b8   :  { %v8095_v52 = vpack.c.bf16 %v3886_v11, %v3885_v43  ;;  %v3888_v17 = vld [vmem:[#allocation14 + $0x78] sm:$0xff]  ;;  %8128 = vmatprep.subr.bf16.mxu1 %v8127_v28 }
 0x4b9   :  { %14842 = vst [vmem:[#allocation50_spill] sm:$0xff] %v11201_v61  ;;  %3725 = vmatmul.mubr.f32.gmra.mrb[100].mxu1 %v11201_v61  ;;  %v8099_v35 = vpack.c.bf16 %v3888_v17, %v3887_v63 }
 0x4ba   :  { %3730 = vmatprep.mubr.f32.mxu1 %v14825_v26  ;;  %8096 = vmatprep.subr.bf16.mxu0 %v8095_v52 }
 0x4bb   :  { %8130 = vmatpush3.bf16.msra.mxu1 %v8127_v28  ;;  %8098 = vmatpush3.bf16.msra.mxu0 %v8095_v52 }
 0x4bc   :  { %8100 = vmatprep.subr.bf16.mxu0 %v8099_v35  ;;  %8132 = vmatprep.subr.bf16.mxu1 %v8131_v5 }
 0x4bd   :  { %v3444_v22 = vpop.f32.mrb[102].mxu0 }
 0x4be   :  { %v11206_v20 = vadd.f32 %v11103_v8, %v3444_v22  ;;  %v3446_v41 = vpop.f32.mrb[103].mxu0  ;;  %v14846_v22 = vmov 0.0|0.0  }
 0x4bf   :  { %8134 = vmatpush3.bf16.msra.mxu1 %v8131_v5  ;;  %8102 = vmatpush3.bf16.msra.mxu0 %v8099_v35 }
 0x4c0   :  { %14843 = vst [vmem:[#allocation79_spill] sm:$0xff] %v11206_v20  ;;  %3731 = vmatmul.mubr.f32.gmra.mrb[102].mxu1 %v11206_v20  ;;  %8135 = vmatprep.subr.bf16.mxu0 %v14846_v22 }
 0x4c1   :  { %3736 = vmatprep.mubr.f32.mxu1 %v14825_v26 }
 0x4c5   :  { %v3449_v30 = vpop.f32.mrb[104].mxu0 }
 0x4c6   :  { %v11211_v59 = vadd.f32 %v11103_v8, %v3449_v30  ;;  %v3451_v50 = vpop.f32.mrb[105].mxu0 }
 0x4c8   :  { %14844 = vst [vmem:[#allocation80_spill] sm:$0xff] %v11211_v59  ;;  %3737 = vmatmul.mubr.f32.gmra.mrb[104].mxu1 %v11211_v59 }
 0x4c9   :  { %3742 = vmatprep.mubr.f32.mxu1 %v14825_v26 }
 0x4cd   :  { %v3454_v0 = vpop.f32.mrb[106].mxu0 }
 0x4ce   :  { %v11216_v18 = vadd.f32 %v11103_v8, %v3454_v0  ;;  %v3456_v16 = vpop.f32.mrb[107].mxu0  ;;  %v3540_v0 = vld [vmem:[%s13743_s10] sm:$0x3] }
 0x4d0   :  { %14845 = vst [vmem:[#allocation81_spill] sm:$0xff] %v11216_v18  ;;  %3743 = vmatmul.mubr.f32.gmra.mrb[106].mxu1 %v11216_v18 }
 0x4d1   :  { %3748 = vmatprep.mubr.f32.mxu1 %v14825_v26 }
 0x4d6   :  { %v3459_v29 = vpop.f32.mrb[108].mxu0 }
 0x4d7   :  { %v11222_v3 = vadd.f32 %v11103_v8, %v3459_v29  ;;  %v3461_v33 = vpop.f32.mrb[109].mxu0  ;;  %v11273_v29 = vrot.slane %v3540_v0, %v14728_v24 }
 0x4d8   :  { %v11277_v33 = vrot.slane %v3540_v0, %v14789_v32 }
 0x4d9   :  { %14847 = vst [vmem:[#allocation82_spill] sm:$0xff] %v11222_v3  ;;  %3749 = vmatmul.mubr.f32.gmra.mrb[108].mxu1 %v11222_v3 }
 0x4da   :  { %3754 = vmatprep.mubr.f32.mxu1 %v14825_v26 }
 0x4e3   :  { %v3464_v41 = vpop.f32.mrb[110].mxu0 }
 0x4e4   :  { %v11227_v10 = vadd.f32 %v11103_v8, %v3464_v41  ;;  %v3466_v58 = vpop.f32.mrb[111].mxu0 }
 0x4e6   :  { %14848 = vst [vmem:[#allocation71_spill] sm:$0xff] %v11227_v10  ;;  %3755 = vmatmul.mubr.f32.gmra.mrb[110].mxu1 %v11227_v10 }
 0x4e7   :  { %3760 = vmatprep.mubr.f32.mxu1 %v14825_v26 }
 0x4ea   :  { %v3469_v44 = vpop.f32.mrb[112].mxu0 }
 0x4eb   :  { %v11232_v53 = vadd.f32 %v11103_v8, %v3469_v44  ;;  %v3471_v40 = vpop.f32.mrb[113].mxu0 }
 0x4ed   :  { %14849 = vst [vmem:[#allocation72_spill] sm:$0xff] %v11232_v53  ;;  %3761 = vmatmul.mubr.f32.gmra.mrb[112].mxu1 %v11232_v53 }
 0x4ee   :  { %3766 = vmatprep.mubr.f32.mxu1 %v14825_v26 }
 0x4f6   :  { %v3474_v21 = vpop.f32.mrb[114].mxu0 }
 0x4f7   :  { %v11237_v49 = vadd.f32 %v11103_v8, %v3474_v21  ;;  %v3476_v56 = vpop.f32.mrb[115].mxu0 }
 0x4f9   :  { %14850 = vst [vmem:[#allocation73_spill] sm:$0xff] %v11237_v49  ;;  %3767 = vmatmul.mubr.f32.gmra.mrb[114].mxu1 %v11237_v49 }
 0x4fa   :  { %3772 = vmatprep.mubr.f32.mxu1 %v14825_v26 }
 0x4fd   :  { %v3479_v25 = vpop.f32.mrb[116].mxu0 }
 0x4fe   :  { %v11242_v30 = vadd.f32 %v11103_v8, %v3479_v25  ;;  %v3481_v27 = vpop.f32.mrb[117].mxu0 }
 0x500   :  { %14851 = vst [vmem:[#allocation74_spill] sm:$0xff] %v11242_v30  ;;  %3773 = vmatmul.mubr.f32.gmra.mrb[116].mxu1 %v11242_v30  ;;  %v6534_v30 = vld [vmem:[#allocation17 + $0xa8] sm:$0xff] }
 0x501   :  { %3778 = vmatprep.mubr.f32.mxu1 %v14825_v26 }
 0x509   :  { %v3484_v39 = vpop.f32.mrb[118].mxu0 }
 0x50a   :  { %v11247_v42 = vadd.f32 %v11103_v8, %v3484_v39  ;;  %v3486_v50 = vpop.f32.mrb[119].mxu0 }
 0x50c   :  { %14852 = vst [vmem:[#allocation83_spill] sm:$0xff] %v11247_v42  ;;  %3779 = vmatmul.mubr.f32.gmra.mrb[118].mxu1 %v11247_v42 }
 0x50d   :  { %3784 = vmatprep.mubr.f32.mxu1 %v14825_v26 }
 0x510   :  { %v3489_v12 = vpop.f32.mrb[120].mxu0 }
 0x511   :  { %v11252_v43 = vadd.f32 %v11103_v8, %v3489_v12  ;;  %v3491_v11 = vpop.f32.mrb[121].mxu0 }
 0x513   :  { %14853 = vst [vmem:[#allocation92_spill] sm:$0xff] %v11252_v43  ;;  %3785 = vmatmul.mubr.f32.gmra.mrb[120].mxu1 %v11252_v43 }
 0x514   :  { %3790 = vmatprep.mubr.f32.mxu1 %v14825_v26 }
 0x51d   :  { %v3494_v28 = vpop.f32.mrb[122].mxu0 }
 0x51e   :  { %v11257_v52 = vadd.f32 %v11103_v8, %v3494_v28  ;;  %v3496_v63 = vpop.f32.mrb[123].mxu0 }
 0x520   :  { %14854 = vst [vmem:[#allocation93_spill] sm:$0xff] %v11257_v52  ;;  %3791 = vmatmul.mubr.f32.gmra.mrb[122].mxu1 %v11257_v52 }
 0x521   :  { %3796 = vmatprep.mubr.f32.mxu1 %v14825_v26 }
 0x523   :  { %v3499_v17 = vpop.f32.mrb[124].mxu0 }
 0x524   :  { %v11262_v46 = vadd.f32 %v11103_v8, %v3499_v17  ;;  %v3501_v1 = vpop.f32.mrb[125].mxu0 }
 0x526   :  { %14855 = vst [vmem:[#allocation84_spill] sm:$0xff] %v11262_v46  ;;  %3797 = vmatmul.mubr.f32.gmra.mrb[124].mxu1 %v11262_v46 }
 0x527   :  { %3802 = vmatprep.mubr.f32.mxu1 %v14825_v26 }
 0x52f   :  { %v3504_v35 = vpop.f32.mrb[126].mxu0 }
 0x530   :  { %v11270_v16 = vadd.f32 %v11103_v8, %v3504_v35  ;;  %v3506_v5 = vpop.f32.mrb[127].mxu0 }
 0x532   :  { %14856 = vst [vmem:[#allocation55_spill] sm:$0xff] %v11270_v16  ;;  %3803 = vmatmul.mubr.f32.gmra.mrb[126].mxu1 %v11270_v16 }
 0x533   :  { %v3618_v41 = vpop.f32.mrb[64].mxu1 }
 0x534   :  { %v3619_v26 = vadd.f32 %v3618_v41, %v11273_v29  ;;  %v3620_v58 = vpop.f32.mrb[65].mxu1 }
 0x535   :  { %v3621_v44 = vadd.f32 %v3620_v58, %v11277_v33 }
 0x536   :  { %v3809_v40 = vmax.f32 %v3619_v26, 0.0 }
 0x537   :  { %v3810_v21 = vmax.f32 %v3621_v44, 0.0  ;;  %v3624_v56 = vpop.f32.mrb[66].mxu1 }
 0x538   :  { %v3625_v8 = vadd.f32 %v3624_v56, %v11273_v29  ;;  %v3626_v25 = vpop.f32.mrb[67].mxu1  ;;  %7687 = vmatprep.mubr.f32.mxu0 %v3809_v40 }
 0x539   :  { %v3627_v27 = vadd.f32 %v3626_v25, %v11277_v33  ;;  %7767 = vmatprep.mubr.f32.mxu1 %v3810_v21 }
 0x53a   :  { %v3811_v39 = vmax.f32 %v3625_v8, 0.0 }
 0x53b   :  { %v3812_v50 = vmax.f32 %v3627_v27, 0.0  ;;  %v3630_v12 = vpop.f32.mrb[68].mxu1 }
 0x53c   :  { %v3631_v11 = vadd.f32 %v3630_v12, %v11273_v29  ;;  %v3632_v28 = vpop.f32.mrb[69].mxu1  ;;  %7688 = vmatmul.mubr.f32.vlgmr.msra.gmra.mrb[128].mxu0 %v3811_v39 }
 0x53d   :  { %v3633_v63 = vadd.f32 %v3632_v28, %v11277_v33  ;;  %7768 = vmatmul.mubr.f32.vlgmr.msra.gmra.mrb[128].mxu1 %v3812_v50 }
 0x53e   :  { %v3813_v17 = vmax.f32 %v3631_v11, 0.0 }
 0x53f   :  { %v3814_v1 = vmax.f32 %v3633_v63, 0.0  ;;  %v3636_v0 = vpop.f32.mrb[70].mxu1 }
 0x540   :  { %v3637_v35 = vadd.f32 %v3636_v0, %v11273_v29  ;;  %v3638_v5 = vpop.f32.mrb[71].mxu1  ;;  %7690 = vmatprep.mubr.f32.mxu0 %v3813_v17 }
 0x541   :  { %v3639_v41 = vadd.f32 %v3638_v5, %v11277_v33  ;;  %7770 = vmatprep.mubr.f32.mxu1 %v3814_v1 }
 0x542   :  { %v3815_v26 = vmax.f32 %v3637_v35, 0.0 }
 0x543   :  { %v3816_v58 = vmax.f32 %v3639_v41, 0.0  ;;  %v3642_v44 = vpop.f32.mrb[72].mxu1 }
 0x544   :  { %v3643_v40 = vadd.f32 %v3642_v44, %v11273_v29  ;;  %v3644_v21 = vpop.f32.mrb[73].mxu1  ;;  %7691 = vmatmul.mubr.f32.gmra.mrb[130].mxu0 %v3815_v26 }
 0x545   :  { %v3645_v56 = vadd.f32 %v3644_v21, %v11277_v33  ;;  %7771 = vmatmul.mubr.f32.gmra.mrb[130].mxu1 %v3816_v58 }
 0x546   :  { %v3817_v8 = vmax.f32 %v3643_v40, 0.0 }
 0x547   :  { %v3818_v25 = vmax.f32 %v3645_v56, 0.0  ;;  %v3648_v27 = vpop.f32.mrb[74].mxu1 }
 0x548   :  { %v3649_v39 = vadd.f32 %v3648_v27, %v11273_v29  ;;  %v3650_v50 = vpop.f32.mrb[75].mxu1  ;;  %7693 = vmatprep.mubr.f32.mxu0 %v3817_v8 }
 0x549   :  { %v3651_v12 = vadd.f32 %v3650_v50, %v11277_v33  ;;  %7773 = vmatprep.mubr.f32.mxu1 %v3818_v25 }
 0x54a   :  { %v3819_v11 = vmax.f32 %v3649_v39, 0.0 }
 0x54b   :  { %v3820_v28 = vmax.f32 %v3651_v12, 0.0  ;;  %v3654_v63 = vpop.f32.mrb[76].mxu1 }
 0x54c   :  { %v3655_v17 = vadd.f32 %v3654_v63, %v11273_v29  ;;  %v3656_v1 = vpop.f32.mrb[77].mxu1  ;;  %7694 = vmatmul.mubr.f32.gmra.mrb[132].mxu0 %v3819_v11 }
 0x54d   :  { %v3657_v0 = vadd.f32 %v3656_v1, %v11277_v33  ;;  %7774 = vmatmul.mubr.f32.gmra.mrb[132].mxu1 %v3820_v28 }
 0x54e   :  { %v3821_v35 = vmax.f32 %v3655_v17, 0.0 }
 0x54f   :  { %v3822_v5 = vmax.f32 %v3657_v0, 0.0  ;;  %v3660_v41 = vpop.f32.mrb[78].mxu1 }
 0x550   :  { %v3661_v26 = vadd.f32 %v3660_v41, %v11273_v29  ;;  %v3662_v58 = vpop.f32.mrb[79].mxu1  ;;  %7696 = vmatprep.mubr.f32.mxu0 %v3821_v35 }
 0x551   :  { %v3663_v44 = vadd.f32 %v3662_v58, %v11277_v33  ;;  %7776 = vmatprep.mubr.f32.mxu1 %v3822_v5 }
 0x552   :  { %v3823_v40 = vmax.f32 %v3661_v26, 0.0 }
 0x553   :  { %v3824_v21 = vmax.f32 %v3663_v44, 0.0  ;;  %v3666_v56 = vpop.f32.mrb[80].mxu1 }
 0x554   :  { %v3667_v8 = vadd.f32 %v3666_v56, %v11273_v29  ;;  %v3668_v25 = vpop.f32.mrb[81].mxu1  ;;  %7697 = vmatmul.mubr.f32.gmra.mrb[134].mxu0 %v3823_v40 }
 0x555   :  { %v3669_v27 = vadd.f32 %v3668_v25, %v11277_v33  ;;  %7777 = vmatmul.mubr.f32.gmra.mrb[134].mxu1 %v3824_v21 }
 0x556   :  { %v3825_v39 = vmax.f32 %v3667_v8, 0.0 }
 0x557   :  { %v3826_v50 = vmax.f32 %v3669_v27, 0.0  ;;  %v3672_v12 = vpop.f32.mrb[82].mxu1 }
 0x558   :  { %v3673_v11 = vadd.f32 %v3672_v12, %v11273_v29  ;;  %v3674_v28 = vpop.f32.mrb[83].mxu1  ;;  %7699 = vmatprep.mubr.f32.mxu0 %v3825_v39 }
 0x559   :  { %v3675_v63 = vadd.f32 %v3674_v28, %v11277_v33  ;;  %7779 = vmatprep.mubr.f32.mxu1 %v3826_v50 }
 0x55a   :  { %v3827_v17 = vmax.f32 %v3673_v11, 0.0 }
 0x55b   :  { %v3828_v1 = vmax.f32 %v3675_v63, 0.0  ;;  %v3678_v0 = vpop.f32.mrb[84].mxu1 }
 0x55c   :  { %v3679_v35 = vadd.f32 %v3678_v0, %v11273_v29  ;;  %v3680_v5 = vpop.f32.mrb[85].mxu1  ;;  %7700 = vmatmul.mubr.f32.gmra.mrb[136].mxu0 %v3827_v17 }
 0x55d   :  { %v3681_v41 = vadd.f32 %v3680_v5, %v11277_v33  ;;  %7780 = vmatmul.mubr.f32.gmra.mrb[136].mxu1 %v3828_v1 }
 0x55e   :  { %v3829_v26 = vmax.f32 %v3679_v35, 0.0 }
 0x55f   :  { %v3830_v58 = vmax.f32 %v3681_v41, 0.0  ;;  %v3684_v44 = vpop.f32.mrb[86].mxu1 }
 0x560   :  { %v3685_v40 = vadd.f32 %v3684_v44, %v11273_v29  ;;  %v3686_v21 = vpop.f32.mrb[87].mxu1  ;;  %7702 = vmatprep.mubr.f32.mxu0 %v3829_v26 }
 0x561   :  { %v3687_v56 = vadd.f32 %v3686_v21, %v11277_v33  ;;  %7782 = vmatprep.mubr.f32.mxu1 %v3830_v58 }
 0x562   :  { %v3831_v8 = vmax.f32 %v3685_v40, 0.0 }
 0x563   :  { %v3832_v25 = vmax.f32 %v3687_v56, 0.0  ;;  %v3690_v27 = vpop.f32.mrb[88].mxu1 }
 0x564   :  { %v3691_v39 = vadd.f32 %v3690_v27, %v11273_v29  ;;  %v3692_v50 = vpop.f32.mrb[89].mxu1  ;;  %7703 = vmatmul.mubr.f32.gmra.mrb[138].mxu0 %v3831_v8 }
 0x565   :  { %v3693_v12 = vadd.f32 %v3692_v50, %v11277_v33  ;;  %7783 = vmatmul.mubr.f32.gmra.mrb[138].mxu1 %v3832_v25 }
 0x566   :  { %v3833_v11 = vmax.f32 %v3691_v39, 0.0 }
 0x567   :  { %v3834_v28 = vmax.f32 %v3693_v12, 0.0  ;;  %v3696_v63 = vpop.f32.mrb[90].mxu1 }
 0x568   :  { %v3697_v17 = vadd.f32 %v3696_v63, %v11273_v29  ;;  %v3698_v1 = vpop.f32.mrb[91].mxu1  ;;  %7705 = vmatprep.mubr.f32.mxu0 %v3833_v11 }
 0x569   :  { %v3699_v0 = vadd.f32 %v3698_v1, %v11277_v33  ;;  %7785 = vmatprep.mubr.f32.mxu1 %v3834_v28 }
 0x56a   :  { %v3835_v35 = vmax.f32 %v3697_v17, 0.0 }
 0x56b   :  { %v3836_v5 = vmax.f32 %v3699_v0, 0.0  ;;  %v3702_v41 = vpop.f32.mrb[92].mxu1 }
 0x56c   :  { %v3703_v26 = vadd.f32 %v3702_v41, %v11273_v29  ;;  %v3704_v58 = vpop.f32.mrb[93].mxu1  ;;  %7706 = vmatmul.mubr.f32.gmra.mrb[140].mxu0 %v3835_v35 }
 0x56d   :  { %v3705_v44 = vadd.f32 %v3704_v58, %v11277_v33  ;;  %7786 = vmatmul.mubr.f32.gmra.mrb[140].mxu1 %v3836_v5 }
 0x56e   :  { %v3837_v40 = vmax.f32 %v3703_v26, 0.0 }
 0x56f   :  { %v3838_v21 = vmax.f32 %v3705_v44, 0.0 }
 0x570   :  { %7708 = vmatprep.mubr.f32.mxu0 %v3837_v40 }
 0x571   :  { %7788 = vmatprep.mubr.f32.mxu1 %v3838_v21 }
 0x573   :  { %v3708_v56 = vpop.f32.mrb[94].mxu1 }
 0x574   :  { %v3709_v8 = vadd.f32 %v3708_v56, %v11273_v29  ;;  %v3710_v25 = vpop.f32.mrb[95].mxu1 }
 0x575   :  { %v3711_v27 = vadd.f32 %v3710_v25, %v11277_v33 }
 0x576   :  { %v3839_v39 = vmax.f32 %v3709_v8, 0.0 }
 0x577   :  { %v3840_v50 = vmax.f32 %v3711_v27, 0.0 }
 0x578   :  { %7709 = vmatmul.mubr.f32.gmra.mrb[142].mxu0 %v3839_v39 }
 0x579   :  { %7789 = vmatmul.mubr.f32.gmra.mrb[142].mxu1 %v3840_v50 }
 0x57b   :  { %v3714_v12 = vpop.f32.mrb[96].mxu1 }
 0x57c   :  { %v3715_v11 = vadd.f32 %v3714_v12, %v11273_v29  ;;  %v3716_v28 = vpop.f32.mrb[97].mxu1 }
 0x57d   :  { %v3717_v63 = vadd.f32 %v3716_v28, %v11277_v33 }
 0x57e   :  { %v3841_v17 = vmax.f32 %v3715_v11, 0.0 }
 0x57f   :  { %v3842_v1 = vmax.f32 %v3717_v63, 0.0 }
 0x580   :  { %7711 = vmatprep.mubr.f32.mxu0 %v3841_v17 }
 0x581   :  { %7791 = vmatprep.mubr.f32.mxu1 %v3842_v1 }
 0x584   :  { %v3720_v0 = vpop.f32.mrb[98].mxu1 }
 0x585   :  { %v3721_v35 = vadd.f32 %v3720_v0, %v11273_v29  ;;  %v3722_v5 = vpop.f32.mrb[99].mxu1 }
 0x586   :  { %v3723_v41 = vadd.f32 %v3722_v5, %v11277_v33 }
 0x587   :  { %v3843_v26 = vmax.f32 %v3721_v35, 0.0 }
 0x588   :  { %v3844_v58 = vmax.f32 %v3723_v41, 0.0 }
 0x589   :  { %7712 = vmatmul.mubr.f32.gmra.mrb[144].mxu0 %v3843_v26 }
 0x58a   :  { %7792 = vmatmul.mubr.f32.gmra.mrb[144].mxu1 %v3844_v58 }
 0x58c   :  { %v3726_v44 = vpop.f32.mrb[100].mxu1 }
 0x58d   :  { %v3727_v40 = vadd.f32 %v3726_v44, %v11273_v29  ;;  %v3728_v21 = vpop.f32.mrb[101].mxu1 }
 0x58e   :  { %v3729_v56 = vadd.f32 %v3728_v21, %v11277_v33 }
 0x58f   :  { %v3845_v8 = vmax.f32 %v3727_v40, 0.0 }
 0x590   :  { %v3846_v25 = vmax.f32 %v3729_v56, 0.0 }
 0x591   :  { %7714 = vmatprep.mubr.f32.mxu0 %v3845_v8 }
 0x592   :  { %7794 = vmatprep.mubr.f32.mxu1 %v3846_v25 }
 0x593   :  { %v3732_v27 = vpop.f32.mrb[102].mxu1 }
 0x594   :  { %v3733_v39 = vadd.f32 %v3732_v27, %v11273_v29  ;;  %v3734_v50 = vpop.f32.mrb[103].mxu1 }
 0x595   :  { %v3735_v12 = vadd.f32 %v3734_v50, %v11277_v33 }
 0x596   :  { %v3847_v11 = vmax.f32 %v3733_v39, 0.0 }
 0x597   :  { %v3848_v28 = vmax.f32 %v3735_v12, 0.0 }
 0x598   :  { %7715 = vmatmul.mubr.f32.gmra.mrb[146].mxu0 %v3847_v11 }
 0x599   :  { %7795 = vmatmul.mubr.f32.gmra.mrb[146].mxu1 %v3848_v28 }
 0x59b   :  { %v3738_v63 = vpop.f32.mrb[104].mxu1 }
 0x59c   :  { %v3739_v17 = vadd.f32 %v3738_v63, %v11273_v29  ;;  %v3740_v1 = vpop.f32.mrb[105].mxu1 }
 0x59d   :  { %v3741_v0 = vadd.f32 %v3740_v1, %v11277_v33 }
 0x59e   :  { %v3849_v35 = vmax.f32 %v3739_v17, 0.0 }
 0x59f   :  { %v3850_v5 = vmax.f32 %v3741_v0, 0.0 }
 0x5a0   :  { %7717 = vmatprep.mubr.f32.mxu0 %v3849_v35 }
 0x5a1   :  { %7797 = vmatprep.mubr.f32.mxu1 %v3850_v5 }
 0x5a3   :  { %v3744_v41 = vpop.f32.mrb[106].mxu1 }
 0x5a4   :  { %v3745_v26 = vadd.f32 %v3744_v41, %v11273_v29  ;;  %v3746_v58 = vpop.f32.mrb[107].mxu1 }
 0x5a5   :  { %v3747_v44 = vadd.f32 %v3746_v58, %v11277_v33 }
 0x5a6   :  { %v3851_v40 = vmax.f32 %v3745_v26, 0.0 }
 0x5a7   :  { %v3852_v21 = vmax.f32 %v3747_v44, 0.0 }
 0x5a8   :  { %7718 = vmatmul.mubr.f32.gmra.mrb[148].mxu0 %v3851_v40 }
 0x5a9   :  { %7798 = vmatmul.mubr.f32.gmra.mrb[148].mxu1 %v3852_v21 }
 0x5ac   :  { %v3750_v56 = vpop.f32.mrb[108].mxu1 }
 0x5ad   :  { %v3751_v8 = vadd.f32 %v3750_v56, %v11273_v29  ;;  %v3752_v25 = vpop.f32.mrb[109].mxu1 }
 0x5ae   :  { %v3753_v27 = vadd.f32 %v3752_v25, %v11277_v33 }
 0x5af   :  { %v3853_v39 = vmax.f32 %v3751_v8, 0.0 }
 0x5b0   :  { %v3854_v50 = vmax.f32 %v3753_v27, 0.0 }
 0x5b1   :  { %7720 = vmatprep.mubr.f32.mxu0 %v3853_v39 }
 0x5b2   :  { %7800 = vmatprep.mubr.f32.mxu1 %v3854_v50 }
 0x5b9   :  { %v3756_v12 = vpop.f32.mrb[110].mxu1 }
 0x5ba   :  { %v3757_v11 = vadd.f32 %v3756_v12, %v11273_v29  ;;  %v3758_v28 = vpop.f32.mrb[111].mxu1 }
 0x5bb   :  { %v3759_v63 = vadd.f32 %v3758_v28, %v11277_v33 }
 0x5bc   :  { %v3855_v17 = vmax.f32 %v3757_v11, 0.0 }
 0x5bd   :  { %v3856_v1 = vmax.f32 %v3759_v63, 0.0 }
 0x5be   :  { %7721 = vmatmul.mubr.f32.gmra.mrb[150].mxu0 %v3855_v17 }
 0x5bf   :  { %7801 = vmatmul.mubr.f32.gmra.mrb[150].mxu1 %v3856_v1 }
 0x5c0   :  { %v3762_v0 = vpop.f32.mrb[112].mxu1 }
 0x5c1   :  { %v3763_v35 = vadd.f32 %v3762_v0, %v11273_v29  ;;  %v3764_v5 = vpop.f32.mrb[113].mxu1 }
 0x5c2   :  { %v3765_v41 = vadd.f32 %v3764_v5, %v11277_v33  ;;  %v6513_v5 = vld [vmem:[#allocation17] sm:$0xff] }
 0x5c3   :  { %v3857_v26 = vmax.f32 %v3763_v35, 0.0 }
 0x5c4   :  { %v3858_v58 = vmax.f32 %v3765_v41, 0.0  ;;  %v6514_v41 = vld [vmem:[#allocation17 + $0x8] sm:$0xff] }
 0x5c5   :  { %7723 = vmatprep.mubr.f32.mxu0 %v3857_v26 }
 0x5c6   :  { %7803 = vmatprep.mubr.f32.mxu1 %v3858_v58  ;;  %v8136_v58 = vpack.c.bf16 %v6514_v41, %v6513_v5 }
 0x5c8   :  { %8137 = vmatpush1.bf16.msra.mxu0 %v8136_v58 }
 0x5c9   :  { %8138 = vmatprep.subr.bf16.mxu0 %v14846_v22 }
 0x5cc   :  { %v3768_v44 = vpop.f32.mrb[114].mxu1 }
 0x5cd   :  { %v3769_v40 = vadd.f32 %v3768_v44, %v11273_v29  ;;  %v3770_v21 = vpop.f32.mrb[115].mxu1 }
 0x5ce   :  { %v3771_v56 = vadd.f32 %v3770_v21, %v11277_v33 }
 0x5cf   :  { %v3859_v8 = vmax.f32 %v3769_v40, 0.0 }
 0x5d0   :  { %v3860_v25 = vmax.f32 %v3771_v56, 0.0 }
 0x5d1   :  { %7724 = vmatmul.mubr.f32.gmra.mrb[152].mxu0 %v3859_v8 }
 0x5d2   :  { %7804 = vmatmul.mubr.f32.gmra.mrb[152].mxu1 %v3860_v25 }
 0x5d3   :  { %v3774_v27 = vpop.f32.mrb[116].mxu1 }
 0x5d4   :  { %v3775_v39 = vadd.f32 %v3774_v27, %v11273_v29  ;;  %v3776_v50 = vpop.f32.mrb[117].mxu1  ;;  %v6515_v27 = vld [vmem:[#allocation17 + $0x10] sm:$0xff] }
 0x5d5   :  { %v3777_v12 = vadd.f32 %v3776_v50, %v11277_v33 }
 0x5d6   :  { %v3861_v11 = vmax.f32 %v3775_v39, 0.0  ;;  %v6516_v39 = vld [vmem:[#allocation17 + $0x18] sm:$0xff] }
 0x5d7   :  { %v3862_v28 = vmax.f32 %v3777_v12, 0.0  ;;  %v8139_v50 = vpack.c.bf16 %v6516_v39, %v6515_v27  ;;  %v6517_v12 = vld [vmem:[#allocation17 + $0x20] sm:$0xff]  ;;  %v6522_v39 = vld [vmem:[#allocation17 + $0x48] sm:$0xff] }
 0x5d8   :  { %7726 = vmatprep.mubr.f32.mxu0 %v3861_v11  ;;  %v6518_v11 = vld [vmem:[#allocation17 + $0x28] sm:$0xff] }
 0x5d9   :  { %7806 = vmatprep.mubr.f32.mxu1 %v3862_v28  ;;  %8140 = vmatpush1.bf16.msra.mxu0 %v8139_v50 }
 0x5da   :  { %8141 = vmatprep.subr.bf16.mxu0 %v14846_v22 }
 0x5df   :  { %v3780_v63 = vpop.f32.mrb[118].mxu1 }
 0x5e0   :  { %v3781_v17 = vadd.f32 %v3780_v63, %v11273_v29  ;;  %v3782_v1 = vpop.f32.mrb[119].mxu1 }
 0x5e1   :  { %v3783_v0 = vadd.f32 %v3782_v1, %v11277_v33 }
 0x5e2   :  { %v3863_v35 = vmax.f32 %v3781_v17, 0.0 }
 0x5e3   :  { %v3864_v26 = vmax.f32 %v3783_v0, 0.0  ;;  %v8142_v0 = vpack.c.bf16 %v6518_v11, %v6517_v12 }
 0x5e4   :  { %7727 = vmatmul.mubr.f32.gmra.mrb[154].mxu0 %v3863_v35 }
 0x5e5   :  { %7807 = vmatmul.mubr.f32.gmra.mrb[154].mxu1 %v3864_v26  ;;  %8143 = vmatpush1.bf16.msra.mxu0 %v8142_v0 }
 0x5e6   :  { %v3786_v44 = vpop.f32.mrb[120].mxu1  ;;  %8144 = vmatprep.subr.bf16.mxu0 %v14846_v22 }
 0x5e7   :  { %v3787_v40 = vadd.f32 %v3786_v44, %v11273_v29  ;;  %v3788_v21 = vpop.f32.mrb[121].mxu1 }
 0x5e8   :  { %v3789_v56 = vadd.f32 %v3788_v21, %v11277_v33 }
 0x5e9   :  { %v3865_v8 = vmax.f32 %v3787_v40, 0.0 }
 0x5ea   :  { %v3866_v25 = vmax.f32 %v3789_v56, 0.0  ;;  %v6519_v56 = vld [vmem:[#allocation17 + $0x30] sm:$0xff] }
 0x5eb   :  { %7729 = vmatprep.mubr.f32.mxu0 %v3865_v8  ;;  %v6520_v8 = vld [vmem:[#allocation17 + $0x38] sm:$0xff] }
 0x5ec   :  { %7809 = vmatprep.mubr.f32.mxu1 %v3866_v25  ;;  %v6521_v25 = vld [vmem:[#allocation17 + $0x40] sm:$0xff]  ;;  %v8145_v27 = vpack.c.bf16 %v6520_v8, %v6519_v56 }
 0x5ed   :  { %v8148_v50 = vpack.c.bf16 %v6522_v39, %v6521_v25 }
 0x5ee   :  { %8146 = vmatpush1.bf16.msra.mxu0 %v8145_v27 }
 0x5ef   :  { %8147 = vmatprep.subr.bf16.mxu0 %v14846_v22 }
 0x5f2   :  { %8149 = vmatpush1.bf16.msra.mxu0 %v8148_v50 }
 0x5f3   :  { %v3792_v28 = vpop.f32.mrb[122].mxu1  ;;  %8150 = vmatprep.subr.bf16.mxu0 %v14846_v22 }
 0x5f4   :  { %v3793_v63 = vadd.f32 %v3792_v28, %v11273_v29  ;;  %v3794_v17 = vpop.f32.mrb[123].mxu1 }
 0x5f5   :  { %v3795_v1 = vadd.f32 %v3794_v17, %v11277_v33 }
 0x5f6   :  { %v3867_v35 = vmax.f32 %v3793_v63, 0.0 }
 0x5f7   :  { %v3868_v5 = vmax.f32 %v3795_v1, 0.0 }
 0x5f8   :  { %7730 = vmatmul.mubr.f32.gmra.mrb[156].mxu0 %v3867_v35 }
 0x5f9   :  { %v3798_v41 = vpop.f32.mrb[124].mxu1  ;;  %7810 = vmatmul.mubr.f32.gmra.mrb[156].mxu1 %v3868_v5 }
 0x5fa   :  { %v3799_v26 = vadd.f32 %v3798_v41, %v11273_v29  ;;  %v3800_v58 = vpop.f32.mrb[125].mxu1 }
 0x5fb   :  { %v3801_v44 = vadd.f32 %v3800_v58, %v11277_v33  ;;  %v6524_v58 = vld [vmem:[#allocation17 + $0x58] sm:$0xff] }
 0x5fc   :  { %v3869_v40 = vmax.f32 %v3799_v26, 0.0  ;;  %v6523_v26 = vld [vmem:[#allocation17 + $0x50] sm:$0xff] }
 0x5fd   :  { %v3870_v21 = vmax.f32 %v3801_v44, 0.0  ;;  %v8151_v44 = vpack.c.bf16 %v6524_v58, %v6523_v26  ;;  %v6529_v26 = vld [vmem:[#allocation17 + $0x80] sm:$0xff] }
 0x5fe   :  { %7732 = vmatprep.mubr.f32.mxu0 %v3869_v40  ;;  %v6526_v40 = vld [vmem:[#allocation17 + $0x68] sm:$0xff] }
 0x5ff   :  { %7812 = vmatprep.mubr.f32.mxu1 %v3870_v21  ;;  %8152 = vmatpush1.bf16.msra.mxu0 %v8151_v44  ;;  %v6530_v44 = vld [vmem:[#allocation17 + $0x88] sm:$0xff] }
 0x600   :  { %8153 = vmatprep.subr.bf16.mxu0 %v14846_v22 }
 0x605   :  { %v3804_v12 = vpop.f32.mrb[126].mxu1 }
 0x606   :  { %v3805_v11 = vadd.f32 %v3804_v12, %v11273_v29  ;;  %v3806_v28 = vpop.f32.mrb[127].mxu1  ;;  %v6525_v29 = vld [vmem:[#allocation17 + $0x60] sm:$0xff] }
 0x607   :  { %v3807_v63 = vadd.f32 %v3806_v28, %v11277_v33  ;;  %v8154_v8 = vpack.c.bf16 %v6526_v40, %v6525_v29  ;;  %v8160_v40 = vpack.c.bf16 %v6530_v44, %v6529_v26  ;;  %v6531_v26 = vld [vmem:[#allocation17 + $0x90] sm:$0xff]  ;;  %v6533_v44 = vld [vmem:[#allocation17 + $0xa0] sm:$0xff] }
 0x608   :  { %v3871_v17 = vmax.f32 %v3805_v11, 0.0  ;;  %v8166_v49 = vpack.c.bf16 %v6534_v30, %v6533_v44 }
 0x609   :  { %v3872_v1 = vmax.f32 %v3807_v63, 0.0  ;;  %8155 = vmatpush1.bf16.msra.mxu0 %v8154_v8 }
 0x60a   :  { %7733 = vmatmul.mubr.f32.gmra.mrb[158].mxu0 %v3871_v17  ;;  %8156 = vmatprep.subr.bf16.mxu0 %v14846_v22  ;;  %v6527_v17 = vld [vmem:[#allocation17 + $0x70] sm:$0xff] }
 0x60b   :  { %7813 = vmatmul.mubr.f32.gmra.mrb[158].mxu1 %v3872_v1  ;;  %v6528_v1 = vld [vmem:[#allocation17 + $0x78] sm:$0xff] }
 0x60c   :  { %v8157_v29 = vpack.c.bf16 %v6528_v1, %v6527_v17 }
 0x60e   :  { %8158 = vmatpush1.bf16.msra.mxu0 %v8157_v29  ;;  %v6532_v29 = vld [vmem:[#allocation17 + $0x98] sm:$0xff] }
 0x60f   :  { %v11348_v0 = vpop.f32.mrb[128].mxu0  ;;  %8159 = vmatprep.subr.bf16.mxu0 %v14846_v22 }
 0x610   :  { %v3979_v35 = vpop.f32.mrb[129].mxu0  ;;  %v11350_v5 = vpop.f32.mrb[128].mxu1 }
 0x611   :  { %v11352_v41 = vpop.f32.mrb[129].mxu1 }
 0x612   :  { %8161 = vmatpush1.bf16.msra.mxu0 %v8160_v40  ;;  %v8163_v40 = vpack.c.bf16 %v6532_v29, %v6531_v26  ;;  %v11403_v26 = vld [vmem:[%s13745_s12] ss:$0 sm:$0xff] }
 0x613   :  { %8162 = vmatprep.subr.bf16.mxu0 %v14846_v22  ;;  %v3980_v30 = vadd.f32 %v11403_v26, %v3979_v35  ;;  %v11409_v29 = vld [vmem:[%s13747_s14] ss:$0 sm:$0xff] }
 0x614   :  { %14857 = vst [vmem:[#allocation94_spill] sm:$0xff] %v11409_v29  ;;  %v4248_v61 = vadd.f32 %v11350_v5, %v11409_v29  ;;  %v4243_v54 = vadd.f32 %v11409_v29, %v11352_v41  ;;  %v6538_v41 = vld [vmem:[#allocation17 + $0xc8] sm:$0xff] }
 0x615   :  { %v11424_v34 = vmax.f32 %v3980_v30, 0.0  ;;  %v8169_v30 = vpack.c.bf16 %v6536_v45, %v6535_v55 }
 0x616   :  { %8164 = vmatpush1.bf16.msra.mxu0 %v8163_v40  ;;  %v11433_v15 = vmax.f32 %v4248_v61, 0.0 }
 0x617   :  { %v7692_v33 = vpop.f32.mrb[130].mxu0  ;;  %8165 = vmatprep.subr.bf16.mxu0 %v14846_v22 }
 0x618   :  { %v3989_v21 = vpop.f32.mrb[131].mxu0  ;;  %v7772_v56 = vpop.f32.mrb[130].mxu1  ;;  %v3995_v51 = vadd.f32 %v7692_v33, %v11403_v26  ;;  %14858 = vst [vmem:[#allocation61_spill] sm:$0xff] %v11433_v15  ;;  %v11445_v33 = vrot.slane %v11424_v34, %v14789_v32 }
 0x619   :  { %v11354_v25 = vpop.f32.mrb[131].mxu1  ;;  %v3990_v35 = vadd.f32 %v11403_v26, %v3989_v21  ;;  %v4258_v60 = vadd.f32 %v7772_v56, %v11409_v29  ;;  %v11447_v56 = vmax.f32 %v4243_v54, 0.0 }
 0x61a   :  { %8167 = vmatpush1.bf16.msra.mxu0 %v8166_v49  ;;  %v3985_v49 = vadd.f32 %v11348_v0, %v11403_v26  ;;  %v4253_v21 = vadd.f32 %v11409_v29, %v11354_v25  ;;  %v8172_v25 = vpack.c.bf16 %v6538_v41, %v6537_v48  ;;  %v11461_v54 = vmax.f32 %v3995_v51, 0.0 }
 0x61b   :  { %8168 = vmatprep.subr.bf16.mxu0 %v14846_v22  ;;  %v11435_v5 = vmax.f32 %v3990_v35, 0.0  ;;  %14859 = vst [vmem:[#allocation85_spill] sm:$0xff] %v11447_v56  ;;  %v11459_v35 = vrot.slane %v11424_v34, %v14812_v19  ;;  %v11463_v57 = vmax.f32 %v4258_v60, 0.0 }
 0x61c   :  { %v11428_v14 = vmax.f32 %v3985_v49, 0.0  ;;  %v11441_v49 = vrot.slane %v11424_v34, %v14728_v24 }
 0x61d   :  { %14860 = vst [vmem:[#allocation95_spill] sm:$0xff] %v11463_v57  ;;  %v11480_v60 = vrot.slane %v11435_v5, %v14789_v32  ;;  %v11484_v51 = vrot.slane %v11435_v5, %v14812_v19 }
 0x61e   :  { %8170 = vmatpush1.bf16.msra.mxu0 %v8169_v30 }
 0x61f   :  { %v11358_v27 = vpop.f32.mrb[132].mxu0  ;;  %8171 = vmatprep.subr.bf16.mxu0 %v14846_v22 }
 0x620   :  { %v3999_v39 = vpop.f32.mrb[133].mxu0  ;;  %v11360_v50 = vpop.f32.mrb[132].mxu1  ;;  %v4005_v61 = vadd.f32 %v11358_v27, %v11403_v26 }
 0x621   :  { %v11362_v12 = vpop.f32.mrb[133].mxu1  ;;  %v4000_v0 = vadd.f32 %v11403_v26, %v3999_v39  ;;  %v4268_v39 = vadd.f32 %v11360_v50, %v11409_v29  ;;  %v11470_v50 = vrot.slane %v11435_v5, %v14728_v24 }
 0x622   :  { %v4263_v45 = vadd.f32 %v11409_v29, %v11362_v12  ;;  %v11472_v12 = vmax.f32 %v4253_v21, 0.0  ;;  %v11490_v30 = vmax.f32 %v4005_v61, 0.0  ;;  %8173 = vmatpush1.bf16.msra.mxu0 %v8172_v25 }
 0x623   :  { %v11465_v27 = vmax.f32 %v4000_v0, 0.0  ;;  %8174 = vmatprep.subr.bf16.mxu0 %v14846_v22 }
 0x624   :  { %14862 = vst [vmem:[#allocation86_spill] sm:$0xff] %v11472_v12  ;;  %14863 = vst [vmem:[#allocation96_spill] sm:$0xff] %v11490_v30  ;;  %v11494_v41 = vmax.f32 %v4263_v45, 0.0  ;;  %v4948_v30 = vrot.slane %v11424_v34, %v14722_v23 }
 0x625   :  { %14861 = vst [vmem:[#allocation40_spill] sm:$0xff] %v11465_v27  ;;  %v11500_v47 = vrot.slane %v11465_v27, %v14728_v24  ;;  %v11504_v9 = vrot.slane %v11465_v27, %v14789_v32  ;;  %v11513_v61 = vrot.slane %v11465_v27, %v14812_v19 }
 0x626   :  { %14865 = vst [vmem:[#allocation98_spill] sm:$0xff] %v11494_v41 }
 0x627   :  { %v11364_v11 = vpop.f32.mrb[134].mxu0  ;;  %14867 = vst [vmem:[#allocation87_spill] sm:$0xff] %v11513_v61 }
 0x628   :  { %v11366_v28 = vpop.f32.mrb[135].mxu0  ;;  %v11368_v63 = vpop.f32.mrb[134].mxu1  ;;  %v4015_v48 = vadd.f32 %v11364_v11, %v11403_v26  ;;  %v11492_v11 = vmax.f32 %v4268_v39, 0.0 }
 0x629   :  { %v11370_v58 = vpop.f32.mrb[135].mxu1  ;;  %v4010_v55 = vadd.f32 %v11403_v26, %v11366_v28  ;;  %v4278_v28 = vadd.f32 %v11368_v63, %v11409_v29 }
 0x62a   :  { %v4273_v0 = vadd.f32 %v11409_v29, %v11370_v58  ;;  %14864 = vst [vmem:[#allocation97_spill] sm:$0xff] %v11492_v11  ;;  %v11515_v39 = vmax.f32 %v4015_v48, 0.0 }
 0x62b   :  { %v11496_v63 = vmax.f32 %v4010_v55, 0.0  ;;  %v11517_v45 = vmax.f32 %v4278_v28, 0.0 }
 0x62c   :  { %14868 = vst [vmem:[#allocation88_spill] sm:$0xff] %v11515_v39  ;;  %v11521_v25 = vmax.f32 %v4273_v0, 0.0 }
 0x62d   :  { %14866 = vst [vmem:[#allocation60_spill] sm:$0xff] %v11496_v63  ;;  %14869 = vst [vmem:[#allocation89_spill] sm:$0xff] %v11517_v45  ;;  %v11531_v31 = vrot.slane %v11496_v63, %v14728_v24 }
 0x62e   :  { %14870 = vst [vmem:[#allocation90_spill] sm:$0xff] %v11521_v25 }
 0x62f   :  { %v11373_v8 = vpop.f32.mrb[136].mxu0  ;;  %14872 = vst [vmem:[#allocation107_spill] sm:$0xff] %v11531_v31 }
 0x630   :  { %v11375_v16 = vpop.f32.mrb[137].mxu0  ;;  %v11377_v46 = vpop.f32.mrb[136].mxu1 }
 0x631   :  { %v11380_v52 = vpop.f32.mrb[137].mxu1  ;;  %v4020_v21 = vadd.f32 %v11403_v26, %v11375_v16  ;;  %v4025_v16 = vadd.f32 %v11373_v8, %v11403_v26  ;;  %v4288_v55 = vadd.f32 %v11377_v46, %v11409_v29 }
 0x633   :  { %v11523_v4 = vmax.f32 %v4020_v21, 0.0  ;;  %v11547_v21 = vmax.f32 %v4025_v16, 0.0  ;;  %v11551_v37 = vmax.f32 %v4288_v55, 0.0 }
 0x635   :  { %14871 = vst [vmem:[#allocation99_spill] sm:$0xff] %v11523_v4  ;;  %14875 = vst [vmem:[#allocation100_spill] sm:$0xff] %v11547_v21  ;;  %v11561_v16 = vrot.slane %v11523_v4, %v14728_v24 }
 0x636   :  { %14877 = vst [vmem:[#allocation101_spill] sm:$0xff] %v11551_v37 }
 0x637   :  { %v11382_v43 = vpop.f32.mrb[138].mxu0  ;;  %14878 = vst [vmem:[#allocation102_spill] sm:$0xff] %v11561_v16 }
 0x638   :  { %v11384_v42 = vpop.f32.mrb[139].mxu0  ;;  %v11386_v17 = vpop.f32.mrb[138].mxu1  ;;  %v4035_v48 = vadd.f32 %v11382_v43, %v11403_v26 }
 0x639   :  { %v11388_v1 = vpop.f32.mrb[139].mxu1  ;;  %v4030_v58 = vadd.f32 %v11403_v26, %v11384_v42  ;;  %v4283_v42 = vadd.f32 %v11409_v29, %v11380_v52  ;;  %v4298_v46 = vadd.f32 %v11386_v17, %v11409_v29  ;;  %v11541_v52 = vrot.slane %v11496_v63, %v14789_v32 }
 0x63a   :  { %v4293_v28 = vadd.f32 %v11409_v29, %v11388_v1 }
 0x63b   :  { %14873 = vst [vmem:[#allocation108_spill] sm:$0xff] %v11541_v52  ;;  %v11549_v6 = vmax.f32 %v4030_v58, 0.0  ;;  %v11565_v58 = vrot.slane %v11523_v4, %v14789_v32  ;;  %v11567_v55 = vmax.f32 %v4283_v42, 0.0 }
 0x63d   :  { %14876 = vst [vmem:[#allocation110_spill] sm:$0xff] %v11549_v6  ;;  %14879 = vst [vmem:[#allocation111_spill] sm:$0xff] %v11565_v58  ;;  %v11583_v16 = vrot.slane %v11549_v6, %v14728_v24  ;;  %v11587_v42 = vrot.slane %v11549_v6, %v14789_v32  ;;  %v6542_v58 = vld [vmem:[#allocation17 + $0xe8] sm:$0xff] }
 0x63e   :  { %14880 = vst [vmem:[#allocation112_spill] sm:$0xff] %v11567_v55 }
 0x63f   :  { %v11390_v53 = vpop.f32.mrb[140].mxu0  ;;  %14886 = vst [vmem:[#allocation106_spill] sm:$0xff] %v11583_v16  ;;  %14887 = vst [vmem:[#allocation115_spill] sm:$0xff] %v11587_v42 }
 0x640   :  { %v11393_v10 = vpop.f32.mrb[141].mxu0  ;;  %v11395_v3 = vpop.f32.mrb[140].mxu1  ;;  %v4045_v17 = vadd.f32 %v11390_v53, %v11403_v26  ;;  %v11573_v53 = vrot.slane %v11523_v4, %v14812_v19 }
 0x641   :  { %v11397_v18 = vpop.f32.mrb[141].mxu1  ;;  %v4040_v8 = vadd.f32 %v11403_v26, %v11393_v10  ;;  %v11545_v10 = vrot.slane %v11496_v63, %v14812_v19  ;;  %v4308_v1 = vadd.f32 %v11395_v3, %v11409_v29  ;;  %v11575_v3 = vmax.f32 %v4035_v48, 0.0 }
 0x642   :  { %v4303_v38 = vadd.f32 %v11409_v29, %v11397_v18  ;;  %14882 = vst [vmem:[#allocation114_spill] sm:$0xff] %v11573_v53  ;;  %v11577_v18 = vmax.f32 %v4298_v46, 0.0  ;;  %v11595_v48 = vrot.slane %v11549_v6, %v14812_v19  ;;  %v11597_v46 = vmax.f32 %v4045_v17, 0.0  ;;  %v6539_v17 = vld [vmem:[#allocation17 + $0xd0] sm:$0xff] }
 0x643   :  { %14874 = vst [vmem:[#allocation109_spill] sm:$0xff] %v11545_v10  ;;  %v11569_v21 = vmax.f32 %v4040_v8, 0.0  ;;  %14883 = vst [vmem:[#allocation103_spill] sm:$0xff] %v11575_v3  ;;  %v11579_v10 = vmax.f32 %v4293_v28, 0.0  ;;  %v11599_v28 = vmax.f32 %v4308_v1, 0.0  ;;  %v6541_v1 = vld [vmem:[#allocation17 + $0xe0] sm:$0xff]  ;;  %v4625_v6 = vmul.f32 %v11445_v33, %v11472_v12 }
 0x644   :  { %14884 = vst [vmem:[#allocation104_spill] sm:$0xff] %v11577_v18  ;;  %14888 = vst [vmem:[#allocation116_spill] sm:$0xff] %v11595_v48  ;;  %v11601_v3 = vmax.f32 %v4303_v38, 0.0  ;;  %v4497_v38 = vmul.f32 %v11441_v49, %v11447_v56 }
 0x645   :  { %14881 = vst [vmem:[#allocation113_spill] sm:$0xff] %v11569_v21  ;;  %14885 = vst [vmem:[#allocation105_spill] sm:$0xff] %v11579_v10  ;;  %v11605_v16 = vrot.slane %v11569_v21, %v14728_v24 }
 0x646   :  { %14889 = vst [vmem:[#allocation119_spill] sm:$0xff] %v11597_v46  ;;  %14890 = vst [vmem:[#allocation123_spill] sm:$0xff] %v11599_v28  ;;  %v6540_v46 = vld [vmem:[#allocation17 + $0xd8] sm:$0xff]  ;;  %v4657_v52 = vadd.f32 %v4625_v6, %v4497_v38  ;;  %v5076_v38 = vrot.slane %v11424_v34, %v14724_v62 }
 0x647   :  { %14891 = vst [vmem:[#allocation124_spill] sm:$0xff] %v11601_v3  ;;  %14892 = vst [vmem:[#allocation117_spill] sm:$0xff] %v11605_v16  ;;  %v4753_v16 = vmul.f32 %v11459_v35, %v11494_v41  ;;  %v8175_v4 = vpack.c.bf16 %v6540_v46, %v6539_v17  ;;  %v6543_v46 = vld [vmem:[#allocation17 + $0xf0] sm:$0xff]  ;;  %v5009_v17 = vmul.f32 %v4948_v30, %v11567_v55 }
 0x649   :  { %8176 = vmatpush1.bf16.msra.mxu0 %v8175_v4  ;;  %v4785_v6 = vadd.f32 %v4753_v16, %v4657_v52 }
 0x64a   :  { %8177 = vmatprep.subr.bf16.mxu0 %v14846_v22 }
 0x64b   :  { %v11411_v44 = vpop.f32.mrb[142].mxu0 }
 0x64c   :  { %v11413_v40 = vpop.f32.mrb[143].mxu0  ;;  %v11415_v59 = vpop.f32.mrb[142].mxu1  ;;  %v4055_v8 = vadd.f32 %v11411_v44, %v11403_v26  ;;  %v11609_v44 = vrot.slane %v11569_v21, %v14789_v32 }
 0x64d   :  { %v11419_v20 = vpop.f32.mrb[143].mxu1  ;;  %v4050_v53 = vadd.f32 %v11403_v26, %v11413_v40  ;;  %v4318_v40 = vadd.f32 %v11415_v59, %v11409_v29  ;;  %v11625_v59 = vrot.slane %v11569_v21, %v14812_v19 }
 0x64e   :  { %14893 = vst [vmem:[#allocation125_spill] sm:$0xff] %v11609_v44  ;;  %v4313_v48 = vadd.f32 %v11409_v29, %v11419_v20  ;;  %v4820_v44 = vrot.slane %v11424_v34, %v14774_v36  ;;  %v11627_v20 = vmax.f32 %v4055_v8, 0.0  ;;  %v8178_v8 = vpack.c.bf16 %v6542_v58, %v6541_v1 }
 0x64f   :  { %14894 = vst [vmem:[#allocation118_spill] sm:$0xff] %v11625_v59  ;;  %v11629_v42 = vmax.f32 %v4050_v53, 0.0  ;;  %v11635_v61 = vmax.f32 %v4318_v40, 0.0  ;;  %v5137_v58 = vmul.f32 %v5076_v38, %v11579_v10 }
 0x650   :  { %14895 = vst [vmem:[#allocation126_spill] sm:$0xff] %v11627_v20  ;;  %v4881_v31 = vmul.f32 %v4820_v44, %v11521_v25  ;;  %v11639_v53 = vmax.f32 %v4313_v48, 0.0  ;;  %v5204_v48 = vrot.slane %v11424_v34, %v14727_v2  ;;  %8179 = vmatpush1.bf16.msra.mxu0 %v8178_v8 }
 0x651   :  { %14896 = vst [vmem:[#allocation127_spill] sm:$0xff] %v11629_v42  ;;  %14897 = vst [vmem:[#allocation128_spill] sm:$0xff] %v11635_v61  ;;  %v11647_v40 = vrot.slane %v11629_v42, %v14728_v24  ;;  %v11651_v4 = vrot.slane %v11629_v42, %v14789_v32  ;;  %8180 = vmatprep.subr.bf16.mxu0 %v14846_v22  ;;  %v4754_v22 = vmul.f32 %v11459_v35, %v11492_v11 }
 0x652   :  { %14898 = vst [vmem:[#allocation129_spill] sm:$0xff] %v11639_v53  ;;  %v4913_v16 = vadd.f32 %v4881_v31, %v4785_v6  ;;  %v4498_v6 = vmul.f32 %v11441_v49, %v11433_v15  ;;  %v4882_v49 = vmul.f32 %v4820_v44, %v11517_v45  ;;  %v5588_v35 = vrot.slane %v11428_v14, %v14789_v32 }
 0x653   :  { %14899 = vst [vmem:[#allocation120_spill] sm:$0xff] %v11647_v40  ;;  %14900 = vst [vmem:[#allocation121_spill] sm:$0xff] %v11651_v4  ;;  %v5010_v44 = vmul.f32 %v4948_v30, %v11551_v37  ;;  %v5138_v30 = vmul.f32 %v5076_v38, %v11577_v18 }
 0x654   :  { %v5041_v31 = vadd.f32 %v5009_v17, %v4913_v16 }
 0x656   :  { %v5169_v17 = vadd.f32 %v5137_v58, %v5041_v31 }
 0x65c   :  { %v7713_v0 = vpop.f32.mrb[144].mxu0 }
 0x65d   :  { %v4059_v43 = vpop.f32.mrb[145].mxu0  ;;  %v7793_v7 = vpop.f32.mrb[144].mxu1  ;;  %v4065_v63 = vadd.f32 %v7713_v0, %v11403_v26  ;;  %v6544_v0 = vld [vmem:[#allocation17 + $0xf8] sm:$0xff] }
 0x65e   :  { %v4322_v39 = vpop.f32.mrb[145].mxu1  ;;  %v4060_v27 = vadd.f32 %v11403_v26, %v4059_v43  ;;  %v4328_v43 = vadd.f32 %v7793_v7, %v11409_v29  ;;  %v8181_v4 = vpack.c.bf16 %v6544_v0, %v6543_v46 }
 0x65f   :  { %v4323_v59 = vadd.f32 %v11409_v29, %v4322_v39  ;;  %v11655_v39 = vrot.slane %v11629_v42, %v14812_v19  ;;  %v11658_v52 = vmax.f32 %v4065_v63, 0.0  ;;  %v5265_v63 = vmul.f32 %v5204_v48, %v11601_v3 }
 0x660   :  { %v11663_v1 = vmax.f32 %v4060_v27, 0.0  ;;  %v4626_v27 = vmul.f32 %v11445_v33, %v11463_v57  ;;  %8182 = vmatpush1.bf16.msra.mxu0 %v8181_v4  ;;  %v11705_v4 = vrot.slane %v11428_v14, %v14812_v19 }
 0x661   :  { %14901 = vst [vmem:[#allocation122_spill] sm:$0xff] %v11655_v39  ;;  %14902 = vst [vmem:[#allocation130_spill] sm:$0xff] %v11658_v52  ;;  %v11665_v20 = vmax.f32 %v4323_v59, 0.0  ;;  %v5332_v39 = vrot.slane %v11424_v34, %v14725_v13  ;;  %v11675_v59 = vmax.f32 %v4328_v43, 0.0  ;;  %v5460_v34 = vrot.slane %v11428_v14, %v14728_v24 }
 0x662   :  { %14903 = vst [vmem:[#allocation131_spill] sm:$0xff] %v11663_v1  ;;  %v4658_v16 = vadd.f32 %v4626_v27, %v4498_v6  ;;  %v11686_v33 = vrot.slane %v11663_v1, %v14728_v24  ;;  %v11690_v43 = vrot.slane %v11663_v1, %v14789_v32  ;;  %v5297_v58 = vadd.f32 %v5265_v63, %v5169_v17 }
 0x663   :  { %14904 = vst [vmem:[#allocation134_spill] sm:$0xff] %v11665_v20  ;;  %14905 = vst [vmem:[#allocation135_spill] sm:$0xff] %v11675_v59  ;;  %v5393_v46 = vmul.f32 %v5332_v39, %v11639_v53  ;;  %v5521_v52 = vmul.f32 %v5460_v34, %v11665_v20  ;;  %v11700_v6 = vrot.slane %v11663_v1, %v14812_v19 }
 0x664   :  { %14906 = vst [vmem:[#allocation137_spill] sm:$0xff] %v11686_v33  ;;  %14907 = vst [vmem:[#allocation139_spill] sm:$0xff] %v11690_v43  ;;  %v4786_v31 = vadd.f32 %v4754_v22, %v4658_v16  ;;  %v5266_v16 = vmul.f32 %v5204_v48, %v11599_v28  ;;  %v4952_v48 = vrot.slane %v11435_v5, %v14722_v23 }
 0x665   :  { %14909 = vst [vmem:[#allocation45_spill] sm:$0xff] %v11700_v6  ;;  %v4627_v6 = vmul.f32 %v11480_v60, %v11472_v12 }
 0x666   :  { %v4914_v22 = vadd.f32 %v4882_v49, %v4786_v31  ;;  %v4824_v49 = vrot.slane %v11435_v5, %v14774_v36 }
 0x668   :  { %v5042_v43 = vadd.f32 %v5010_v44, %v4914_v22 }
 0x66a   :  { %v5170_v33 = vadd.f32 %v5138_v30, %v5042_v43  ;;  %v5080_v43 = vrot.slane %v11435_v5, %v14724_v62  ;;  %v11752_v30 = vrot.slane %v11428_v14, %v14725_v13 }
 0x66b   :  { %v7716_v40 = vpop.f32.mrb[146].mxu0 }
 0x66c   :  { %v4069_v42 = vpop.f32.mrb[147].mxu0  ;;  %v7796_v7 = vpop.f32.mrb[146].mxu1  ;;  %v4075_v38 = vadd.f32 %v7716_v40, %v11403_v26  ;;  %v11738_v40 = vrot.slane %v11428_v14, %v14724_v62  ;;  %14917 = vst [vmem:[#allocation141_spill] sm:$0xff] %v11752_v30  ;;  %v4756_v30 = vmul.f32 %v11484_v51, %v11492_v11 }
 0x66d   :  { %v4332_v8 = vpop.f32.mrb[147].mxu1  ;;  %v4338_v27 = vadd.f32 %v7796_v7, %v11409_v29  ;;  %v4070_v17 = vadd.f32 %v11403_v26, %v4069_v42  ;;  %v4499_v7 = vmul.f32 %v11470_v50, %v11447_v56  ;;  %v5394_v42 = vmul.f32 %v5332_v39, %v11635_v61 }
 0x66e   :  { %v4333_v0 = vadd.f32 %v11409_v29, %v4332_v8  ;;  %v11709_v8 = vrot.slane %v11428_v14, %v14774_v36  ;;  %14914 = vst [vmem:[#allocation144_spill] sm:$0xff] %v11738_v40  ;;  %v5522_v39 = vmul.f32 %v5460_v34, %v11675_v59  ;;  %v4884_v40 = vmul.f32 %v4824_v49, %v11517_v45 }
 0x66f   :  { %v11730_v44 = vmax.f32 %v4070_v17, 0.0 }
 0x670   :  { %v11695_v21 = vmax.f32 %v4333_v0, 0.0  ;;  %14910 = vst [vmem:[#allocation133_spill] sm:$0xff] %v11709_v8  ;;  %v5425_v0 = vadd.f32 %v5393_v46, %v5297_v58  ;;  %v4755_v46 = vmul.f32 %v11484_v51, %v11494_v41  ;;  %v11724_v58 = vmax.f32 %v4338_v27, 0.0 }
 0x671   :  { %v4659_v8 = vadd.f32 %v4627_v6, %v4499_v7  ;;  %14912 = vst [vmem:[#allocation136_spill] sm:$0xff] %v11730_v44  ;;  %v5298_v27 = vadd.f32 %v5266_v16, %v5170_v33  ;;  %v11744_v6 = vmax.f32 %v4075_v38, 0.0  ;;  %v5208_v16 = vrot.slane %v11435_v5, %v14727_v2 }
 0x672   :  { %14908 = vst [vmem:[#allocation132_spill] sm:$0xff] %v11695_v21  ;;  %v5649_v63 = vmul.f32 %v5588_v35, %v11695_v21  ;;  %v5553_v1 = vadd.f32 %v5521_v52, %v5425_v0  ;;  %14911 = vst [vmem:[#allocation140_spill] sm:$0xff] %v11724_v58  ;;  %v4883_v52 = vmul.f32 %v4824_v49, %v11521_v25 }
 0x673   :  { %v11734_v0 = vrot.slane %v11428_v14, %v14722_v23  ;;  %v4787_v22 = vadd.f32 %v4755_v46, %v4659_v8  ;;  %14915 = vst [vmem:[#allocation149_spill] sm:$0xff] %v11744_v6  ;;  %v5650_v17 = vmul.f32 %v5588_v35, %v11724_v58  ;;  %v5426_v34 = vadd.f32 %v5394_v42, %v5298_v27 }
 0x674   :  { %v5681_v31 = vadd.f32 %v5649_v63, %v5553_v1  ;;  %v5011_v1 = vmul.f32 %v4952_v48, %v11567_v55  ;;  %v11748_v63 = vrot.slane %v11428_v14, %v14727_v2  ;;  %v5139_v8 = vmul.f32 %v5080_v43, %v11579_v10 }
 0x675   :  { %14913 = vst [vmem:[#allocation143_spill] sm:$0xff] %v11734_v0  ;;  %v4915_v33 = vadd.f32 %v4883_v52, %v4787_v22  ;;  %v11760_v7 = vrot.slane %v11730_v44, %v14728_v24  ;;  %v5336_v38 = vrot.slane %v11435_v5, %v14725_v13  ;;  %v4500_v14 = vmul.f32 %v11470_v50, %v11433_v15 }
 0x676   :  { %14916 = vst [vmem:[#allocation138_spill] sm:$0xff] %v11748_v63  ;;  %v4628_v35 = vmul.f32 %v11480_v60, %v11463_v57  ;;  %v5554_v27 = vadd.f32 %v5522_v39, %v5426_v34  ;;  %v5267_v6 = vmul.f32 %v5208_v16, %v11601_v3  ;;  %v5464_v50 = vrot.slane %v11461_v54, %v14728_v24 }
 0x677   :  { %14918 = vst [vmem:[#allocation142_spill] sm:$0xff] %v11760_v7  ;;  %v5043_v22 = vadd.f32 %v5011_v1, %v4915_v33  ;;  %v5395_v5 = vmul.f32 %v5336_v38, %v11639_v53  ;;  %v11779_v34 = vrot.slane %v11730_v44, %v14789_v32 }
 0x678   :  { %v5682_v0 = vadd.f32 %v5650_v17, %v5554_v27  ;;  %v4660_v1 = vadd.f32 %v4628_v35, %v4500_v14  ;;  %v5523_v33 = vmul.f32 %v5464_v50, %v11665_v20  ;;  %v11791_v17 = vrot.slane %v11730_v44, %v14812_v19 }
 0x679   :  { %v5171_v39 = vadd.f32 %v5139_v8, %v5043_v22  ;;  %14919 = vst [vmem:[#allocation150_spill] sm:$0xff] %v11779_v34  ;;  %v5720_v14 = vrot.slane %v11461_v54, %v14812_v19  ;;  %v4501_v34 = vmul.f32 %v11500_v47, %v11447_v56 }
 0x67a   :  { %v4788_v49 = vadd.f32 %v4756_v30, %v4660_v1  ;;  %14922 = vst [vmem:[#allocation145_spill] sm:$0xff] %v11791_v17  ;;  %v5140_v30 = vmul.f32 %v5080_v43, %v11577_v18 }
 0x67b   :  { %v7719_v46 = vpop.f32.mrb[148].mxu0  ;;  %v5299_v53 = vadd.f32 %v5267_v6, %v5171_v39  ;;  %v5268_v39 = vmul.f32 %v5208_v16, %v11599_v28 }
 0x67c   :  { %v4079_v42 = vpop.f32.mrb[149].mxu0  ;;  %v7799_v52 = vpop.f32.mrb[148].mxu1  ;;  %v4916_v6 = vadd.f32 %v4884_v40, %v4788_v49  ;;  %v14924_v40 = vld [vmem:[#allocation40_spill] sm:$0xff]  ;;  %v4085_v43 = vadd.f32 %v7719_v46, %v11403_v26  ;;  %v14925_v49 = vld [vmem:[#allocation87_spill] sm:$0xff]  ;;  %v5524_v46 = vmul.f32 %v5464_v50, %v11675_v59 }
 0x67d   :  { %v4348_v7 = vadd.f32 %v7799_v52, %v11409_v29  ;;  %v4342_v63 = vpop.f32.mrb[149].mxu1  ;;  %v5592_v52 = vrot.slane %v11461_v54, %v14789_v32  ;;  %v5427_v27 = vadd.f32 %v5395_v5, %v5299_v53  ;;  %v11812_v53 = vrot.slane %v11461_v54, %v14774_v36 }
 0x67e   :  { %v4343_v60 = vadd.f32 %v11409_v29, %v4342_v63  ;;  %v5012_v63 = vmul.f32 %v4952_v48, %v11551_v37  ;;  %v4080_v48 = vadd.f32 %v11403_v26, %v4079_v42  ;;  %v5396_v5 = vmul.f32 %v5336_v38, %v11635_v61 }
 0x67f   :  { %v11781_v51 = vmax.f32 %v4348_v7, 0.0  ;;  %v5651_v7 = vmul.f32 %v5592_v52, %v11695_v21  ;;  %v5555_v44 = vadd.f32 %v5523_v33, %v5427_v27  ;;  %v5652_v50 = vmul.f32 %v5592_v52, %v11724_v58 }
 0x680   :  { %v11786_v11 = vmax.f32 %v4343_v60, 0.0  ;;  %v5044_v17 = vadd.f32 %v5012_v63, %v4916_v6  ;;  %v4757_v63 = vmul.f32 %v14925_v49, %v11494_v41  ;;  %v11829_v27 = vmax.f32 %v4080_v48, 0.0 }
 0x681   :  { %14920 = vst [vmem:[#allocation151_spill] sm:$0xff] %v11781_v51  ;;  %v5778_v8 = vmul.f32 %v11705_v4, %v11781_v51  ;;  %v5683_v16 = vadd.f32 %v5651_v7, %v5555_v44  ;;  %v11836_v44 = vrot.slane %v11461_v54, %v14724_v62  ;;  %v11843_v7 = vrot.slane %v11461_v54, %v14727_v2 }
 0x682   :  { %14921 = vst [vmem:[#allocation152_spill] sm:$0xff] %v11786_v11  ;;  %v5777_v35 = vmul.f32 %v11705_v4, %v11786_v11  ;;  %v5779_v60 = vmul.f32 %v5720_v14, %v11786_v11  ;;  %v11816_v4 = vrot.slane %v11461_v54, %v14722_v23  ;;  %v5172_v42 = vadd.f32 %v5140_v30, %v5044_v17 }
 0x683   :  { %v11802_v22 = vadd.f32 %v5778_v8, %v5682_v0  ;;  %v4629_v0 = vmul.f32 %v11504_v9, %v11472_v12  ;;  %14926 = vst [vmem:[#allocation147_spill] sm:$0xff] %v11829_v27  ;;  %14927 = vst [vmem:[#allocation153_spill] sm:$0xff] %v11836_v44  ;;  %v5084_v17 = vrot.slane %v14924_v40, %v14724_v62 }
 0x684   :  { %v11806_v1 = vadd.f32 %v5777_v35, %v5681_v31  ;;  %14923 = vst [vmem:[#allocation146_spill] sm:$0xff] %v11816_v4  ;;  %v4828_v31 = vrot.slane %v14924_v40, %v14774_v36  ;;  %v4956_v35 = vrot.slane %v14924_v40, %v14722_v23  ;;  %v11831_v6 = vadd.f32 %v5779_v60, %v5683_v16 }
 0x685   :  { %v4661_v33 = vadd.f32 %v4629_v0, %v4501_v34  ;;  %v5300_v4 = vadd.f32 %v5268_v39, %v5172_v42  ;;  %14928 = vst [vmem:[#allocation157_spill] sm:$0xff] %v11843_v7  ;;  %v11847_v30 = vrot.slane %v11461_v54, %v14725_v13  ;;  %v11850_v60 = vmax.f32 %v4085_v43, 0.0  ;;  %v14936_v7 = vld [vmem:[#allocation107_spill] sm:$0xff] }
 0x686   :  { %v4885_v8 = vmul.f32 %v4828_v31, %v11521_v25  ;;  %v5013_v34 = vmul.f32 %v4956_v35, %v11567_v55  ;;  %v5141_v0 = vmul.f32 %v5084_v17, %v11579_v10  ;;  %v5212_v16 = vrot.slane %v14924_v40, %v14727_v2 }
 0x687   :  { %v4789_v38 = vadd.f32 %v4757_v63, %v4661_v33  ;;  %14929 = vst [vmem:[#allocation168_spill] sm:$0xff] %v11847_v30  ;;  %v5428_v48 = vadd.f32 %v5396_v5, %v5300_v4  ;;  %14930 = vst [vmem:[#allocation169_spill] sm:$0xff] %v11850_v60  ;;  %v11857_v42 = vrot.slane %v11829_v27, %v14728_v24 }
 0x688   :  { %v5780_v63 = vmul.f32 %v5720_v14, %v11781_v51  ;;  %v5340_v54 = vrot.slane %v14924_v40, %v14725_v13  ;;  %v5269_v52 = vmul.f32 %v5212_v16, %v11601_v3  ;;  %v4502_v43 = vmul.f32 %v11500_v47, %v11433_v15  ;;  %v14934_v14 = vld [vmem:[#allocation96_spill] sm:$0xff] }
 0x689   :  { %v4917_v39 = vadd.f32 %v4885_v8, %v4789_v38  ;;  %14931 = vst [vmem:[#allocation170_spill] sm:$0xff] %v11857_v42  ;;  %v5556_v33 = vadd.f32 %v5524_v46, %v5428_v48  ;;  %v4630_v5 = vmul.f32 %v11504_v9, %v11463_v57  ;;  %v11869_v8 = vrot.slane %v11829_v27, %v14789_v32  ;;  %v14933_v46 = vld [vmem:[#allocation129_spill] sm:$0xff]  ;;  %v14937_v57 = vld [vmem:[#allocation108_spill] sm:$0xff] }
 0x68a   :  { %v5397_v48 = vmul.f32 %v5340_v54, %v14933_v46  ;;  %v5468_v60 = vrot.slane %v14934_v14, %v14728_v24  ;;  %v11878_v47 = vrot.slane %v14934_v14, %v14812_v19  ;;  %v4503_v44 = vmul.f32 %v14936_v7, %v11447_v56 }
 0x68b   :  { %v5045_v4 = vadd.f32 %v5013_v34, %v4917_v39  ;;  %14932 = vst [vmem:[#allocation174_spill] sm:$0xff] %v11869_v8  ;;  %v5684_v38 = vadd.f32 %v5652_v50, %v5556_v33  ;;  %v5596_v34 = vrot.slane %v14934_v14, %v14789_v32  ;;  %v4662_v39 = vadd.f32 %v4630_v5, %v4502_v43  ;;  %v14935_v33 = vld [vmem:[#allocation97_spill] sm:$0xff] }
 0x68c   :  { %v5525_v42 = vmul.f32 %v5468_v60, %v11665_v20  ;;  %v11883_v50 = vrot.slane %v14934_v14, %v14774_v36  ;;  %v4758_v8 = vmul.f32 %v14925_v49, %v14935_v33  ;;  %v4631_v43 = vmul.f32 %v14937_v57, %v11472_v12  ;;  %v14938_v49 = vld [vmem:[#allocation60_spill] sm:$0xff] }
 0x68d   :  { %v5173_v40 = vadd.f32 %v5141_v0, %v5045_v4  ;;  %v5812_v9 = vadd.f32 %v5780_v63, %v5684_v38  ;;  %v4886_v4 = vmul.f32 %v4828_v31, %v11517_v45  ;;  %v5653_v38 = vmul.f32 %v5596_v34, %v11695_v21 }
 0x68e   :  { %v5781_v15 = vmul.f32 %v11878_v47, %v11786_v11  ;;  %v5014_v32 = vmul.f32 %v4956_v35, %v11551_v37  ;;  %v4790_v45 = vadd.f32 %v4758_v8, %v4662_v39  ;;  %v5142_v12 = vmul.f32 %v5084_v17, %v11577_v18  ;;  %v14939_v11 = vld [vmem:[#allocation109_spill] sm:$0xff] }
 0x68f   :  { %v5301_v0 = vadd.f32 %v5269_v52, %v5173_v40  ;;  %v11898_v52 = vrot.slane %v14938_v49, %v14774_v36  ;;  %v5270_v21 = vmul.f32 %v5212_v16, %v11599_v28  ;;  %v4663_v57 = vadd.f32 %v4631_v43, %v4503_v44  ;;  %v14942_v16 = vld [vmem:[#allocation133_spill] sm:$0xff] }
 0x690   :  { %v4759_v7 = vmul.f32 %v14939_v11, %v11494_v41  ;;  %v4918_v36 = vadd.f32 %v4886_v4, %v4790_v45  ;;  %v5398_v17 = vmul.f32 %v5340_v54, %v11635_v61  ;;  %v5526_v8 = vmul.f32 %v5468_v60, %v11675_v59 }
 0x691   :  { %v7722_v30 = vpop.f32.mrb[150].mxu0  ;;  %v5429_v56 = vadd.f32 %v5397_v48, %v5301_v0  ;;  %v4887_v44 = vmul.f32 %v11898_v52, %v11521_v25 }
 0x692   :  { %v4089_v63 = vpop.f32.mrb[151].mxu0  ;;  %v7802_v5 = vpop.f32.mrb[150].mxu1  ;;  %v5046_v0 = vadd.f32 %v5014_v32, %v4918_v36  ;;  %v4791_v43 = vadd.f32 %v4759_v7, %v4663_v57  ;;  %v11935_v57 = vrot.slane %v14938_v49, %v14724_v62 }
 0x693   :  { %v4358_v31 = vadd.f32 %v7802_v5, %v11409_v29  ;;  %v4352_v40 = vpop.f32.mrb[151].mxu1  ;;  %v5557_v37 = vadd.f32 %v5525_v42, %v5429_v56  ;;  %v11910_v5 = vrot.slane %v14938_v49, %v14722_v23 }
 0x694   :  { %v4353_v33 = vadd.f32 %v11409_v29, %v4352_v40  ;;  %v5174_v32 = vadd.f32 %v5142_v12, %v5046_v0  ;;  %v5216_v12 = vrot.slane %v14938_v49, %v14727_v2  ;;  %v11951_v40 = vrot.slane %v11829_v27, %v14812_v19 }
 0x695   :  { %v11906_v35 = vmax.f32 %v4358_v31, 0.0  ;;  %v5015_v56 = vmul.f32 %v11910_v5, %v11567_v55  ;;  %v5685_v54 = vadd.f32 %v5653_v38, %v5557_v37  ;;  %v5143_v38 = vmul.f32 %v11935_v57, %v11579_v10 }
 0x696   :  { %v11912_v48 = vmax.f32 %v4353_v33, 0.0  ;;  %14943 = vst [vmem:[#allocation166_spill] sm:$0xff] %v11951_v40  ;;  %v11966_v0 = vrot.slane %v14934_v14, %v14724_v62 }
 0x697   :  { %14940 = vst [vmem:[#allocation177_spill] sm:$0xff] %v11906_v35  ;;  %v5906_v39 = vmul.f32 %v14942_v16, %v11906_v35  ;;  %v5908_v60 = vmul.f32 %v11812_v53, %v11906_v35  ;;  %v5813_v37 = vadd.f32 %v5781_v15, %v5685_v54 }
 0x698   :  { %14941 = vst [vmem:[#allocation165_spill] sm:$0xff] %v11912_v48  ;;  %v5905_v45 = vmul.f32 %v14942_v16, %v11912_v48  ;;  %v5907_v42 = vmul.f32 %v11812_v53, %v11912_v48  ;;  %v5909_v36 = vmul.f32 %v11883_v50, %v11912_v48  ;;  %v5302_v53 = vadd.f32 %v5270_v21, %v5174_v32 }
 0x699   :  { %v11929_v33 = vadd.f32 %v5906_v39, %v11802_v22  ;;  %v11943_v31 = vadd.f32 %v5908_v60, %v5812_v9  ;;  %v4919_v22 = vadd.f32 %v4887_v44, %v4791_v43  ;;  %v5271_v21 = vmul.f32 %v5216_v12, %v11601_v3  ;;  %14944 = vst [vmem:[#allocation167_spill] sm:$0xff] %v11966_v0  ;;  %v14959_v0 = vld [vmem:[#allocation152_spill] sm:$0xff] }
 0x69a   :  { %v11938_v7 = vadd.f32 %v5905_v45, %v11806_v1  ;;  %v11941_v4 = vadd.f32 %v5907_v42, %v11831_v6  ;;  %v4090_v1 = vadd.f32 %v11403_v26, %v4089_v63  ;;  %v11954_v16 = vadd.f32 %v5909_v36, %v5813_v37 }
 0x69b   :  { %v5654_v6 = vmul.f32 %v5596_v34, %v11724_v58  ;;  %v5430_v9 = vadd.f32 %v5398_v17, %v5302_v53  ;;  %v5047_v15 = vadd.f32 %v5015_v56, %v4919_v22  ;;  %v11960_v44 = vrot.slane %v14938_v49, %v14725_v13  ;;  %v14945_v34 = vld [vmem:[#allocation88_spill] sm:$0xff]  ;;  %v14950_v22 = vld [vmem:[#allocation95_spill] sm:$0xff] }
 0x69c   :  { %v5980_v39 = vrot.slane %v14934_v14, %v14722_v23  ;;  %v5782_v63 = vmul.f32 %v11878_v47, %v11781_v51  ;;  %v11972_v17 = vrot.slane %v14945_v34, %v14728_v24  ;;  %v4095_v43 = vadd.f32 %v7722_v30, %v11403_v26  ;;  %v14947_v47 = vld [vmem:[#allocation30_spill] sm:$0xff]  ;;  %v14948_v30 = vld [vmem:[#allocation61_spill] sm:$0xff] }
 0x69d   :  { %v5558_v56 = vadd.f32 %v5526_v8, %v5430_v9  ;;  %v5175_v45 = vadd.f32 %v5143_v38, %v5047_v15  ;;  %v5399_v49 = vmul.f32 %v11960_v44, %v14933_v46  ;;  %v11977_v42 = vmax.f32 %v4090_v1, 0.0  ;;  %v14949_v8 = vld [vmem:[#allocation107_spill] sm:$0xff]  ;;  %v14951_v38 = vld [vmem:[#allocation108_spill] sm:$0xff] }
 0x69e   :  { %v5910_v60 = vmul.f32 %v11883_v50, %v11906_v35  ;;  %v5527_v54 = vmul.f32 %v11972_v17, %v11665_v20  ;;  %v11985_v36 = vrot.slane %v14945_v34, %v14947_v47  ;;  %v4504_v53 = vmul.f32 %v14949_v8, %v14948_v30  ;;  %v14954_v15 = vld [vmem:[#allocation132_spill] sm:$0xff]  ;;  %v14955_v8 = vld [vmem:[#allocation97_spill] sm:$0xff] }
 0x69f   :  { %14946 = vst [vmem:[#allocation178_spill] sm:$0xff] %v11977_v42  ;;  %v5686_v32 = vadd.f32 %v5654_v6, %v5558_v56  ;;  %v5303_v37 = vadd.f32 %v5271_v21, %v5175_v45  ;;  %v4632_v9 = vmul.f32 %v14951_v38, %v14950_v22  ;;  %v11993_v1 = vrot.slane %v14934_v14, %v14727_v2  ;;  %v14963_v20 = vld [vmem:[#allocation101_spill] sm:$0xff] }
 0x6a0   :  { %v11997_v50 = vrot.slane %v14934_v14, %v14725_v13  ;;  %v5655_v40 = vmul.f32 %v11985_v36, %v14954_v15  ;;  %v12003_v6 = vrot.slane %v14945_v34, %v14812_v19  ;;  %v4760_v38 = vmul.f32 %v14939_v11, %v14955_v8  ;;  %v14960_v11 = vld [vmem:[#allocation89_spill] sm:$0xff] }
 0x6a1   :  { %14952 = vst [vmem:[#allocation179_spill] sm:$0xff] %v11993_v1  ;;  %v5814_v21 = vadd.f32 %v5782_v63, %v5686_v32  ;;  %v5431_v56 = vadd.f32 %v5399_v49, %v5303_v37  ;;  %v4664_v45 = vadd.f32 %v4632_v9, %v4504_v53  ;;  %v12007_v27 = vmax.f32 %v4095_v43, 0.0 }
 0x6a2   :  { %14953 = vst [vmem:[#allocation155_spill] sm:$0xff] %v11997_v50  ;;  %v12011_v1 = vrot.slane %v11977_v42, %v14728_v24  ;;  %v12015_v14 = vrot.slane %v11977_v42, %v14947_v47  ;;  %v5783_v15 = vmul.f32 %v12003_v6, %v14959_v0  ;;  %v4888_v43 = vmul.f32 %v11898_v52, %v14960_v11  ;;  %v14970_v11 = vld [vmem:[#allocation111_spill] sm:$0xff] }
 0x6a3   :  { %14956 = vst [vmem:[#allocation156_spill] sm:$0xff] %v12007_v27  ;;  %v5942_v32 = vadd.f32 %v5910_v60, %v5814_v21  ;;  %v5559_v37 = vadd.f32 %v5527_v54, %v5431_v56  ;;  %v4792_v53 = vadd.f32 %v4760_v38, %v4664_v45  ;;  %v12023_v9 = vrot.slane %v11977_v42, %v14812_v19 }
 0x6a4   :  { %14957 = vst [vmem:[#allocation181_spill] sm:$0xff] %v12011_v1  ;;  %14958 = vst [vmem:[#allocation158_spill] sm:$0xff] %v12015_v14  ;;  %v7725_v50 = vpop.f32.mrb[152].mxu0  ;;  %v14962_v14 = vld [vmem:[#allocation32_spill] sm:$0xff]  ;;  %v5016_v0 = vmul.f32 %v11910_v5, %v14963_v20  ;;  %v12033_v21 = vrot.slane %v14945_v34, %v14722_v23  ;;  %v5144_v38 = vmul.f32 %v11935_v57, %v11577_v18  ;;  %v14968_v20 = vld [vmem:[#allocation143_spill] sm:$0xff] }
 0x6a5   :  { %v4099_v63 = vpop.f32.mrb[153].mxu0  ;;  %v7805_v49 = vpop.f32.mrb[152].mxu1  ;;  %14961 = vst [vmem:[#allocation198_spill] sm:$0xff] %v12023_v9  ;;  %v5856_v8 = vrot.slane %v14945_v34, %v14962_v14  ;;  %v5687_v54 = vadd.f32 %v5655_v40, %v5559_v37  ;;  %v4920_v52 = vadd.f32 %v4888_v43, %v4792_v53  ;;  %v14966_v40 = vld [vmem:[#allocation85_spill] sm:$0xff]  ;;  %v14967_v37 = vld [vmem:[#allocation102_spill] sm:$0xff] }
 0x6a6   :  { %v4368_v27 = vadd.f32 %v7805_v49, %v11409_v29  ;;  %v4362_v1 = vpop.f32.mrb[153].mxu1  ;;  %v5272_v49 = vmul.f32 %v5216_v12, %v11599_v28  ;;  %v4100_v42 = vadd.f32 %v11403_v26, %v4099_v63  ;;  %v4505_v9 = vmul.f32 %v14967_v37, %v14966_v40  ;;  %v14969_v43 = vld [vmem:[#allocation86_spill] sm:$0xff] }
 0x6a7   :  { %v4363_v60 = vadd.f32 %v11409_v29, %v4362_v1  ;;  %v5911_v45 = vmul.f32 %v5856_v8, %v11912_v48  ;;  %v5815_v1 = vadd.f32 %v5783_v15, %v5687_v54  ;;  %v4633_v48 = vmul.f32 %v14970_v11, %v14969_v43  ;;  %v14971_v29 = vld [vmem:[#allocation99_spill] sm:$0xff]  ;;  %v14972_v63 = vld [vmem:[#allocation146_spill] sm:$0xff] }
 0x6a8   :  { %v12035_v56 = vmax.f32 %v4368_v27, 0.0  ;;  %v5048_v27 = vadd.f32 %v5016_v0, %v4920_v52  ;;  %v12052_v57 = vrot.slane %v14971_v29, %v14962_v14 }
 0x6a9   :  { %v12042_v5 = vmax.f32 %v4363_v60, 0.0  ;;  %v5943_v43 = vadd.f32 %v5911_v45, %v5815_v1  ;;  %v5400_v45 = vmul.f32 %v11960_v44, %v11635_v61  ;;  %v4665_v1 = vadd.f32 %v4633_v48, %v4505_v9 }
 0x6aa   :  { %14964 = vst [vmem:[#allocation182_spill] sm:$0xff] %v12035_v56  ;;  %v6034_v53 = vmul.f32 %v14968_v20, %v12035_v56  ;;  %v6036_v60 = vmul.f32 %v14972_v63, %v12035_v56  ;;  %v6038_v52 = vmul.f32 %v5980_v39, %v12035_v56  ;;  %v12100_v44 = vrot.slane %v14945_v34, %v14727_v2 }
 0x6ab   :  { %14965 = vst [vmem:[#allocation183_spill] sm:$0xff] %v12042_v5  ;;  %v6033_v12 = vmul.f32 %v14968_v20, %v12042_v5  ;;  %v6035_v15 = vmul.f32 %v14972_v63, %v12042_v5  ;;  %v6037_v54 = vmul.f32 %v5980_v39, %v12042_v5  ;;  %v6039_v40 = vmul.f32 %v12033_v21, %v12042_v5 }
 0x6ac   :  { %v12062_v0 = vadd.f32 %v6034_v53, %v11929_v33  ;;  %v12074_v18 = vadd.f32 %v6036_v60, %v11943_v31  ;;  %v12079_v33 = vadd.f32 %v6038_v52, %v5942_v32  ;;  %v5176_v39 = vadd.f32 %v5144_v38, %v5048_v27  ;;  %14975 = vst [vmem:[#allocation200_spill] sm:$0xff] %v12100_v44 }
 0x6ad   :  { %v12068_v28 = vadd.f32 %v6033_v12, %v11938_v7  ;;  %v12071_v20 = vadd.f32 %v6035_v15, %v11941_v4  ;;  %v12077_v63 = vadd.f32 %v6037_v54, %v11954_v16  ;;  %v12081_v53 = vadd.f32 %v6039_v40, %v5943_v43  ;;  %v14973_v4 = vld [vmem:[#allocation114_spill] sm:$0xff] }
 0x6ae   :  { %v4105_v7 = vadd.f32 %v7725_v50, %v11403_v26  ;;  %v4761_v12 = vmul.f32 %v14973_v4, %v11494_v41  ;;  %v4964_v31 = vrot.slane %v14971_v29, %v14722_v23  ;;  %v12090_v15 = vmax.f32 %v4100_v42, 0.0 }
 0x6af   :  { %v12094_v16 = vrot.slane %v14945_v34, %v14724_v62  ;;  %v5304_v32 = vadd.f32 %v5272_v49, %v5176_v39  ;;  %v5528_v38 = vmul.f32 %v11972_v17, %v11675_v59  ;;  %v12104_v48 = vrot.slane %v14945_v34, %v14725_v13 }
 0x6b0   :  { %14974 = vst [vmem:[#allocation199_spill] sm:$0xff] %v12090_v15  ;;  %v4793_v50 = vadd.f32 %v4761_v12, %v4665_v1  ;;  %v4889_v42 = vmul.f32 %v12052_v57, %v11521_v25  ;;  %v5656_v40 = vmul.f32 %v11985_v36, %v11724_v58  ;;  %v5784_v49 = vmul.f32 %v12003_v6, %v11781_v51  ;;  %v14981_v12 = vld [vmem:[#allocation100_spill] sm:$0xff] }
 0x6b1   :  { %14976 = vst [vmem:[#allocation53_spill] sm:$0xff] %v12104_v48  ;;  %v5432_v9 = vadd.f32 %v5400_v45, %v5304_v32  ;;  %v5912_v17 = vmul.f32 %v5856_v8, %v11906_v35  ;;  %v12113_v27 = vmax.f32 %v4105_v7, 0.0  ;;  %v5017_v60 = vmul.f32 %v4964_v31, %v11567_v55 }
 0x6b2   :  { %v4921_v43 = vadd.f32 %v4889_v42, %v4793_v50  ;;  %v12118_v34 = vrot.slane %v14971_v29, %v14724_v62  ;;  %v12122_v54 = vrot.slane %v12090_v15, %v14728_v24  ;;  %v12126_v36 = vrot.slane %v12090_v15, %v14947_v47 }
 0x6b3   :  { %14977 = vst [vmem:[#allocation41_spill] sm:$0xff] %v12113_v27  ;;  %v12130_v6 = vrot.slane %v12090_v15, %v14812_v19  ;;  %v5560_v8 = vadd.f32 %v5528_v38, %v5432_v9  ;;  %v5220_v45 = vrot.slane %v14971_v29, %v14727_v2  ;;  %v5348_v7 = vrot.slane %v14971_v29, %v14725_v13  ;;  %v14982_v15 = vld [vmem:[#allocation134_spill] sm:$0xff] }
 0x6b4   :  { %14978 = vst [vmem:[#allocation195_spill] sm:$0xff] %v12122_v54  ;;  %14979 = vst [vmem:[#allocation196_spill] sm:$0xff] %v12126_v36  ;;  %v5049_v52 = vadd.f32 %v5017_v60, %v4921_v43  ;;  %v5145_v39 = vmul.f32 %v12118_v34, %v11579_v10  ;;  %v12140_v32 = vrot.slane %v14981_v12, %v14728_v24  ;;  %v14984_v54 = vld [vmem:[#allocation94_spill] sm:$0xff] }
 0x6b5   :  { %14980 = vst [vmem:[#allocation197_spill] sm:$0xff] %v12130_v6  ;;  %v5688_v1 = vadd.f32 %v5656_v40, %v5560_v8  ;;  %v4506_v50 = vmul.f32 %v14967_v37, %v14948_v30  ;;  %v4634_v38 = vmul.f32 %v14970_v11, %v14950_v22  ;;  %v6040_v9 = vmul.f32 %v12033_v21, %v12035_v56  ;;  %v14983_v11 = vld [vmem:[#allocation97_spill] sm:$0xff]  ;;  %v14985_v30 = vld [vmem:[#allocation132_spill] sm:$0xff] }
 0x6b6   :  { %v5273_v43 = vmul.f32 %v5220_v45, %v11601_v3  ;;  %v5401_v60 = vmul.f32 %v5348_v7, %v14933_v46  ;;  %v12152_v29 = vrot.slane %v14981_v12, %v14947_v47  ;;  %v5529_v37 = vmul.f32 %v12140_v32, %v14982_v15 }
 0x6b7   :  { %v7728_v42 = vpop.f32.mrb[154].mxu0  ;;  %v5816_v27 = vadd.f32 %v5784_v49, %v5688_v1  ;;  %v4666_v6 = vadd.f32 %v4634_v38, %v4506_v50  ;;  %v4762_v36 = vmul.f32 %v14973_v4, %v14983_v11  ;;  %v5177_v22 = vadd.f32 %v5145_v39, %v5049_v52  ;;  %v14987_v39 = vld [vmem:[#allocation89_spill] sm:$0xff] }
 0x6b8   :  { %v4109_v40 = vpop.f32.mrb[155].mxu0  ;;  %v7808_v8 = vpop.f32.mrb[154].mxu1  ;;  %v5657_v44 = vmul.f32 %v12152_v29, %v14985_v30  ;;  %v12163_v46 = vrot.slane %v14981_v12, %v14812_v19  ;;  %v12168_v50 = vrot.slane %v14981_v12, %v14962_v14  ;;  %v12174_v52 = vrot.slane %v14981_v12, %v14722_v23 }
 0x6b9   :  { %v4378_v21 = vadd.f32 %v7808_v8, %v14984_v54  ;;  %v4372_v48 = vpop.f32.mrb[155].mxu1  ;;  %v5944_v1 = vadd.f32 %v5912_v17, %v5816_v27  ;;  %v4794_v38 = vadd.f32 %v4762_v36, %v4666_v6  ;;  %v5305_v8 = vadd.f32 %v5273_v43, %v5177_v22  ;;  %v14990_v27 = vld [vmem:[#allocation101_spill] sm:$0xff]  ;;  %v14991_v6 = vld [vmem:[#allocation144_spill] sm:$0xff] }
 0x6ba   :  { %v4373_v49 = vadd.f32 %v14984_v54, %v4372_v48  ;;  %v4890_v11 = vmul.f32 %v12052_v57, %v14987_v39  ;;  %v14989_v48 = vld [vmem:[#allocation152_spill] sm:$0xff]  ;;  %v5018_v54 = vmul.f32 %v4964_v31, %v14990_v27  ;;  %v4110_v36 = vadd.f32 %v11403_v26, %v4109_v40  ;;  %v14992_v57 = vld [vmem:[#allocation153_spill] sm:$0xff] }
 0x6bb   :  { %v12170_v4 = vmax.f32 %v4378_v21, 0.0  ;;  %v6072_v15 = vadd.f32 %v6040_v9, %v5944_v1  ;;  %v5785_v17 = vmul.f32 %v12163_v46, %v14989_v48  ;;  %v5433_v43 = vadd.f32 %v5401_v60, %v5305_v8  ;;  %v14993_v1 = vld [vmem:[#allocation167_spill] sm:$0xff] }
 0x6bc   :  { %v12178_v30 = vmax.f32 %v4373_v49, 0.0  ;;  %v4922_v21 = vadd.f32 %v4890_v11, %v4794_v38 }
 0x6bd   :  { %14986 = vst [vmem:[#allocation47_spill] sm:$0xff] %v12170_v4  ;;  %v6162_v22 = vmul.f32 %v14991_v6, %v12170_v4  ;;  %v6164_v9 = vmul.f32 %v14992_v57, %v12170_v4  ;;  %v6166_v40 = vmul.f32 %v14993_v1, %v12170_v4  ;;  %v6168_v11 = vmul.f32 %v12094_v16, %v12170_v4 }
 0x6be   :  { %14988 = vst [vmem:[#allocation54_spill] sm:$0xff] %v12178_v30  ;;  %v6161_v3 = vmul.f32 %v14991_v6, %v12178_v30  ;;  %v6163_v49 = vmul.f32 %v14992_v57, %v12178_v30  ;;  %v6165_v39 = vmul.f32 %v14993_v1, %v12178_v30  ;;  %v6167_v60 = vmul.f32 %v12094_v16, %v12178_v30 }
 0x6bf   :  { %v12195_v31 = vadd.f32 %v6162_v22, %v12062_v0  ;;  %v12210_v6 = vadd.f32 %v6164_v9, %v12074_v18  ;;  %v12216_v22 = vadd.f32 %v6166_v40, %v12079_v33  ;;  %v12221_v1 = vadd.f32 %v6168_v11, %v6072_v15  ;;  %v14996_v33 = vld [vmem:[#allocation165_spill] sm:$0xff]  ;;  %v15000_v11 = vld [vmem:[#allocation115_spill] sm:$0xff] }
 0x6c0   :  { %v12204_v38 = vadd.f32 %v6161_v3, %v12068_v28  ;;  %v12207_v8 = vadd.f32 %v6163_v49, %v12071_v20  ;;  %v12213_v0 = vadd.f32 %v6165_v39, %v12077_v63  ;;  %v12219_v57 = vadd.f32 %v6167_v60, %v12081_v53  ;;  %v14994_v20 = vld [vmem:[#allocation104_spill] sm:$0xff]  ;;  %v14995_v49 = vld [vmem:[#allocation123_spill] sm:$0xff]  ;;  %v14998_v60 = vld [vmem:[#allocation106_spill] sm:$0xff] }
 0x6c1   :  { %v5561_v16 = vadd.f32 %v5529_v37, %v5433_v43  ;;  %v6116_v3 = vrot.slane %v14981_v12, %v14724_v62  ;;  %v5050_v28 = vadd.f32 %v5018_v54, %v4922_v21  ;;  %v5146_v18 = vmul.f32 %v12118_v34, %v14994_v20  ;;  %v14997_v43 = vld [vmem:[#allocation85_spill] sm:$0xff]  ;;  %v14999_v21 = vld [vmem:[#allocation86_spill] sm:$0xff] }
 0x6c2   :  { %v5274_v9 = vmul.f32 %v5220_v45, %v14995_v49  ;;  %v4115_v63 = vadd.f32 %v7728_v42, %v11403_v26  ;;  %v5913_v40 = vmul.f32 %v12168_v50, %v14996_v33  ;;  %v6041_v53 = vmul.f32 %v12174_v52, %v12042_v5 }
 0x6c3   :  { %v5689_v39 = vadd.f32 %v5657_v44, %v5561_v16  ;;  %v5178_v15 = vadd.f32 %v5146_v18, %v5050_v28  ;;  %v5402_v37 = vmul.f32 %v5348_v7, %v11635_v61  ;;  %v4507_v54 = vmul.f32 %v14998_v60, %v14997_v43  ;;  %v15002_v44 = vld [vmem:[#allocation110_spill] sm:$0xff]  ;;  %v15003_v7 = vld [vmem:[#allocation116_spill] sm:$0xff] }
 0x6c4   :  { %v4635_v34 = vmul.f32 %v15000_v11, %v14999_v21  ;;  %v12238_v20 = vmax.f32 %v4110_v36, 0.0  ;;  %v5530_v26 = vmul.f32 %v12140_v32, %v11675_v59  ;;  %v12244_v42 = vrot.slane %v15002_v44, %v14962_v14 }
 0x6c5   :  { %v5817_v45 = vadd.f32 %v5785_v17, %v5689_v39  ;;  %v5306_v16 = vadd.f32 %v5274_v9, %v5178_v15  ;;  %v4763_v18 = vmul.f32 %v15003_v7, %v11494_v41  ;;  %v12250_v61 = vrot.slane %v15002_v44, %v14722_v23 }
 0x6c6   :  { %15001 = vst [vmem:[#allocation161_spill] sm:$0xff] %v12238_v20  ;;  %v4667_v28 = vadd.f32 %v4635_v34, %v4507_v54  ;;  %v6169_v36 = vmul.f32 %v6116_v3, %v12178_v30  ;;  %v12255_v17 = vrot.slane %v14981_v12, %v14727_v2  ;;  %v5658_v32 = vmul.f32 %v12152_v29, %v11724_v58 }
 0x6c7   :  { %v5945_v49 = vadd.f32 %v5913_v40, %v5817_v45  ;;  %v5434_v39 = vadd.f32 %v5402_v37, %v5306_v16  ;;  %v4891_v15 = vmul.f32 %v12244_v42, %v11521_v25  ;;  %v12263_v54 = vrot.slane %v15002_v44, %v14724_v62 }
 0x6c8   :  { %v4795_v9 = vadd.f32 %v4763_v18, %v4667_v28  ;;  %v12265_v34 = vmax.f32 %v4115_v63, 0.0  ;;  %v12269_v40 = vrot.slane %v12238_v20, %v14728_v24  ;;  %v12273_v41 = vrot.slane %v14981_v12, %v14725_v13 }
 0x6c9   :  { %v6073_v45 = vadd.f32 %v6041_v53, %v5945_v49  ;;  %v5562_v29 = vadd.f32 %v5530_v26, %v5434_v39  ;;  %v5786_v37 = vmul.f32 %v12163_v46, %v11781_v51  ;;  %v5019_v28 = vmul.f32 %v12250_v61, %v11567_v55 }
 0x6ca   :  { %15004 = vst [vmem:[#allocation162_spill] sm:$0xff] %v12265_v34  ;;  %15005 = vst [vmem:[#allocation163_spill] sm:$0xff] %v12269_v40  ;;  %v4923_v16 = vadd.f32 %v4891_v15, %v4795_v9  ;;  %v12281_v63 = vrot.slane %v12238_v20, %v14947_v47  ;;  %v12285_v18 = vrot.slane %v12238_v20, %v14812_v19 }
 0x6cb   :  { %15006 = vst [vmem:[#allocation148_spill] sm:$0xff] %v12273_v41  ;;  %v7731_v49 = vpop.f32.mrb[156].mxu0  ;;  %v6201_v53 = vadd.f32 %v6169_v36, %v6073_v45  ;;  %v5914_v12 = vmul.f32 %v12168_v50, %v11906_v35  ;;  %v5690_v46 = vadd.f32 %v5658_v32, %v5562_v29  ;;  %v5147_v15 = vmul.f32 %v12263_v54, %v11579_v10  ;;  %v15018_v35 = vld [vmem:[#allocation179_spill] sm:$0xff] }
 0x6cc   :  { %15007 = vst [vmem:[#allocation42_spill] sm:$0xff] %v12281_v63  ;;  %15008 = vst [vmem:[#allocation48_spill] sm:$0xff] %v12285_v18  ;;  %v4119_v26 = vpop.f32.mrb[157].mxu0  ;;  %v7811_v39 = vpop.f32.mrb[156].mxu1  ;;  %v5051_v9 = vadd.f32 %v5019_v28, %v4923_v16  ;;  %v12293_v34 = vrot.slane %v15002_v44, %v14727_v2  ;;  %v12298_v18 = vld [vmem:[%s13747_s14] ss:$0 sm:$0xff]  ;;  %v6042_v50 = vmul.f32 %v12174_v52, %v12035_v56 }
 0x6cd   :  { %v4388_v36 = vadd.f32 %v12298_v18, %v7811_v39  ;;  %v4382_v45 = vpop.f32.mrb[157].mxu1  ;;  %v6170_v32 = vmul.f32 %v6116_v3, %v12170_v4  ;;  %v12306_v29 = vrot.slane %v15002_v44, %v14725_v13  ;;  %v5818_v28 = vadd.f32 %v5786_v37, %v5690_v46  ;;  %v15009_v63 = vld [vmem:[#allocation124_spill] sm:$0xff]  ;;  %v15011_v39 = vld [vmem:[#allocation129_spill] sm:$0xff]  ;;  %v15012_v52 = vld [vmem:[#allocation103_spill] sm:$0xff] }
 0x6ce   :  { %v4383_v16 = vadd.f32 %v12298_v18, %v4382_v45  ;;  %v5179_v20 = vadd.f32 %v5147_v15, %v5051_v9  ;;  %v5275_v40 = vmul.f32 %v12293_v34, %v15009_v63  ;;  %v12317_v41 = vrot.slane %v15012_v52, %v14728_v24  ;;  %v12336_v15 = vld [vmem:[%s13745_s12] ss:$0 sm:$0xff]  ;;  %v15015_v45 = vld [vmem:[#allocation138_spill] sm:$0xff]  ;;  %v15017_v4 = vld [vmem:[#allocation157_spill] sm:$0xff] }
 0x6cf   :  { %v12311_v10 = vmax.f32 %v4388_v36, 0.0  ;;  %v5403_v55 = vmul.f32 %v12306_v29, %v15011_v39  ;;  %v12321_v3 = vrot.slane %v15012_v52, %v14947_v47  ;;  %v5946_v37 = vadd.f32 %v5914_v12, %v5818_v28  ;;  %v15016_v12 = vld [vmem:[#allocation134_spill] sm:$0xff] }
 0x6d0   :  { %15013 = vst [vmem:[#allocation154_spill] sm:$0xff] %v12317_v41  ;;  %v12323_v44 = vmax.f32 %v4383_v16, 0.0  ;;  %v12327_v46 = vrot.slane %v15012_v52, %v14812_v19  ;;  %v12331_v9 = vrot.slane %v15012_v52, %v14962_v14  ;;  %v4120_v36 = vadd.f32 %v12336_v15, %v4119_v26 }
 0x6d1   :  { %15010 = vst [vmem:[#allocation36_spill] sm:$0xff] %v12311_v10  ;;  %v6290_v16 = vmul.f32 %v15015_v45, %v12311_v10  ;;  %v5307_v39 = vadd.f32 %v5275_v40, %v5179_v20  ;;  %v5531_v28 = vmul.f32 %v12317_v41, %v15016_v12  ;;  %v6292_v56 = vmul.f32 %v15017_v4, %v12311_v10  ;;  %v15019_v40 = vld [vmem:[#allocation200_spill] sm:$0xff] }
 0x6d2   :  { %15014 = vst [vmem:[#allocation35_spill] sm:$0xff] %v12323_v44  ;;  %v6289_v63 = vmul.f32 %v15015_v45, %v12323_v44  ;;  %v6291_v25 = vmul.f32 %v15017_v4, %v12323_v44  ;;  %v6293_v51 = vmul.f32 %v15018_v35, %v12323_v44  ;;  %v6294_v20 = vmul.f32 %v15018_v35, %v12311_v10 }
 0x6d3   :  { %v12352_v26 = vadd.f32 %v6290_v16, %v12195_v31  ;;  %v6295_v12 = vmul.f32 %v15019_v40, %v12323_v44  ;;  %v6296_v45 = vmul.f32 %v15019_v40, %v12311_v10  ;;  %v12367_v41 = vadd.f32 %v6292_v56, %v12210_v6  ;;  %v15020_v6 = vld [vmem:[#allocation132_spill] sm:$0xff] }
 0x6d4   :  { %v12361_v58 = vadd.f32 %v6289_v63, %v12204_v38  ;;  %v12364_v4 = vadd.f32 %v6291_v25, %v12207_v8  ;;  %v12370_v31 = vadd.f32 %v6293_v51, %v12213_v0  ;;  %v12373_v35 = vadd.f32 %v6294_v20, %v12216_v22 }
 0x6d5   :  { %v12376_v16 = vadd.f32 %v6295_v12, %v12219_v57  ;;  %v12379_v40 = vadd.f32 %v6296_v45, %v12221_v1  ;;  %v6297_v38 = vmul.f32 %v12255_v17, %v12323_v44  ;;  %v6074_v25 = vadd.f32 %v6042_v50, %v5946_v37  ;;  %v15021_v57 = vld [vmem:[#allocation61_spill] sm:$0xff]  ;;  %v15022_v1 = vld [vmem:[#allocation95_spill] sm:$0xff] }
 0x6d6   :  { %v6298_v56 = vmul.f32 %v12255_v17, %v12311_v10  ;;  %v5435_v8 = vadd.f32 %v5403_v55, %v5307_v39  ;;  %v5659_v51 = vmul.f32 %v12321_v3, %v15020_v6  ;;  %v4125_v0 = vadd.f32 %v12336_v15, %v7731_v49  ;;  %v15024_v39 = vld [vmem:[#allocation97_spill] sm:$0xff] }
 0x6d7   :  { %v12388_v22 = vadd.f32 %v6297_v38, %v6201_v53  ;;  %v4508_v63 = vmul.f32 %v14998_v60, %v15021_v57  ;;  %v4636_v12 = vmul.f32 %v15000_v11, %v15022_v1  ;;  %v6202_v20 = vadd.f32 %v6170_v32, %v6074_v25 }
 0x6d8   :  { %v5563_v45 = vadd.f32 %v5531_v28, %v5435_v8  ;;  %v5787_v50 = vmul.f32 %v12327_v46, %v14989_v48  ;;  %v5992_v55 = vrot.slane %v15012_v52, %v14722_v23  ;;  %v12398_v17 = vmax.f32 %v4120_v36, 0.0  ;;  %v15026_v8 = vld [vmem:[#allocation89_spill] sm:$0xff] }
 0x6d9   :  { %v12402_v49 = vrot.slane %v15012_v52, %v14724_v62  ;;  %v4668_v53 = vadd.f32 %v4636_v12, %v4508_v63  ;;  %v4764_v60 = vmul.f32 %v15003_v7, %v15024_v39  ;;  %v12406_v37 = vadd.f32 %v6298_v56, %v6202_v20 }
 0x6da   :  { %15023 = vst [vmem:[#allocation29_spill] sm:$0xff] %v12398_v17  ;;  %v5691_v11 = vadd.f32 %v5659_v51, %v5563_v45  ;;  %v5915_v32 = vmul.f32 %v12331_v9, %v14996_v33  ;;  %v6043_v28 = vmul.f32 %v5992_v55, %v12042_v5  ;;  %v12411_v38 = vmax.f32 %v4125_v0, 0.0  ;;  %v15027_v51 = vld [vmem:[#allocation117_spill] sm:$0xff]  ;;  %v15038_v33 = vld [vmem:[#allocation140_spill] sm:$0xff] }
 0x6db   :  { %v6171_v36 = vmul.f32 %v12402_v49, %v12178_v30  ;;  %v4796_v25 = vadd.f32 %v4764_v60, %v4668_v53  ;;  %v4892_v63 = vmul.f32 %v12244_v42, %v15026_v8  ;;  %v12419_v7 = vrot.slane %v15012_v52, %v14727_v2  ;;  %v15032_v8 = vld [vmem:[#allocation104_spill] sm:$0xff] }
 0x6dc   :  { %15025 = vst [vmem:[#allocation159_spill] sm:$0xff] %v12411_v38  ;;  %v5819_v12 = vadd.f32 %v5787_v50, %v5691_v11  ;;  %v12423_v56 = vrot.slane %v15012_v52, %v14725_v13  ;;  %v4509_v0 = vmul.f32 %v15027_v51, %v14997_v43  ;;  %v12429_v20 = vrot.slane %v12398_v17, %v14728_v24  ;;  %v15030_v50 = vld [vmem:[#allocation125_spill] sm:$0xff] }
 0x6dd   :  { %v12433_v45 = vrot.slane %v12398_v17, %v14947_v47  ;;  %v4924_v42 = vadd.f32 %v4892_v63, %v4796_v25  ;;  %v4637_v53 = vmul.f32 %v15030_v50, %v14999_v21  ;;  %v12439_v60 = vrot.slane %v12398_v17, %v14812_v19  ;;  %v7734_v52 = vpop.f32.mrb[158].mxu0  ;;  %v15033_v63 = vld [vmem:[#allocation123_spill] sm:$0xff]  ;;  %v15034_v21 = vld [vmem:[#allocation128_spill] sm:$0xff] }
 0x6de   :  { %15028 = vst [vmem:[#allocation171_spill] sm:$0xff] %v12429_v20  ;;  %v5947_v11 = vadd.f32 %v5915_v32, %v5819_v12  ;;  %v6299_v38 = vmul.f32 %v12419_v7, %v12323_v44  ;;  %v5020_v20 = vmul.f32 %v12250_v61, %v14990_v27  ;;  %v4129_v43 = vpop.f32.mrb[159].mxu0  ;;  %v7814_v30 = vpop.f32.mrb[158].mxu1  ;;  %v5148_v25 = vmul.f32 %v12263_v54, %v15032_v8  ;;  %v15037_v54 = vld [vmem:[#allocation154_spill] sm:$0xff] }
 0x6df   :  { %15029 = vst [vmem:[#allocation172_spill] sm:$0xff] %v12433_v45  ;;  %15031 = vst [vmem:[#allocation175_spill] sm:$0xff] %v12439_v60  ;;  %v5276_v45 = vmul.f32 %v12293_v34, %v15033_v63  ;;  %v5404_v17 = vmul.f32 %v12306_v29, %v15034_v21  ;;  %v15035_v60 = vld [vmem:[#allocation113_spill] sm:$0xff]  ;;  %v4398_v12 = vadd.f32 %v12298_v18, %v7814_v30  ;;  %v4392_v44 = vpop.f32.mrb[159].mxu1  ;;  %v15039_v63 = vld [vmem:[#allocation151_spill] sm:$0xff] }
 0x6e0   :  { %v12453_v32 = vrot.slane %v15035_v60, %v14962_v14  ;;  %v6075_v5 = vadd.f32 %v6043_v28, %v5947_v11  ;;  %v5052_v61 = vadd.f32 %v5020_v20, %v4924_v42  ;;  %v4669_v27 = vadd.f32 %v4637_v53, %v4509_v0  ;;  %v15041_v30 = vld [vmem:[#allocation177_spill] sm:$0xff]  ;;  %v15042_v0 = vld [vmem:[#allocation98_spill] sm:$0xff] }
 0x6e1   :  { %v4393_v39 = vadd.f32 %v12298_v18, %v4392_v44  ;;  %v5532_v8 = vmul.f32 %v15037_v54, %v11675_v59  ;;  %v5660_v34 = vmul.f32 %v12321_v3, %v15038_v33  ;;  %v12463_v29 = vmul.f32 %v12327_v46, %v15039_v63  ;;  %v15043_v20 = vld [vmem:[#allocation118_spill] sm:$0xff]  ;;  %v15048_v54 = vld [vmem:[#allocation168_spill] sm:$0xff]  ;;  %v15049_v63 = vld [vmem:[#allocation155_spill] sm:$0xff] }
 0x6e2   :  { %15036 = vst [vmem:[#allocation160_spill] sm:$0xff] %v12453_v32  ;;  %v12465_v21 = vmax.f32 %v4398_v12, 0.0  ;;  %v6203_v50 = vadd.f32 %v6171_v36, %v6075_v5  ;;  %v12469_v28 = vmul.f32 %v12331_v9, %v15041_v30  ;;  %v4765_v18 = vmul.f32 %v15043_v20, %v15042_v0  ;;  %v15045_v42 = vld [vmem:[#allocation182_spill] sm:$0xff]  ;;  %v15046_v5 = vld [vmem:[#allocation141_spill] sm:$0xff] }
 0x6e3   :  { %v12473_v44 = vmax.f32 %v4393_v39, 0.0  ;;  %v12476_v53 = vmul.f32 %v5992_v55, %v15045_v42  ;;  %v12480_v3 = vrot.slane %v15035_v60, %v14722_v23  ;;  %v12484_v46 = vrot.slane %v15035_v60, %v14724_v62  ;;  %v15047_v12 = vld [vmem:[#allocation90_spill] sm:$0xff] }
 0x6e4   :  { %15040 = vst [vmem:[#allocation208_spill] sm:$0xff] %v12465_v21  ;;  %v6418_v9 = vmul.f32 %v15046_v5, %v12465_v21  ;;  %v5180_v36 = vadd.f32 %v5148_v25, %v5052_v61  ;;  %v4797_v11 = vadd.f32 %v4765_v18, %v4669_v27  ;;  %v4893_v39 = vmul.f32 %v12453_v32, %v15047_v12  ;;  %v15050_v25 = vld [vmem:[#allocation53_spill] sm:$0xff] }
 0x6e5   :  { %15044 = vst [vmem:[#allocation210_spill] sm:$0xff] %v12473_v44  ;;  %v6417_v55 = vmul.f32 %v15046_v5, %v12473_v44  ;;  %v6419_v42 = vmul.f32 %v15048_v54, %v12473_v44  ;;  %v6420_v30 = vmul.f32 %v15048_v54, %v12465_v21  ;;  %v6421_v33 = vmul.f32 %v15049_v63, %v12473_v44 }
 0x6e6   :  { %v6450_v59 = vadd.f32 %v6418_v9, %v12352_v26  ;;  %v6422_v27 = vmul.f32 %v15049_v63, %v12465_v21  ;;  %v6423_v61 = vmul.f32 %v15050_v25, %v12473_v44  ;;  %v6424_v18 = vmul.f32 %v15050_v25, %v12465_v21 }
 0x6e7   :  { %v6449_v5 = vadd.f32 %v6417_v55, %v12361_v58  ;;  %v6451_v12 = vadd.f32 %v6419_v42, %v12364_v4  ;;  %v6452_v54 = vadd.f32 %v6420_v30, %v12367_v41  ;;  %v6453_v0 = vadd.f32 %v6421_v33, %v12370_v31  ;;  %v15051_v33 = vld [vmem:[#allocation148_spill] sm:$0xff]  ;;  %v15053_v42 = vld [vmem:[#allocation63_spill] sm:$0xff] }
 0x6e8   :  { %v6454_v32 = vadd.f32 %v6422_v27, %v12373_v35  ;;  %v6455_v26 = vadd.f32 %v6423_v61, %v12376_v16  ;;  %v6456_v63 = vadd.f32 %v6424_v18, %v12379_v40  ;;  %v4925_v9 = vadd.f32 %v4893_v39, %v4797_v11  ;;  %v15052_v35 = vld [vmem:[#allocation112_spill] sm:$0xff]  ;;  %v15055_v11 = vld [vmem:[#allocation105_spill] sm:$0xff] }
 0x6e9   :  { %v4130_v62 = vadd.f32 %v12336_v15, %v4129_v43  ;;  %v6481_v20 = vmul.f32 0.03125, %v6449_v5  ;;  %v5308_v23 = vadd.f32 %v5276_v45, %v5180_v36  ;;  %v12515_v58 = vrot.slane %v15035_v60, %v14727_v2 }
 0x6ea   :  { %v4135_v4 = vadd.f32 %v12336_v15, %v7734_v52  ;;  %v6482_v41 = vmul.f32 0.03125, %v6450_v59  ;;  %v6425_v31 = vmul.f32 %v15051_v33, %v12473_v44  ;;  %v5021_v16 = vmul.f32 %v12480_v3, %v15052_v35  ;;  %v15054_v59 = vld [vmem:[#allocation47_spill] sm:$0xff] }
 0x6eb   :  { %6616 = vmatprep.mubr.f32.mxu0 %v6481_v20  ;;  %v6426_v40 = vmul.f32 %v15051_v33, %v12465_v21  ;;  %v6331_v43 = vadd.f32 %v6299_v38, %v6203_v50  ;;  %v6427_v45 = vmul.f32 %v12423_v56, %v12473_v44  ;;  %v5436_v30 = vadd.f32 %v5404_v17, %v5308_v23  ;;  %v15057_v23 = vld [vmem:[#allocation124_spill] sm:$0xff]  ;;  %v15062_v33 = vld [vmem:[#allocation134_spill] sm:$0xff] }
 0x6ec   :  { %6617 = vmatmul.mubr.f32.vlgmr.msra.gmra.mrb[160].mxu0 %v15053_v42  ;;  %v6457_v15 = vadd.f32 %v6425_v31, %v12388_v22  ;;  %v6172_v52 = vmul.f32 %v12402_v49, %v15054_v59  ;;  %v5053_v36 = vadd.f32 %v5021_v16, %v4925_v9  ;;  %v5149_v39 = vmul.f32 %v12484_v46, %v15055_v11  ;;  %v15058_v49 = vld [vmem:[#allocation119_spill] sm:$0xff]  ;;  %v15061_v9 = vld [vmem:[#allocation129_spill] sm:$0xff] }
 0x6ed   :  { %v12532_v20 = vmax.f32 %v4130_v62, 0.0  ;;  %6621 = vmatprep.mubr.f32.mxu0 %v6482_v41  ;;  %v6458_v38 = vadd.f32 %v6426_v40, %v12406_v37  ;;  %v6459_v50 = vadd.f32 %v6427_v45, %v6331_v43  ;;  %v5564_v55 = vadd.f32 %v5532_v8, %v5436_v30  ;;  %v15060_v8 = vld [vmem:[#allocation64_spill] sm:$0xff] }
 0x6ee   :  { %v5181_v27 = vadd.f32 %v5149_v39, %v5053_v36  ;;  %v5277_v17 = vmul.f32 %v12515_v58, %v15057_v23  ;;  %v12539_v22 = vrot.slane %v15035_v60, %v14725_v13  ;;  %v12543_v25 = vrot.slane %v15058_v49, %v14728_v24 }
 0x6ef   :  { %15056 = vst [vmem:[#allocation214_spill] sm:$0xff] %v12532_v20  ;;  %v12545_v61 = vmax.f32 %v4135_v4, 0.0  ;;  %v6483_v62 = vmul.f32 0.03125, %v6451_v12  ;;  %v5692_v18 = vadd.f32 %v5660_v34, %v5564_v55  ;;  %v6300_v37 = vmul.f32 %v12419_v7, %v12311_v10  ;;  %v15065_v55 = vld [vmem:[#allocation75_spill] sm:$0xff] }
 0x6f0   :  { %6622 = vmatmul.mubr.f32.gmra.mrb[162].mxu0 %v15060_v8  ;;  %v5309_v5 = vadd.f32 %v5277_v17, %v5181_v27  ;;  %v5405_v41 = vmul.f32 %v12539_v22, %v15061_v9  ;;  %v5533_v60 = vmul.f32 %v12543_v25, %v15062_v33  ;;  %v12556_v31 = vrot.slane %v15058_v49, %v14947_v47  ;;  %v15066_v27 = vld [vmem:[#allocation125_spill] sm:$0xff] }
 0x6f1   :  { %15059 = vst [vmem:[#allocation164_spill] sm:$0xff] %v12545_v61  ;;  %v12560_v12 = vrot.slane %v12532_v20, %v14728_v24  ;;  %v12564_v7 = vrot.slane %v12532_v20, %v14947_v47  ;;  %6626 = vmatprep.mubr.f32.mxu0 %v6483_v62  ;;  %v6484_v34 = vmul.f32 0.03125, %v6452_v54  ;;  %v5820_v4 = vadd.f32 %v12463_v29, %v5692_v18  ;;  %v15067_v62 = vld [vmem:[#allocation33_spill] sm:$0xff]  ;;  %v15074_v61 = vld [vmem:[#allocation183_spill] sm:$0xff] }
 0x6f2   :  { %v6485_v16 = vmul.f32 0.03125, %v6453_v0  ;;  %v5437_v40 = vadd.f32 %v5405_v41, %v5309_v5  ;;  %v5661_v43 = vmul.f32 %v12556_v31, %v15020_v6  ;;  %v12571_v45 = vrot.slane %v15058_v49, %v14812_v19  ;;  %v15068_v5 = vld [vmem:[#allocation165_spill] sm:$0xff] }
 0x6f3   :  { %15063 = vst [vmem:[#allocation184_spill] sm:$0xff] %v12560_v12  ;;  %15064 = vst [vmem:[#allocation185_spill] sm:$0xff] %v12564_v7  ;;  %v6486_v30 = vmul.f32 0.03125, %v6454_v32  ;;  %v6487_v42 = vmul.f32 0.03125, %v6455_v26  ;;  %v5948_v36 = vadd.f32 %v12469_v28, %v5820_v4  ;;  %v5868_v39 = vrot.slane %v15058_v49, %v14962_v14  ;;  %v15069_v4 = vld [vmem:[#allocation97_spill] sm:$0xff]  ;;  %v15076_v12 = vld [vmem:[#allocation160_spill] sm:$0xff] }
 0x6f4   :  { %6627 = vmatmul.mubr.f32.gmra.mrb[164].mxu0 %v15065_v55  ;;  %v5565_v54 = vadd.f32 %v5533_v60, %v5437_v40  ;;  %v5789_v29 = vmul.f32 %v12571_v45, %v14989_v48  ;;  %v4510_v0 = vmul.f32 %v15027_v51, %v15021_v57  ;;  %v4638_v17 = vmul.f32 %v15066_v27, %v15022_v1  ;;  %v15070_v51 = vld [vmem:[#allocation118_spill] sm:$0xff] }
 0x6f5   :  { %6631 = vmatprep.mubr.f32.mxu0 %v6484_v34  ;;  %v12583_v32 = vmul.f32 0.03125, %v6456_v63  ;;  %v6076_v28 = vadd.f32 %v12476_v53, %v5948_v36  ;;  %v6428_v26 = vmul.f32 %v12423_v56, %v12465_v21  ;;  %v5996_v18 = vrot.slane %v15058_v49, %v15067_v62  ;;  %v15072_v27 = vld [vmem:[#allocation34_spill] sm:$0xff]  ;;  %v15073_v36 = vld [vmem:[#allocation65_spill] sm:$0xff] }
 0x6f6   :  { %v5693_v8 = vadd.f32 %v5661_v43, %v5565_v54  ;;  %v5917_v41 = vmul.f32 %v5868_v39, %v15068_v5  ;;  %v4670_v60 = vadd.f32 %v4638_v17, %v4510_v0  ;;  %v4766_v40 = vmul.f32 %v15070_v51, %v15069_v4  ;;  %v15075_v54 = vld [vmem:[#allocation89_spill] sm:$0xff]  ;;  %v15078_v51 = vld [vmem:[#allocation54_spill] sm:$0xff] }
 0x6f7   :  { %v12593_v55 = vmul.f32 0.03125, %v6457_v15  ;;  %v12595_v34 = vmul.f32 0.03125, %v6458_v38  ;;  %v6204_v63 = vadd.f32 %v6172_v52, %v6076_v28  ;;  %v6124_v53 = vrot.slane %v15058_v49, %v15072_v27 }
 0x6f8   :  { %6632 = vmatmul.mubr.f32.gmra.mrb[166].mxu0 %v15073_v36  ;;  %v5821_v56 = vadd.f32 %v5789_v29, %v5693_v8  ;;  %v6045_v7 = vmul.f32 %v5996_v18, %v15074_v61  ;;  %v4798_v43 = vadd.f32 %v4766_v40, %v4670_v60  ;;  %v4894_v0 = vmul.f32 %v15076_v12, %v15075_v54  ;;  %v15080_v8 = vld [vmem:[#allocation85_spill] sm:$0xff]  ;;  %v15081_v36 = vld [vmem:[#allocation120_spill] sm:$0xff] }
 0x6f9   :  { %15071 = vst [vmem:[#allocation173_spill] sm:$0xff] %v12595_v34  ;;  %6636 = vmatprep.mubr.f32.mxu0 %v6485_v16  ;;  %v12603_v17 = vmul.f32 0.03125, %v6459_v50  ;;  %v6332_v15 = vadd.f32 %v6300_v37, %v6204_v63  ;;  %v6173_v38 = vmul.f32 %v6124_v53, %v15078_v51  ;;  %v6252_v52 = vrot.slane %v15058_v49, %v14727_v2  ;;  %v15079_v34 = vld [vmem:[#allocation101_spill] sm:$0xff]  ;;  %v15082_v50 = vld [vmem:[#allocation86_spill] sm:$0xff]  ;;  %v15084_v63 = vld [vmem:[#allocation127_spill] sm:$0xff] }
 0x6fa   :  { %v5949_v28 = vadd.f32 %v5917_v41, %v5821_v56  ;;  %v4926_v20 = vadd.f32 %v4894_v0, %v4798_v43  ;;  %v5022_v29 = vmul.f32 %v12480_v3, %v15079_v34  ;;  %v4511_v60 = vmul.f32 %v15081_v36, %v15080_v8  ;;  %v15083_v16 = vld [vmem:[#allocation121_spill] sm:$0xff]  ;;  %v15085_v51 = vld [vmem:[#allocation91_spill] sm:$0xff]  ;;  %v15087_v0 = vld [vmem:[#allocation104_spill] sm:$0xff] }
 0x6fb   :  { %15077 = vst [vmem:[#allocation212_spill] sm:$0xff] %v12603_v17  ;;  %v6460_v40 = vadd.f32 %v6428_v26, %v6332_v15  ;;  %v6380_v12 = vrot.slane %v15058_v49, %v14725_v13  ;;  %v4639_v37 = vmul.f32 %v15083_v16, %v15082_v50  ;;  %v12618_v17 = vrot.slane %v15084_v63, %v14962_v14  ;;  %v15086_v56 = vld [vmem:[#allocation35_spill] sm:$0xff]  ;;  %v15088_v15 = vld [vmem:[#allocation98_spill] sm:$0xff] }
 0x6fc   :  { %6637 = vmatmul.mubr.f32.gmra.mrb[168].mxu0 %v15085_v51  ;;  %v6077_v41 = vadd.f32 %v6045_v7, %v5949_v28  ;;  %v6301_v43 = vmul.f32 %v6252_v52, %v15086_v56  ;;  %v5054_v3 = vadd.f32 %v5022_v29, %v4926_v20  ;;  %v5150_v8 = vmul.f32 %v12484_v46, %v15087_v0  ;;  %v15089_v34 = vld [vmem:[#allocation122_spill] sm:$0xff]  ;;  %v15090_v7 = vld [vmem:[#allocation123_spill] sm:$0xff]  ;;  %v15091_v20 = vld [vmem:[#allocation128_spill] sm:$0xff] }
 0x6fd   :  { %6641 = vmatprep.mubr.f32.mxu0 %v6486_v30  ;;  %v6429_v26 = vmul.f32 %v6380_v12, %v12473_v44  ;;  %v4671_v49 = vadd.f32 %v4639_v37, %v4511_v60  ;;  %v4767_v50 = vmul.f32 %v15089_v34, %v15088_v15  ;;  %v12629_v61 = vrot.slane %v15084_v63, %v15067_v62  ;;  %v15092_v46 = vld [vmem:[#allocation135_spill] sm:$0xff]  ;;  %v15093_v60 = vld [vmem:[#allocation90_spill] sm:$0xff] }
 0x6fe   :  { %v6205_v54 = vadd.f32 %v6173_v38, %v6077_v41  ;;  %v5182_v51 = vadd.f32 %v5150_v8, %v5054_v3  ;;  %v5278_v28 = vmul.f32 %v12515_v58, %v15090_v7  ;;  %v5406_v29 = vmul.f32 %v12539_v22, %v15091_v20  ;;  %v15094_v0 = vld [vmem:[#allocation66_spill] sm:$0xff]  ;;  %v15095_v41 = vld [vmem:[#allocation140_spill] sm:$0xff]  ;;  %v15097_v3 = vld [vmem:[#allocation177_spill] sm:$0xff] }
 0x6ff   :  { %v5534_v30 = vmul.f32 %v12543_v25, %v15092_v46  ;;  %v4799_v44 = vadd.f32 %v4767_v50, %v4671_v49  ;;  %v4895_v37 = vmul.f32 %v12618_v17, %v15093_v60  ;;  %v12641_v15 = vrot.slane %v15084_v63, %v15072_v27  ;;  %v15096_v25 = vld [vmem:[#allocation151_spill] sm:$0xff] }
 0x700   :  { %6642 = vmatmul.mubr.f32.gmra.mrb[170].mxu0 %v15094_v0  ;;  %v6333_v38 = vadd.f32 %v6301_v43, %v6205_v54  ;;  %v5310_v8 = vadd.f32 %v5278_v28, %v5182_v51  ;;  %v5662_v58 = vmul.f32 %v12556_v31, %v15095_v41  ;;  %v12648_v22 = vrot.slane %v15084_v63, %v14727_v2  ;;  %v15098_v43 = vld [vmem:[#allocation182_spill] sm:$0xff] }
 0x701   :  { %6646 = vmatprep.mubr.f32.mxu0 %v6487_v42  ;;  %v5790_v50 = vmul.f32 %v12571_v45, %v15096_v25  ;;  %v5918_v49 = vmul.f32 %v5868_v39, %v15097_v3  ;;  %v4927_v46 = vadd.f32 %v4895_v37, %v4799_v44  ;;  %v5023_v20 = vmul.f32 %v12629_v61, %v15052_v35  ;;  %v15099_v44 = vld [vmem:[#allocation56_spill] sm:$0xff] }
 0x702   :  { %v6461_v0 = vadd.f32 %v6429_v26, %v6333_v38  ;;  %v5438_v54 = vadd.f32 %v5406_v29, %v5310_v8  ;;  %v6046_v51 = vmul.f32 %v5996_v18, %v15098_v43  ;;  %v12658_v31 = vrot.slane %v15084_v63, %v14725_v13 }
 0x703   :  { %v6174_v28 = vmul.f32 %v6124_v53, %v15054_v59  ;;  %v6302_v42 = vmul.f32 %v6252_v52, %v12311_v10  ;;  %v5055_v41 = vadd.f32 %v5023_v20, %v4927_v46  ;;  %v5151_v45 = vmul.f32 %v12641_v15, %v15055_v11  ;;  %v15100_v53 = vld [vmem:[#allocation126_spill] sm:$0xff] }
 0x704   :  { %6647 = vmatmul.mubr.f32.gmra.mrb[172].mxu0 %v15099_v44  ;;  %v12665_v39 = vmul.f32 0.03125, %v6460_v40  ;;  %v5566_v26 = vadd.f32 %v5534_v30, %v5438_v54  ;;  %v6430_v29 = vmul.f32 %v6380_v12, %v12465_v21  ;;  %v5279_v18 = vmul.f32 %v12648_v22, %v15057_v23 }
 0x705   :  { %6651 = vmatprep.mubr.f32.mxu0 %v12583_v32  ;;  %v5183_v63 = vadd.f32 %v5151_v45, %v5055_v41  ;;  %v5488_v52 = vrot.slane %v15100_v53, %v14728_v24  ;;  %v12675_v20 = vrot.slane %v15100_v53, %v14947_v47  ;;  %v4512_v40 = vmul.f32 %v15081_v36, %v15021_v57  ;;  %v15101_v41 = vld [vmem:[#allocation57_spill] sm:$0xff] }
 0x706   :  { %v5694_v46 = vadd.f32 %v5662_v58, %v5566_v26  ;;  %v5407_v12 = vmul.f32 %v12658_v31, %v15061_v9  ;;  %v12683_v30 = vrot.slane %v15100_v53, %v14812_v19  ;;  %v4640_v32 = vmul.f32 %v15083_v16, %v15022_v1  ;;  %v15111_v1 = vld [vmem:[#allocation139_spill] sm:$0xff] }
 0x707   :  { %v5311_v37 = vadd.f32 %v5279_v18, %v5183_v63  ;;  %v5535_v38 = vmul.f32 %v5488_v52, %v15062_v33  ;;  %v5663_v8 = vmul.f32 %v12675_v20, %v15020_v6  ;;  %v5872_v36 = vrot.slane %v15100_v53, %v14962_v14 }
 0x708   :  { %6652 = vmatmul.mubr.f32.gmra.mrb[174].mxu0 %v15101_v41  ;;  %v5822_v58 = vadd.f32 %v5790_v50, %v5694_v46  ;;  %v5791_v54 = vmul.f32 %v12683_v30, %v14989_v48  ;;  %v4672_v45 = vadd.f32 %v4640_v32, %v4512_v40  ;;  %v4768_v44 = vmul.f32 %v15089_v34, %v15069_v4  ;;  %v15102_v48 = vld [vmem:[#allocation89_spill] sm:$0xff]  ;;  %v15103_v34 = vld [vmem:[#allocation183_spill] sm:$0xff] }
 0x709   :  { %6656 = vmatprep.mubr.f32.mxu0 %v12593_v55  ;;  %v5439_v16 = vadd.f32 %v5407_v12, %v5311_v37  ;;  %v5919_v26 = vmul.f32 %v5872_v36, %v15068_v5  ;;  %v6000_v18 = vrot.slane %v15100_v53, %v15067_v62  ;;  %v6128_v63 = vrot.slane %v15100_v53, %v15072_v27  ;;  %v15104_v37 = vld [vmem:[#allocation58_spill] sm:$0xff] }
 0x70a   :  { %v12703_v41 = vmul.f32 0.03125, %v6461_v0  ;;  %v5950_v50 = vadd.f32 %v5918_v49, %v5822_v58  ;;  %v4800_v46 = vadd.f32 %v4768_v44, %v4672_v45  ;;  %v4896_v40 = vmul.f32 %v12618_v17, %v15102_v48  ;;  %v15105_v0 = vld [vmem:[#allocation101_spill] sm:$0xff]  ;;  %v15110_v48 = vld [vmem:[#allocation86_spill] sm:$0xff] }
 0x70b   :  { %v5567_v32 = vadd.f32 %v5535_v38, %v5439_v16  ;;  %v6047_v4 = vmul.f32 %v6000_v18, %v15103_v34  ;;  %v6256_v55 = vrot.slane %v15100_v53, %v14727_v2  ;;  %v6384_v12 = vrot.slane %v15100_v53, %v14725_v13  ;;  %v15106_v58 = vld [vmem:[#allocation85_spill] sm:$0xff]  ;;  %v15109_v16 = vld [vmem:[#allocation54_spill] sm:$0xff]  ;;  %v15112_v53 = vld [vmem:[#allocation131_spill] sm:$0xff] }
 0x70c   :  { %6657 = vmatmul.mubr.f32.gmra.mrb[176].mxu0 %v15104_v37  ;;  %v6078_v5 = vadd.f32 %v6046_v51, %v5950_v50  ;;  %v4928_v6 = vadd.f32 %v4896_v40, %v4800_v46  ;;  %v5024_v49 = vmul.f32 %v12629_v61, %v15105_v0  ;;  %v15107_v45 = vld [vmem:[#allocation137_spill] sm:$0xff]  ;;  %v6175_v34 = vmul.f32 %v6128_v63, %v15109_v16  ;;  %v15113_v61 = vld [vmem:[#allocation104_spill] sm:$0xff] }
 0x70d   :  { %v4513_v44 = vmul.f32 %v15107_v45, %v15106_v58  ;;  %v15108_v17 = vld [vmem:[#allocation173_spill] sm:$0xff]  ;;  %v5695_v38 = vadd.f32 %v5663_v8, %v5567_v32  ;;  %v4641_v33 = vmul.f32 %v15111_v1, %v15110_v48  ;;  %v12723_v57 = vrot.slane %v15112_v53, %v14962_v14  ;;  %v15116_v48 = vld [vmem:[#allocation59_spill] sm:$0xff]  ;;  %v15117_v14 = vld [vmem:[#allocation210_spill] sm:$0xff] }
 0x70e   :  { %6661 = vmatprep.mubr.f32.mxu0 %v15108_v17  ;;  %v6206_v51 = vadd.f32 %v6174_v28, %v6078_v5  ;;  %v6303_v50 = vmul.f32 %v6256_v55, %v15086_v56  ;;  %v5056_v46 = vadd.f32 %v5024_v49, %v4928_v6  ;;  %v5152_v40 = vmul.f32 %v12641_v15, %v15113_v61  ;;  %v15114_v17 = vld [vmem:[#allocation98_spill] sm:$0xff]  ;;  %v15115_v8 = vld [vmem:[#allocation45_spill] sm:$0xff]  ;;  %v15118_v49 = vld [vmem:[#allocation212_spill] sm:$0xff] }
 0x70f   :  { %v5823_v37 = vadd.f32 %v5791_v54, %v5695_v38  ;;  %v4673_v58 = vadd.f32 %v4641_v33, %v4513_v44  ;;  %v4769_v32 = vmul.f32 %v15115_v8, %v15114_v17  ;;  %v12732_v16 = vrot.slane %v15112_v53, %v15067_v62 }
 0x710   :  { %6662 = vmatmul.mubr.f32.gmra.mrb[178].mxu0 %v15116_v48  ;;  %v6334_v0 = vadd.f32 %v6302_v42, %v6206_v51  ;;  %v6431_v5 = vmul.f32 %v6384_v12, %v15117_v14  ;;  %v5184_v28 = vadd.f32 %v5152_v40, %v5056_v46  ;;  %v5280_v6 = vmul.f32 %v12648_v22, %v15090_v7  ;;  %v15119_v42 = vld [vmem:[#allocation128_spill] sm:$0xff]  ;;  %v15120_v46 = vld [vmem:[#allocation135_spill] sm:$0xff] }
 0x711   :  { %6666 = vmatprep.mubr.f32.mxu0 %v15118_v49  ;;  %v5951_v15 = vadd.f32 %v5919_v26, %v5823_v37  ;;  %v4801_v33 = vadd.f32 %v4769_v32, %v4673_v58  ;;  %v4897_v54 = vmul.f32 %v12723_v57, %v15093_v60  ;;  %v12743_v44 = vrot.slane %v15112_v53, %v15072_v27  ;;  %v15121_v37 = vld [vmem:[#allocation67_spill] sm:$0xff]  ;;  %v15122_v49 = vld [vmem:[#allocation140_spill] sm:$0xff] }
 0x712   :  { %v6462_v38 = vadd.f32 %v6430_v29, %v6334_v0  ;;  %v5312_v48 = vadd.f32 %v5280_v6, %v5184_v28  ;;  %v5408_v51 = vmul.f32 %v12658_v31, %v15119_v42  ;;  %v5536_v40 = vmul.f32 %v5488_v52, %v15120_v46 }
 0x713   :  { %v6079_v14 = vadd.f32 %v6047_v4, %v5951_v15  ;;  %v4929_v22 = vadd.f32 %v4897_v54, %v4801_v33  ;;  %v5025_v26 = vmul.f32 %v12732_v16, %v15052_v35  ;;  %v12752_v58 = vrot.slane %v15112_v53, %v14727_v2 }
 0x714   :  { %6667 = vmatmul.mubr.f32.gmra.mrb[180].mxu0 %v15121_v37  ;;  %v5440_v32 = vadd.f32 %v5408_v51, %v5312_v48  ;;  %v5664_v29 = vmul.f32 %v12675_v20, %v15122_v49  ;;  %v5792_v31 = vmul.f32 %v12683_v30, %v15096_v25  ;;  %v12761_v4 = vrot.slane %v15112_v53, %v14725_v13  ;;  %v15123_v30 = vld [vmem:[#allocation130_spill] sm:$0xff] }
 0x715   :  { %6671 = vmatprep.mubr.f32.mxu0 %v12665_v39  ;;  %v6207_v52 = vadd.f32 %v6175_v34, %v6079_v14  ;;  %v5920_v0 = vmul.f32 %v5872_v36, %v15097_v3  ;;  %v5057_v28 = vadd.f32 %v5025_v26, %v4929_v22  ;;  %v5153_v6 = vmul.f32 %v12743_v44, %v15055_v11  ;;  %v15124_v36 = vld [vmem:[#allocation68_spill] sm:$0xff]  ;;  %v15125_v22 = vld [vmem:[#allocation61_spill] sm:$0xff] }
 0x716   :  { %v5568_v15 = vadd.f32 %v5536_v40, %v5440_v32  ;;  %v6048_v33 = vmul.f32 %v6000_v18, %v15098_v43  ;;  %v6176_v20 = vmul.f32 %v6128_v63, %v15054_v59  ;;  %v12771_v54 = vrot.slane %v15123_v30, %v14728_v24  ;;  %v15126_v32 = vld [vmem:[#allocation134_spill] sm:$0xff] }
 0x717   :  { %v6335_v53 = vadd.f32 %v6303_v50, %v6207_v52  ;;  %v6304_v48 = vmul.f32 %v6256_v55, %v12311_v10  ;;  %v5185_v39 = vadd.f32 %v5153_v6, %v5057_v28  ;;  %v5281_v14 = vmul.f32 %v12752_v58, %v15057_v23  ;;  %v15127_v52 = vld [vmem:[#allocation95_spill] sm:$0xff] }
 0x718   :  { %6672 = vmatmul.mubr.f32.gmra.mrb[182].mxu0 %v15124_v36  ;;  %v5696_v34 = vadd.f32 %v5664_v29, %v5568_v15  ;;  %v6432_v51 = vmul.f32 %v6384_v12, %v12465_v21  ;;  %v5409_v18 = vmul.f32 %v12761_v4, %v15061_v9  ;;  %v12782_v63 = vrot.slane %v15123_v30, %v14947_v47  ;;  %v15128_v15 = vld [vmem:[#allocation132_spill] sm:$0xff]  ;;  %v15131_v36 = vld [vmem:[#allocation69_spill] sm:$0xff]  ;;  %v15139_v21 = vld [vmem:[#allocation142_spill] sm:$0xff] }
 0x719   :  { %6676 = vmatprep.mubr.f32.mxu0 %v12703_v41  ;;  %v6463_v50 = vadd.f32 %v6431_v5, %v6335_v53  ;;  %v5313_v55 = vadd.f32 %v5281_v14, %v5185_v39  ;;  %v12787_v40 = vrot.slane %v15123_v30, %v14812_v19  ;;  %v4514_v26 = vmul.f32 %v15107_v45, %v15125_v22  ;;  %v15129_v5 = vld [vmem:[#allocation152_spill] sm:$0xff]  ;;  %v15140_v22 = vld [vmem:[#allocation86_spill] sm:$0xff] }
 0x71a   :  { %v6494_v37 = vmul.f32 0.03125, %v6462_v38  ;;  %v5824_v12 = vadd.f32 %v5792_v31, %v5696_v34  ;;  %v5537_v29 = vmul.f32 %v12771_v54, %v15126_v32  ;;  %v4642_v28 = vmul.f32 %v15111_v1, %v15127_v52  ;;  %v15130_v39 = vld [vmem:[#allocation32_spill] sm:$0xff]  ;;  %v15132_v34 = vld [vmem:[#allocation97_spill] sm:$0xff]  ;;  %v15137_v52 = vld [vmem:[#allocation70_spill] sm:$0xff] }
 0x71b   :  { %v5441_v6 = vadd.f32 %v5409_v18, %v5313_v55  ;;  %v5665_v41 = vmul.f32 %v12782_v63, %v15128_v15  ;;  %v5793_v53 = vmul.f32 %v12787_v40, %v15129_v5  ;;  %v5876_v14 = vrot.slane %v15123_v30, %v15130_v39  ;;  %v15133_v55 = vld [vmem:[#allocation165_spill] sm:$0xff] }
 0x71c   :  { %6677 = vmatmul.mubr.f32.gmra.mrb[184].mxu0 %v15131_v36  ;;  %v5952_v45 = vadd.f32 %v5920_v0, %v5824_v12  ;;  %v12804_v38 = vrot.slane %v15123_v30, %v15067_v62  ;;  %v4674_v31 = vadd.f32 %v4642_v28, %v4514_v26  ;;  %v4770_v1 = vmul.f32 %v15115_v8, %v15132_v34  ;;  %v15134_v26 = vld [vmem:[#allocation89_spill] sm:$0xff] }
 0x71d   :  { %6681 = vmatprep.mubr.f32.mxu0 %v6494_v37  ;;  %v5569_v18 = vadd.f32 %v5537_v29, %v5441_v6  ;;  %v5921_v15 = vmul.f32 %v5876_v14, %v15133_v55  ;;  %v6132_v5 = vrot.slane %v15123_v30, %v15072_v27  ;;  %v6260_v32 = vrot.slane %v15123_v30, %v14727_v2  ;;  %v15135_v29 = vld [vmem:[#allocation183_spill] sm:$0xff]  ;;  %v15136_v55 = vld [vmem:[#allocation101_spill] sm:$0xff] }
 0x71e   :  { %v6080_v36 = vadd.f32 %v6048_v33, %v5952_v45  ;;  %v12815_v0 = vrot.slane %v15123_v30, %v14725_v13  ;;  %v4802_v12 = vadd.f32 %v4770_v1, %v4674_v31  ;;  %v4898_v28 = vmul.f32 %v12723_v57, %v15134_v26  ;;  %v15138_v45 = vld [vmem:[#allocation85_spill] sm:$0xff]  ;;  %v15141_v31 = vld [vmem:[#allocation150_spill] sm:$0xff] }
 0x71f   :  { %v6495_v8 = vmul.f32 0.03125, %v6463_v50  ;;  %v5697_v37 = vadd.f32 %v5665_v41, %v5569_v18  ;;  %v6049_v6 = vmul.f32 %v12804_v38, %v15135_v29  ;;  %v5026_v34 = vmul.f32 %v12732_v16, %v15136_v55  ;;  %v15142_v41 = vld [vmem:[#allocation145_spill] sm:$0xff]  ;;  %v15143_v16 = vld [vmem:[#allocation136_spill] sm:$0xff] }
 0x720   :  { %6682 = vmatmul.mubr.f32.gmra.mrb[186].mxu0 %v15137_v52  ;;  %v6208_v19 = vadd.f32 %v6176_v20, %v6080_v36  ;;  %v4930_v33 = vadd.f32 %v4898_v28, %v4802_v12  ;;  %v4515_v30 = vmul.f32 %v15139_v21, %v15138_v45  ;;  %v4643_v1 = vmul.f32 %v15141_v31, %v15140_v22 }
 0x721   :  { %6686 = vmatprep.mubr.f32.mxu0 %v6495_v8  ;;  %v5825_v57 = vadd.f32 %v5793_v53, %v5697_v37  ;;  %v5154_v50 = vmul.f32 %v12743_v44, %v15113_v61  ;;  %v4771_v18 = vmul.f32 %v15142_v41, %v15114_v17  ;;  %v12834_v55 = vrot.slane %v15143_v16, %v15130_v39  ;;  %v15144_v8 = vld [vmem:[#allocation54_spill] sm:$0xff]  ;;  %v15145_v17 = vld [vmem:[#allocation76_spill] sm:$0xff] }
 0x722   :  { %v6336_v20 = vadd.f32 %v6304_v48, %v6208_v19  ;;  %v5058_v52 = vadd.f32 %v5026_v34, %v4930_v33  ;;  %v4675_v36 = vadd.f32 %v4643_v1, %v4515_v30  ;;  %v12838_v12 = vrot.slane %v15143_v16, %v15067_v62 }
 0x723   :  { %v5953_v28 = vadd.f32 %v5921_v15, %v5825_v57  ;;  %v6177_v53 = vmul.f32 %v6132_v5, %v15144_v8  ;;  %v5282_v44 = vmul.f32 %v12752_v58, %v15090_v7  ;;  %v12845_v37 = vrot.slane %v15143_v16, %v15072_v27 }
 0x724   :  { %6687 = vmatmul.mubr.f32.gmra.mrb[188].mxu0 %v15145_v17  ;;  %v6464_v61 = vadd.f32 %v6432_v51, %v6336_v20  ;;  %v5186_v19 = vadd.f32 %v5154_v50, %v5058_v52  ;;  %v4803_v48 = vadd.f32 %v4771_v18, %v4675_v36  ;;  %v4899_v34 = vmul.f32 %v12834_v55, %v15093_v60  ;;  %v15146_v50 = vld [vmem:[#allocation210_spill] sm:$0xff] }
 0x725   :  { %v6081_v33 = vadd.f32 %v6049_v6, %v5953_v28  ;;  %v6305_v15 = vmul.f32 %v6260_v32, %v15086_v56  ;;  %v5410_v30 = vmul.f32 %v12761_v4, %v15119_v42  ;;  %v12855_v58 = vrot.slane %v15143_v16, %v14727_v2  ;;  %v15147_v28 = vld [vmem:[#allocation77_spill] sm:$0xff] }
 0x726   :  { %v6496_v1 = vmul.f32 0.03125, %v6464_v61  ;;  %v5314_v57 = vadd.f32 %v5282_v44, %v5186_v19  ;;  %v4931_v7 = vadd.f32 %v4899_v34, %v4803_v48  ;;  %v5027_v17 = vmul.f32 %v12838_v12, %v15052_v35  ;;  %v15148_v48 = vld [vmem:[#allocation149_spill] sm:$0xff] }
 0x727   :  { %v6209_v51 = vadd.f32 %v6177_v53, %v6081_v33  ;;  %v6433_v18 = vmul.f32 %v12815_v0, %v15146_v50  ;;  %v5538_v6 = vmul.f32 %v12771_v54, %v15120_v46  ;;  %v5666_v4 = vmul.f32 %v12782_v63, %v15122_v49 }
 0x728   :  { %6691 = vmatprep.mubr.f32.mxu0 %v6496_v1  ;;  %v5442_v20 = vadd.f32 %v5410_v30, %v5314_v57  ;;  %v5059_v52 = vadd.f32 %v5027_v17, %v4931_v7  ;;  %v5155_v61 = vmul.f32 %v12845_v37, %v15055_v11  ;;  %v12869_v36 = vrot.slane %v15143_v16, %v14725_v13  ;;  %v15149_v17 = vld [vmem:[#allocation61_spill] sm:$0xff] }
 0x729   :  { %6692 = vmatmul.mubr.f32.gmra.mrb[190].mxu0 %v15147_v28  ;;  %v6337_v53 = vadd.f32 %v6305_v15, %v6209_v51  ;;  %v5794_v44 = vmul.f32 %v12787_v40, %v15096_v25  ;;  %v5922_v54 = vmul.f32 %v5876_v14, %v15097_v3  ;;  %v5283_v63 = vmul.f32 %v12855_v58, %v15057_v23  ;;  %v15153_v28 = vld [vmem:[#allocation134_spill] sm:$0xff] }
 0x72a   :  { %v5570_v19 = vadd.f32 %v5538_v6, %v5442_v20  ;;  %v5187_v7 = vadd.f32 %v5155_v61, %v5059_v52  ;;  %v12879_v34 = vrot.slane %v15148_v48, %v14728_v24  ;;  %v12883_v16 = vrot.slane %v15148_v48, %v14947_v47  ;;  %v15150_v20 = vld [vmem:[#allocation208_spill] sm:$0xff] }
 0x72b   :  { %v6465_v33 = vadd.f32 %v6433_v18, %v6337_v53  ;;  %v6050_v15 = vmul.f32 %v12804_v38, %v15098_v43  ;;  %v6178_v40 = vmul.f32 %v6132_v5, %v15054_v59  ;;  %v6306_v14 = vmul.f32 %v6260_v32, %v12311_v10  ;;  %v15151_v18 = vld [vmem:[#allocation31_spill] sm:$0xff] }
 0x72c   :  { %v5698_v30 = vadd.f32 %v5666_v4, %v5570_v19  ;;  %v5315_v1 = vadd.f32 %v5283_v63, %v5187_v7  ;;  %v5411_v57 = vmul.f32 %v12869_v36, %v15061_v9  ;;  %v4516_v51 = vmul.f32 %v15139_v21, %v15149_v17  ;;  %v15152_v38 = vld [vmem:[#allocation95_spill] sm:$0xff]  ;;  %v15154_v63 = vld [vmem:[#allocation132_spill] sm:$0xff] }
 0x72d   :  { %v6497_v6 = vmul.f32 0.03125, %v6465_v33  ;;  %v6434_v52 = vmul.f32 %v12815_v0, %v15150_v20  ;;  %v12897_v61 = vrot.slane %v15148_v48, %v15151_v18  ;;  %v4644_v5 = vmul.f32 %v15141_v31, %v15152_v38  ;;  %v15155_v21 = vld [vmem:[#allocation152_spill] sm:$0xff]  ;;  %v15156_v20 = vld [vmem:[#allocation97_spill] sm:$0xff]  ;;  %v15157_v31 = vld [vmem:[#allocation78_spill] sm:$0xff] }
 0x72e   :  { %v5826_v32 = vadd.f32 %v5794_v44, %v5698_v30  ;;  %v5443_v4 = vadd.f32 %v5411_v57, %v5315_v1  ;;  %v5539_v53 = vmul.f32 %v12879_v34, %v15153_v28  ;;  %v5667_v19 = vmul.f32 %v12883_v16, %v15154_v63  ;;  %v15161_v38 = vld [vmem:[#allocation174_spill] sm:$0xff]  ;;  %v15162_v9 = vld [vmem:[#allocation104_spill] sm:$0xff] }
 0x72f   :  { %6696 = vmatprep.mubr.f32.mxu0 %v6497_v6  ;;  %v5795_v7 = vmul.f32 %v12897_v61, %v15155_v21  ;;  %v5880_v0 = vrot.slane %v15148_v48, %v15130_v39  ;;  %v4676_v33 = vadd.f32 %v4644_v5, %v4516_v51  ;;  %v4772_v17 = vmul.f32 %v15142_v41, %v15156_v20  ;;  %v15158_v6 = vld [vmem:[#allocation165_spill] sm:$0xff]  ;;  %v15160_v20 = vld [vmem:[#allocation170_spill] sm:$0xff] }
 0x730   :  { %6697 = vmatmul.mubr.f32.gmra.mrb[192].mxu0 %v15157_v31  ;;  %v5954_v44 = vadd.f32 %v5922_v54, %v5826_v32  ;;  %v5571_v30 = vadd.f32 %v5539_v53, %v5443_v4  ;;  %v6008_v1 = vrot.slane %v15148_v48, %v15067_v62  ;;  %v6136_v57 = vrot.slane %v15148_v48, %v15072_v27  ;;  %v15159_v53 = vld [vmem:[#allocation101_spill] sm:$0xff] }
 0x731   :  { %v5923_v63 = vmul.f32 %v5880_v0, %v15158_v6  ;;  %v6264_v21 = vrot.slane %v15148_v48, %v14727_v2  ;;  %v4804_v28 = vadd.f32 %v4772_v17, %v4676_v33  ;;  %v4900_v51 = vmul.f32 %v12834_v55, %v15134_v26 }
 0x732   :  { %v6082_v41 = vadd.f32 %v6050_v15, %v5954_v44  ;;  %v5699_v5 = vadd.f32 %v5667_v19, %v5571_v30  ;;  %v6051_v54 = vmul.f32 %v6008_v1, %v15135_v29  ;;  %v6179_v32 = vmul.f32 %v6136_v57, %v15144_v8  ;;  %v15163_v15 = vld [vmem:[#allocation147_spill] sm:$0xff]  ;;  %v15164_v30 = vld [vmem:[#allocation98_spill] sm:$0xff] }
 0x733   :  { %v4932_v4 = vadd.f32 %v4900_v51, %v4804_v28  ;;  %v5028_v31 = vmul.f32 %v12838_v12, %v15159_v53  ;;  %v4517_v6 = vmul.f32 %v15160_v20, %v15138_v45  ;;  %v4645_v10 = vmul.f32 %v15161_v38, %v15140_v22  ;;  %v15165_v51 = vld [vmem:[#allocation166_spill] sm:$0xff] }
 0x734   :  { %v6210_v17 = vadd.f32 %v6178_v40, %v6082_v41  ;;  %v5827_v33 = vadd.f32 %v5795_v7, %v5699_v5  ;;  %v5156_v55 = vmul.f32 %v12845_v37, %v15162_v9  ;;  %v12933_v19 = vrot.slane %v15163_v15, %v15130_v39  ;;  %v15166_v7 = vld [vmem:[#allocation123_spill] sm:$0xff] }
 0x735   :  { %v5060_v44 = vadd.f32 %v5028_v31, %v4932_v4  ;;  %v4677_v28 = vadd.f32 %v4645_v10, %v4517_v6  ;;  %v4773_v12 = vmul.f32 %v15165_v51, %v15164_v30  ;;  %v12939_v8 = vrot.slane %v15163_v15, %v15067_v62 }
 0x736   :  { %v6338_v45 = vadd.f32 %v6306_v14, %v6210_v17  ;;  %v5955_v22 = vadd.f32 %v5923_v63, %v5827_v33  ;;  %v6392_v40 = vrot.slane %v15148_v48, %v14725_v13  ;;  %v5284_v37 = vmul.f32 %v12855_v58, %v15166_v7 }
 0x737   :  { %v5188_v41 = vadd.f32 %v5156_v55, %v5060_v44  ;;  %v4805_v5 = vadd.f32 %v4773_v12, %v4677_v28  ;;  %v4901_v10 = vmul.f32 %v12933_v19, %v15093_v60  ;;  %v12949_v6 = vrot.slane %v15163_v15, %v15072_v27 }
 0x738   :  { %v6466_v4 = vadd.f32 %v6434_v52, %v6338_v45  ;;  %v6083_v31 = vadd.f32 %v6051_v54, %v5955_v22  ;;  %v6307_v14 = vmul.f32 %v6264_v21, %v15086_v56  ;;  %v5412_v63 = vmul.f32 %v12869_v36, %v15119_v42 }
 0x739   :  { %v5316_v48 = vadd.f32 %v5284_v37, %v5188_v41  ;;  %v4933_v17 = vadd.f32 %v4901_v10, %v4805_v5  ;;  %v5029_v58 = vmul.f32 %v12939_v8, %v15052_v35  ;;  %v12958_v33 = vrot.slane %v15163_v15, %v14727_v2 }
 0x73a   :  { %v6498_v55 = vmul.f32 0.03125, %v6466_v4  ;;  %v6211_v44 = vadd.f32 %v6179_v32, %v6083_v31  ;;  %v6435_v28 = vmul.f32 %v6392_v40, %v15146_v50  ;;  %v5540_v22 = vmul.f32 %v12879_v34, %v15120_v46  ;;  %v15167_v34 = vld [vmem:[#allocation37_spill] sm:$0xff] }
 0x73b   :  { %v5444_v45 = vadd.f32 %v5412_v63, %v5316_v48  ;;  %v5061_v52 = vadd.f32 %v5029_v58, %v4933_v17  ;;  %v5157_v36 = vmul.f32 %v12949_v6, %v15055_v11  ;;  %v12967_v54 = vrot.slane %v15163_v15, %v14725_v13  ;;  %v15168_v15 = vld [vmem:[#allocation169_spill] sm:$0xff] }
 0x73c   :  { %6701 = vmatprep.mubr.f32.mxu0 %v6498_v55  ;;  %v6339_v12 = vadd.f32 %v6307_v14, %v6211_v44  ;;  %v5668_v37 = vmul.f32 %v12883_v16, %v15122_v49  ;;  %v5796_v32 = vmul.f32 %v12897_v61, %v15096_v25  ;;  %v5924_v41 = vmul.f32 %v5880_v0, %v15097_v3  ;;  %v15169_v58 = vld [vmem:[#allocation129_spill] sm:$0xff] }
 0x73d   :  { %6702 = vmatmul.mubr.f32.gmra.mrb[194].mxu0 %v15167_v34  ;;  %v5572_v5 = vadd.f32 %v5540_v22, %v5444_v45  ;;  %v5189_v10 = vadd.f32 %v5157_v36, %v5061_v52  ;;  %v5285_v4 = vmul.f32 %v12958_v33, %v15057_v23  ;;  %v12979_v31 = vrot.slane %v15168_v15, %v14728_v24  ;;  %v15170_v22 = vld [vmem:[#allocation36_spill] sm:$0xff]  ;;  %v15171_v45 = vld [vmem:[#allocation61_spill] sm:$0xff]  ;;  %v15172_v52 = vld [vmem:[#allocation95_spill] sm:$0xff] }
 0x73e   :  { %v6467_v14 = vadd.f32 %v6435_v28, %v6339_v12  ;;  %v6052_v63 = vmul.f32 %v6008_v1, %v15098_v43  ;;  %v12984_v16 = vrot.slane %v15168_v15, %v14947_v47  ;;  %v12988_v61 = vrot.slane %v15168_v15, %v15151_v18  ;;  %v15173_v34 = vld [vmem:[#allocation208_spill] sm:$0xff] }
 0x73f   :  { %v5700_v0 = vadd.f32 %v5668_v37, %v5572_v5  ;;  %v6180_v48 = vmul.f32 %v6136_v57, %v15054_v59  ;;  %v5317_v17 = vadd.f32 %v5285_v4, %v5189_v10  ;;  %v5413_v55 = vmul.f32 %v12967_v54, %v15169_v58  ;;  %v15174_v37 = vld [vmem:[#allocation134_spill] sm:$0xff]  ;;  %v15175_v5 = vld [vmem:[#allocation132_spill] sm:$0xff] }
 0x740   :  { %v6499_v44 = vmul.f32 0.03125, %v6467_v14  ;;  %v6308_v28 = vmul.f32 %v6264_v21, %v15170_v22  ;;  %v4518_v1 = vmul.f32 %v15160_v20, %v15171_v45  ;;  %v4646_v36 = vmul.f32 %v15161_v38, %v15172_v52  ;;  %v15176_v4 = vld [vmem:[#allocation152_spill] sm:$0xff]  ;;  %v15177_v22 = vld [vmem:[#allocation97_spill] sm:$0xff]  ;;  %v15178_v45 = vld [vmem:[#allocation50_spill] sm:$0xff] }
 0x741   :  { %v5828_v12 = vadd.f32 %v5796_v32, %v5700_v0  ;;  %v6436_v43 = vmul.f32 %v6392_v40, %v15173_v34  ;;  %v5445_v47 = vadd.f32 %v5413_v55, %v5317_v17  ;;  %v5541_v57 = vmul.f32 %v12979_v31, %v15174_v37 }
 0x742   :  { %6706 = vmatprep.mubr.f32.mxu0 %v6499_v44  ;;  %v5669_v10 = vmul.f32 %v12984_v16, %v15175_v5  ;;  %v5797_v21 = vmul.f32 %v12988_v61, %v15176_v4  ;;  %v4678_v14 = vadd.f32 %v4646_v36, %v4518_v1  ;;  %v4774_v20 = vmul.f32 %v15165_v51, %v15177_v22  ;;  %v15180_v4 = vld [vmem:[#allocation85_spill] sm:$0xff] }
 0x743   :  { %6707 = vmatmul.mubr.f32.gmra.mrb[196].mxu0 %v15178_v45  ;;  %v5956_v38 = vadd.f32 %v5924_v41, %v5828_v12  ;;  %v5573_v32 = vadd.f32 %v5541_v57, %v5445_v47  ;;  %v5884_v40 = vrot.slane %v15168_v15, %v15130_v39  ;;  %v6012_v0 = vrot.slane %v15168_v15, %v15067_v62  ;;  %v15179_v47 = vld [vmem:[#allocation165_spill] sm:$0xff] }
 0x744   :  { %v6140_v17 = vrot.slane %v15168_v15, %v15072_v27  ;;  %v13016_v55 = vrot.slane %v15168_v15, %v14727_v2  ;;  %v4806_v44 = vadd.f32 %v4774_v20, %v4678_v14  ;;  %v4902_v51 = vmul.f32 %v12933_v19, %v15134_v26  ;;  %v15181_v5 = vld [vmem:[#allocation181_spill] sm:$0xff]  ;;  %v15182_v19 = vld [vmem:[#allocation54_spill] sm:$0xff] }
 0x745   :  { %v6084_v45 = vadd.f32 %v6052_v63, %v5956_v38  ;;  %v5701_v41 = vadd.f32 %v5669_v10, %v5573_v32  ;;  %v5925_v1 = vmul.f32 %v5884_v40, %v15179_v47  ;;  %v6053_v36 = vmul.f32 %v6012_v0, %v15135_v29  ;;  %v15183_v10 = vld [vmem:[#allocation86_spill] sm:$0xff] }
 0x746   :  { %v13024_v12 = vrot.slane %v15168_v15, %v14725_v13  ;;  %v4934_v57 = vadd.f32 %v4902_v51, %v4806_v44  ;;  %v5030_v22 = vmul.f32 %v12939_v8, %v15159_v53  ;;  %v4519_v14 = vmul.f32 %v15181_v5, %v15180_v4  ;;  %v15184_v38 = vld [vmem:[#allocation158_spill] sm:$0xff] }
 0x747   :  { %v6212_v20 = vadd.f32 %v6180_v48, %v6084_v45  ;;  %v5829_v37 = vadd.f32 %v5797_v21, %v5701_v41  ;;  %v6181_v63 = vmul.f32 %v6140_v17, %v15182_v19  ;;  %v4647_v32 = vmul.f32 %v15184_v38, %v15183_v10  ;;  %v15185_v15 = vld [vmem:[#allocation198_spill] sm:$0xff] }
 0x748   :  { %v5062_v26 = vadd.f32 %v5030_v22, %v4934_v57  ;;  %v5158_v29 = vmul.f32 %v12949_v6, %v15162_v9  ;;  %v4775_v44 = vmul.f32 %v15185_v15, %v15164_v30  ;;  %v15186_v51 = vld [vmem:[#allocation178_spill] sm:$0xff]  ;;  %v6309_v22 = vmul.f32 %v13016_v55, %v15086_v56 }
 0x749   :  { %v13039_v8 = vrot.slane %v15186_v51, %v15130_v39  ;;  %v6340_v53 = vadd.f32 %v6308_v28, %v6212_v20  ;;  %v5957_v4 = vadd.f32 %v5925_v1, %v5829_v37  ;;  %v4679_v48 = vadd.f32 %v4647_v32, %v4519_v14 }
 0x74a   :  { %v13043_v21 = vrot.slane %v15186_v51, %v15067_v62  ;;  %v5190_v45 = vadd.f32 %v5158_v29, %v5062_v26  ;;  %v5286_v6 = vmul.f32 %v12958_v33, %v15166_v7  ;;  %v13051_v41 = vrot.slane %v15186_v51, %v15072_v27 }
 0x74b   :  { %v6468_v57 = vadd.f32 %v6436_v43, %v6340_v53  ;;  %v6085_v19 = vadd.f32 %v6053_v36, %v5957_v4  ;;  %v4807_v28 = vadd.f32 %v4775_v44, %v4679_v48  ;;  %v4903_v37 = vmul.f32 %v13039_v8, %v15093_v60  ;;  %v15187_v53 = vld [vmem:[#allocation214_spill] sm:$0xff] }
 0x74c   :  { %v6437_v1 = vmul.f32 %v13024_v12, %v15146_v50  ;;  %v5318_v14 = vadd.f32 %v5286_v6, %v5190_v45  ;;  %v5414_v26 = vmul.f32 %v12967_v54, %v15119_v42  ;;  %v13061_v29 = vrot.slane %v15186_v51, %v14727_v2  ;;  %v15189_v6 = vld [vmem:[#allocation79_spill] sm:$0xff] }
 0x74d   :  { %v6500_v33 = vmul.f32 0.03125, %v6468_v57  ;;  %v6213_v20 = vadd.f32 %v6181_v63, %v6085_v19  ;;  %v4935_v32 = vadd.f32 %v4903_v37, %v4807_v28  ;;  %v5031_v43 = vmul.f32 %v13043_v21, %v15052_v35 }
 0x74e   :  { %v13067_v4 = vrot.slane %v15187_v53, %v15151_v18  ;;  %v5446_v36 = vadd.f32 %v5414_v26, %v5318_v14  ;;  %v5542_v44 = vmul.f32 %v12979_v31, %v15120_v46  ;;  %v5670_v54 = vmul.f32 %v12984_v16, %v15122_v49  ;;  %v15190_v14 = vld [vmem:[#allocation156_spill] sm:$0xff] }
 0x74f   :  { %6711 = vmatprep.mubr.f32.mxu0 %v6500_v33  ;;  %v6341_v48 = vadd.f32 %v6309_v22, %v6213_v20  ;;  %v5063_v45 = vadd.f32 %v5031_v43, %v4935_v32  ;;  %v5159_v19 = vmul.f32 %v13051_v41, %v15055_v11  ;;  %v13077_v63 = vrot.slane %v15186_v51, %v14725_v13  ;;  %v15191_v33 = vld [vmem:[#allocation30_spill] sm:$0xff]  ;;  %v15198_v53 = vld [vmem:[#allocation152_spill] sm:$0xff] }
 0x750   :  { %15188 = vst [vmem:[#allocation213_spill] sm:$0xff] %v13067_v4  ;;  %6712 = vmatmul.mubr.f32.gmra.mrb[198].mxu0 %v15189_v6  ;;  %v5574_v57 = vadd.f32 %v5542_v44, %v5446_v36  ;;  %v5798_v28 = vmul.f32 %v12988_v61, %v15096_v25  ;;  %v5926_v31 = vmul.f32 %v5884_v40, %v15097_v3  ;;  %v15192_v32 = vld [vmem:[#allocation182_spill] sm:$0xff]  ;;  %v15194_v6 = vld [vmem:[#allocation36_spill] sm:$0xff] }
 0x751   :  { %v5287_v16 = vmul.f32 %v13061_v29, %v15057_v23  ;;  %v6469_v22 = vadd.f32 %v6437_v1, %v6341_v48  ;;  %v5191_v37 = vadd.f32 %v5159_v19, %v5063_v45  ;;  %v13087_v26 = vrot.slane %v15190_v14, %v14728_v24  ;;  %v15193_v48 = vld [vmem:[#allocation61_spill] sm:$0xff] }
 0x752   :  { %v13091_v51 = vrot.slane %v15190_v14, %v15191_v33  ;;  %v5702_v20 = vadd.f32 %v5670_v54, %v5574_v57  ;;  %v6054_v43 = vmul.f32 %v6012_v0, %v15192_v32  ;;  %v6182_v61 = vmul.f32 %v6140_v17, %v15054_v59 }
 0x753   :  { %v13097_v40 = vrot.slane %v15190_v14, %v15151_v18  ;;  %v6501_v36 = vmul.f32 0.03125, %v6469_v22  ;;  %v5319_v1 = vadd.f32 %v5287_v16, %v5191_v37  ;;  %v5415_v44 = vmul.f32 %v13077_v63, %v15169_v58  ;;  %v15195_v22 = vld [vmem:[#allocation134_spill] sm:$0xff] }
 0x754   :  { %v4520_v45 = vmul.f32 %v15181_v5, %v15193_v48  ;;  %v5830_v19 = vadd.f32 %v5798_v28, %v5702_v20  ;;  %v6310_v54 = vmul.f32 %v13016_v55, %v15194_v6  ;;  %v13107_v0 = vrot.slane %v15190_v14, %v15130_v39  ;;  %v15196_v5 = vld [vmem:[#allocation132_spill] sm:$0xff]  ;;  %v15199_v48 = vld [vmem:[#allocation97_spill] sm:$0xff] }
 0x755   :  { %v4648_v17 = vmul.f32 %v15184_v38, %v15172_v52  ;;  %6716 = vmatprep.mubr.f32.mxu0 %v6501_v36  ;;  %v6438_v57 = vmul.f32 %v13024_v12, %v15173_v34  ;;  %v5447_v16 = vadd.f32 %v5415_v44, %v5319_v1  ;;  %v5543_v37 = vmul.f32 %v13087_v26, %v15195_v22  ;;  %v15197_v20 = vld [vmem:[#allocation80_spill] sm:$0xff] }
 0x756   :  { %v5671_v28 = vmul.f32 %v13091_v51, %v15196_v5  ;;  %6717 = vmatmul.mubr.f32.gmra.mrb[200].mxu0 %v15197_v20  ;;  %v5958_v55 = vadd.f32 %v5926_v31, %v5830_v19  ;;  %v5799_v4 = vmul.f32 %v13097_v40, %v15198_v53  ;;  %v4776_v38 = vmul.f32 %v15185_v15, %v15199_v48  ;;  %v15202_v48 = vld [vmem:[#allocation85_spill] sm:$0xff]  ;;  %v15203_v5 = vld [vmem:[#allocation195_spill] sm:$0xff] }
 0x757   :  { %v4680_v6 = vadd.f32 %v4648_v17, %v4520_v45  ;;  %v5575_v36 = vadd.f32 %v5543_v37, %v5447_v16  ;;  %v6016_v12 = vrot.slane %v15190_v14, %v15067_v62  ;;  %v6144_v1 = vrot.slane %v15190_v14, %v15072_v27  ;;  %v15200_v45 = vld [vmem:[#allocation89_spill] sm:$0xff]  ;;  %v15201_v16 = vld [vmem:[#allocation183_spill] sm:$0xff] }
 0x758   :  { %v13128_v44 = vrot.slane %v15190_v14, %v14727_v2  ;;  %v6086_v20 = vadd.f32 %v6054_v43, %v5958_v55  ;;  %v5927_v31 = vmul.f32 %v13107_v0, %v15179_v47  ;;  %v4904_v17 = vmul.f32 %v13039_v8, %v15200_v45  ;;  %v15204_v43 = vld [vmem:[#allocation101_spill] sm:$0xff] }
 0x759   :  { %v4808_v19 = vadd.f32 %v4776_v38, %v4680_v6  ;;  %v5703_v15 = vadd.f32 %v5671_v28, %v5575_v36  ;;  %v6055_v37 = vmul.f32 %v6016_v12, %v15201_v16  ;;  %v13137_v53 = vrot.slane %v15190_v14, %v14725_v13  ;;  %v15205_v6 = vld [vmem:[#allocation196_spill] sm:$0xff]  ;;  %v15206_v28 = vld [vmem:[#allocation197_spill] sm:$0xff]  ;;  %v15207_v14 = vld [vmem:[#allocation199_spill] sm:$0xff] }
 0x75a   :  { %v4521_v34 = vmul.f32 %v15203_v5, %v15202_v48  ;;  %v6214_v22 = vadd.f32 %v6182_v61, %v6086_v20  ;;  %v5032_v55 = vmul.f32 %v13043_v21, %v15204_v43  ;;  %v4649_v38 = vmul.f32 %v15205_v6, %v15183_v10 }
 0x75b   :  { %v4936_v52 = vadd.f32 %v4904_v17, %v4808_v19  ;;  %v5831_v47 = vadd.f32 %v5799_v4, %v5703_v15  ;;  %v5160_v8 = vmul.f32 %v13051_v41, %v15162_v9  ;;  %v4777_v36 = vmul.f32 %v15206_v28, %v15164_v30  ;;  %v15208_v17 = vld [vmem:[#allocation54_spill] sm:$0xff] }
 0x75c   :  { %v13151_v16 = vrot.slane %v15207_v14, %v15130_v39  ;;  %v6342_v48 = vadd.f32 %v6310_v54, %v6214_v22  ;;  %v4681_v20 = vadd.f32 %v4649_v38, %v4521_v34  ;;  %v13155_v21 = vrot.slane %v15207_v14, %v15067_v62 }
 0x75d   :  { %v5064_v61 = vadd.f32 %v5032_v55, %v4936_v52  ;;  %v5959_v19 = vadd.f32 %v5927_v31, %v5831_v47  ;;  %v6183_v4 = vmul.f32 %v6144_v1, %v15208_v17  ;;  %v5288_v41 = vmul.f32 %v13061_v29, %v15166_v7 }
 0x75e   :  { %v13162_v15 = vrot.slane %v15207_v14, %v15072_v27  ;;  %v6470_v30 = vadd.f32 %v6438_v57, %v6342_v48  ;;  %v4809_v10 = vadd.f32 %v4777_v36, %v4681_v20  ;;  %v4905_v52 = vmul.f32 %v13151_v16, %v15093_v60 }
 0x75f   :  { %v5192_v9 = vadd.f32 %v5160_v8, %v5064_v61  ;;  %v6087_v34 = vadd.f32 %v6055_v37, %v5959_v19  ;;  %v6311_v54 = vmul.f32 %v13128_v44, %v15086_v56  ;;  %v5416_v47 = vmul.f32 %v13077_v63, %v15119_v42 }
 0x760   :  { %v13172_v29 = vrot.slane %v15207_v14, %v14727_v2  ;;  %v6502_v22 = vmul.f32 0.03125, %v6470_v30  ;;  %v4937_v55 = vadd.f32 %v4905_v52, %v4809_v10  ;;  %v5033_v48 = vmul.f32 %v13155_v21, %v15052_v35  ;;  %v15209_v10 = vld [vmem:[#allocation81_spill] sm:$0xff] }
 0x761   :  { %v5320_v31 = vadd.f32 %v5288_v41, %v5192_v9  ;;  %v6215_v57 = vadd.f32 %v6183_v4, %v6087_v34  ;;  %v6439_v37 = vmul.f32 %v13137_v53, %v15146_v50  ;;  %v5544_v38 = vmul.f32 %v13087_v26, %v15120_v46  ;;  %v15210_v52 = vld [vmem:[#allocation41_spill] sm:$0xff] }
 0x762   :  { %v5672_v63 = vmul.f32 %v13091_v51, %v15122_v49  ;;  %6721 = vmatprep.mubr.f32.mxu0 %v6502_v22  ;;  %v5065_v36 = vadd.f32 %v5033_v48, %v4937_v55  ;;  %v5161_v9 = vmul.f32 %v13162_v15, %v15055_v11  ;;  %v13186_v30 = vrot.slane %v15207_v14, %v14725_v13 }
 0x763   :  { %v5448_v8 = vadd.f32 %v5416_v47, %v5320_v31  ;;  %6722 = vmatmul.mubr.f32.gmra.mrb[202].mxu0 %v15209_v10  ;;  %v6343_v61 = vadd.f32 %v6311_v54, %v6215_v57  ;;  %v5800_v20 = vmul.f32 %v13097_v40, %v15096_v25  ;;  %v5928_v26 = vmul.f32 %v13107_v0, %v15097_v3  ;;  %v15211_v31 = vld [vmem:[#allocation61_spill] sm:$0xff]  ;;  %v15212_v57 = vld [vmem:[#allocation36_spill] sm:$0xff] }
 0x764   :  { %v6056_v51 = vmul.f32 %v6016_v12, %v15192_v32  ;;  %v5193_v4 = vadd.f32 %v5161_v9, %v5065_v36  ;;  %v5289_v41 = vmul.f32 %v13172_v29, %v15057_v23  ;;  %v13198_v14 = vrot.slane %v15210_v52, %v14728_v24  ;;  %v15214_v9 = vld [vmem:[#allocation134_spill] sm:$0xff] }
 0x765   :  { %v5576_v19 = vadd.f32 %v5544_v38, %v5448_v8  ;;  %v6471_v34 = vadd.f32 %v6439_v37, %v6343_v61  ;;  %v6184_v54 = vmul.f32 %v6144_v1, %v15054_v59  ;;  %v13203_v40 = vrot.slane %v15210_v52, %v15191_v33  ;;  %v15213_v38 = vld [vmem:[#allocation95_spill] sm:$0xff] }
 0x766   :  { %v13207_v0 = vrot.slane %v15210_v52, %v15151_v18  ;;  %v5321_v47 = vadd.f32 %v5289_v41, %v5193_v4  ;;  %v5417_v22 = vmul.f32 %v13186_v30, %v15169_v58  ;;  %v4522_v55 = vmul.f32 %v15203_v5, %v15211_v31  ;;  %v15215_v5 = vld [vmem:[#allocation208_spill] sm:$0xff] }
 0x767   :  { %v5704_v12 = vadd.f32 %v5672_v63, %v5576_v19  ;;  %v6503_v48 = vmul.f32 0.03125, %v6471_v34  ;;  %v6312_v1 = vmul.f32 %v13128_v44, %v15212_v57  ;;  %v13217_v37 = vrot.slane %v15210_v52, %v15130_v39  ;;  %v15216_v19 = vld [vmem:[#allocation132_spill] sm:$0xff]  ;;  %v15217_v34 = vld [vmem:[#allocation97_spill] sm:$0xff] }
 0x768   :  { %v4650_v8 = vmul.f32 %v15205_v6, %v15213_v38  ;;  %v5449_v63 = vadd.f32 %v5417_v22, %v5321_v47  ;;  %v5545_v10 = vmul.f32 %v13198_v14, %v15214_v9  ;;  %v13225_v61 = vrot.slane %v15210_v52, %v15067_v62  ;;  %v15219_v22 = vld [vmem:[#allocation152_spill] sm:$0xff]  ;;  %v15220_v38 = vld [vmem:[#allocation165_spill] sm:$0xff] }
 0x769   :  { %v5832_v36 = vadd.f32 %v5800_v20, %v5704_v12  ;;  %6726 = vmatprep.mubr.f32.mxu0 %v6503_v48  ;;  %v6440_v44 = vmul.f32 %v13137_v53, %v15215_v5  ;;  %v5673_v4 = vmul.f32 %v13203_v40, %v15216_v19  ;;  %v4778_v6 = vmul.f32 %v15206_v28, %v15217_v34  ;;  %v15218_v20 = vld [vmem:[#allocation82_spill] sm:$0xff]  ;;  %v15223_v34 = vld [vmem:[#allocation163_spill] sm:$0xff] }
 0x76a   :  { %v4682_v41 = vadd.f32 %v4650_v8, %v4522_v55  ;;  %6727 = vmatmul.mubr.f32.gmra.mrb[204].mxu0 %v15218_v20  ;;  %v5577_v47 = vadd.f32 %v5545_v10, %v5449_v63  ;;  %v5801_v9 = vmul.f32 %v13207_v0, %v15219_v22  ;;  %v6148_v48 = vrot.slane %v15210_v52, %v15072_v27  ;;  %v15222_v22 = vld [vmem:[#allocation85_spill] sm:$0xff] }
 0x76b   :  { %v5960_v12 = vadd.f32 %v5928_v26, %v5832_v36  ;;  %v5929_v53 = vmul.f32 %v13217_v37, %v15220_v38  ;;  %v6276_v19 = vrot.slane %v15210_v52, %v14727_v2  ;;  %v4906_v28 = vmul.f32 %v13151_v16, %v15200_v45  ;;  %v15221_v26 = vld [vmem:[#allocation183_spill] sm:$0xff]  ;;  %v15229_v45 = vld [vmem:[#allocation48_spill] sm:$0xff] }
 0x76c   :  { %v4810_v55 = vadd.f32 %v4778_v6, %v4682_v41  ;;  %v5705_v20 = vadd.f32 %v5673_v4, %v5577_v47  ;;  %v6057_v36 = vmul.f32 %v13225_v61, %v15221_v26  ;;  %v13248_v63 = vrot.slane %v15210_v52, %v14725_v13  ;;  %v15224_v41 = vld [vmem:[#allocation86_spill] sm:$0xff]  ;;  %v15226_v4 = vld [vmem:[#allocation104_spill] sm:$0xff]  ;;  %v15227_v47 = vld [vmem:[#allocation161_spill] sm:$0xff] }
 0x76d   :  { %v6088_v8 = vadd.f32 %v6056_v51, %v5960_v12  ;;  %v5034_v38 = vmul.f32 %v13155_v21, %v15204_v43  ;;  %v4523_v5 = vmul.f32 %v15223_v34, %v15222_v22  ;;  %v15225_v6 = vld [vmem:[#allocation42_spill] sm:$0xff]  ;;  %v5162_v12 = vmul.f32 %v13162_v15, %v15226_v4 }
 0x76e   :  { %v4938_v10 = vadd.f32 %v4906_v28, %v4810_v55  ;;  %v4651_v31 = vmul.f32 %v15225_v6, %v15224_v41  ;;  %v5833_v51 = vadd.f32 %v5801_v9, %v5705_v20  ;;  %v13260_v26 = vrot.slane %v15227_v47, %v15130_v39  ;;  %v15228_v28 = vld [vmem:[#allocation98_spill] sm:$0xff] }
 0x76f   :  { %v6216_v16 = vadd.f32 %v6184_v54, %v6088_v8  ;;  %v4779_v21 = vmul.f32 %v15229_v45, %v15228_v28  ;;  %v13266_v22 = vrot.slane %v15227_v47, %v15067_v62  ;;  %v6185_v54 = vmul.f32 %v6148_v48, %v15208_v17 }
 0x770   :  { %v5066_v52 = vadd.f32 %v5034_v38, %v4938_v10  ;;  %v4683_v55 = vadd.f32 %v4651_v31, %v4523_v5  ;;  %v5961_v41 = vadd.f32 %v5929_v53, %v5833_v51  ;;  %v5290_v15 = vmul.f32 %v13172_v29, %v15166_v7 }
 0x771   :  { %v6344_v43 = vadd.f32 %v6312_v1, %v6216_v16  ;;  %v4907_v38 = vmul.f32 %v13260_v26, %v15093_v60  ;;  %v13275_v31 = vrot.slane %v15227_v47, %v15072_v27  ;;  %v6313_v10 = vmul.f32 %v6276_v19, %v15086_v56 }
 0x772   :  { %v5194_v9 = vadd.f32 %v5162_v12, %v5066_v52  ;;  %v4811_v8 = vadd.f32 %v4779_v21, %v4683_v55  ;;  %v6089_v20 = vadd.f32 %v6057_v36, %v5961_v41  ;;  %v5418_v1 = vmul.f32 %v13186_v30, %v15119_v42 }
 0x773   :  { %v6472_v5 = vadd.f32 %v6440_v44, %v6344_v43  ;;  %v5035_v29 = vmul.f32 %v13266_v22, %v15052_v35  ;;  %v13284_v51 = vrot.slane %v15227_v47, %v14727_v2  ;;  %v6441_v43 = vmul.f32 %v13248_v63, %v15146_v50 }
 0x774   :  { %v5322_v53 = vadd.f32 %v5290_v15, %v5194_v9  ;;  %v4939_v16 = vadd.f32 %v4907_v38, %v4811_v8  ;;  %v6217_v52 = vadd.f32 %v6185_v54, %v6089_v20  ;;  %v5546_v44 = vmul.f32 %v13198_v14, %v15120_v46  ;;  %v15230_v9 = vld [vmem:[#allocation71_spill] sm:$0xff] }
 0x775   :  { %v6504_v12 = vmul.f32 0.03125, %v6472_v5  ;;  %v5163_v30 = vmul.f32 %v13275_v31, %v15055_v11  ;;  %v13294_v55 = vrot.slane %v15227_v47, %v14725_v13  ;;  %v5674_v54 = vmul.f32 %v13203_v40, %v15122_v49  ;;  %v15231_v47 = vld [vmem:[#allocation162_spill] sm:$0xff] }
 0x776   :  { %v5450_v36 = vadd.f32 %v5418_v1, %v5322_v53  ;;  %v5067_v41 = vadd.f32 %v5035_v29, %v4939_v16  ;;  %v6345_v21 = vadd.f32 %v6313_v10, %v6217_v52  ;;  %v5802_v15 = vmul.f32 %v13207_v0, %v15096_v25 }
 0x777   :  { %6731 = vmatprep.mubr.f32.mxu0 %v6504_v12  ;;  %v5930_v14 = vmul.f32 %v13217_v37, %v15097_v3  ;;  %v5291_v5 = vmul.f32 %v13284_v51, %v15057_v23  ;;  %v13307_v20 = vrot.slane %v15231_v47, %v14728_v24  ;;  %v6058_v40 = vmul.f32 %v13225_v61, %v15192_v32 }
 0x778   :  { %6732 = vmatmul.mubr.f32.gmra.mrb[206].mxu0 %v15230_v9  ;;  %v5578_v8 = vadd.f32 %v5546_v44, %v5450_v36  ;;  %v5195_v38 = vadd.f32 %v5163_v30, %v5067_v41  ;;  %v6473_v10 = vadd.f32 %v6441_v43, %v6345_v21  ;;  %v6186_v0 = vmul.f32 %v6148_v48, %v15054_v59  ;;  %v15232_v43 = vld [vmem:[#allocation61_spill] sm:$0xff]  ;;  %v15233_v48 = vld [vmem:[#allocation95_spill] sm:$0xff]  ;;  %v15234_v30 = vld [vmem:[#allocation134_spill] sm:$0xff] }
 0x779   :  { %v13314_v37 = vrot.slane %v15231_v47, %v15191_v33  ;;  %v5419_v16 = vmul.f32 %v13294_v55, %v15169_v58  ;;  %v13320_v29 = vrot.slane %v15231_v47, %v15151_v18  ;;  %v6314_v52 = vmul.f32 %v6276_v19, %v15212_v57  ;;  %v15235_v9 = vld [vmem:[#allocation208_spill] sm:$0xff]  ;;  %v15243_v57 = vld [vmem:[#allocation85_spill] sm:$0xff] }
 0x77a   :  { %v5706_v1 = vadd.f32 %v5674_v54, %v5578_v8  ;;  %v5323_v53 = vadd.f32 %v5291_v5, %v5195_v38  ;;  %v6505_v12 = vmul.f32 0.03125, %v6473_v10  ;;  %v4524_v61 = vmul.f32 %v15223_v34, %v15232_v43  ;;  %v15236_v19 = vld [vmem:[#allocation132_spill] sm:$0xff]  ;;  %v15237_v5 = vld [vmem:[#allocation97_spill] sm:$0xff] }
 0x77b   :  { %v4652_v44 = vmul.f32 %v15225_v6, %v15233_v48  ;;  %v5547_v21 = vmul.f32 %v13307_v20, %v15234_v30  ;;  %v13331_v54 = vrot.slane %v15231_v47, %v15130_v39  ;;  %v6442_v8 = vmul.f32 %v13248_v63, %v15235_v9  ;;  %v15242_v9 = vld [vmem:[#allocation101_spill] sm:$0xff]  ;;  %v15244_v30 = vld [vmem:[#allocation171_spill] sm:$0xff] }
 0x77c   :  { %v5834_v36 = vadd.f32 %v5802_v15, %v5706_v1  ;;  %v5451_v41 = vadd.f32 %v5419_v16, %v5323_v53  ;;  %6736 = vmatprep.mubr.f32.mxu0 %v6505_v12  ;;  %v5675_v38 = vmul.f32 %v13314_v37, %v15236_v19  ;;  %v4780_v6 = vmul.f32 %v15229_v45, %v15237_v5  ;;  %v15238_v15 = vld [vmem:[#allocation72_spill] sm:$0xff] }
 0x77d   :  { %v4684_v34 = vadd.f32 %v4652_v44, %v4524_v61  ;;  %6737 = vmatmul.mubr.f32.gmra.mrb[208].mxu0 %v15238_v15  ;;  %v15239_v53 = vld [vmem:[#allocation152_spill] sm:$0xff]  ;;  %v6024_v12 = vrot.slane %v15231_v47, %v15067_v62  ;;  %v6152_v63 = vrot.slane %v15231_v47, %v15072_v27  ;;  %v13348_v19 = vrot.slane %v15231_v47, %v14727_v2  ;;  %v15240_v44 = vld [vmem:[#allocation89_spill] sm:$0xff] }
 0x77e   :  { %v5962_v10 = vadd.f32 %v5930_v14, %v5834_v36  ;;  %v5579_v1 = vadd.f32 %v5547_v21, %v5451_v41  ;;  %v5803_v16 = vmul.f32 %v13320_v29, %v15239_v53  ;;  %v4908_v45 = vmul.f32 %v13260_v26, %v15240_v44  ;;  %v15241_v36 = vld [vmem:[#allocation165_spill] sm:$0xff] }
 0x77f   :  { %v4812_v61 = vadd.f32 %v4780_v6, %v4684_v34  ;;  %v5931_v41 = vmul.f32 %v13331_v54, %v15241_v36  ;;  %v13356_v21 = vrot.slane %v15231_v47, %v14725_v13  ;;  %v5036_v5 = vmul.f32 %v13266_v22, %v15242_v9  ;;  %v15245_v34 = vld [vmem:[#allocation86_spill] sm:$0xff]  ;;  %v15246_v6 = vld [vmem:[#allocation172_spill] sm:$0xff] }
 0x780   :  { %v6090_v15 = vadd.f32 %v6058_v40, %v5962_v10  ;;  %v5707_v14 = vadd.f32 %v5675_v38, %v5579_v1  ;;  %v4525_v48 = vmul.f32 %v15244_v30, %v15243_v57  ;;  %v4653_v43 = vmul.f32 %v15246_v6, %v15245_v34  ;;  %v15247_v10 = vld [vmem:[#allocation29_spill] sm:$0xff] }
 0x781   :  { %v4940_v53 = vadd.f32 %v4908_v45, %v4812_v61  ;;  %v5164_v38 = vmul.f32 %v13275_v31, %v15226_v4  ;;  %v13368_v1 = vrot.slane %v15247_v10, %v15130_v39  ;;  %v15248_v45 = vld [vmem:[#allocation175_spill] sm:$0xff]  ;;  %v13374_v57 = vrot.slane %v15247_v10, %v15067_v62 }
 0x782   :  { %v6218_v26 = vadd.f32 %v6186_v0, %v6090_v15  ;;  %v5835_v40 = vadd.f32 %v5803_v16, %v5707_v14  ;;  %v4685_v61 = vadd.f32 %v4653_v43, %v4525_v48  ;;  %v4781_v22 = vmul.f32 %v15248_v45, %v15228_v28  ;;  %v15249_v0 = vld [vmem:[#allocation183_spill] sm:$0xff] }
 0x783   :  { %v5068_v47 = vadd.f32 %v5036_v5, %v4940_v53  ;;  %v6059_v16 = vmul.f32 %v6024_v12, %v15249_v0  ;;  %v5292_v31 = vmul.f32 %v13284_v51, %v15166_v7  ;;  %v4909_v5 = vmul.f32 %v13368_v1, %v15093_v60 }
 0x784   :  { %v6346_v9 = vadd.f32 %v6314_v52, %v6218_v26  ;;  %v5963_v34 = vadd.f32 %v5931_v41, %v5835_v40  ;;  %v4813_v14 = vadd.f32 %v4781_v22, %v4685_v61  ;;  %v13383_v43 = vrot.slane %v15247_v10, %v15072_v27 }
 0x785   :  { %v5196_v15 = vadd.f32 %v5164_v38, %v5068_v47  ;;  %v6187_v28 = vmul.f32 %v6152_v63, %v15208_v17  ;;  %v5420_v52 = vmul.f32 %v13294_v55, %v15119_v42  ;;  %v5037_v51 = vmul.f32 %v13374_v57, %v15052_v35 }
 0x786   :  { %v6474_v48 = vadd.f32 %v6442_v8, %v6346_v9  ;;  %v6091_v53 = vadd.f32 %v6059_v16, %v5963_v34  ;;  %v4941_v26 = vadd.f32 %v4909_v5, %v4813_v14  ;;  %v13392_v40 = vrot.slane %v15247_v10, %v14727_v2 }
 0x787   :  { %v5324_v41 = vadd.f32 %v5292_v31, %v5196_v15  ;;  %v6315_v9 = vmul.f32 %v13348_v19, %v15086_v56  ;;  %v5548_v8 = vmul.f32 %v13307_v20, %v15120_v46  ;;  %v5165_v55 = vmul.f32 %v13383_v43, %v15055_v11  ;;  %v15250_v15 = vld [vmem:[#allocation73_spill] sm:$0xff] }
 0x788   :  { %v6506_v38 = vmul.f32 0.03125, %v6474_v48  ;;  %v6219_v47 = vadd.f32 %v6187_v28, %v6091_v53  ;;  %v5069_v61 = vadd.f32 %v5037_v51, %v4941_v26  ;;  %v13402_v22 = vrot.slane %v15247_v10, %v14725_v13  ;;  %v15251_v10 = vld [vmem:[#allocation159_spill] sm:$0xff] }
 0x789   :  { %v5452_v34 = vadd.f32 %v5420_v52, %v5324_v41  ;;  %v6443_v28 = vmul.f32 %v13356_v21, %v15146_v50  ;;  %v5676_v31 = vmul.f32 %v13314_v37, %v15122_v49  ;;  %v5804_v20 = vmul.f32 %v13320_v29, %v15096_v25 }
 0x78a   :  { %6741 = vmatprep.mubr.f32.mxu0 %v6506_v38  ;;  %v6347_v16 = vadd.f32 %v6315_v9, %v6219_v47  ;;  %v5197_v5 = vadd.f32 %v5165_v55, %v5069_v61  ;;  %v5293_v48 = vmul.f32 %v13392_v40, %v15057_v23  ;;  %v13415_v53 = vrot.slane %v15251_v10, %v14728_v24 }
 0x78b   :  { %6742 = vmatmul.mubr.f32.gmra.mrb[210].mxu0 %v15250_v15  ;;  %v5580_v14 = vadd.f32 %v5548_v8, %v5452_v34  ;;  %v5932_v41 = vmul.f32 %v13331_v54, %v15097_v3  ;;  %v6060_v37 = vmul.f32 %v6024_v12, %v15192_v32  ;;  %v6188_v26 = vmul.f32 %v6152_v63, %v15054_v59  ;;  %v15252_v34 = vld [vmem:[#allocation61_spill] sm:$0xff]  ;;  %v15253_v12 = vld [vmem:[#allocation95_spill] sm:$0xff]  ;;  %v15255_v15 = vld [vmem:[#allocation36_spill] sm:$0xff] }
 0x78c   :  { %v6475_v52 = vadd.f32 %v6443_v28, %v6347_v16  ;;  %v5325_v51 = vadd.f32 %v5293_v48, %v5197_v5  ;;  %v5421_v38 = vmul.f32 %v13402_v22, %v15169_v58  ;;  %v13425_v47 = vrot.slane %v15251_v10, %v15191_v33  ;;  %v15254_v16 = vld [vmem:[#allocation134_spill] sm:$0xff]  ;;  %v15256_v48 = vld [vmem:[#allocation97_spill] sm:$0xff]  ;;  %v15259_v59 = vld [vmem:[#allocation132_spill] sm:$0xff] }
 0x78d   :  { %v5708_v29 = vadd.f32 %v5676_v31, %v5580_v14  ;;  %v13429_v8 = vrot.slane %v15251_v10, %v15151_v18  ;;  %v4526_v54 = vmul.f32 %v15244_v30, %v15252_v34  ;;  %v4654_v63 = vmul.f32 %v15246_v6, %v15253_v12  ;;  %v15260_v32 = vld [vmem:[#allocation152_spill] sm:$0xff] }
 0x78e   :  { %v6507_v9 = vmul.f32 0.03125, %v6475_v52  ;;  %v5453_v55 = vadd.f32 %v5421_v38, %v5325_v51  ;;  %v5549_v28 = vmul.f32 %v13415_v53, %v15254_v16  ;;  %v13439_v31 = vrot.slane %v15251_v10, %v15130_v39 }
 0x78f   :  { %v5836_v61 = vadd.f32 %v5804_v20, %v5708_v29  ;;  %v6316_v14 = vmul.f32 %v13348_v19, %v15255_v15  ;;  %v13445_v5 = vrot.slane %v15251_v10, %v15067_v62  ;;  %v4686_v30 = vadd.f32 %v4654_v63, %v4526_v54  ;;  %v15257_v20 = vld [vmem:[#allocation74_spill] sm:$0xff]  ;;  %v15258_v29 = vld [vmem:[#allocation208_spill] sm:$0xff] }
 0x790   :  { %6746 = vmatprep.mubr.f32.mxu0 %v6507_v9  ;;  %v4782_v6 = vmul.f32 %v15248_v45, %v15256_v48  ;;  %v6444_v51 = vmul.f32 %v13356_v21, %v15258_v29  ;;  %v5581_v38 = vadd.f32 %v5549_v28, %v5453_v55  ;;  %v5677_v9 = vmul.f32 %v13425_v47, %v15259_v59 }
 0x791   :  { %6747 = vmatmul.mubr.f32.gmra.mrb[212].mxu0 %v15257_v20  ;;  %v5964_v52 = vadd.f32 %v5932_v41, %v5836_v61  ;;  %v5805_v19 = vmul.f32 %v13429_v8, %v15260_v32  ;;  %v13458_v15 = vrot.slane %v15251_v10, %v15072_v27  ;;  %v4910_v45 = vmul.f32 %v13368_v1, %v15240_v44  ;;  %v15261_v20 = vld [vmem:[#allocation101_spill] sm:$0xff] }
 0x792   :  { %v4814_v54 = vadd.f32 %v4782_v6, %v4686_v30  ;;  %v5709_v41 = vadd.f32 %v5677_v9, %v5581_v38  ;;  %v5933_v21 = vmul.f32 %v13439_v31, %v15241_v36  ;;  %v13466_v61 = vrot.slane %v15251_v10, %v14727_v2  ;;  %v15262_v30 = vld [vmem:[#allocation85_spill] sm:$0xff]  ;;  %v15263_v6 = vld [vmem:[#allocation184_spill] sm:$0xff]  ;;  %v15264_v38 = vld [vmem:[#allocation86_spill] sm:$0xff] }
 0x793   :  { %v6092_v63 = vadd.f32 %v6060_v37, %v5964_v52  ;;  %v6061_v55 = vmul.f32 %v13445_v5, %v15249_v0  ;;  %v5038_v29 = vmul.f32 %v13374_v57, %v15261_v20  ;;  %v4527_v32 = vmul.f32 %v15263_v6, %v15262_v30  ;;  %v15265_v9 = vld [vmem:[#allocation185_spill] sm:$0xff]  ;;  %v15268_v57 = vld [vmem:[#allocation214_spill] sm:$0xff] }
 0x794   :  { %v4942_v28 = vadd.f32 %v4910_v45, %v4814_v54  ;;  %v5837_v37 = vadd.f32 %v5805_v19, %v5709_v41  ;;  %v13476_v52 = vrot.slane %v15251_v10, %v14725_v13  ;;  %v4655_v36 = vmul.f32 %v15265_v9, %v15264_v38  ;;  %v15266_v54 = vld [vmem:[#allocation98_spill] sm:$0xff]  ;;  %v15267_v45 = vld [vmem:[#allocation213_spill] sm:$0xff] }
 0x795   :  { %v6220_v1 = vadd.f32 %v6188_v26, %v6092_v63  ;;  %v5166_v0 = vmul.f32 %v13383_v43, %v15226_v4  ;;  %v4783_v59 = vmul.f32 %v15267_v45, %v15266_v54  ;;  %v13486_v20 = vrot.slane %v15268_v57, %v15130_v39 }
 0x796   :  { %v5070_v44 = vadd.f32 %v5038_v29, %v4942_v28  ;;  %v5965_v19 = vadd.f32 %v5933_v21, %v5837_v37  ;;  %v4687_v63 = vadd.f32 %v4655_v36, %v4527_v32  ;;  %v13490_v10 = vrot.slane %v15268_v57, %v15067_v62 }
 0x797   :  { %v6348_v26 = vadd.f32 %v6316_v14, %v6220_v1  ;;  %v6189_v29 = vmul.f32 %v13458_v15, %v15208_v17  ;;  %v5294_v43 = vmul.f32 %v13392_v40, %v15166_v7  ;;  %v13498_v28 = vrot.slane %v15268_v57, %v15072_v27 }
 0x798   :  { %v5198_v41 = vadd.f32 %v5166_v0, %v5070_v44  ;;  %v6093_v38 = vadd.f32 %v6061_v55, %v5965_v19  ;;  %v4815_v14 = vadd.f32 %v4783_v59, %v4687_v63  ;;  %v4911_v32 = vmul.f32 %v13486_v20, %v15093_v60  ;;  %v15269_v63 = vld [vmem:[#allocation83_spill] sm:$0xff] }
 0x799   :  { %v6476_v30 = vadd.f32 %v6444_v51, %v6348_v26  ;;  %v6317_v36 = vmul.f32 %v13466_v61, %v15086_v56  ;;  %v5422_v44 = vmul.f32 %v13402_v22, %v15119_v42  ;;  %v13508_v0 = vrot.slane %v15268_v57, %v14727_v2 }
 0x79a   :  { %v5326_v21 = vadd.f32 %v5294_v43, %v5198_v41  ;;  %v6221_v1 = vadd.f32 %v6189_v29, %v6093_v38  ;;  %v4943_v37 = vadd.f32 %v4911_v32, %v4815_v14  ;;  %v5039_v59 = vmul.f32 %v13490_v10, %v15052_v35 }
 0x79b   :  { %v6508_v40 = vmul.f32 0.03125, %v6476_v30  ;;  %v6445_v60 = vmul.f32 %v13476_v52, %v15146_v50  ;;  %v5550_v55 = vmul.f32 %v13415_v53, %v15120_v46  ;;  %v5167_v26 = vmul.f32 %v13498_v28, %v15055_v11  ;;  %v15270_v30 = vld [vmem:[#allocation164_spill] sm:$0xff] }
 0x79c   :  { %v5454_v51 = vadd.f32 %v5422_v44, %v5326_v21  ;;  %v6349_v54 = vadd.f32 %v6317_v36, %v6221_v1  ;;  %v5071_v22 = vadd.f32 %v5039_v59, %v4943_v37  ;;  %v13520_v19 = vrot.slane %v15268_v57, %v14725_v13 }
 0x79d   :  { %6751 = vmatprep.mubr.f32.mxu0 %v6508_v40  ;;  %v5678_v29 = vmul.f32 %v13425_v47, %v15122_v49  ;;  %v5295_v53 = vmul.f32 %v13508_v0, %v15057_v23  ;;  %v13529_v38 = vrot.slane %v15270_v30, %v14728_v24  ;;  %v5806_v57 = vmul.f32 %v13429_v8, %v15096_v25 }
 0x79e   :  { %6752 = vmatmul.mubr.f32.gmra.mrb[214].mxu0 %v15269_v63  ;;  %v5582_v35 = vadd.f32 %v5550_v55, %v5454_v51  ;;  %v6477_v41 = vadd.f32 %v6445_v60, %v6349_v54  ;;  %v5199_v43 = vadd.f32 %v5167_v26, %v5071_v22  ;;  %v13535_v14 = vrot.slane %v15270_v30, %v15191_v33  ;;  %v15273_v60 = vld [vmem:[#allocation47_spill] sm:$0xff]  ;;  %v15274_v55 = vld [vmem:[#allocation132_spill] sm:$0xff]  ;;  %v6779_v22 = vld [vmem:[#allocation18 + $0x10] sm:$0xff] }
 0x79f   :  { %v5423_v47 = vmul.f32 %v13520_v19, %v15169_v58  ;;  %v4528_v23 = vmul.f32 %v15263_v6, %v15252_v34  ;;  %v5934_v44 = vmul.f32 %v13439_v31, %v15097_v3  ;;  %v4656_v40 = vmul.f32 %v15265_v9, %v15253_v12  ;;  %v15271_v58 = vld [vmem:[#allocation92_spill] sm:$0xff]  ;;  %v15272_v34 = vld [vmem:[#allocation182_spill] sm:$0xff] }
 0x7a0   :  { %v5710_v11 = vadd.f32 %v5678_v29, %v5582_v35  ;;  %v6509_v32 = vmul.f32 0.03125, %v6477_v41  ;;  %v5327_v36 = vadd.f32 %v5295_v53, %v5199_v43  ;;  %v5551_v33 = vmul.f32 %v13529_v38, %v15254_v16  ;;  %v6777_v12 = vld [vmem:[#allocation18] sm:$0xff]  ;;  %v6778_v9 = vld [vmem:[#allocation18 + $0x8] sm:$0xff]  ;;  %v6780_v26 = vld [vmem:[#allocation18 + $0x18] sm:$0xff] }
 0x7a1   :  { %v13549_v1 = vrot.slane %v15270_v30, %v15151_v18  ;;  %v6062_v6 = vmul.f32 %v13445_v5, %v15272_v34  ;;  %v4688_v59 = vadd.f32 %v4656_v40, %v4528_v23  ;;  %v4784_v31 = vmul.f32 %v15267_v45, %v15256_v48  ;;  %v15275_v63 = vld [vmem:[#allocation36_spill] sm:$0xff]  ;;  %v15276_v45 = vld [vmem:[#allocation89_spill] sm:$0xff] }
 0x7a2   :  { %v5838_v21 = vadd.f32 %v5806_v57, %v5710_v11  ;;  %6756 = vmatprep.mubr.f32.mxu0 %v6509_v32  ;;  %v5455_v8 = vadd.f32 %v5423_v47, %v5327_v36  ;;  %v6190_v51 = vmul.f32 %v13458_v15, %v15273_v60  ;;  %v5679_v18 = vmul.f32 %v13535_v14, %v15274_v55  ;;  %v15277_v15 = vld [vmem:[#allocation152_spill] sm:$0xff]  ;;  %v15278_v32 = vld [vmem:[#allocation101_spill] sm:$0xff] }
 0x7a3   :  { %6757 = vmatmul.mubr.f32.gmra.mrb[216].mxu0 %v15271_v58  ;;  %v13562_v54 = vrot.slane %v15270_v30, %v15130_v39  ;;  %v6318_v35 = vmul.f32 %v13466_v61, %v15275_v63  ;;  %v4816_v48 = vadd.f32 %v4784_v31, %v4688_v59  ;;  %v4912_v29 = vmul.f32 %v13486_v20, %v15276_v45  ;;  %v6781_v61 = vld [vmem:[#allocation18 + $0x20] sm:$0xff]  ;;  %v6782_v23 = vld [vmem:[#allocation18 + $0x28] sm:$0xff] }
 0x7a4   :  { %v5966_v37 = vadd.f32 %v5934_v44, %v5838_v21  ;;  %v5583_v16 = vadd.f32 %v5551_v33, %v5455_v8  ;;  %v5807_v43 = vmul.f32 %v13549_v1, %v15277_v15  ;;  %v13572_v53 = vrot.slane %v15270_v30, %v15067_v62  ;;  %v15279_v44 = vld [vmem:[#allocation165_spill] sm:$0xff]  ;;  %v15280_v62 = vld [vmem:[#allocation208_spill] sm:$0xff] }
 0x7a5   :  { %v8183_v39 = vpack.c.bf16 %v6778_v9, %v6777_v12  ;;  %v4944_v57 = vadd.f32 %v4912_v29, %v4816_v48  ;;  %v5040_v36 = vmul.f32 %v13490_v10, %v15278_v32  ;;  %v8187_v47 = vpack.c.bf16 %v6780_v26, %v6779_v22  ;;  %v6786_v48 = vld [vmem:[#allocation18 + $0x48] sm:$0xff]  ;;  %v6789_v32 = vld [vmem:[#allocation18 + $0x60] sm:$0xff] }
 0x7a6   :  { %v6094_v5 = vadd.f32 %v6062_v6, %v5966_v37  ;;  %v5711_v41 = vadd.f32 %v5679_v18, %v5583_v16  ;;  %v5935_v20 = vmul.f32 %v13562_v54, %v15279_v44  ;;  %v6160_v40 = vrot.slane %v15270_v30, %v15072_v27  ;;  %v15281_v6 = vld [vmem:[#allocation183_spill] sm:$0xff]  ;;  %v15282_v45 = vld [vmem:[#allocation93_spill] sm:$0xff] }
 0x7a7   :  { %8184 = vmatprep.subr.bf16.mxu1 %v8183_v39  ;;  %v6446_v33 = vmul.f32 %v13476_v52, %v15280_v62  ;;  %v5072_v58 = vadd.f32 %v5040_v36, %v4944_v57  ;;  %v5168_v37 = vmul.f32 %v13498_v28, %v15226_v4  ;;  %v6063_v59 = vmul.f32 %v13572_v53, %v15281_v6  ;;  %v6783_v52 = vld [vmem:[#allocation18 + $0x30] sm:$0xff]  ;;  %v6784_v16 = vld [vmem:[#allocation18 + $0x38] sm:$0xff]  ;;  %v6790_v36 = vld [vmem:[#allocation18 + $0x68] sm:$0xff] }
 0x7a8   :  { %v6222_v11 = vadd.f32 %v6190_v51, %v6094_v5  ;;  %v5839_v21 = vadd.f32 %v5807_v43, %v5711_v41  ;;  %8186 = vmatpush3.bf16.msra.mxu1 %v8183_v39  ;;  %v6288_v31 = vrot.slane %v15270_v30, %v14727_v2  ;;  %v8191_v12 = vpack.c.bf16 %v6782_v23, %v6781_v61  ;;  %v6792_v23 = vld [vmem:[#allocation18 + $0x78] sm:$0xff] }
 0x7a9   :  { %8188 = vmatprep.subr.bf16.mxu1 %v8187_v47  ;;  %v5200_v9 = vadd.f32 %v5168_v37, %v5072_v58  ;;  %v5296_v51 = vmul.f32 %v13508_v0, %v15166_v7  ;;  %v6191_v4 = vmul.f32 %v6160_v40, %v15208_v17  ;;  %v6416_v28 = vrot.slane %v15270_v30, %v14725_v13  ;;  %v6785_v17 = vld [vmem:[#allocation18 + $0x40] sm:$0xff] }
 0x7aa   :  { %v6350_v8 = vadd.f32 %v6318_v35, %v6222_v11  ;;  %v5967_v10 = vadd.f32 %v5935_v20, %v5839_v21  ;;  %v5424_v2 = vmul.f32 %v13520_v19, %v15119_v42  ;;  %v6319_v5 = vmul.f32 %v6288_v31, %v15086_v56 }
 0x7ab   :  { %v5328_v22 = vadd.f32 %v5296_v51, %v5200_v9  ;;  %v8195_v35 = vpack.c.bf16 %v6784_v16, %v6783_v52  ;;  %v5552_v0 = vmul.f32 %v13529_v38, %v15120_v46  ;;  %v6447_v30 = vmul.f32 %v6416_v28, %v15146_v50  ;;  %v6787_v46 = vld [vmem:[#allocation18 + $0x50] sm:$0xff]  ;;  %v6788_v38 = vld [vmem:[#allocation18 + $0x58] sm:$0xff] }
 0x7ac   :  { %v6478_v27 = vadd.f32 %v6446_v33, %v6350_v8  ;;  %v6095_v55 = vadd.f32 %v6063_v59, %v5967_v10  ;;  %8190 = vmatpush3.bf16.msra.mxu1 %v8187_v47  ;;  %v5680_v42 = vmul.f32 %v13535_v14, %v15122_v49  ;;  %v8199_v19 = vpack.c.bf16 %v6786_v48, %v6785_v17  ;;  %v15283_v49 = vld [vmem:[#allocation84_spill] sm:$0xff] }
 0x7ad   :  { %8192 = vmatprep.subr.bf16.mxu1 %v8191_v12  ;;  %v5456_v7 = vadd.f32 %v5424_v2, %v5328_v22  ;;  %v5808_v15 = vmul.f32 %v13549_v1, %v15096_v25  ;;  %v5936_v11 = vmul.f32 %v13562_v54, %v15097_v3  ;;  %v8203_v50 = vpack.c.bf16 %v6788_v38, %v6787_v46  ;;  %v6791_v54 = vld [vmem:[#allocation18 + $0x70] sm:$0xff] }
 0x7ae   :  { %v6510_v18 = vmul.f32 0.03125, %v6478_v27  ;;  %v6223_v26 = vadd.f32 %v6191_v4, %v6095_v55  ;;  %v6064_v57 = vmul.f32 %v13572_v53, %v15272_v34  ;;  %v6192_v1 = vmul.f32 %v6160_v40, %v15273_v60  ;;  %v13615_v34 = vld [vmem:[%s13749_s16] ss:$0 sm:$0xff] }
 0x7af   :  { %v5584_v29 = vadd.f32 %v5552_v0, %v5456_v7  ;;  %v8207_v47 = vpack.c.bf16 %v6790_v36, %v6789_v32  ;;  %v6320_v3 = vmul.f32 %v6288_v31, %v15275_v63  ;;  %v6448_v44 = vmul.f32 %v6416_v28, %v15280_v62  ;;  %v15284_v62 = vld [vmem:[#allocation55_spill] sm:$0xff] }
 0x7b0   :  { %6761 = vmatprep.mubr.f32.mxu0 %v6510_v18  ;;  %v6351_v13 = vadd.f32 %v6319_v5, %v6223_v26  ;;  %8194 = vmatpush3.bf16.msra.mxu1 %v8191_v12  ;;  %v8211_v53 = vpack.c.bf16 %v6792_v23, %v6791_v54 }
 0x7b1   :  { %6762 = vmatmul.mubr.f32.gmra.mrb[218].mxu0 %v15282_v45  ;;  %8196 = vmatprep.subr.bf16.mxu1 %v8195_v35  ;;  %v5712_v41 = vadd.f32 %v5680_v42, %v5584_v29 }
 0x7b2   :  { %v6479_v56 = vadd.f32 %v6447_v30, %v6351_v13 }
 0x7b3   :  { %v5840_v39 = vadd.f32 %v5808_v15, %v5712_v41 }
 0x7b4   :  { %v6511_v43 = vmul.f32 0.03125, %v6479_v56  ;;  %8198 = vmatpush3.bf16.msra.mxu1 %v8195_v35 }
 0x7b5   :  { %8200 = vmatprep.subr.bf16.mxu1 %v8199_v19  ;;  %v5968_v14 = vadd.f32 %v5936_v11, %v5840_v39 }
 0x7b6   :  { %6766 = vmatprep.mubr.f32.mxu0 %v6511_v43 }
 0x7b7   :  { %6767 = vmatmul.mubr.f32.gmra.mrb[220].mxu0 %v15283_v49  ;;  %v6096_v25 = vadd.f32 %v6064_v57, %v5968_v14 }
 0x7b8   :  { %8202 = vmatpush3.bf16.msra.mxu1 %v8199_v19 }
 0x7b9   :  { %8204 = vmatprep.subr.bf16.mxu1 %v8203_v50  ;;  %v6224_v61 = vadd.f32 %v6192_v1, %v6096_v25 }
 0x7bb   :  { %v6352_v21 = vadd.f32 %v6320_v3, %v6224_v61 }
 0x7bc   :  { %8206 = vmatpush3.bf16.msra.mxu1 %v8203_v50 }
 0x7bd   :  { %8208 = vmatprep.subr.bf16.mxu1 %v8207_v47  ;;  %v6480_v60 = vadd.f32 %v6448_v44, %v6352_v21 }
 0x7bf   :  { %v6618_v20 = vpop.f32.mrb[160].mxu0  ;;  %v6512_v33 = vmul.f32 0.03125, %v6480_v60 }
 0x7c0   :  { %v6619_v40 = vadd.f32 %v13615_v34, %v6618_v20  ;;  %v6620_v8 = vpop.f32.mrb[161].mxu0  ;;  %8210 = vmatpush3.bf16.msra.mxu1 %v8207_v47 }
 0x7c1   :  { %8212 = vmatprep.subr.bf16.mxu1 %v8211_v53  ;;  %6771 = vmatprep.mubr.f32.mxu0 %v6512_v33 }
 0x7c2   :  { %7847 = vmatprep.mubr.f32.mxu1 %v6619_v40  ;;  %6772 = vmatmul.mubr.f32.gmra.mrb[222].mxu0 %v15284_v62 }
 0x7c3   :  { %v6623_v63 = vpop.f32.mrb[162].mxu0 }
 0x7c4   :  { %v6624_v58 = vadd.f32 %v13615_v34, %v6623_v63  ;;  %v6625_v37 = vpop.f32.mrb[163].mxu0  ;;  %8214 = vmatpush3.bf16.msra.mxu1 %v8211_v53 }
 0x7c7   :  { %v6628_v10 = vpop.f32.mrb[164].mxu0  ;;  %7848 = vmatmul.mubr.f32.vlgmr.msra.gmra.mrb[160].mxu1 %v6624_v58 }
 0x7c8   :  { %v6629_v6 = vadd.f32 %v13615_v34, %v6628_v10  ;;  %v6630_v59 = vpop.f32.mrb[165].mxu0 }
 0x7ca   :  { %7850 = vmatprep.mubr.f32.mxu1 %v6629_v6 }
 0x7cb   :  { %v6633_v31 = vpop.f32.mrb[166].mxu0 }
 0x7cc   :  { %v6634_v12 = vadd.f32 %v13615_v34, %v6633_v31  ;;  %v6635_v27 = vpop.f32.mrb[167].mxu0 }
 0x7ce   :  { %7851 = vmatmul.mubr.f32.gmra.mrb[162].mxu1 %v6634_v12 }
 0x7cf   :  { %v6638_v9 = vpop.f32.mrb[168].mxu0 }
 0x7d0   :  { %v6639_v51 = vadd.f32 %v13615_v34, %v6638_v9  ;;  %v6640_v52 = vpop.f32.mrb[169].mxu0 }
 0x7d2   :  { %7853 = vmatprep.mubr.f32.mxu1 %v6639_v51 }
 0x7d3   :  { %v6643_v16 = vpop.f32.mrb[170].mxu0 }
 0x7d4   :  { %v6644_v55 = vadd.f32 %v13615_v34, %v6643_v16  ;;  %v6645_v4 = vpop.f32.mrb[171].mxu0 }
 0x7d6   :  { %7854 = vmatmul.mubr.f32.gmra.mrb[164].mxu1 %v6644_v55 }
 0x7d7   :  { %v6648_v28 = vpop.f32.mrb[172].mxu0 }
 0x7d8   :  { %v6649_v18 = vadd.f32 %v13615_v34, %v6648_v28  ;;  %v6650_v22 = vpop.f32.mrb[173].mxu0 }
 0x7da   :  { %7856 = vmatprep.mubr.f32.mxu1 %v6649_v18 }
 0x7db   :  { %v6653_v2 = vpop.f32.mrb[174].mxu0 }
 0x7dc   :  { %v6654_v26 = vadd.f32 %v13615_v34, %v6653_v2  ;;  %v6655_v5 = vpop.f32.mrb[175].mxu0 }
 0x7de   :  { %7857 = vmatmul.mubr.f32.gmra.mrb[166].mxu1 %v6654_v26 }
 0x7df   :  { %v6658_v35 = vpop.f32.mrb[176].mxu0 }
 0x7e0   :  { %v6659_v7 = vadd.f32 %v13615_v34, %v6658_v35  ;;  %v6660_v0 = vpop.f32.mrb[177].mxu0 }
 0x7e2   :  { %7859 = vmatprep.mubr.f32.mxu1 %v6659_v7 }
 0x7e3   :  { %v6663_v17 = vpop.f32.mrb[178].mxu0 }
 0x7e4   :  { %v6664_v48 = vadd.f32 %v13615_v34, %v6663_v17  ;;  %v6665_v45 = vpop.f32.mrb[179].mxu0 }
 0x7e6   :  { %7860 = vmatmul.mubr.f32.gmra.mrb[168].mxu1 %v6664_v48 }
 0x7e7   :  { %v6668_v13 = vpop.f32.mrb[180].mxu0 }
 0x7e8   :  { %v6669_v30 = vadd.f32 %v13615_v34, %v6668_v13  ;;  %v6670_v29 = vpop.f32.mrb[181].mxu0 }
 0x7ea   :  { %7862 = vmatprep.mubr.f32.mxu1 %v6669_v30 }
 0x7eb   :  { %v6673_v42 = vpop.f32.mrb[182].mxu0 }
 0x7ec   :  { %v6674_v56 = vadd.f32 %v13615_v34, %v6673_v42  ;;  %v6675_v19 = vpop.f32.mrb[183].mxu0 }
 0x7ee   :  { %7863 = vmatmul.mubr.f32.gmra.mrb[170].mxu1 %v6674_v56  ;;  %v13653_v56 = vld [vmem:[%s13751_s18] ss:$0 sm:$0xff] }
 0x7ef   :  { %v6678_v41 = vpop.f32.mrb[184].mxu0 }
 0x7f0   :  { %v6679_v15 = vadd.f32 %v13615_v34, %v6678_v41  ;;  %v6680_v46 = vpop.f32.mrb[185].mxu0 }
 0x7f2   :  { %7865 = vmatprep.mubr.f32.mxu1 %v6679_v15 }
 0x7f3   :  { %v6683_v38 = vpop.f32.mrb[186].mxu0 }
 0x7f4   :  { %v6684_v43 = vadd.f32 %v13615_v34, %v6683_v38  ;;  %v6685_v39 = vpop.f32.mrb[187].mxu0 }
 0x7f6   :  { %7866 = vmatmul.mubr.f32.gmra.mrb[172].mxu1 %v6684_v43 }
 0x7f7   :  { %v6688_v11 = vpop.f32.mrb[188].mxu0 }
 0x7f8   :  { %v6689_v50 = vadd.f32 %v13615_v34, %v6688_v11  ;;  %v6690_v49 = vpop.f32.mrb[189].mxu0 }
 0x7fa   :  { %7868 = vmatprep.mubr.f32.mxu1 %v6689_v50 }
 0x7fc   :  { %v6693_v14 = vpop.f32.mrb[190].mxu0 }
 0x7fd   :  { %v6694_v57 = vadd.f32 %v13615_v34, %v6693_v14  ;;  %v6695_v32 = vpop.f32.mrb[191].mxu0 }
 0x7ff   :  { %7869 = vmatmul.mubr.f32.gmra.mrb[174].mxu1 %v6694_v57 }
 0x803   :  { %v6698_v36 = vpop.f32.mrb[192].mxu0 }
 0x804   :  { %v6699_v25 = vadd.f32 %v13615_v34, %v6698_v36  ;;  %v6700_v1 = vpop.f32.mrb[193].mxu0 }
 0x806   :  { %7871 = vmatprep.mubr.f32.mxu1 %v6699_v25 }
 0x810   :  { %v6703_v47 = vpop.f32.mrb[194].mxu0 }
 0x811   :  { %v6704_v61 = vadd.f32 %v13615_v34, %v6703_v47  ;;  %v6705_v3 = vpop.f32.mrb[195].mxu0 }
 0x813   :  { %7872 = vmatmul.mubr.f32.gmra.mrb[176].mxu1 %v6704_v61 }
 0x816   :  { %v6708_v54 = vpop.f32.mrb[196].mxu0 }
 0x817   :  { %v6709_v23 = vadd.f32 %v13615_v34, %v6708_v54  ;;  %v6710_v21 = vpop.f32.mrb[197].mxu0 }
 0x819   :  { %7874 = vmatprep.mubr.f32.mxu1 %v6709_v23 }
 0x823   :  { %v6713_v44 = vpop.f32.mrb[198].mxu0 }
 0x824   :  { %v6714_v53 = vadd.f32 %v13615_v34, %v6713_v44  ;;  %v6715_v60 = vpop.f32.mrb[199].mxu0 }
 0x826   :  { %7875 = vmatmul.mubr.f32.gmra.mrb[178].mxu1 %v6714_v53 }
 0x829   :  { %v6718_v20 = vpop.f32.mrb[200].mxu0 }
 0x82a   :  { %v6719_v40 = vadd.f32 %v13615_v34, %v6718_v20  ;;  %v6720_v8 = vpop.f32.mrb[201].mxu0 }
 0x82c   :  { %7877 = vmatprep.mubr.f32.mxu1 %v6719_v40 }
 0x836   :  { %v6723_v33 = vpop.f32.mrb[202].mxu0 }
 0x837   :  { %v6724_v63 = vadd.f32 %v13615_v34, %v6723_v33  ;;  %v6725_v62 = vpop.f32.mrb[203].mxu0 }
 0x839   :  { %7878 = vmatmul.mubr.f32.gmra.mrb[180].mxu1 %v6724_v63 }
 0x83d   :  { %v6728_v58 = vpop.f32.mrb[204].mxu0 }
 0x83e   :  { %v6729_v37 = vadd.f32 %v13615_v34, %v6728_v58  ;;  %v6730_v10 = vpop.f32.mrb[205].mxu0 }
 0x840   :  { %7880 = vmatprep.mubr.f32.mxu1 %v6729_v37 }
 0x84b   :  { %v6733_v6 = vpop.f32.mrb[206].mxu0 }
 0x84c   :  { %v6734_v59 = vadd.f32 %v13615_v34, %v6733_v6  ;;  %v6735_v31 = vpop.f32.mrb[207].mxu0 }
 0x84e   :  { %7881 = vmatmul.mubr.f32.gmra.mrb[182].mxu1 %v6734_v59 }
 0x850   :  { %v6738_v12 = vpop.f32.mrb[208].mxu0 }
 0x851   :  { %v6739_v27 = vadd.f32 %v13615_v34, %v6738_v12  ;;  %v6740_v9 = vpop.f32.mrb[209].mxu0 }
 0x853   :  { %7883 = vmatprep.mubr.f32.mxu1 %v6739_v27 }
 0x85e   :  { %v6743_v51 = vpop.f32.mrb[210].mxu0 }
 0x85f   :  { %v6744_v52 = vadd.f32 %v13615_v34, %v6743_v51  ;;  %v6745_v16 = vpop.f32.mrb[211].mxu0 }
 0x861   :  { %7884 = vmatmul.mubr.f32.gmra.mrb[184].mxu1 %v6744_v52 }
 0x864   :  { %v6748_v55 = vpop.f32.mrb[212].mxu0 }
 0x865   :  { %v6749_v4 = vadd.f32 %v13615_v34, %v6748_v55  ;;  %v6750_v28 = vpop.f32.mrb[213].mxu0 }
 0x867   :  { %7886 = vmatprep.mubr.f32.mxu1 %v6749_v4 }
 0x871   :  { %v6753_v18 = vpop.f32.mrb[214].mxu0 }
 0x872   :  { %v6754_v22 = vadd.f32 %v13615_v34, %v6753_v18  ;;  %v6755_v2 = vpop.f32.mrb[215].mxu0 }
 0x874   :  { %7887 = vmatmul.mubr.f32.gmra.mrb[186].mxu1 %v6754_v22 }
 0x876   :  { %v6758_v26 = vpop.f32.mrb[216].mxu0 }
 0x877   :  { %v6759_v5 = vadd.f32 %v13615_v34, %v6758_v26  ;;  %v6760_v35 = vpop.f32.mrb[217].mxu0 }
 0x879   :  { %7889 = vmatprep.mubr.f32.mxu1 %v6759_v5 }
 0x884   :  { %v6763_v7 = vpop.f32.mrb[218].mxu0 }
 0x885   :  { %v6764_v0 = vadd.f32 %v13615_v34, %v6763_v7  ;;  %v6765_v17 = vpop.f32.mrb[219].mxu0 }
 0x887   :  { %7890 = vmatmul.mubr.f32.gmra.mrb[188].mxu1 %v6764_v0 }
 0x88a   :  { %v6768_v48 = vpop.f32.mrb[220].mxu0 }
 0x88b   :  { %v6769_v45 = vadd.f32 %v13615_v34, %v6768_v48  ;;  %v6770_v13 = vpop.f32.mrb[221].mxu0 }
 0x88d   :  { %7892 = vmatprep.mubr.f32.mxu1 %v6769_v45 }
 0x895   :  { %v6773_v30 = vpop.f32.mrb[222].mxu0 }
 0x896   :  { %v6774_v29 = vadd.f32 %v13615_v34, %v6773_v30  ;;  %v6775_v42 = vpop.f32.mrb[223].mxu0 }
 0x898   :  { %7893 = vmatmul.mubr.f32.gmra.mrb[190].mxu1 %v6774_v29 }
 0x89a   :  { %v7849_v19 = vpop.f32.mrb[160].mxu1 }
 0x89b   :  { %v6874_v41 = vadd.f32 %v7849_v19, %v13653_v56  ;;  %v6868_v15 = vpop.f32.mrb[161].mxu1 }
 0x89c   :  { %v6869_v46 = vadd.f32 %v13653_v56, %v6868_v15 }
 0x89d   :  { %v7028_v38 = vmul.f32 0.03125, %v6874_v41 }
 0x89e   :  { %v7027_v43 = vmul.f32 0.03125, %v6869_v46 }
 0x89f   :  { %v7060_v39 = vmax.f32 %v7028_v38, 0.0 }
 0x8a0   :  { %v7059_v11 = vmax.f32 %v7027_v43, 0.0 }
 0x8a1   :  { %v7852_v50 = vpop.f32.mrb[162].mxu1 }
 0x8a2   :  { %v6884_v34 = vadd.f32 %v7852_v50, %v13653_v56  ;;  %v6878_v49 = vpop.f32.mrb[163].mxu1  ;;  %v13658_v14 = vpack.c.bf16 %v7060_v39, %v7059_v11 }
 0x8a3   :  { %v6879_v57 = vadd.f32 %v13653_v56, %v6878_v49 }
 0x8a4   :  { %v7030_v32 = vmul.f32 0.03125, %v6884_v34 }
 0x8a5   :  { %v7029_v36 = vmul.f32 0.03125, %v6879_v57 }
 0x8a6   :  { %v7062_v25 = vmax.f32 %v7030_v32, 0.0 }
 0x8a7   :  { %v7061_v1 = vmax.f32 %v7029_v36, 0.0 }
 0x8a9   :  { %v13661_v47 = vpack.c.bf16 %v7062_v25, %v7061_v1  ;;  %v7855_v61 = vpop.f32.mrb[164].mxu1 }
 0x8aa   :  { %v6894_v3 = vadd.f32 %v7855_v61, %v13653_v56  ;;  %v6888_v54 = vpop.f32.mrb[165].mxu1 }
 0x8ab   :  { %v6889_v23 = vadd.f32 %v13653_v56, %v6888_v54 }
 0x8ac   :  { %v7032_v21 = vmul.f32 0.03125, %v6894_v3 }
 0x8ad   :  { %v7031_v44 = vmul.f32 0.03125, %v6889_v23  ;;  %v13693_v23 = vld [vmem:[%s15285_s9] sm:$0x1] }
 0x8ae   :  { %v7064_v53 = vmax.f32 %v7032_v21, 0.0  ;;  %7493 = vmatprep.mubr.f32.mxu1 %v13693_v23 }
 0x8af   :  { %v7063_v60 = vmax.f32 %v7031_v44, 0.0 }
 0x8b1   :  { %v13665_v20 = vpack.c.bf16 %v7064_v53, %v7063_v60  ;;  %v7858_v40 = vpop.f32.mrb[166].mxu1 }
 0x8b2   :  { %v6904_v8 = vadd.f32 %v7858_v40, %v13653_v56  ;;  %v6898_v33 = vpop.f32.mrb[167].mxu1 }
 0x8b3   :  { %v6899_v63 = vadd.f32 %v13653_v56, %v6898_v33 }
 0x8b4   :  { %v7034_v62 = vmul.f32 0.03125, %v6904_v8 }
 0x8b5   :  { %v7033_v58 = vmul.f32 0.03125, %v6899_v63 }
 0x8b6   :  { %v7066_v37 = vmax.f32 %v7034_v62, 0.0  ;;  %v6795_v62 = vld [vmem:[#allocation2] sm:$0x1] }
 0x8b7   :  { %v7065_v10 = vmax.f32 %v7033_v58, 0.0  ;;  %v8573_v58 = vmov 0  }
 0x8b8   :  { %8266 = vset.pattern.permute.xlu0 %v8573_v58 }
 0x8b9   :  { %v13669_v6 = vpack.c.bf16 %v7066_v37, %v7065_v10  ;;  %v7861_v59 = vpop.f32.mrb[168].mxu1  ;;  %7093 = vperm.xlu0 %8266, %v6795_v62  }
 0x8ba   :  { %v6914_v31 = vadd.f32 %v7861_v59, %v13653_v56  ;;  %v6908_v12 = vpop.f32.mrb[169].mxu1 }
 0x8bb   :  { %v6909_v27 = vadd.f32 %v13653_v56, %v6908_v12 }
 0x8bc   :  { %v7036_v9 = vmul.f32 0.03125, %v6914_v31 }
 0x8bd   :  { %v7035_v51 = vmul.f32 0.03125, %v6909_v27 }
 0x8be   :  { %v7068_v52 = vmax.f32 %v7036_v9, 0.0 }
 0x8bf   :  { %v7067_v16 = vmax.f32 %v7035_v51, 0.0 }
 0x8c1   :  { %v13673_v55 = vpack.c.bf16 %v7068_v52, %v7067_v16  ;;  %v7864_v4 = vpop.f32.mrb[170].mxu1 }
 0x8c2   :  { %v6924_v28 = vadd.f32 %v7864_v4, %v13653_v56  ;;  %v6918_v18 = vpop.f32.mrb[171].mxu1 }
 0x8c3   :  { %v6919_v22 = vadd.f32 %v13653_v56, %v6918_v18 }
 0x8c4   :  { %v7038_v2 = vmul.f32 0.03125, %v6924_v28 }
 0x8c5   :  { %v7037_v26 = vmul.f32 0.03125, %v6919_v22 }
 0x8c6   :  { %v7070_v5 = vmax.f32 %v7038_v2, 0.0 }
 0x8c7   :  { %v7069_v35 = vmax.f32 %v7037_v26, 0.0 }
 0x8c9   :  { %v13677_v7 = vpack.c.bf16 %v7070_v5, %v7069_v35  ;;  %v7867_v0 = vpop.f32.mrb[172].mxu1 }
 0x8ca   :  { %v6934_v17 = vadd.f32 %v7867_v0, %v13653_v56  ;;  %v6928_v48 = vpop.f32.mrb[173].mxu1 }
 0x8cb   :  { %v6929_v45 = vadd.f32 %v13653_v56, %v6928_v48 }
 0x8cc   :  { %v7040_v13 = vmul.f32 0.03125, %v6934_v17 }
 0x8cd   :  { %v7039_v30 = vmul.f32 0.03125, %v6929_v45 }
 0x8ce   :  { %v7072_v29 = vmax.f32 %v7040_v13, 0.0 }
 0x8cf   :  { %v7071_v42 = vmax.f32 %v7039_v30, 0.0 }
 0x8d1   :  { %v13681_v19 = vpack.c.bf16 %v7072_v29, %v7071_v42 }
 0x8d2   :  { %v7870_v41 = vpop.f32.mrb[174].mxu1 }
 0x8d3   :  { %v6944_v15 = vadd.f32 %v7870_v41, %v13653_v56  ;;  %v6938_v46 = vpop.f32.mrb[175].mxu1 }
 0x8d4   :  { %v6939_v38 = vadd.f32 %v13653_v56, %v6938_v46 }
 0x8d5   :  { %v7042_v43 = vmul.f32 0.03125, %v6944_v15 }
 0x8d6   :  { %v7041_v39 = vmul.f32 0.03125, %v6939_v38 }
 0x8d7   :  { %v7074_v11 = vmax.f32 %v7042_v43, 0.0 }
 0x8d8   :  { %v7073_v50 = vmax.f32 %v7041_v39, 0.0 }
 0x8da   :  { %v13685_v34 = vpack.c.bf16 %v7074_v11, %v7073_v50 }
 0x8e6   :  { %v7873_v49 = vpop.f32.mrb[176].mxu1 }
 0x8e7   :  { %v6954_v57 = vadd.f32 %v7873_v49, %v13653_v56  ;;  %v6948_v32 = vpop.f32.mrb[177].mxu1 }
 0x8e8   :  { %v6949_v36 = vadd.f32 %v13653_v56, %v6948_v32 }
 0x8e9   :  { %v7044_v25 = vmul.f32 0.03125, %v6954_v57 }
 0x8ea   :  { %v7043_v1 = vmul.f32 0.03125, %v6949_v36 }
 0x8eb   :  { %v7076_v61 = vmax.f32 %v7044_v25, 0.0 }
 0x8ec   :  { %v7075_v3 = vmax.f32 %v7043_v1, 0.0 }
 0x8ee   :  { %v8215_v54 = vpack.c.bf16 %v7076_v61, %v7075_v3 }
 0x8f0   :  { %8216 = vmatprep.subr.bf16.mxu1 %v8215_v54 }
 0x8f1   :  { %8218 = vmatpush3.bf16.xpose.msra.mxu1 %v13658_v14 }
 0x8f9   :  { %v7876_v21 = vpop.f32.mrb[178].mxu1 }
 0x8fa   :  { %v6964_v44 = vadd.f32 %v7876_v21, %v13653_v56  ;;  %v6958_v53 = vpop.f32.mrb[179].mxu1 }
 0x8fb   :  { %v6959_v60 = vadd.f32 %v13653_v56, %v6958_v53 }
 0x8fc   :  { %v7046_v40 = vmul.f32 0.03125, %v6964_v44 }
 0x8fd   :  { %v7045_v8 = vmul.f32 0.03125, %v6959_v60 }
 0x8fe   :  { %v7078_v33 = vmax.f32 %v7046_v40, 0.0 }
 0x8ff   :  { %v7077_v63 = vmax.f32 %v7045_v8, 0.0 }
 0x901   :  { %v8219_v14 = vpack.c.bf16 %v7078_v33, %v7077_v63  ;;  %v8574_v63 = vmov 1966171168  }
 0x902   :  { %v7175_v62 = vunpack.c.l.s4 %v8574_v63 }
 0x903   :  { %8220 = vmatprep.subr.bf16.mxu1 %v8219_v14 }
 0x904   :  { %8222 = vmatpush3.bf16.xpose.msra.mxu1 %v13661_v47  ;;  %v7176_v58 = vunpack.c.0.s8 %v7175_v62 }
 0x90c   :  { %v7879_v37 = vpop.f32.mrb[180].mxu1 }
 0x90d   :  { %v6974_v10 = vadd.f32 %v7879_v37, %v13653_v56  ;;  %v6968_v59 = vpop.f32.mrb[181].mxu1 }
 0x90e   :  { %v6969_v31 = vadd.f32 %v13653_v56, %v6968_v59  ;;  %v15286_v59 = vld [vmem:[#allocation28_spill] sm:$0xff] }
 0x90f   :  { %v7048_v12 = vmul.f32 0.03125, %v6974_v10 }
 0x910   :  { %v7047_v27 = vmul.f32 0.03125, %v6969_v31  ;;  %v7179_v31 = vsub.s32 %v7176_v58, %v15286_v59 }
 0x911   :  { %v7080_v9 = vmax.f32 %v7048_v12, 0.0 }
 0x912   :  { %v7079_v51 = vmax.f32 %v7047_v27, 0.0 }
 0x914   :  { %v8223_v52 = vpack.c.bf16 %v7080_v9, %v7079_v51  ;;  %v15287_v9 = vlaneseq }
 0x916   :  { %8224 = vmatprep.subr.bf16.mxu1 %v8223_v52  ;;  %vm7191_vm0 = vcmp.lt.s32.totalorder %v15287_v9, 256 }
 0x917   :  { %8226 = vmatpush3.bf16.xpose.msra.mxu1 %v13665_v20 }
 0x921   :  { %v7882_v16 = vpop.f32.mrb[182].mxu1 }
 0x922   :  { %v6984_v4 = vadd.f32 %v7882_v16, %v13653_v56  ;;  %v6978_v28 = vpop.f32.mrb[183].mxu1 }
 0x923   :  { %v6979_v47 = vadd.f32 %v13653_v56, %v6978_v28 }
 0x924   :  { %v7050_v18 = vmul.f32 0.03125, %v6984_v4 }
 0x925   :  { %v7049_v22 = vmul.f32 0.03125, %v6979_v47 }
 0x926   :  { %v7082_v2 = vmax.f32 %v7050_v18, 0.0 }
 0x927   :  { %v7081_v26 = vmax.f32 %v7049_v22, 0.0 }
 0x929   :  { %v8227_v5 = vpack.c.bf16 %v7082_v2, %v7081_v26 }
 0x92b   :  { %8228 = vmatprep.subr.bf16.mxu1 %v8227_v5 }
 0x92c   :  { %8230 = vmatpush3.bf16.xpose.msra.mxu1 %v13669_v6 }
 0x934   :  { %v7885_v35 = vpop.f32.mrb[184].mxu1 }
 0x935   :  { %v6994_v0 = vadd.f32 %v7885_v35, %v13653_v56  ;;  %v6988_v17 = vpop.f32.mrb[185].mxu1 }
 0x936   :  { %v6989_v20 = vadd.f32 %v13653_v56, %v6988_v17 }
 0x937   :  { %v7052_v48 = vmul.f32 0.03125, %v6994_v0 }
 0x938   :  { %v7051_v45 = vmul.f32 0.03125, %v6989_v20  ;;  %v7094_v33 = vpop.permute.xlu0 %7093 }
 0x939   :  { %v7084_v13 = vmax.f32 %v7052_v48, 0.0 }
 0x93a   :  { %v7083_v30 = vmax.f32 %v7051_v45, 0.0 }
 0x93c   :  { %v8231_v29 = vpack.c.bf16 %v7084_v13, %v7083_v30 }
 0x93e   :  { %8232 = vmatprep.subr.bf16.mxu1 %v8231_v29 }
 0x93f   :  { %8234 = vmatpush3.bf16.xpose.msra.mxu1 %v13673_v55 }
 0x947   :  { %v7888_v42 = vpop.f32.mrb[186].mxu1 }
 0x948   :  { %v7004_v41 = vadd.f32 %v7888_v42, %v13653_v56  ;;  %v6998_v15 = vpop.f32.mrb[187].mxu1 }
 0x949   :  { %v6999_v6 = vadd.f32 %v13653_v56, %v6998_v15 }
 0x94a   :  { %v7054_v46 = vmul.f32 0.03125, %v7004_v41 }
 0x94b   :  { %v7053_v38 = vmul.f32 0.03125, %v6999_v6 }
 0x94c   :  { %v7086_v43 = vmax.f32 %v7054_v46, 0.0 }
 0x94d   :  { %v7085_v39 = vmax.f32 %v7053_v38, 0.0 }
 0x94f   :  { %v8235_v11 = vpack.c.bf16 %v7086_v43, %v7085_v39 }
 0x951   :  { %8236 = vmatprep.subr.bf16.mxu1 %v8235_v11 }
 0x952   :  { %8238 = vmatpush3.bf16.xpose.msra.mxu1 %v13677_v7 }
 0x95a   :  { %v7891_v50 = vpop.f32.mrb[188].mxu1 }
 0x95b   :  { %v7014_v49 = vadd.f32 %v7891_v50, %v13653_v56  ;;  %v7008_v57 = vpop.f32.mrb[189].mxu1 }
 0x95c   :  { %v7009_v55 = vadd.f32 %v13653_v56, %v7008_v57 }
 0x95d   :  { %v7056_v32 = vmul.f32 0.03125, %v7014_v49 }
 0x95e   :  { %v7055_v36 = vmul.f32 0.03125, %v7009_v55 }
 0x95f   :  { %v7088_v25 = vmax.f32 %v7056_v32, 0.0 }
 0x960   :  { %v7087_v1 = vmax.f32 %v7055_v36, 0.0 }
 0x962   :  { %v8239_v61 = vpack.c.bf16 %v7088_v25, %v7087_v1 }
 0x964   :  { %8240 = vmatprep.subr.bf16.mxu1 %v8239_v61 }
 0x965   :  { %8242 = vmatpush3.bf16.xpose.msra.mxu1 %v13681_v19  ;;  %v7099_v19 = vrot.slane %v7094_v33, %v14728_v24 }
 0x96b   :  { %v7894_v3 = vpop.f32.mrb[190].mxu1 }
 0x96c   :  { %v7024_v54 = vadd.f32 %v7894_v3, %v13653_v56  ;;  %v7018_v21 = vpop.f32.mrb[191].mxu1 }
 0x96d   :  { %v7019_v7 = vadd.f32 %v13653_v56, %v7018_v21 }
 0x96e   :  { %v7058_v44 = vmul.f32 0.03125, %v7024_v54 }
 0x96f   :  { %v7057_v53 = vmul.f32 0.03125, %v7019_v7 }
 0x970   :  { %v7090_v60 = vmax.f32 %v7058_v44, 0.0 }
 0x971   :  { %v7089_v40 = vmax.f32 %v7057_v53, 0.0 }
 0x973   :  { %v8243_v8 = vpack.c.bf16 %v7090_v60, %v7089_v40 }
 0x975   :  { %8244 = vmatprep.subr.bf16.mxu1 %v8243_v8 }
 0x976   :  { %8246 = vmatpush3.bf16.xpose.msra.mxu1 %v13685_v34 }
 0x97d   :  { %7494 = vmatmul.mubr.f32.vlgmr.msra.gmra.mrb[192].mxu1 %v13693_v23 }
 0xa50   :  { %v7166_v14 = vpop.f32.mrb[192].mxu1 }
 0xa51   :  { %v7167_v37 = vadd.f32 %v7166_v14, %v7099_v19  ;;  %v7168_v10 = vpop.f32.mrb[193].mxu1 }
 0xa52   :  { %v7169_v56 = vadd.f32 %v7168_v10, %v7099_v19 }
 0xa54   :  { %v7173_v12 = vcombine.low %v7167_v37, %v7169_v56 }
 0xa56   :  { %v7180_v27 = vrot.slane %v7173_v12, %v7179_v31 }
 0xa58   :  { %v7187_v34 = vrot.slane %v7180_v27, %v7179_v31 }
 0xa5a   :  { %7193 = vst.msk [vmem:[#allocation20] sm:$0x3] %vm7191_vm0, %v7187_v34 }
 0xa5b   :  { %8532 = shalt.err (!%p8529_p0)
}
 0xa5c   :  { %s15288_s29 = sld [smem:[#allocation224_spill]] }
 0xa62   :  { %s8533_s24 = scalar_lea.hbm %s15288_s29, 32 }
 0xa63   :  { %p8534_p1 = scmp.ne.s32.totalorder %s15288_s29, %s8533_s24  ;;  %p8537_p2 = scmp.lt.u32.totalorder %s8533_s24, %s15288_s29 }
 0xa65   :  { %p8539_p3 = pnand %p8537_p2, %p8534_p1 }
 0xa67   :  { %8542 = shalt.err (!%p8539_p3)
}
 0xa68   :  { %7203 = dma.vmem_to_hbm [thread:$0]  %s7201_s23, 32, %s15288_s29, [#allocation5]  }
 0xa69   :  { %8555 = dma.done.wait [#allocation5], 32  }
 0xa6a   :  { %8556 = vsyncadd [#allocation5], 4294967264 }
 0xa6b   :  { %7207 = vsyncpa [#allocation4], 1 }
 0xa6c   :  { %7208 = vsyncpa [#allocation7], 1 }
 0xa6d   :  { %7209 = vsyncpa [#allocation10], 1 }
 0xa6e   :  { %7210 = vsyncpa [#allocation13], 1 }
 0xa6f   :  { %7211 = vsyncpa [#allocation16], 1 }
 0xa70   :  { %7212 = vsyncpa [#allocation19], 1 }
 0xa71   :  { %7213 = vsyncpa [#allocation5], 1 }

</bundles_post_ra>
